<compile_context>
chip_gen: v7x
topology: tpu7x:2x2x1
jax: 0.10.0
libtpu: 0.0.40
codegen_flags: <defaults>
</compile_context>

<pallas_src>
import functools

import jax
import jax.numpy as jnp
from jax.experimental import pallas as pl
from jax.experimental.pallas import tpu as pltpu


def _round_up(v, m):
    return -(-v // m) * m


def dwconv_bn_kernel(x_ref, w_ref, g_ref, b_ref, o_ref, xp_ref, xs_ref,
                     *, N, H, W, KH, KW, eps, ch):
    # x_ref : (N, H, W, TC)                 input tile (channels on lanes)
    # w_ref : (KH, KW, TC)                  depthwise filter tile
    # g_ref : (1, TC), b_ref : (1, TC)      BN affine params
    # o_ref : (N, H, W, TC)                 output tile
    # xp_ref: VMEM (N, H+KH-1, W+KW-1, TC)  f32 zero-padded ("SAME") staging
    # xs_ref: VMEM (KW, N, H+KH-1, W, TC)   f32 W-shifted copies (sublane shifts hoisted)
    ph, pw = KH // 2, KW // 2
    hp = H + KH - 1
    wp = W + KW - 1
    tc = x_ref.shape[-1]
    f32 = jnp.float32

    # ---- In-kernel "SAME" padding: zero only the border stripes, then copy the
    # interior.  The scratch is per-core, so this runs every grid step by design
    # (with "parallel" semantics each TensorCore owns its own scratch).
    if ph:
        xp_ref[:, 0:ph, :, :] = jnp.zeros((N, ph, wp, tc), f32)
    if hp - (ph + H):
        xp_ref[:, ph + H:, :, :] = jnp.zeros((N, hp - ph - H, wp, tc), f32)
    if pw:
        xp_ref[:, ph:ph + H, 0:pw, :] = jnp.zeros((N, H, pw, tc), f32)
    if wp - (pw + W):
        xp_ref[:, ph:ph + H, pw + W:, :] = jnp.zeros((N, H, wp - pw - W, tc), f32)
    xp_ref[:, ph:ph + H, pw:pw + W, :] = x_ref[...].astype(f32)

    inv_cnt = 1.0 / float(N * H * W)
    n_chunks = tc // ch

    # ---- Channel-chunk loop (static, 128 lanes/chunk): keeps acc + operands + taps
    # well inside the 64-vreg register file while the outer grid stays at 1-2 steps.
    for ci in range(n_chunks):
        c0 = ci * ch
        lane = slice(c0, c0 + ch)

        # Stage the KW sublane (W-axis) shifts for this chunk once: KW retiling passes
        # instead of one masked/rotated load per MAC term; MAC loads are then aligned.
        for kw in range(KW):
            xs_ref[kw, :, :, :, lane] = xp_ref[:, :, kw:kw + W, lane]

        taps = w_ref[:, :, lane].astype(f32)                     # (KH, KW, ch)
        s1 = jnp.zeros((W, ch), f32)
        s2 = jnp.zeros((W, ch), f32)
        accs = []
        for n in range(N):
            acc = jnp.zeros((H, W, ch), f32)
            # Depthwise MAC vectorized over H: KH*KW statements per image.
            for kh in range(KH):
                for kw in range(KW):
                    acc = acc + xs_ref[kw, n, kh:kh + H, :, lane] * taps[kh, kw]
            accs.append(acc)
            s1 = s1 + jnp.sum(acc, axis=0)                       # reduce over H (cheap)
            s2 = s2 + jnp.sum(acc * acc, axis=0)

        # ---- Training-mode BN (biased variance over N*H*W), folded to scale/shift.
        mean = jnp.sum(s1, axis=0) * inv_cnt                     # (ch,)
        ex2 = jnp.sum(s2, axis=0) * inv_cnt
        var = ex2 - mean * mean
        inv = jax.lax.rsqrt(var + eps)
        scale = g_ref[0, lane].astype(f32) * inv
        shift = b_ref[0, lane].astype(f32) - mean * scale

        # ---- Single store pass: normalized output written once, no raw-conv round trip.
        for n in range(N):
            o_ref[n, :, :, lane] = (accs[n] * scale + shift).astype(o_ref.dtype)


def _grid_steps_for_device():
    # v7x has 2 TensorCores per chip -> shard the channel grid 2-way; single-TC
    # v5e/v6e use one step so no channels are wasted on tile padding.
    try:
        kind = jax.devices()[0].device_kind.lower()
    except Exception:
        return 1
    return 2 if ("v7" in kind or "7x" in kind) else 1


def dwconv_bn(x_nhwc, w_khkwc, gamma, beta, *, eps=1e-3, ch=128, grid_steps=None):
    N, H, W, C = x_nhwc.shape
    KH, KW, _ = w_khkwc.shape

    if grid_steps is None:
        grid_steps = _grid_steps_for_device()

    # Channel tiling: lane-align to 128; 1 grid step on single-TC chips (tc = c128,
    # zero pad waste), 2 parallel steps on v7x so the channel axis shards across TCs.
    c128 = _round_up(C, 128)
    steps = max(1, min(grid_steps, c128 // 128))
    tc = _round_up(-(-c128 // steps), 128)
    cp = tc * steps

    dc = cp - C
    if dc:
        x_nhwc = jnp.pad(x_nhwc, ((0, 0), (0, 0), (0, 0), (0, dc)))
        w_khkwc = jnp.pad(w_khkwc, ((0, 0), (0, 0), (0, dc)))
        gamma = jnp.pad(gamma, (0, dc))
        beta = jnp.pad(beta, (0, dc))

    ch = min(ch, tc)
    assert tc % ch == 0, (tc, ch)

    kern = functools.partial(dwconv_bn_kernel, N=N, H=H, W=W, KH=KH, KW=KW,
                             eps=eps, ch=ch)

    out = pl.pallas_call(
        kern,
        out_shape=jax.ShapeDtypeStruct((N, H, W, cp), x_nhwc.dtype),
        grid_spec=pltpu.PrefetchScalarGridSpec(
            num_scalar_prefetch=0,
            grid=(steps,),
            in_specs=[
                pl.BlockSpec((N, H, W, tc), lambda c: (0, 0, 0, c)),
                pl.BlockSpec((KH, KW, tc), lambda c: (0, 0, c)),
                pl.BlockSpec((1, tc), lambda c: (0, c)),
                pl.BlockSpec((1, tc), lambda c: (0, c)),
            ],
            out_specs=pl.BlockSpec((N, H, W, tc), lambda c: (0, 0, 0, c)),
            scratch_shapes=[
                pltpu.VMEM((N, H + KH - 1, W + KW - 1, tc), jnp.float32),
                pltpu.VMEM((KW, N, H + KH - 1, W, tc), jnp.float32),
            ],
        ),
        compiler_params=pltpu.CompilerParams(dimension_semantics=("parallel",)),
    )(x_nhwc, w_khkwc, gamma.reshape(1, cp), beta.reshape(1, cp))

    return out[..., :C] if dc else out


def reference(x_nhwc, w_khkwc, gamma, beta, eps):
    """Pure-JAX reference: depthwise conv (SAME) + training-mode BN."""
    C = x_nhwc.shape[-1]
    KH, KW, _ = w_khkwc.shape
    w_hwio = w_khkwc.reshape(KH, KW, 1, C)
    y = jax.lax.conv_general_dilated(
        x_nhwc, w_hwio, window_strides=(1, 1), padding="SAME",
        dimension_numbers=("NHWC", "HWIO", "NHWC"),
        feature_group_count=C)
    mean = jnp.mean(y, axis=(0, 1, 2), keepdims=True)
    var = jnp.mean((y - mean) ** 2, axis=(0, 1, 2), keepdims=True)
    return (y - mean) * jax.lax.rsqrt(var + eps) * gamma + beta


if __name__ == "__main__":
    # Small shapes consistent with the module (original: N=1, C=2064, H=W=7, k=5, p=2).
    # C=200 is deliberately NOT a multiple of 128 to exercise the channel-padding path
    # (like the module's C=2064); it pads to 256 -> in-kernel chunk loop of 1-2 chunks.
    N, C, H, W = 2, 200, 7, 7
    KH = KW = 5
    EPS = 1e-3

    key = jax.random.PRNGKey(0)
    kx, kw_, kg, kb = jax.random.split(key, 4)

    # PyTorch-style NCHW input and (C, 1, KH, KW) depthwise weight, built deterministically.
    x_nchw = jax.random.normal(kx, (N, C, H, W), dtype=jnp.float32)
    w_pt = jax.random.normal(kw_, (C, 1, KH, KW), dtype=jnp.float32) * 0.1
    gamma = 1.0 + 0.1 * jax.random.normal(kg, (C,), dtype=jnp.float32)
    beta = 0.1 * jax.random.normal(kb, (C,), dtype=jnp.float32)

    # Convert to kernel layout.
    x_nhwc = jnp.transpose(x_nchw, (0, 2, 3, 1))            # NCHW -> NHWC
    w_khkwc = jnp.transpose(w_pt[:, 0, :, :], (1, 2, 0))    # (C,1,KH,KW) -> (KH,KW,C)

    out = dwconv_bn(x_nhwc, w_khkwc, gamma, beta, eps=EPS)
    out = jax.block_until_ready(out)

    ref = reference(x_nhwc, w_khkwc, gamma, beta, EPS)
    assert out.shape == (N, H, W, C)
    assert jnp.allclose(out, ref, atol=2e-4, rtol=2e-4), "mismatch vs reference"

    # Result in PyTorch NCHW layout if needed: jnp.transpose(out, (0, 3, 1, 2))
    print("KERNEL_OK")
</pallas_src>

<mosaic_0001>
module attributes {stable_mosaic.version = 11 : i64} {
  func.func @dwconv_bn_kernel(%arg0: i32, %arg1: memref<2x7x7x256xf32, #tpu.memory_space<vmem>>, %arg2: memref<5x5x256xf32, #tpu.memory_space<vmem>>, %arg3: memref<1x256xf32, #tpu.memory_space<vmem>>, %arg4: memref<1x256xf32, #tpu.memory_space<vmem>>, %arg5: memref<2x7x7x256xf32, #tpu.memory_space<vmem>>, %arg6: memref<2x11x11x256xf32, #tpu.memory_space<vmem>>, %arg7: memref<5x2x11x7x256xf32, #tpu.memory_space<vmem>>) attributes {dimension_semantics = [#tpu.dimension_semantics<parallel>], iteration_bounds = array<i64: 1>, scalar_prefetch = 0 : i64, scratch_operands = 2 : i64, tpu.core_type = #tpu.core_type<tc>, window_params = [{transform_indices = @transform_0, window_bounds = array<i64: 2, 7, 7, 256>}, {transform_indices = @transform_1, window_bounds = array<i64: 5, 5, 256>}, {transform_indices = @transform_2, window_bounds = array<i64: 1, 256>}, {transform_indices = @transform_3, window_bounds = array<i64: 1, 256>}, {transform_indices = @transform_4, window_bounds = array<i64: 2, 7, 7, 256>}]} {
    %cst = arith.constant 0.000000e+00 : f32
    %0 = vector.broadcast %cst : f32 to vector<2x2x11x256xf32>
    %c0 = arith.constant 0 : index
    %c0_0 = arith.constant 0 : index
    %c0_1 = arith.constant 0 : index
    %c0_2 = arith.constant 0 : index
    %1 = vector.load %arg6[%c0, %c0_0, %c0_1, %c0_2] : memref<2x11x11x256xf32, #tpu.memory_space<vmem>>, vector<2x2x11x256xf32>
    tpu.vector_store %arg6[%c0, %c0_0, %c0_1, %c0_2], %0 {strides = array<i32>} : memref<2x11x11x256xf32, #tpu.memory_space<vmem>>, vector<2x2x11x256xf32>,
    %cst_3 = arith.constant 0.000000e+00 : f32
    %2 = vector.broadcast %cst_3 : f32 to vector<2x2x11x256xf32>
    %c0_4 = arith.constant 0 : index
    %c9 = arith.constant 9 : index
    %c0_5 = arith.constant 0 : index
    %c0_6 = arith.constant 0 : index
    %3 = vector.load %arg6[%c0_4, %c9, %c0_5, %c0_6] : memref<2x11x11x256xf32, #tpu.memory_space<vmem>>, vector<2x2x11x256xf32>
    tpu.vector_store %arg6[%c0_4, %c9, %c0_5, %c0_6], %2 {strides = array<i32>} : memref<2x11x11x256xf32, #tpu.memory_space<vmem>>, vector<2x2x11x256xf32>,
    %cst_7 = arith.constant 0.000000e+00 : f32
    %4 = vector.broadcast %cst_7 : f32 to vector<2x7x2x256xf32>
    %c0_8 = arith.constant 0 : index
    %c2 = arith.constant 2 : index
    %c0_9 = arith.constant 0 : index
    %c0_10 = arith.constant 0 : index
    %5 = vector.load %arg6[%c0_8, %c2, %c0_9, %c0_10] : memref<2x11x11x256xf32, #tpu.memory_space<vmem>>, vector<2x7x2x256xf32>
    tpu.vector_store %arg6[%c0_8, %c2, %c0_9, %c0_10], %4 {strides = array<i32>} : memref<2x11x11x256xf32, #tpu.memory_space<vmem>>, vector<2x7x2x256xf32>,
    %cst_11 = arith.constant 0.000000e+00 : f32
    %6 = vector.broadcast %cst_11 : f32 to vector<2x7x2x256xf32>
    %c0_12 = arith.constant 0 : index
    %c2_13 = arith.constant 2 : index
    %c9_14 = arith.constant 9 : index
    %c0_15 = arith.constant 0 : index
    %7 = vector.load %arg6[%c0_12, %c2_13, %c9_14, %c0_15] : memref<2x11x11x256xf32, #tpu.memory_space<vmem>>, vector<2x7x2x256xf32>
    tpu.vector_store %arg6[%c0_12, %c2_13, %c9_14, %c0_15], %6 {strides = array<i32>} : memref<2x11x11x256xf32, #tpu.memory_space<vmem>>, vector<2x7x2x256xf32>,
    %c0_16 = arith.constant 0 : index
    %c0_17 = arith.constant 0 : index
    %c0_18 = arith.constant 0 : index
    %c0_19 = arith.constant 0 : index
    %8 = vector.load %arg1[%c0_16, %c0_17, %c0_18, %c0_19] : memref<2x7x7x256xf32, #tpu.memory_space<vmem>>, vector<2x7x7x256xf32>
    %c0_20 = arith.constant 0 : index
    %c2_21 = arith.constant 2 : index
    %c2_22 = arith.constant 2 : index
    %c0_23 = arith.constant 0 : index
    %9 = vector.load %arg6[%c0_20, %c2_21, %c2_22, %c0_23] : memref<2x11x11x256xf32, #tpu.memory_space<vmem>>, vector<2x7x7x256xf32>
    tpu.vector_store %arg6[%c0_20, %c2_21, %c2_22, %c0_23], %8 {strides = array<i32>} : memref<2x11x11x256xf32, #tpu.memory_space<vmem>>, vector<2x7x7x256xf32>,
    %c0_24 = arith.constant 0 : index
    %c0_25 = arith.constant 0 : index
    %c0_26 = arith.constant 0 : index
    %c0_27 = arith.constant 0 : index
    %10 = vector.load %arg6[%c0_24, %c0_25, %c0_26, %c0_27] : memref<2x11x11x256xf32, #tpu.memory_space<vmem>>, vector<2x11x7x128xf32>
    %c0_28 = arith.constant 0 : index
    %c0_29 = arith.constant 0 : index
    %c0_30 = arith.constant 0 : index
    %c0_31 = arith.constant 0 : index
    %c0_32 = arith.constant 0 : index
    %11 = vector.load %arg7[%c0_28, %c0_29, %c0_30, %c0_31, %c0_32] : memref<5x2x11x7x256xf32, #tpu.memory_space<vmem>>, vector<1x2x11x7x128xf32>
    %12 = vector.shape_cast %11 : vector<1x2x11x7x128xf32> to vector<2x11x7x128xf32>
    %13 = vector.shape_cast %10 : vector<2x11x7x128xf32> to vector<1x2x11x7x128xf32>
    tpu.vector_store %arg7[%c0_28, %c0_29, %c0_30, %c0_31, %c0_32], %13 {strides = array<i32>} : memref<5x2x11x7x256xf32, #tpu.memory_space<vmem>>, vector<1x2x11x7x128xf32>,
    %c0_33 = arith.constant 0 : index
    %c0_34 = arith.constant 0 : index
    %c1 = arith.constant 1 : index
    %c0_35 = arith.constant 0 : index
    %14 = vector.load %arg6[%c0_33, %c0_34, %c1, %c0_35] : memref<2x11x11x256xf32, #tpu.memory_space<vmem>>, vector<2x11x7x128xf32>
    %c1_36 = arith.constant 1 : index
    %c0_37 = arith.constant 0 : index
    %c0_38 = arith.constant 0 : index
    %c0_39 = arith.constant 0 : index
    %c0_40 = arith.constant 0 : index
    %15 = vector.load %arg7[%c1_36, %c0_37, %c0_38, %c0_39, %c0_40] : memref<5x2x11x7x256xf32, #tpu.memory_space<vmem>>, vector<1x2x11x7x128xf32>
    %16 = vector.shape_cast %15 : vector<1x2x11x7x128xf32> to vector<2x11x7x128xf32>
    %17 = vector.shape_cast %14 : vector<2x11x7x128xf32> to vector<1x2x11x7x128xf32>
    tpu.vector_store %arg7[%c1_36, %c0_37, %c0_38, %c0_39, %c0_40], %17 {strides = array<i32>} : memref<5x2x11x7x256xf32, #tpu.memory_space<vmem>>, vector<1x2x11x7x128xf32>,
    %c0_41 = arith.constant 0 : index
    %c0_42 = arith.constant 0 : index
    %c2_43 = arith.constant 2 : index
    %c0_44 = arith.constant 0 : index
    %18 = vector.load %arg6[%c0_41, %c0_42, %c2_43, %c0_44] : memref<2x11x11x256xf32, #tpu.memory_space<vmem>>, vector<2x11x7x128xf32>
    %c2_45 = arith.constant 2 : index
    %c0_46 = arith.constant 0 : index
    %c0_47 = arith.constant 0 : index
    %c0_48 = arith.constant 0 : index
    %c0_49 = arith.constant 0 : index
    %19 = vector.load %arg7[%c2_45, %c0_46, %c0_47, %c0_48, %c0_49] : memref<5x2x11x7x256xf32, #tpu.memory_space<vmem>>, vector<1x2x11x7x128xf32>
    %20 = vector.shape_cast %19 : vector<1x2x11x7x128xf32> to vector<2x11x7x128xf32>
    %21 = vector.shape_cast %18 : vector<2x11x7x128xf32> to vector<1x2x11x7x128xf32>
    tpu.vector_store %arg7[%c2_45, %c0_46, %c0_47, %c0_48, %c0_49], %21 {strides = array<i32>} : memref<5x2x11x7x256xf32, #tpu.memory_space<vmem>>, vector<1x2x11x7x128xf32>,
    %c0_50 = arith.constant 0 : index
    %c0_51 = arith.constant 0 : index
    %c3 = arith.constant 3 : index
    %c0_52 = arith.constant 0 : index
    %22 = vector.load %arg6[%c0_50, %c0_51, %c3, %c0_52] : memref<2x11x11x256xf32, #tpu.memory_space<vmem>>, vector<2x11x7x128xf32>
    %c3_53 = arith.constant 3 : index
    %c0_54 = arith.constant 0 : index
    %c0_55 = arith.constant 0 : index
    %c0_56 = arith.constant 0 : index
    %c0_57 = arith.constant 0 : index
    %23 = vector.load %arg7[%c3_53, %c0_54, %c0_55, %c0_56, %c0_57] : memref<5x2x11x7x256xf32, #tpu.memory_space<vmem>>, vector<1x2x11x7x128xf32>
    %24 = vector.shape_cast %23 : vector<1x2x11x7x128xf32> to vector<2x11x7x128xf32>
    %25 = vector.shape_cast %22 : vector<2x11x7x128xf32> to vector<1x2x11x7x128xf32>
    tpu.vector_store %arg7[%c3_53, %c0_54, %c0_55, %c0_56, %c0_57], %25 {strides = array<i32>} : memref<5x2x11x7x256xf32, #tpu.memory_space<vmem>>, vector<1x2x11x7x128xf32>,
    %c0_58 = arith.constant 0 : index
    %c0_59 = arith.constant 0 : index
    %c4 = arith.constant 4 : index
    %c0_60 = arith.constant 0 : index
    %26 = vector.load %arg6[%c0_58, %c0_59, %c4, %c0_60] : memref<2x11x11x256xf32, #tpu.memory_space<vmem>>, vector<2x11x7x128xf32>
    %c4_61 = arith.constant 4 : index
    %c0_62 = arith.constant 0 : index
    %c0_63 = arith.constant 0 : index
    %c0_64 = arith.constant 0 : index
    %c0_65 = arith.constant 0 : index
    %27 = vector.load %arg7[%c4_61, %c0_62, %c0_63, %c0_64, %c0_65] : memref<5x2x11x7x256xf32, #tpu.memory_space<vmem>>, vector<1x2x11x7x128xf32>
    %28 = vector.shape_cast %27 : vector<1x2x11x7x128xf32> to vector<2x11x7x128xf32>
    %29 = vector.shape_cast %26 : vector<2x11x7x128xf32> to vector<1x2x11x7x128xf32>
    tpu.vector_store %arg7[%c4_61, %c0_62, %c0_63, %c0_64, %c0_65], %29 {strides = array<i32>} : memref<5x2x11x7x256xf32, #tpu.memory_space<vmem>>, vector<1x2x11x7x128xf32>,
    %c0_66 = arith.constant 0 : index
    %c0_67 = arith.constant 0 : index
    %c0_68 = arith.constant 0 : index
    %30 = vector.load %arg2[%c0_66, %c0_67, %c0_68] : memref<5x5x256xf32, #tpu.memory_space<vmem>>, vector<5x5x128xf32>
    %cst_69 = arith.constant 0.000000e+00 : f32
    %31 = vector.broadcast %cst_69 : f32 to vector<7x128xf32>
    %cst_70 = arith.constant 0.000000e+00 : f32
    %32 = vector.broadcast %cst_70 : f32 to vector<7x128xf32>
    %cst_71 = arith.constant 0.000000e+00 : f32
    %33 = vector.broadcast %cst_71 : f32 to vector<7x7x128xf32>
    %c0_72 = arith.constant 0 : index
    %c0_73 = arith.constant 0 : index
    %c0_74 = arith.constant 0 : index
    %c0_75 = arith.constant 0 : index
    %c0_76 = arith.constant 0 : index
    %34 = vector.load %arg7[%c0_72, %c0_73, %c0_74, %c0_75, %c0_76] : memref<5x2x11x7x256xf32, #tpu.memory_space<vmem>>, vector<1x1x7x7x128xf32>
    %35 = vector.shape_cast %34 : vector<1x1x7x7x128xf32> to vector<7x7x128xf32>
    %36 = vector.extract_strided_slice %30 {offsets = [0, 0, 0], sizes = [1, 1, 128], strides = [1, 1, 1]} : vector<5x5x128xf32> to vector<1x1x128xf32>
    %37 = vector.shape_cast %36 : vector<1x1x128xf32> to vector<128xf32>
    %38 = vector.shape_cast %37 : vector<128xf32> to vector<1x1x128xf32>
    %39 = vector.broadcast %38 : vector<1x1x128xf32> to vector<7x7x128xf32>
    %40 = arith.mulf %35, %39 : vector<7x7x128xf32>
    %41 = arith.addf %33, %40 : vector<7x7x128xf32>
    %c1_77 = arith.constant 1 : index
    %c0_78 = arith.constant 0 : index
    %c0_79 = arith.constant 0 : index
    %c0_80 = arith.constant 0 : index
    %c0_81 = arith.constant 0 : index
    %42 = vector.load %arg7[%c1_77, %c0_78, %c0_79, %c0_80, %c0_81] : memref<5x2x11x7x256xf32, #tpu.memory_space<vmem>>, vector<1x1x7x7x128xf32>
    %43 = vector.shape_cast %42 : vector<1x1x7x7x128xf32> to vector<7x7x128xf32>
    %44 = vector.extract_strided_slice %30 {offsets = [0, 1, 0], sizes = [1, 1, 128], strides = [1, 1, 1]} : vector<5x5x128xf32> to vector<1x1x128xf32>
    %45 = vector.shape_cast %44 : vector<1x1x128xf32> to vector<128xf32>
    %46 = vector.shape_cast %45 : vector<128xf32> to vector<1x1x128xf32>
    %47 = vector.broadcast %46 : vector<1x1x128xf32> to vector<7x7x128xf32>
    %48 = arith.mulf %43, %47 : vector<7x7x128xf32>
    %49 = arith.addf %41, %48 : vector<7x7x128xf32>
    %c2_82 = arith.constant 2 : index
    %c0_83 = arith.constant 0 : index
    %c0_84 = arith.constant 0 : index
    %c0_85 = arith.constant 0 : index
    %c0_86 = arith.constant 0 : index
    %50 = vector.load %arg7[%c2_82, %c0_83, %c0_84, %c0_85, %c0_86] : memref<5x2x11x7x256xf32, #tpu.memory_space<vmem>>, vector<1x1x7x7x128xf32>
    %51 = vector.shape_cast %50 : vector<1x1x7x7x128xf32> to vector<7x7x128xf32>
    %52 = vector.extract_strided_slice %30 {offsets = [0, 2, 0], sizes = [1, 1, 128], strides = [1, 1, 1]} : vector<5x5x128xf32> to vector<1x1x128xf32>
    %53 = vector.shape_cast %52 : vector<1x1x128xf32> to vector<128xf32>
    %54 = vector.shape_cast %53 : vector<128xf32> to vector<1x1x128xf32>
    %55 = vector.broadcast %54 : vector<1x1x128xf32> to vector<7x7x128xf32>
    %56 = arith.mulf %51, %55 : vector<7x7x128xf32>
    %57 = arith.addf %49, %56 : vector<7x7x128xf32>
    %c3_87 = arith.constant 3 : index
    %c0_88 = arith.constant 0 : index
    %c0_89 = arith.constant 0 : index
    %c0_90 = arith.constant 0 : index
    %c0_91 = arith.constant 0 : index
    %58 = vector.load %arg7[%c3_87, %c0_88, %c0_89, %c0_90, %c0_91] : memref<5x2x11x7x256xf32, #tpu.memory_space<vmem>>, vector<1x1x7x7x128xf32>
    %59 = vector.shape_cast %58 : vector<1x1x7x7x128xf32> to vector<7x7x128xf32>
    %60 = vector.extract_strided_slice %30 {offsets = [0, 3, 0], sizes = [1, 1, 128], strides = [1, 1, 1]} : vector<5x5x128xf32> to vector<1x1x128xf32>
    %61 = vector.shape_cast %60 : vector<1x1x128xf32> to vector<128xf32>
    %62 = vector.shape_cast %61 : vector<128xf32> to vector<1x1x128xf32>
    %63 = vector.broadcast %62 : vector<1x1x128xf32> to vector<7x7x128xf32>
    %64 = arith.mulf %59, %63 : vector<7x7x128xf32>
    %65 = arith.addf %57, %64 : vector<7x7x128xf32>
    %c4_92 = arith.constant 4 : index
    %c0_93 = arith.constant 0 : index
    %c0_94 = arith.constant 0 : index
    %c0_95 = arith.constant 0 : index
    %c0_96 = arith.constant 0 : index
    %66 = vector.load %arg7[%c4_92, %c0_93, %c0_94, %c0_95, %c0_96] : memref<5x2x11x7x256xf32, #tpu.memory_space<vmem>>, vector<1x1x7x7x128xf32>
    %67 = vector.shape_cast %66 : vector<1x1x7x7x128xf32> to vector<7x7x128xf32>
    %68 = vector.extract_strided_slice %30 {offsets = [0, 4, 0], sizes = [1, 1, 128], strides = [1, 1, 1]} : vector<5x5x128xf32> to vector<1x1x128xf32>
    %69 = vector.shape_cast %68 : vector<1x1x128xf32> to vector<128xf32>
    %70 = vector.shape_cast %69 : vector<128xf32> to vector<1x1x128xf32>
    %71 = vector.broadcast %70 : vector<1x1x128xf32> to vector<7x7x128xf32>
    %72 = arith.mulf %67, %71 : vector<7x7x128xf32>
    %73 = arith.addf %65, %72 : vector<7x7x128xf32>
    %c0_97 = arith.constant 0 : index
    %c0_98 = arith.constant 0 : index
    %c1_99 = arith.constant 1 : index
    %c0_100 = arith.constant 0 : index
    %c0_101 = arith.constant 0 : index
    %74 = vector.load %arg7[%c0_97, %c0_98, %c1_99, %c0_100, %c0_101] : memref<5x2x11x7x256xf32, #tpu.memory_space<vmem>>, vector<1x1x7x7x128xf32>
    %75 = vector.shape_cast %74 : vector<1x1x7x7x128xf32> to vector<7x7x128xf32>
    %76 = vector.extract_strided_slice %30 {offsets = [1, 0, 0], sizes = [1, 1, 128], strides = [1, 1, 1]} : vector<5x5x128xf32> to vector<1x1x128xf32>
    %77 = vector.shape_cast %76 : vector<1x1x128xf32> to vector<128xf32>
    %78 = vector.shape_cast %77 : vector<128xf32> to vector<1x1x128xf32>
    %79 = vector.broadcast %78 : vector<1x1x128xf32> to vector<7x7x128xf32>
    %80 = arith.mulf %75, %79 : vector<7x7x128xf32>
    %81 = arith.addf %73, %80 : vector<7x7x128xf32>
    %c1_102 = arith.constant 1 : index
    %c0_103 = arith.constant 0 : index
    %c1_104 = arith.constant 1 : index
    %c0_105 = arith.constant 0 : index
    %c0_106 = arith.constant 0 : index
    %82 = vector.load %arg7[%c1_102, %c0_103, %c1_104, %c0_105, %c0_106] : memref<5x2x11x7x256xf32, #tpu.memory_space<vmem>>, vector<1x1x7x7x128xf32>
    %83 = vector.shape_cast %82 : vector<1x1x7x7x128xf32> to vector<7x7x128xf32>
    %84 = vector.extract_strided_slice %30 {offsets = [1, 1, 0], sizes = [1, 1, 128], strides = [1, 1, 1]} : vector<5x5x128xf32> to vector<1x1x128xf32>
    %85 = vector.shape_cast %84 : vector<1x1x128xf32> to vector<128xf32>
    %86 = vector.shape_cast %85 : vector<128xf32> to vector<1x1x128xf32>
    %87 = vector.broadcast %86 : vector<1x1x128xf32> to vector<7x7x128xf32>
    %88 = arith.mulf %83, %87 : vector<7x7x128xf32>
    %89 = arith.addf %81, %88 : vector<7x7x128xf32>
    %c2_107 = arith.constant 2 : index
    %c0_108 = arith.constant 0 : index
    %c1_109 = arith.constant 1 : index
    %c0_110 = arith.constant 0 : index
    %c0_111 = arith.constant 0 : index
    %90 = vector.load %arg7[%c2_107, %c0_108, %c1_109, %c0_110, %c0_111] : memref<5x2x11x7x256xf32, #tpu.memory_space<vmem>>, vector<1x1x7x7x128xf32>
    %91 = vector.shape_cast %90 : vector<1x1x7x7x128xf32> to vector<7x7x128xf32>
    %92 = vector.extract_strided_slice %30 {offsets = [1, 2, 0], sizes = [1, 1, 128], strides = [1, 1, 1]} : vector<5x5x128xf32> to vector<1x1x128xf32>
    %93 = vector.shape_cast %92 : vector<1x1x128xf32> to vector<128xf32>
    %94 = vector.shape_cast %93 : vector<128xf32> to vector<1x1x128xf32>
    %95 = vector.broadcast %94 : vector<1x1x128xf32> to vector<7x7x128xf32>
    %96 = arith.mulf %91, %95 : vector<7x7x128xf32>
    %97 = arith.addf %89, %96 : vector<7x7x128xf32>
    %c3_112 = arith.constant 3 : index
    %c0_113 = arith.constant 0 : index
    %c1_114 = arith.constant 1 : index
    %c0_115 = arith.constant 0 : index
    %c0_116 = arith.constant 0 : index
    %98 = vector.load %arg7[%c3_112, %c0_113, %c1_114, %c0_115, %c0_116] : memref<5x2x11x7x256xf32, #tpu.memory_space<vmem>>, vector<1x1x7x7x128xf32>
    %99 = vector.shape_cast %98 : vector<1x1x7x7x128xf32> to vector<7x7x128xf32>
    %100 = vector.extract_strided_slice %30 {offsets = [1, 3, 0], sizes = [1, 1, 128], strides = [1, 1, 1]} : vector<5x5x128xf32> to vector<1x1x128xf32>
    %101 = vector.shape_cast %100 : vector<1x1x128xf32> to vector<128xf32>
    %102 = vector.shape_cast %101 : vector<128xf32> to vector<1x1x128xf32>
    %103 = vector.broadcast %102 : vector<1x1x128xf32> to vector<7x7x128xf32>
    %104 = arith.mulf %99, %103 : vector<7x7x128xf32>
    %105 = arith.addf %97, %104 : vector<7x7x128xf32>
    %c4_117 = arith.constant 4 : index
    %c0_118 = arith.constant 0 : index
    %c1_119 = arith.constant 1 : index
    %c0_120 = arith.constant 0 : index
    %c0_121 = arith.constant 0 : index
    %106 = vector.load %arg7[%c4_117, %c0_118, %c1_119, %c0_120, %c0_121] : memref<5x2x11x7x256xf32, #tpu.memory_space<vmem>>, vector<1x1x7x7x128xf32>
    %107 = vector.shape_cast %106 : vector<1x1x7x7x128xf32> to vector<7x7x128xf32>
    %108 = vector.extract_strided_slice %30 {offsets = [1, 4, 0], sizes = [1, 1, 128], strides = [1, 1, 1]} : vector<5x5x128xf32> to vector<1x1x128xf32>
    %109 = vector.shape_cast %108 : vector<1x1x128xf32> to vector<128xf32>
    %110 = vector.shape_cast %109 : vector<128xf32> to vector<1x1x128xf32>
    %111 = vector.broadcast %110 : vector<1x1x128xf32> to vector<7x7x128xf32>
    %112 = arith.mulf %107, %111 : vector<7x7x128xf32>
    %113 = arith.addf %105, %112 : vector<7x7x128xf32>
    %c0_122 = arith.constant 0 : index
    %c0_123 = arith.constant 0 : index
    %c2_124 = arith.constant 2 : index
    %c0_125 = arith.constant 0 : index
    %c0_126 = arith.constant 0 : index
    %114 = vector.load %arg7[%c0_122, %c0_123, %c2_124, %c0_125, %c0_126] : memref<5x2x11x7x256xf32, #tpu.memory_space<vmem>>, vector<1x1x7x7x128xf32>
    %115 = vector.shape_cast %114 : vector<1x1x7x7x128xf32> to vector<7x7x128xf32>
    %116 = vector.extract_strided_slice %30 {offsets = [2, 0, 0], sizes = [1, 1, 128], strides = [1, 1, 1]} : vector<5x5x128xf32> to vector<1x1x128xf32>
    %117 = vector.shape_cast %116 : vector<1x1x128xf32> to vector<128xf32>
    %118 = vector.shape_cast %117 : vector<128xf32> to vector<1x1x128xf32>
    %119 = vector.broadcast %118 : vector<1x1x128xf32> to vector<7x7x128xf32>
    %120 = arith.mulf %115, %119 : vector<7x7x128xf32>
    %121 = arith.addf %113, %120 : vector<7x7x128xf32>
    %c1_127 = arith.constant 1 : index
    %c0_128 = arith.constant 0 : index
    %c2_129 = arith.constant 2 : index
    %c0_130 = arith.constant 0 : index
    %c0_131 = arith.constant 0 : index
    %122 = vector.load %arg7[%c1_127, %c0_128, %c2_129, %c0_130, %c0_131] : memref<5x2x11x7x256xf32, #tpu.memory_space<vmem>>, vector<1x1x7x7x128xf32>
    %123 = vector.shape_cast %122 : vector<1x1x7x7x128xf32> to vector<7x7x128xf32>
    %124 = vector.extract_strided_slice %30 {offsets = [2, 1, 0], sizes = [1, 1, 128], strides = [1, 1, 1]} : vector<5x5x128xf32> to vector<1x1x128xf32>
    %125 = vector.shape_cast %124 : vector<1x1x128xf32> to vector<128xf32>
    %126 = vector.shape_cast %125 : vector<128xf32> to vector<1x1x128xf32>
    %127 = vector.broadcast %126 : vector<1x1x128xf32> to vector<7x7x128xf32>
    %128 = arith.mulf %123, %127 : vector<7x7x128xf32>
    %129 = arith.addf %121, %128 : vector<7x7x128xf32>
    %c2_132 = arith.constant 2 : index
    %c0_133 = arith.constant 0 : index
    %c2_134 = arith.constant 2 : index
    %c0_135 = arith.constant 0 : index
    %c0_136 = arith.constant 0 : index
    %130 = vector.load %arg7[%c2_132, %c0_133, %c2_134, %c0_135, %c0_136] : memref<5x2x11x7x256xf32, #tpu.memory_space<vmem>>, vector<1x1x7x7x128xf32>
    %131 = vector.shape_cast %130 : vector<1x1x7x7x128xf32> to vector<7x7x128xf32>
    %132 = vector.extract_strided_slice %30 {offsets = [2, 2, 0], sizes = [1, 1, 128], strides = [1, 1, 1]} : vector<5x5x128xf32> to vector<1x1x128xf32>
    %133 = vector.shape_cast %132 : vector<1x1x128xf32> to vector<128xf32>
    %134 = vector.shape_cast %133 : vector<128xf32> to vector<1x1x128xf32>
    %135 = vector.broadcast %134 : vector<1x1x128xf32> to vector<7x7x128xf32>
    %136 = arith.mulf %131, %135 : vector<7x7x128xf32>
    %137 = arith.addf %129, %136 : vector<7x7x128xf32>
    %c3_137 = arith.constant 3 : index
    %c0_138 = arith.constant 0 : index
    %c2_139 = arith.constant 2 : index
    %c0_140 = arith.constant 0 : index
    %c0_141 = arith.constant 0 : index
    %138 = vector.load %arg7[%c3_137, %c0_138, %c2_139, %c0_140, %c0_141] : memref<5x2x11x7x256xf32, #tpu.memory_space<vmem>>, vector<1x1x7x7x128xf32>
    %139 = vector.shape_cast %138 : vector<1x1x7x7x128xf32> to vector<7x7x128xf32>
    %140 = vector.extract_strided_slice %30 {offsets = [2, 3, 0], sizes = [1, 1, 128], strides = [1, 1, 1]} : vector<5x5x128xf32> to vector<1x1x128xf32>
    %141 = vector.shape_cast %140 : vector<1x1x128xf32> to vector<128xf32>
    %142 = vector.shape_cast %141 : vector<128xf32> to vector<1x1x128xf32>
    %143 = vector.broadcast %142 : vector<1x1x128xf32> to vector<7x7x128xf32>
    %144 = arith.mulf %139, %143 : vector<7x7x128xf32>
    %145 = arith.addf %137, %144 : vector<7x7x128xf32>
    %c4_142 = arith.constant 4 : index
    %c0_143 = arith.constant 0 : index
    %c2_144 = arith.constant 2 : index
    %c0_145 = arith.constant 0 : index
    %c0_146 = arith.constant 0 : index
    %146 = vector.load %arg7[%c4_142, %c0_143, %c2_144, %c0_145, %c0_146] : memref<5x2x11x7x256xf32, #tpu.memory_space<vmem>>, vector<1x1x7x7x128xf32>
    %147 = vector.shape_cast %146 : vector<1x1x7x7x128xf32> to vector<7x7x128xf32>
    %148 = vector.extract_strided_slice %30 {offsets = [2, 4, 0], sizes = [1, 1, 128], strides = [1, 1, 1]} : vector<5x5x128xf32> to vector<1x1x128xf32>
    %149 = vector.shape_cast %148 : vector<1x1x128xf32> to vector<128xf32>
    %150 = vector.shape_cast %149 : vector<128xf32> to vector<1x1x128xf32>
    %151 = vector.broadcast %150 : vector<1x1x128xf32> to vector<7x7x128xf32>
    %152 = arith.mulf %147, %151 : vector<7x7x128xf32>
    %153 = arith.addf %145, %152 : vector<7x7x128xf32>
    %c0_147 = arith.constant 0 : index
    %c0_148 = arith.constant 0 : index
    %c3_149 = arith.constant 3 : index
    %c0_150 = arith.constant 0 : index
    %c0_151 = arith.constant 0 : index
    %154 = vector.load %arg7[%c0_147, %c0_148, %c3_149, %c0_150, %c0_151] : memref<5x2x11x7x256xf32, #tpu.memory_space<vmem>>, vector<1x1x7x7x128xf32>
    %155 = vector.shape_cast %154 : vector<1x1x7x7x128xf32> to vector<7x7x128xf32>
    %156 = vector.extract_strided_slice %30 {offsets = [3, 0, 0], sizes = [1, 1, 128], strides = [1, 1, 1]} : vector<5x5x128xf32> to vector<1x1x128xf32>
    %157 = vector.shape_cast %156 : vector<1x1x128xf32> to vector<128xf32>
    %158 = vector.shape_cast %157 : vector<128xf32> to vector<1x1x128xf32>
    %159 = vector.broadcast %158 : vector<1x1x128xf32> to vector<7x7x128xf32>
    %160 = arith.mulf %155, %159 : vector<7x7x128xf32>
    %161 = arith.addf %153, %160 : vector<7x7x128xf32>
    %c1_152 = arith.constant 1 : index
    %c0_153 = arith.constant 0 : index
    %c3_154 = arith.constant 3 : index
    %c0_155 = arith.constant 0 : index
    %c0_156 = arith.constant 0 : index
    %162 = vector.load %arg7[%c1_152, %c0_153, %c3_154, %c0_155, %c0_156] : memref<5x2x11x7x256xf32, #tpu.memory_space<vmem>>, vector<1x1x7x7x128xf32>
    %163 = vector.shape_cast %162 : vector<1x1x7x7x128xf32> to vector<7x7x128xf32>
    %164 = vector.extract_strided_slice %30 {offsets = [3, 1, 0], sizes = [1, 1, 128], strides = [1, 1, 1]} : vector<5x5x128xf32> to vector<1x1x128xf32>
    %165 = vector.shape_cast %164 : vector<1x1x128xf32> to vector<128xf32>
    %166 = vector.shape_cast %165 : vector<128xf32> to vector<1x1x128xf32>
    %167 = vector.broadcast %166 : vector<1x1x128xf32> to vector<7x7x128xf32>
    %168 = arith.mulf %163, %167 : vector<7x7x128xf32>
    %169 = arith.addf %161, %168 : vector<7x7x128xf32>
    %c2_157 = arith.constant 2 : index
    %c0_158 = arith.constant 0 : index
    %c3_159 = arith.constant 3 : index
    %c0_160 = arith.constant 0 : index
    %c0_161 = arith.constant 0 : index
    %170 = vector.load %arg7[%c2_157, %c0_158, %c3_159, %c0_160, %c0_161] : memref<5x2x11x7x256xf32, #tpu.memory_space<vmem>>, vector<1x1x7x7x128xf32>
    %171 = vector.shape_cast %170 : vector<1x1x7x7x128xf32> to vector<7x7x128xf32>
    %172 = vector.extract_strided_slice %30 {offsets = [3, 2, 0], sizes = [1, 1, 128], strides = [1, 1, 1]} : vector<5x5x128xf32> to vector<1x1x128xf32>
    %173 = vector.shape_cast %172 : vector<1x1x128xf32> to vector<128xf32>
    %174 = vector.shape_cast %173 : vector<128xf32> to vector<1x1x128xf32>
    %175 = vector.broadcast %174 : vector<1x1x128xf32> to vector<7x7x128xf32>
    %176 = arith.mulf %171, %175 : vector<7x7x128xf32>
    %177 = arith.addf %169, %176 : vector<7x7x128xf32>
    %c3_162 = arith.constant 3 : index
    %c0_163 = arith.constant 0 : index
    %c3_164 = arith.constant 3 : index
    %c0_165 = arith.constant 0 : index
    %c0_166 = arith.constant 0 : index
    %178 = vector.load %arg7[%c3_162, %c0_163, %c3_164, %c0_165, %c0_166] : memref<5x2x11x7x256xf32, #tpu.memory_space<vmem>>, vector<1x1x7x7x128xf32>
    %179 = vector.shape_cast %178 : vector<1x1x7x7x128xf32> to vector<7x7x128xf32>
    %180 = vector.extract_strided_slice %30 {offsets = [3, 3, 0], sizes = [1, 1, 128], strides = [1, 1, 1]} : vector<5x5x128xf32> to vector<1x1x128xf32>
    %181 = vector.shape_cast %180 : vector<1x1x128xf32> to vector<128xf32>
    %182 = vector.shape_cast %181 : vector<128xf32> to vector<1x1x128xf32>
    %183 = vector.broadcast %182 : vector<1x1x128xf32> to vector<7x7x128xf32>
    %184 = arith.mulf %179, %183 : vector<7x7x128xf32>
    %185 = arith.addf %177, %184 : vector<7x7x128xf32>
    %c4_167 = arith.constant 4 : index
    %c0_168 = arith.constant 0 : index
    %c3_169 = arith.constant 3 : index
    %c0_170 = arith.constant 0 : index
    %c0_171 = arith.constant 0 : index
    %186 = vector.load %arg7[%c4_167, %c0_168, %c3_169, %c0_170, %c0_171] : memref<5x2x11x7x256xf32, #tpu.memory_space<vmem>>, vector<1x1x7x7x128xf32>
    %187 = vector.shape_cast %186 : vector<1x1x7x7x128xf32> to vector<7x7x128xf32>
    %188 = vector.extract_strided_slice %30 {offsets = [3, 4, 0], sizes = [1, 1, 128], strides = [1, 1, 1]} : vector<5x5x128xf32> to vector<1x1x128xf32>
    %189 = vector.shape_cast %188 : vector<1x1x128xf32> to vector<128xf32>
    %190 = vector.shape_cast %189 : vector<128xf32> to vector<1x1x128xf32>
    %191 = vector.broadcast %190 : vector<1x1x128xf32> to vector<7x7x128xf32>
    %192 = arith.mulf %187, %191 : vector<7x7x128xf32>
    %193 = arith.addf %185, %192 : vector<7x7x128xf32>
    %c0_172 = arith.constant 0 : index
    %c0_173 = arith.constant 0 : index
    %c4_174 = arith.constant 4 : index
    %c0_175 = arith.constant 0 : index
    %c0_176 = arith.constant 0 : index
    %194 = vector.load %arg7[%c0_172, %c0_173, %c4_174, %c0_175, %c0_176] : memref<5x2x11x7x256xf32, #tpu.memory_space<vmem>>, vector<1x1x7x7x128xf32>
    %195 = vector.shape_cast %194 : vector<1x1x7x7x128xf32> to vector<7x7x128xf32>
    %196 = vector.extract_strided_slice %30 {offsets = [4, 0, 0], sizes = [1, 1, 128], strides = [1, 1, 1]} : vector<5x5x128xf32> to vector<1x1x128xf32>
    %197 = vector.shape_cast %196 : vector<1x1x128xf32> to vector<128xf32>
    %198 = vector.shape_cast %197 : vector<128xf32> to vector<1x1x128xf32>
    %199 = vector.broadcast %198 : vector<1x1x128xf32> to vector<7x7x128xf32>
    %200 = arith.mulf %195, %199 : vector<7x7x128xf32>
    %201 = arith.addf %193, %200 : vector<7x7x128xf32>
    %c1_177 = arith.constant 1 : index
    %c0_178 = arith.constant 0 : index
    %c4_179 = arith.constant 4 : index
    %c0_180 = arith.constant 0 : index
    %c0_181 = arith.constant 0 : index
    %202 = vector.load %arg7[%c1_177, %c0_178, %c4_179, %c0_180, %c0_181] : memref<5x2x11x7x256xf32, #tpu.memory_space<vmem>>, vector<1x1x7x7x128xf32>
    %203 = vector.shape_cast %202 : vector<1x1x7x7x128xf32> to vector<7x7x128xf32>
    %204 = vector.extract_strided_slice %30 {offsets = [4, 1, 0], sizes = [1, 1, 128], strides = [1, 1, 1]} : vector<5x5x128xf32> to vector<1x1x128xf32>
    %205 = vector.shape_cast %204 : vector<1x1x128xf32> to vector<128xf32>
    %206 = vector.shape_cast %205 : vector<128xf32> to vector<1x1x128xf32>
    %207 = vector.broadcast %206 : vector<1x1x128xf32> to vector<7x7x128xf32>
    %208 = arith.mulf %203, %207 : vector<7x7x128xf32>
    %209 = arith.addf %201, %208 : vector<7x7x128xf32>
    %c2_182 = arith.constant 2 : index
    %c0_183 = arith.constant 0 : index
    %c4_184 = arith.constant 4 : index
    %c0_185 = arith.constant 0 : index
    %c0_186 = arith.constant 0 : index
    %210 = vector.load %arg7[%c2_182, %c0_183, %c4_184, %c0_185, %c0_186] : memref<5x2x11x7x256xf32, #tpu.memory_space<vmem>>, vector<1x1x7x7x128xf32>
    %211 = vector.shape_cast %210 : vector<1x1x7x7x128xf32> to vector<7x7x128xf32>
    %212 = vector.extract_strided_slice %30 {offsets = [4, 2, 0], sizes = [1, 1, 128], strides = [1, 1, 1]} : vector<5x5x128xf32> to vector<1x1x128xf32>
    %213 = vector.shape_cast %212 : vector<1x1x128xf32> to vector<128xf32>
    %214 = vector.shape_cast %213 : vector<128xf32> to vector<1x1x128xf32>
    %215 = vector.broadcast %214 : vector<1x1x128xf32> to vector<7x7x128xf32>
    %216 = arith.mulf %211, %215 : vector<7x7x128xf32>
    %217 = arith.addf %209, %216 : vector<7x7x128xf32>
    %c3_187 = arith.constant 3 : index
    %c0_188 = arith.constant 0 : index
    %c4_189 = arith.constant 4 : index
    %c0_190 = arith.constant 0 : index
    %c0_191 = arith.constant 0 : index
    %218 = vector.load %arg7[%c3_187, %c0_188, %c4_189, %c0_190, %c0_191] : memref<5x2x11x7x256xf32, #tpu.memory_space<vmem>>, vector<1x1x7x7x128xf32>
    %219 = vector.shape_cast %218 : vector<1x1x7x7x128xf32> to vector<7x7x128xf32>
    %220 = vector.extract_strided_slice %30 {offsets = [4, 3, 0], sizes = [1, 1, 128], strides = [1, 1, 1]} : vector<5x5x128xf32> to vector<1x1x128xf32>
    %221 = vector.shape_cast %220 : vector<1x1x128xf32> to vector<128xf32>
    %222 = vector.shape_cast %221 : vector<128xf32> to vector<1x1x128xf32>
    %223 = vector.broadcast %222 : vector<1x1x128xf32> to vector<7x7x128xf32>
    %224 = arith.mulf %219, %223 : vector<7x7x128xf32>
    %225 = arith.addf %217, %224 : vector<7x7x128xf32>
    %c4_192 = arith.constant 4 : index
    %c0_193 = arith.constant 0 : index
    %c4_194 = arith.constant 4 : index
    %c0_195 = arith.constant 0 : index
    %c0_196 = arith.constant 0 : index
    %226 = vector.load %arg7[%c4_192, %c0_193, %c4_194, %c0_195, %c0_196] : memref<5x2x11x7x256xf32, #tpu.memory_space<vmem>>, vector<1x1x7x7x128xf32>
    %227 = vector.shape_cast %226 : vector<1x1x7x7x128xf32> to vector<7x7x128xf32>
    %228 = vector.extract_strided_slice %30 {offsets = [4, 4, 0], sizes = [1, 1, 128], strides = [1, 1, 1]} : vector<5x5x128xf32> to vector<1x1x128xf32>
    %229 = vector.shape_cast %228 : vector<1x1x128xf32> to vector<128xf32>
    %230 = vector.shape_cast %229 : vector<128xf32> to vector<1x1x128xf32>
    %231 = vector.broadcast %230 : vector<1x1x128xf32> to vector<7x7x128xf32>
    %232 = arith.mulf %227, %231 : vector<7x7x128xf32>
    %233 = arith.addf %225, %232 : vector<7x7x128xf32>
    %cst_197 = arith.constant dense<0.000000e+00> : vector<7x128xf32>
    %234 = vector.multi_reduction <add>, %233, %cst_197 [0] : vector<7x7x128xf32> to vector<7x128xf32>
    %235 = arith.addf %31, %234 : vector<7x128xf32>
    %236 = arith.mulf %233, %233 : vector<7x7x128xf32>
    %cst_198 = arith.constant dense<0.000000e+00> : vector<7x128xf32>
    %237 = vector.multi_reduction <add>, %236, %cst_198 [0] : vector<7x7x128xf32> to vector<7x128xf32>
    %238 = arith.addf %32, %237 : vector<7x128xf32>
    %cst_199 = arith.constant 0.000000e+00 : f32
    %239 = vector.broadcast %cst_199 : f32 to vector<7x7x128xf32>
    %c0_200 = arith.constant 0 : index
    %c1_201 = arith.constant 1 : index
    %c0_202 = arith.constant 0 : index
    %c0_203 = arith.constant 0 : index
    %c0_204 = arith.constant 0 : index
    %240 = vector.load %arg7[%c0_200, %c1_201, %c0_202, %c0_203, %c0_204] : memref<5x2x11x7x256xf32, #tpu.memory_space<vmem>>, vector<1x1x7x7x128xf32>
    %241 = vector.shape_cast %240 : vector<1x1x7x7x128xf32> to vector<7x7x128xf32>
    %242 = vector.extract_strided_slice %30 {offsets = [0, 0, 0], sizes = [1, 1, 128], strides = [1, 1, 1]} : vector<5x5x128xf32> to vector<1x1x128xf32>
    %243 = vector.shape_cast %242 : vector<1x1x128xf32> to vector<128xf32>
    %244 = vector.shape_cast %243 : vector<128xf32> to vector<1x1x128xf32>
    %245 = vector.broadcast %244 : vector<1x1x128xf32> to vector<7x7x128xf32>
    %246 = arith.mulf %241, %245 : vector<7x7x128xf32>
    %247 = arith.addf %239, %246 : vector<7x7x128xf32>
    %c1_205 = arith.constant 1 : index
    %c1_206 = arith.constant 1 : index
    %c0_207 = arith.constant 0 : index
    %c0_208 = arith.constant 0 : index
    %c0_209 = arith.constant 0 : index
    %248 = vector.load %arg7[%c1_205, %c1_206, %c0_207, %c0_208, %c0_209] : memref<5x2x11x7x256xf32, #tpu.memory_space<vmem>>, vector<1x1x7x7x128xf32>
    %249 = vector.shape_cast %248 : vector<1x1x7x7x128xf32> to vector<7x7x128xf32>
    %250 = vector.extract_strided_slice %30 {offsets = [0, 1, 0], sizes = [1, 1, 128], strides = [1, 1, 1]} : vector<5x5x128xf32> to vector<1x1x128xf32>
    %251 = vector.shape_cast %250 : vector<1x1x128xf32> to vector<128xf32>
    %252 = vector.shape_cast %251 : vector<128xf32> to vector<1x1x128xf32>
    %253 = vector.broadcast %252 : vector<1x1x128xf32> to vector<7x7x128xf32>
    %254 = arith.mulf %249, %253 : vector<7x7x128xf32>
    %255 = arith.addf %247, %254 : vector<7x7x128xf32>
    %c2_210 = arith.constant 2 : index
    %c1_211 = arith.constant 1 : index
    %c0_212 = arith.constant 0 : index
    %c0_213 = arith.constant 0 : index
    %c0_214 = arith.constant 0 : index
    %256 = vector.load %arg7[%c2_210, %c1_211, %c0_212, %c0_213, %c0_214] : memref<5x2x11x7x256xf32, #tpu.memory_space<vmem>>, vector<1x1x7x7x128xf32>
    %257 = vector.shape_cast %256 : vector<1x1x7x7x128xf32> to vector<7x7x128xf32>
    %258 = vector.extract_strided_slice %30 {offsets = [0, 2, 0], sizes = [1, 1, 128], strides = [1, 1, 1]} : vector<5x5x128xf32> to vector<1x1x128xf32>
    %259 = vector.shape_cast %258 : vector<1x1x128xf32> to vector<128xf32>
    %260 = vector.shape_cast %259 : vector<128xf32> to vector<1x1x128xf32>
    %261 = vector.broadcast %260 : vector<1x1x128xf32> to vector<7x7x128xf32>
    %262 = arith.mulf %257, %261 : vector<7x7x128xf32>
    %263 = arith.addf %255, %262 : vector<7x7x128xf32>
    %c3_215 = arith.constant 3 : index
    %c1_216 = arith.constant 1 : index
    %c0_217 = arith.constant 0 : index
    %c0_218 = arith.constant 0 : index
    %c0_219 = arith.constant 0 : index
    %264 = vector.load %arg7[%c3_215, %c1_216, %c0_217, %c0_218, %c0_219] : memref<5x2x11x7x256xf32, #tpu.memory_space<vmem>>, vector<1x1x7x7x128xf32>
    %265 = vector.shape_cast %264 : vector<1x1x7x7x128xf32> to vector<7x7x128xf32>
    %266 = vector.extract_strided_slice %30 {offsets = [0, 3, 0], sizes = [1, 1, 128], strides = [1, 1, 1]} : vector<5x5x128xf32> to vector<1x1x128xf32>
    %267 = vector.shape_cast %266 : vector<1x1x128xf32> to vector<128xf32>
    %268 = vector.shape_cast %267 : vector<128xf32> to vector<1x1x128xf32>
    %269 = vector.broadcast %268 : vector<1x1x128xf32> to vector<7x7x128xf32>
    %270 = arith.mulf %265, %269 : vector<7x7x128xf32>
    %271 = arith.addf %263, %270 : vector<7x7x128xf32>
    %c4_220 = arith.constant 4 : index
    %c1_221 = arith.constant 1 : index
    %c0_222 = arith.constant 0 : index
    %c0_223 = arith.constant 0 : index
    %c0_224 = arith.constant 0 : index
    %272 = vector.load %arg7[%c4_220, %c1_221, %c0_222, %c0_223, %c0_224] : memref<5x2x11x7x256xf32, #tpu.memory_space<vmem>>, vector<1x1x7x7x128xf32>
    %273 = vector.shape_cast %272 : vector<1x1x7x7x128xf32> to vector<7x7x128xf32>
    %274 = vector.extract_strided_slice %30 {offsets = [0, 4, 0], sizes = [1, 1, 128], strides = [1, 1, 1]} : vector<5x5x128xf32> to vector<1x1x128xf32>
    %275 = vector.shape_cast %274 : vector<1x1x128xf32> to vector<128xf32>
    %276 = vector.shape_cast %275 : vector<128xf32> to vector<1x1x128xf32>
    %277 = vector.broadcast %276 : vector<1x1x128xf32> to vector<7x7x128xf32>
    %278 = arith.mulf %273, %277 : vector<7x7x128xf32>
    %279 = arith.addf %271, %278 : vector<7x7x128xf32>
    %c0_225 = arith.constant 0 : index
    %c1_226 = arith.constant 1 : index
    %c1_227 = arith.constant 1 : index
    %c0_228 = arith.constant 0 : index
    %c0_229 = arith.constant 0 : index
    %280 = vector.load %arg7[%c0_225, %c1_226, %c1_227, %c0_228, %c0_229] : memref<5x2x11x7x256xf32, #tpu.memory_space<vmem>>, vector<1x1x7x7x128xf32>
    %281 = vector.shape_cast %280 : vector<1x1x7x7x128xf32> to vector<7x7x128xf32>
    %282 = vector.extract_strided_slice %30 {offsets = [1, 0, 0], sizes = [1, 1, 128], strides = [1, 1, 1]} : vector<5x5x128xf32> to vector<1x1x128xf32>
    %283 = vector.shape_cast %282 : vector<1x1x128xf32> to vector<128xf32>
    %284 = vector.shape_cast %283 : vector<128xf32> to vector<1x1x128xf32>
    %285 = vector.broadcast %284 : vector<1x1x128xf32> to vector<7x7x128xf32>
    %286 = arith.mulf %281, %285 : vector<7x7x128xf32>
    %287 = arith.addf %279, %286 : vector<7x7x128xf32>
    %c1_230 = arith.constant 1 : index
    %c1_231 = arith.constant 1 : index
    %c1_232 = arith.constant 1 : index
    %c0_233 = arith.constant 0 : index
    %c0_234 = arith.constant 0 : index
    %288 = vector.load %arg7[%c1_230, %c1_231, %c1_232, %c0_233, %c0_234] : memref<5x2x11x7x256xf32, #tpu.memory_space<vmem>>, vector<1x1x7x7x128xf32>
    %289 = vector.shape_cast %288 : vector<1x1x7x7x128xf32> to vector<7x7x128xf32>
    %290 = vector.extract_strided_slice %30 {offsets = [1, 1, 0], sizes = [1, 1, 128], strides = [1, 1, 1]} : vector<5x5x128xf32> to vector<1x1x128xf32>
    %291 = vector.shape_cast %290 : vector<1x1x128xf32> to vector<128xf32>
    %292 = vector.shape_cast %291 : vector<128xf32> to vector<1x1x128xf32>
    %293 = vector.broadcast %292 : vector<1x1x128xf32> to vector<7x7x128xf32>
    %294 = arith.mulf %289, %293 : vector<7x7x128xf32>
    %295 = arith.addf %287, %294 : vector<7x7x128xf32>
    %c2_235 = arith.constant 2 : index
    %c1_236 = arith.constant 1 : index
    %c1_237 = arith.constant 1 : index
    %c0_238 = arith.constant 0 : index
    %c0_239 = arith.constant 0 : index
    %296 = vector.load %arg7[%c2_235, %c1_236, %c1_237, %c0_238, %c0_239] : memref<5x2x11x7x256xf32, #tpu.memory_space<vmem>>, vector<1x1x7x7x128xf32>
    %297 = vector.shape_cast %296 : vector<1x1x7x7x128xf32> to vector<7x7x128xf32>
    %298 = vector.extract_strided_slice %30 {offsets = [1, 2, 0], sizes = [1, 1, 128], strides = [1, 1, 1]} : vector<5x5x128xf32> to vector<1x1x128xf32>
    %299 = vector.shape_cast %298 : vector<1x1x128xf32> to vector<128xf32>
    %300 = vector.shape_cast %299 : vector<128xf32> to vector<1x1x128xf32>
    %301 = vector.broadcast %300 : vector<1x1x128xf32> to vector<7x7x128xf32>
    %302 = arith.mulf %297, %301 : vector<7x7x128xf32>
    %303 = arith.addf %295, %302 : vector<7x7x128xf32>
    %c3_240 = arith.constant 3 : index
    %c1_241 = arith.constant 1 : index
    %c1_242 = arith.constant 1 : index
    %c0_243 = arith.constant 0 : index
    %c0_244 = arith.constant 0 : index
    %304 = vector.load %arg7[%c3_240, %c1_241, %c1_242, %c0_243, %c0_244] : memref<5x2x11x7x256xf32, #tpu.memory_space<vmem>>, vector<1x1x7x7x128xf32>
    %305 = vector.shape_cast %304 : vector<1x1x7x7x128xf32> to vector<7x7x128xf32>
    %306 = vector.extract_strided_slice %30 {offsets = [1, 3, 0], sizes = [1, 1, 128], strides = [1, 1, 1]} : vector<5x5x128xf32> to vector<1x1x128xf32>
    %307 = vector.shape_cast %306 : vector<1x1x128xf32> to vector<128xf32>
    %308 = vector.shape_cast %307 : vector<128xf32> to vector<1x1x128xf32>
    %309 = vector.broadcast %308 : vector<1x1x128xf32> to vector<7x7x128xf32>
    %310 = arith.mulf %305, %309 : vector<7x7x128xf32>
    %311 = arith.addf %303, %310 : vector<7x7x128xf32>
    %c4_245 = arith.constant 4 : index
    %c1_246 = arith.constant 1 : index
    %c1_247 = arith.constant 1 : index
    %c0_248 = arith.constant 0 : index
    %c0_249 = arith.constant 0 : index
    %312 = vector.load %arg7[%c4_245, %c1_246, %c1_247, %c0_248, %c0_249] : memref<5x2x11x7x256xf32, #tpu.memory_space<vmem>>, vector<1x1x7x7x128xf32>
    %313 = vector.shape_cast %312 : vector<1x1x7x7x128xf32> to vector<7x7x128xf32>
    %314 = vector.extract_strided_slice %30 {offsets = [1, 4, 0], sizes = [1, 1, 128], strides = [1, 1, 1]} : vector<5x5x128xf32> to vector<1x1x128xf32>
    %315 = vector.shape_cast %314 : vector<1x1x128xf32> to vector<128xf32>
    %316 = vector.shape_cast %315 : vector<128xf32> to vector<1x1x128xf32>
    %317 = vector.broadcast %316 : vector<1x1x128xf32> to vector<7x7x128xf32>
    %318 = arith.mulf %313, %317 : vector<7x7x128xf32>
    %319 = arith.addf %311, %318 : vector<7x7x128xf32>
    %c0_250 = arith.constant 0 : index
    %c1_251 = arith.constant 1 : index
    %c2_252 = arith.constant 2 : index
    %c0_253 = arith.constant 0 : index
    %c0_254 = arith.constant 0 : index
    %320 = vector.load %arg7[%c0_250, %c1_251, %c2_252, %c0_253, %c0_254] : memref<5x2x11x7x256xf32, #tpu.memory_space<vmem>>, vector<1x1x7x7x128xf32>
    %321 = vector.shape_cast %320 : vector<1x1x7x7x128xf32> to vector<7x7x128xf32>
    %322 = vector.extract_strided_slice %30 {offsets = [2, 0, 0], sizes = [1, 1, 128], strides = [1, 1, 1]} : vector<5x5x128xf32> to vector<1x1x128xf32>
    %323 = vector.shape_cast %322 : vector<1x1x128xf32> to vector<128xf32>
    %324 = vector.shape_cast %323 : vector<128xf32> to vector<1x1x128xf32>
    %325 = vector.broadcast %324 : vector<1x1x128xf32> to vector<7x7x128xf32>
    %326 = arith.mulf %321, %325 : vector<7x7x128xf32>
    %327 = arith.addf %319, %326 : vector<7x7x128xf32>
    %c1_255 = arith.constant 1 : index
    %c1_256 = arith.constant 1 : index
    %c2_257 = arith.constant 2 : index
    %c0_258 = arith.constant 0 : index
    %c0_259 = arith.constant 0 : index
    %328 = vector.load %arg7[%c1_255, %c1_256, %c2_257, %c0_258, %c0_259] : memref<5x2x11x7x256xf32, #tpu.memory_space<vmem>>, vector<1x1x7x7x128xf32>
    %329 = vector.shape_cast %328 : vector<1x1x7x7x128xf32> to vector<7x7x128xf32>
    %330 = vector.extract_strided_slice %30 {offsets = [2, 1, 0], sizes = [1, 1, 128], strides = [1, 1, 1]} : vector<5x5x128xf32> to vector<1x1x128xf32>
    %331 = vector.shape_cast %330 : vector<1x1x128xf32> to vector<128xf32>
    %332 = vector.shape_cast %331 : vector<128xf32> to vector<1x1x128xf32>
    %333 = vector.broadcast %332 : vector<1x1x128xf32> to vector<7x7x128xf32>
    %334 = arith.mulf %329, %333 : vector<7x7x128xf32>
    %335 = arith.addf %327, %334 : vector<7x7x128xf32>
    %c2_260 = arith.constant 2 : index
    %c1_261 = arith.constant 1 : index
    %c2_262 = arith.constant 2 : index
    %c0_263 = arith.constant 0 : index
    %c0_264 = arith.constant 0 : index
    %336 = vector.load %arg7[%c2_260, %c1_261, %c2_262, %c0_263, %c0_264] : memref<5x2x11x7x256xf32, #tpu.memory_space<vmem>>, vector<1x1x7x7x128xf32>
    %337 = vector.shape_cast %336 : vector<1x1x7x7x128xf32> to vector<7x7x128xf32>
    %338 = vector.extract_strided_slice %30 {offsets = [2, 2, 0], sizes = [1, 1, 128], strides = [1, 1, 1]} : vector<5x5x128xf32> to vector<1x1x128xf32>
    %339 = vector.shape_cast %338 : vector<1x1x128xf32> to vector<128xf32>
    %340 = vector.shape_cast %339 : vector<128xf32> to vector<1x1x128xf32>
    %341 = vector.broadcast %340 : vector<1x1x128xf32> to vector<7x7x128xf32>
    %342 = arith.mulf %337, %341 : vector<7x7x128xf32>
    %343 = arith.addf %335, %342 : vector<7x7x128xf32>
    %c3_265 = arith.constant 3 : index
    %c1_266 = arith.constant 1 : index
    %c2_267 = arith.constant 2 : index
    %c0_268 = arith.constant 0 : index
    %c0_269 = arith.constant 0 : index
    %344 = vector.load %arg7[%c3_265, %c1_266, %c2_267, %c0_268, %c0_269] : memref<5x2x11x7x256xf32, #tpu.memory_space<vmem>>, vector<1x1x7x7x128xf32>
    %345 = vector.shape_cast %344 : vector<1x1x7x7x128xf32> to vector<7x7x128xf32>
    %346 = vector.extract_strided_slice %30 {offsets = [2, 3, 0], sizes = [1, 1, 128], strides = [1, 1, 1]} : vector<5x5x128xf32> to vector<1x1x128xf32>
    %347 = vector.shape_cast %346 : vector<1x1x128xf32> to vector<128xf32>
    %348 = vector.shape_cast %347 : vector<128xf32> to vector<1x1x128xf32>
    %349 = vector.broadcast %348 : vector<1x1x128xf32> to vector<7x7x128xf32>
    %350 = arith.mulf %345, %349 : vector<7x7x128xf32>
    %351 = arith.addf %343, %350 : vector<7x7x128xf32>
    %c4_270 = arith.constant 4 : index
    %c1_271 = arith.constant 1 : index
    %c2_272 = arith.constant 2 : index
    %c0_273 = arith.constant 0 : index
    %c0_274 = arith.constant 0 : index
    %352 = vector.load %arg7[%c4_270, %c1_271, %c2_272, %c0_273, %c0_274] : memref<5x2x11x7x256xf32, #tpu.memory_space<vmem>>, vector<1x1x7x7x128xf32>
    %353 = vector.shape_cast %352 : vector<1x1x7x7x128xf32> to vector<7x7x128xf32>
    %354 = vector.extract_strided_slice %30 {offsets = [2, 4, 0], sizes = [1, 1, 128], strides = [1, 1, 1]} : vector<5x5x128xf32> to vector<1x1x128xf32>
    %355 = vector.shape_cast %354 : vector<1x1x128xf32> to vector<128xf32>
    %356 = vector.shape_cast %355 : vector<128xf32> to vector<1x1x128xf32>
    %357 = vector.broadcast %356 : vector<1x1x128xf32> to vector<7x7x128xf32>
    %358 = arith.mulf %353, %357 : vector<7x7x128xf32>
    %359 = arith.addf %351, %358 : vector<7x7x128xf32>
    %c0_275 = arith.constant 0 : index
    %c1_276 = arith.constant 1 : index
    %c3_277 = arith.constant 3 : index
    %c0_278 = arith.constant 0 : index
    %c0_279 = arith.constant 0 : index
    %360 = vector.load %arg7[%c0_275, %c1_276, %c3_277, %c0_278, %c0_279] : memref<5x2x11x7x256xf32, #tpu.memory_space<vmem>>, vector<1x1x7x7x128xf32>
    %361 = vector.shape_cast %360 : vector<1x1x7x7x128xf32> to vector<7x7x128xf32>
    %362 = vector.extract_strided_slice %30 {offsets = [3, 0, 0], sizes = [1, 1, 128], strides = [1, 1, 1]} : vector<5x5x128xf32> to vector<1x1x128xf32>
    %363 = vector.shape_cast %362 : vector<1x1x128xf32> to vector<128xf32>
    %364 = vector.shape_cast %363 : vector<128xf32> to vector<1x1x128xf32>
    %365 = vector.broadcast %364 : vector<1x1x128xf32> to vector<7x7x128xf32>
    %366 = arith.mulf %361, %365 : vector<7x7x128xf32>
    %367 = arith.addf %359, %366 : vector<7x7x128xf32>
    %c1_280 = arith.constant 1 : index
    %c1_281 = arith.constant 1 : index
    %c3_282 = arith.constant 3 : index
    %c0_283 = arith.constant 0 : index
    %c0_284 = arith.constant 0 : index
    %368 = vector.load %arg7[%c1_280, %c1_281, %c3_282, %c0_283, %c0_284] : memref<5x2x11x7x256xf32, #tpu.memory_space<vmem>>, vector<1x1x7x7x128xf32>
    %369 = vector.shape_cast %368 : vector<1x1x7x7x128xf32> to vector<7x7x128xf32>
    %370 = vector.extract_strided_slice %30 {offsets = [3, 1, 0], sizes = [1, 1, 128], strides = [1, 1, 1]} : vector<5x5x128xf32> to vector<1x1x128xf32>
    %371 = vector.shape_cast %370 : vector<1x1x128xf32> to vector<128xf32>
    %372 = vector.shape_cast %371 : vector<128xf32> to vector<1x1x128xf32>
    %373 = vector.broadcast %372 : vector<1x1x128xf32> to vector<7x7x128xf32>
    %374 = arith.mulf %369, %373 : vector<7x7x128xf32>
    %375 = arith.addf %367, %374 : vector<7x7x128xf32>
    %c2_285 = arith.constant 2 : index
    %c1_286 = arith.constant 1 : index
    %c3_287 = arith.constant 3 : index
    %c0_288 = arith.constant 0 : index
    %c0_289 = arith.constant 0 : index
    %376 = vector.load %arg7[%c2_285, %c1_286, %c3_287, %c0_288, %c0_289] : memref<5x2x11x7x256xf32, #tpu.memory_space<vmem>>, vector<1x1x7x7x128xf32>
    %377 = vector.shape_cast %376 : vector<1x1x7x7x128xf32> to vector<7x7x128xf32>
    %378 = vector.extract_strided_slice %30 {offsets = [3, 2, 0], sizes = [1, 1, 128], strides = [1, 1, 1]} : vector<5x5x128xf32> to vector<1x1x128xf32>
    %379 = vector.shape_cast %378 : vector<1x1x128xf32> to vector<128xf32>
    %380 = vector.shape_cast %379 : vector<128xf32> to vector<1x1x128xf32>
    %381 = vector.broadcast %380 : vector<1x1x128xf32> to vector<7x7x128xf32>
    %382 = arith.mulf %377, %381 : vector<7x7x128xf32>
    %383 = arith.addf %375, %382 : vector<7x7x128xf32>
    %c3_290 = arith.constant 3 : index
    %c1_291 = arith.constant 1 : index
    %c3_292 = arith.constant 3 : index
    %c0_293 = arith.constant 0 : index
    %c0_294 = arith.constant 0 : index
    %384 = vector.load %arg7[%c3_290, %c1_291, %c3_292, %c0_293, %c0_294] : memref<5x2x11x7x256xf32, #tpu.memory_space<vmem>>, vector<1x1x7x7x128xf32>
    %385 = vector.shape_cast %384 : vector<1x1x7x7x128xf32> to vector<7x7x128xf32>
    %386 = vector.extract_strided_slice %30 {offsets = [3, 3, 0], sizes = [1, 1, 128], strides = [1, 1, 1]} : vector<5x5x128xf32> to vector<1x1x128xf32>
    %387 = vector.shape_cast %386 : vector<1x1x128xf32> to vector<128xf32>
    %388 = vector.shape_cast %387 : vector<128xf32> to vector<1x1x128xf32>
    %389 = vector.broadcast %388 : vector<1x1x128xf32> to vector<7x7x128xf32>
    %390 = arith.mulf %385, %389 : vector<7x7x128xf32>
    %391 = arith.addf %383, %390 : vector<7x7x128xf32>
    %c4_295 = arith.constant 4 : index
    %c1_296 = arith.constant 1 : index
    %c3_297 = arith.constant 3 : index
    %c0_298 = arith.constant 0 : index
    %c0_299 = arith.constant 0 : index
    %392 = vector.load %arg7[%c4_295, %c1_296, %c3_297, %c0_298, %c0_299] : memref<5x2x11x7x256xf32, #tpu.memory_space<vmem>>, vector<1x1x7x7x128xf32>
    %393 = vector.shape_cast %392 : vector<1x1x7x7x128xf32> to vector<7x7x128xf32>
    %394 = vector.extract_strided_slice %30 {offsets = [3, 4, 0], sizes = [1, 1, 128], strides = [1, 1, 1]} : vector<5x5x128xf32> to vector<1x1x128xf32>
    %395 = vector.shape_cast %394 : vector<1x1x128xf32> to vector<128xf32>
    %396 = vector.shape_cast %395 : vector<128xf32> to vector<1x1x128xf32>
    %397 = vector.broadcast %396 : vector<1x1x128xf32> to vector<7x7x128xf32>
    %398 = arith.mulf %393, %397 : vector<7x7x128xf32>
    %399 = arith.addf %391, %398 : vector<7x7x128xf32>
    %c0_300 = arith.constant 0 : index
    %c1_301 = arith.constant 1 : index
    %c4_302 = arith.constant 4 : index
    %c0_303 = arith.constant 0 : index
    %c0_304 = arith.constant 0 : index
    %400 = vector.load %arg7[%c0_300, %c1_301, %c4_302, %c0_303, %c0_304] : memref<5x2x11x7x256xf32, #tpu.memory_space<vmem>>, vector<1x1x7x7x128xf32>
    %401 = vector.shape_cast %400 : vector<1x1x7x7x128xf32> to vector<7x7x128xf32>
    %402 = vector.extract_strided_slice %30 {offsets = [4, 0, 0], sizes = [1, 1, 128], strides = [1, 1, 1]} : vector<5x5x128xf32> to vector<1x1x128xf32>
    %403 = vector.shape_cast %402 : vector<1x1x128xf32> to vector<128xf32>
    %404 = vector.shape_cast %403 : vector<128xf32> to vector<1x1x128xf32>
    %405 = vector.broadcast %404 : vector<1x1x128xf32> to vector<7x7x128xf32>
    %406 = arith.mulf %401, %405 : vector<7x7x128xf32>
    %407 = arith.addf %399, %406 : vector<7x7x128xf32>
    %c1_305 = arith.constant 1 : index
    %c1_306 = arith.constant 1 : index
    %c4_307 = arith.constant 4 : index
    %c0_308 = arith.constant 0 : index
    %c0_309 = arith.constant 0 : index
    %408 = vector.load %arg7[%c1_305, %c1_306, %c4_307, %c0_308, %c0_309] : memref<5x2x11x7x256xf32, #tpu.memory_space<vmem>>, vector<1x1x7x7x128xf32>
    %409 = vector.shape_cast %408 : vector<1x1x7x7x128xf32> to vector<7x7x128xf32>
    %410 = vector.extract_strided_slice %30 {offsets = [4, 1, 0], sizes = [1, 1, 128], strides = [1, 1, 1]} : vector<5x5x128xf32> to vector<1x1x128xf32>
    %411 = vector.shape_cast %410 : vector<1x1x128xf32> to vector<128xf32>
    %412 = vector.shape_cast %411 : vector<128xf32> to vector<1x1x128xf32>
    %413 = vector.broadcast %412 : vector<1x1x128xf32> to vector<7x7x128xf32>
    %414 = arith.mulf %409, %413 : vector<7x7x128xf32>
    %415 = arith.addf %407, %414 : vector<7x7x128xf32>
    %c2_310 = arith.constant 2 : index
    %c1_311 = arith.constant 1 : index
    %c4_312 = arith.constant 4 : index
    %c0_313 = arith.constant 0 : index
    %c0_314 = arith.constant 0 : index
    %416 = vector.load %arg7[%c2_310, %c1_311, %c4_312, %c0_313, %c0_314] : memref<5x2x11x7x256xf32, #tpu.memory_space<vmem>>, vector<1x1x7x7x128xf32>
    %417 = vector.shape_cast %416 : vector<1x1x7x7x128xf32> to vector<7x7x128xf32>
    %418 = vector.extract_strided_slice %30 {offsets = [4, 2, 0], sizes = [1, 1, 128], strides = [1, 1, 1]} : vector<5x5x128xf32> to vector<1x1x128xf32>
    %419 = vector.shape_cast %418 : vector<1x1x128xf32> to vector<128xf32>
    %420 = vector.shape_cast %419 : vector<128xf32> to vector<1x1x128xf32>
    %421 = vector.broadcast %420 : vector<1x1x128xf32> to vector<7x7x128xf32>
    %422 = arith.mulf %417, %421 : vector<7x7x128xf32>
    %423 = arith.addf %415, %422 : vector<7x7x128xf32>
    %c3_315 = arith.constant 3 : index
    %c1_316 = arith.constant 1 : index
    %c4_317 = arith.constant 4 : index
    %c0_318 = arith.constant 0 : index
    %c0_319 = arith.constant 0 : index
    %424 = vector.load %arg7[%c3_315, %c1_316, %c4_317, %c0_318, %c0_319] : memref<5x2x11x7x256xf32, #tpu.memory_space<vmem>>, vector<1x1x7x7x128xf32>
    %425 = vector.shape_cast %424 : vector<1x1x7x7x128xf32> to vector<7x7x128xf32>
    %426 = vector.extract_strided_slice %30 {offsets = [4, 3, 0], sizes = [1, 1, 128], strides = [1, 1, 1]} : vector<5x5x128xf32> to vector<1x1x128xf32>
    %427 = vector.shape_cast %426 : vector<1x1x128xf32> to vector<128xf32>
    %428 = vector.shape_cast %427 : vector<128xf32> to vector<1x1x128xf32>
    %429 = vector.broadcast %428 : vector<1x1x128xf32> to vector<7x7x128xf32>
    %430 = arith.mulf %425, %429 : vector<7x7x128xf32>
    %431 = arith.addf %423, %430 : vector<7x7x128xf32>
    %c4_320 = arith.constant 4 : index
    %c1_321 = arith.constant 1 : index
    %c4_322 = arith.constant 4 : index
    %c0_323 = arith.constant 0 : index
    %c0_324 = arith.constant 0 : index
    %432 = vector.load %arg7[%c4_320, %c1_321, %c4_322, %c0_323, %c0_324] : memref<5x2x11x7x256xf32, #tpu.memory_space<vmem>>, vector<1x1x7x7x128xf32>
    %433 = vector.shape_cast %432 : vector<1x1x7x7x128xf32> to vector<7x7x128xf32>
    %434 = vector.extract_strided_slice %30 {offsets = [4, 4, 0], sizes = [1, 1, 128], strides = [1, 1, 1]} : vector<5x5x128xf32> to vector<1x1x128xf32>
    %435 = vector.shape_cast %434 : vector<1x1x128xf32> to vector<128xf32>
    %436 = vector.shape_cast %435 : vector<128xf32> to vector<1x1x128xf32>
    %437 = vector.broadcast %436 : vector<1x1x128xf32> to vector<7x7x128xf32>
    %438 = arith.mulf %433, %437 : vector<7x7x128xf32>
    %439 = arith.addf %431, %438 : vector<7x7x128xf32>
    %cst_325 = arith.constant dense<0.000000e+00> : vector<7x128xf32>
    %440 = vector.multi_reduction <add>, %439, %cst_325 [0] : vector<7x7x128xf32> to vector<7x128xf32>
    %441 = arith.addf %235, %440 : vector<7x128xf32>
    %442 = arith.mulf %439, %439 : vector<7x7x128xf32>
    %cst_326 = arith.constant dense<0.000000e+00> : vector<7x128xf32>
    %443 = vector.multi_reduction <add>, %442, %cst_326 [0] : vector<7x7x128xf32> to vector<7x128xf32>
    %444 = arith.addf %238, %443 : vector<7x128xf32>
    %cst_327 = arith.constant dense<0.000000e+00> : vector<128xf32>
    %445 = vector.multi_reduction <add>, %441, %cst_327 [0] : vector<7x128xf32> to vector<128xf32>
    %cst_328 = arith.constant 0.0102040814 : f32
    %446 = vector.broadcast %cst_328 : f32 to vector<128xf32>
    %447 = arith.mulf %445, %446 : vector<128xf32>
    %cst_329 = arith.constant dense<0.000000e+00> : vector<128xf32>
    %448 = vector.multi_reduction <add>, %444, %cst_329 [0] : vector<7x128xf32> to vector<128xf32>
    %cst_330 = arith.constant 0.0102040814 : f32
    %449 = vector.broadcast %cst_330 : f32 to vector<128xf32>
    %450 = arith.mulf %448, %449 : vector<128xf32>
    %451 = arith.mulf %447, %447 : vector<128xf32>
    %452 = arith.subf %450, %451 : vector<128xf32>
    %cst_331 = arith.constant 1.000000e-03 : f32
    %453 = vector.broadcast %cst_331 : f32 to vector<128xf32>
    %454 = arith.addf %452, %453 : vector<128xf32>
    %455 = math.rsqrt %454 : vector<128xf32>
    %c0_332 = arith.constant 0 : index
    %c0_333 = arith.constant 0 : index
    %456 = vector.load %arg3[%c0_332, %c0_333] : memref<1x256xf32, #tpu.memory_space<vmem>>, vector<1x128xf32>
    %457 = vector.shape_cast %456 : vector<1x128xf32> to vector<128xf32>
    %458 = arith.mulf %457, %455 : vector<128xf32>
    %c0_334 = arith.constant 0 : index
    %c0_335 = arith.constant 0 : index
    %459 = vector.load %arg4[%c0_334, %c0_335] : memref<1x256xf32, #tpu.memory_space<vmem>>, vector<1x128xf32>
    %460 = vector.shape_cast %459 : vector<1x128xf32> to vector<128xf32>
    %461 = arith.mulf %447, %458 : vector<128xf32>
    %462 = arith.subf %460, %461 : vector<128xf32>
    %463 = vector.shape_cast %458 : vector<128xf32> to vector<1x1x128xf32>
    %464 = vector.broadcast %463 : vector<1x1x128xf32> to vector<7x7x128xf32>
    %465 = arith.mulf %233, %464 : vector<7x7x128xf32>
    %466 = vector.shape_cast %462 : vector<128xf32> to vector<1x1x128xf32>
    %467 = vector.broadcast %466 : vector<1x1x128xf32> to vector<7x7x128xf32>
    %468 = arith.addf %465, %467 : vector<7x7x128xf32>
    %c0_336 = arith.constant 0 : index
    %c0_337 = arith.constant 0 : index
    %c0_338 = arith.constant 0 : index
    %c0_339 = arith.constant 0 : index
    %469 = vector.load %arg5[%c0_336, %c0_337, %c0_338, %c0_339] : memref<2x7x7x256xf32, #tpu.memory_space<vmem>>, vector<1x7x7x128xf32>
    %470 = vector.shape_cast %469 : vector<1x7x7x128xf32> to vector<7x7x128xf32>
    %471 = vector.shape_cast %468 : vector<7x7x128xf32> to vector<1x7x7x128xf32>
    tpu.vector_store %arg5[%c0_336, %c0_337, %c0_338, %c0_339], %471 {strides = array<i32>} : memref<2x7x7x256xf32, #tpu.memory_space<vmem>>, vector<1x7x7x128xf32>,
    %472 = vector.shape_cast %458 : vector<128xf32> to vector<1x1x128xf32>
    %473 = vector.broadcast %472 : vector<1x1x128xf32> to vector<7x7x128xf32>
    %474 = arith.mulf %439, %473 : vector<7x7x128xf32>
    %475 = vector.shape_cast %462 : vector<128xf32> to vector<1x1x128xf32>
    %476 = vector.broadcast %475 : vector<1x1x128xf32> to vector<7x7x128xf32>
    %477 = arith.addf %474, %476 : vector<7x7x128xf32>
    %c1_340 = arith.constant 1 : index
    %c0_341 = arith.constant 0 : index
    %c0_342 = arith.constant 0 : index
    %c0_343 = arith.constant 0 : index
    %478 = vector.load %arg5[%c1_340, %c0_341, %c0_342, %c0_343] : memref<2x7x7x256xf32, #tpu.memory_space<vmem>>, vector<1x7x7x128xf32>
    %479 = vector.shape_cast %478 : vector<1x7x7x128xf32> to vector<7x7x128xf32>
    %480 = vector.shape_cast %477 : vector<7x7x128xf32> to vector<1x7x7x128xf32>
    tpu.vector_store %arg5[%c1_340, %c0_341, %c0_342, %c0_343], %480 {strides = array<i32>} : memref<2x7x7x256xf32, #tpu.memory_space<vmem>>, vector<1x7x7x128xf32>,
    %c0_344 = arith.constant 0 : index
    %c0_345 = arith.constant 0 : index
    %c0_346 = arith.constant 0 : index
    %c128 = arith.constant 128 : index
    %481 = vector.load %arg6[%c0_344, %c0_345, %c0_346, %c128] : memref<2x11x11x256xf32, #tpu.memory_space<vmem>>, vector<2x11x7x128xf32>
    %c0_347 = arith.constant 0 : index
    %c0_348 = arith.constant 0 : index
    %c0_349 = arith.constant 0 : index
    %c0_350 = arith.constant 0 : index
    %c128_351 = arith.constant 128 : index
    %482 = vector.load %arg7[%c0_347, %c0_348, %c0_349, %c0_350, %c128_351] : memref<5x2x11x7x256xf32, #tpu.memory_space<vmem>>, vector<1x2x11x7x128xf32>
    %483 = vector.shape_cast %482 : vector<1x2x11x7x128xf32> to vector<2x11x7x128xf32>
    %484 = vector.shape_cast %481 : vector<2x11x7x128xf32> to vector<1x2x11x7x128xf32>
    tpu.vector_store %arg7[%c0_347, %c0_348, %c0_349, %c0_350, %c128_351], %484 {strides = array<i32>} : memref<5x2x11x7x256xf32, #tpu.memory_space<vmem>>, vector<1x2x11x7x128xf32>,
    %c0_352 = arith.constant 0 : index
    %c0_353 = arith.constant 0 : index
    %c1_354 = arith.constant 1 : index
    %c128_355 = arith.constant 128 : index
    %485 = vector.load %arg6[%c0_352, %c0_353, %c1_354, %c128_355] : memref<2x11x11x256xf32, #tpu.memory_space<vmem>>, vector<2x11x7x128xf32>
    %c1_356 = arith.constant 1 : index
    %c0_357 = arith.constant 0 : index
    %c0_358 = arith.constant 0 : index
    %c0_359 = arith.constant 0 : index
    %c128_360 = arith.constant 128 : index
    %486 = vector.load %arg7[%c1_356, %c0_357, %c0_358, %c0_359, %c128_360] : memref<5x2x11x7x256xf32, #tpu.memory_space<vmem>>, vector<1x2x11x7x128xf32>
    %487 = vector.shape_cast %486 : vector<1x2x11x7x128xf32> to vector<2x11x7x128xf32>
    %488 = vector.shape_cast %485 : vector<2x11x7x128xf32> to vector<1x2x11x7x128xf32>
    tpu.vector_store %arg7[%c1_356, %c0_357, %c0_358, %c0_359, %c128_360], %488 {strides = array<i32>} : memref<5x2x11x7x256xf32, #tpu.memory_space<vmem>>, vector<1x2x11x7x128xf32>,
    %c0_361 = arith.constant 0 : index
    %c0_362 = arith.constant 0 : index
    %c2_363 = arith.constant 2 : index
    %c128_364 = arith.constant 128 : index
    %489 = vector.load %arg6[%c0_361, %c0_362, %c2_363, %c128_364] : memref<2x11x11x256xf32, #tpu.memory_space<vmem>>, vector<2x11x7x128xf32>
    %c2_365 = arith.constant 2 : index
    %c0_366 = arith.constant 0 : index
    %c0_367 = arith.constant 0 : index
    %c0_368 = arith.constant 0 : index
    %c128_369 = arith.constant 128 : index
    %490 = vector.load %arg7[%c2_365, %c0_366, %c0_367, %c0_368, %c128_369] : memref<5x2x11x7x256xf32, #tpu.memory_space<vmem>>, vector<1x2x11x7x128xf32>
    %491 = vector.shape_cast %490 : vector<1x2x11x7x128xf32> to vector<2x11x7x128xf32>
    %492 = vector.shape_cast %489 : vector<2x11x7x128xf32> to vector<1x2x11x7x128xf32>
    tpu.vector_store %arg7[%c2_365, %c0_366, %c0_367, %c0_368, %c128_369], %492 {strides = array<i32>} : memref<5x2x11x7x256xf32, #tpu.memory_space<vmem>>, vector<1x2x11x7x128xf32>,
    %c0_370 = arith.constant 0 : index
    %c0_371 = arith.constant 0 : index
    %c3_372 = arith.constant 3 : index
    %c128_373 = arith.constant 128 : index
    %493 = vector.load %arg6[%c0_370, %c0_371, %c3_372, %c128_373] : memref<2x11x11x256xf32, #tpu.memory_space<vmem>>, vector<2x11x7x128xf32>
    %c3_374 = arith.constant 3 : index
    %c0_375 = arith.constant 0 : index
    %c0_376 = arith.constant 0 : index
    %c0_377 = arith.constant 0 : index
    %c128_378 = arith.constant 128 : index
    %494 = vector.load %arg7[%c3_374, %c0_375, %c0_376, %c0_377, %c128_378] : memref<5x2x11x7x256xf32, #tpu.memory_space<vmem>>, vector<1x2x11x7x128xf32>
    %495 = vector.shape_cast %494 : vector<1x2x11x7x128xf32> to vector<2x11x7x128xf32>
    %496 = vector.shape_cast %493 : vector<2x11x7x128xf32> to vector<1x2x11x7x128xf32>
    tpu.vector_store %arg7[%c3_374, %c0_375, %c0_376, %c0_377, %c128_378], %496 {strides = array<i32>} : memref<5x2x11x7x256xf32, #tpu.memory_space<vmem>>, vector<1x2x11x7x128xf32>,
    %c0_379 = arith.constant 0 : index
    %c0_380 = arith.constant 0 : index
    %c4_381 = arith.constant 4 : index
    %c128_382 = arith.constant 128 : index
    %497 = vector.load %arg6[%c0_379, %c0_380, %c4_381, %c128_382] : memref<2x11x11x256xf32, #tpu.memory_space<vmem>>, vector<2x11x7x128xf32>
    %c4_383 = arith.constant 4 : index
    %c0_384 = arith.constant 0 : index
    %c0_385 = arith.constant 0 : index
    %c0_386 = arith.constant 0 : index
    %c128_387 = arith.constant 128 : index
    %498 = vector.load %arg7[%c4_383, %c0_384, %c0_385, %c0_386, %c128_387] : memref<5x2x11x7x256xf32, #tpu.memory_space<vmem>>, vector<1x2x11x7x128xf32>
    %499 = vector.shape_cast %498 : vector<1x2x11x7x128xf32> to vector<2x11x7x128xf32>
    %500 = vector.shape_cast %497 : vector<2x11x7x128xf32> to vector<1x2x11x7x128xf32>
    tpu.vector_store %arg7[%c4_383, %c0_384, %c0_385, %c0_386, %c128_387], %500 {strides = array<i32>} : memref<5x2x11x7x256xf32, #tpu.memory_space<vmem>>, vector<1x2x11x7x128xf32>,
    %c0_388 = arith.constant 0 : index
    %c0_389 = arith.constant 0 : index
    %c128_390 = arith.constant 128 : index
    %501 = vector.load %arg2[%c0_388, %c0_389, %c128_390] : memref<5x5x256xf32, #tpu.memory_space<vmem>>, vector<5x5x128xf32>
    %cst_391 = arith.constant 0.000000e+00 : f32
    %502 = vector.broadcast %cst_391 : f32 to vector<7x128xf32>
    %cst_392 = arith.constant 0.000000e+00 : f32
    %503 = vector.broadcast %cst_392 : f32 to vector<7x128xf32>
    %cst_393 = arith.constant 0.000000e+00 : f32
    %504 = vector.broadcast %cst_393 : f32 to vector<7x7x128xf32>
    %c0_394 = arith.constant 0 : index
    %c0_395 = arith.constant 0 : index
    %c0_396 = arith.constant 0 : index
    %c0_397 = arith.constant 0 : index
    %c128_398 = arith.constant 128 : index
    %505 = vector.load %arg7[%c0_394, %c0_395, %c0_396, %c0_397, %c128_398] : memref<5x2x11x7x256xf32, #tpu.memory_space<vmem>>, vector<1x1x7x7x128xf32>
    %506 = vector.shape_cast %505 : vector<1x1x7x7x128xf32> to vector<7x7x128xf32>
    %507 = vector.extract_strided_slice %501 {offsets = [0, 0, 0], sizes = [1, 1, 128], strides = [1, 1, 1]} : vector<5x5x128xf32> to vector<1x1x128xf32>
    %508 = vector.shape_cast %507 : vector<1x1x128xf32> to vector<128xf32>
    %509 = vector.shape_cast %508 : vector<128xf32> to vector<1x1x128xf32>
    %510 = vector.broadcast %509 : vector<1x1x128xf32> to vector<7x7x128xf32>
    %511 = arith.mulf %506, %510 : vector<7x7x128xf32>
    %512 = arith.addf %504, %511 : vector<7x7x128xf32>
    %c1_399 = arith.constant 1 : index
    %c0_400 = arith.constant 0 : index
    %c0_401 = arith.constant 0 : index
    %c0_402 = arith.constant 0 : index
    %c128_403 = arith.constant 128 : index
    %513 = vector.load %arg7[%c1_399, %c0_400, %c0_401, %c0_402, %c128_403] : memref<5x2x11x7x256xf32, #tpu.memory_space<vmem>>, vector<1x1x7x7x128xf32>
    %514 = vector.shape_cast %513 : vector<1x1x7x7x128xf32> to vector<7x7x128xf32>
    %515 = vector.extract_strided_slice %501 {offsets = [0, 1, 0], sizes = [1, 1, 128], strides = [1, 1, 1]} : vector<5x5x128xf32> to vector<1x1x128xf32>
    %516 = vector.shape_cast %515 : vector<1x1x128xf32> to vector<128xf32>
    %517 = vector.shape_cast %516 : vector<128xf32> to vector<1x1x128xf32>
    %518 = vector.broadcast %517 : vector<1x1x128xf32> to vector<7x7x128xf32>
    %519 = arith.mulf %514, %518 : vector<7x7x128xf32>
    %520 = arith.addf %512, %519 : vector<7x7x128xf32>
    %c2_404 = arith.constant 2 : index
    %c0_405 = arith.constant 0 : index
    %c0_406 = arith.constant 0 : index
    %c0_407 = arith.constant 0 : index
    %c128_408 = arith.constant 128 : index
    %521 = vector.load %arg7[%c2_404, %c0_405, %c0_406, %c0_407, %c128_408] : memref<5x2x11x7x256xf32, #tpu.memory_space<vmem>>, vector<1x1x7x7x128xf32>
    %522 = vector.shape_cast %521 : vector<1x1x7x7x128xf32> to vector<7x7x128xf32>
    %523 = vector.extract_strided_slice %501 {offsets = [0, 2, 0], sizes = [1, 1, 128], strides = [1, 1, 1]} : vector<5x5x128xf32> to vector<1x1x128xf32>
    %524 = vector.shape_cast %523 : vector<1x1x128xf32> to vector<128xf32>
    %525 = vector.shape_cast %524 : vector<128xf32> to vector<1x1x128xf32>
    %526 = vector.broadcast %525 : vector<1x1x128xf32> to vector<7x7x128xf32>
    %527 = arith.mulf %522, %526 : vector<7x7x128xf32>
    %528 = arith.addf %520, %527 : vector<7x7x128xf32>
    %c3_409 = arith.constant 3 : index
    %c0_410 = arith.constant 0 : index
    %c0_411 = arith.constant 0 : index
    %c0_412 = arith.constant 0 : index
    %c128_413 = arith.constant 128 : index
    %529 = vector.load %arg7[%c3_409, %c0_410, %c0_411, %c0_412, %c128_413] : memref<5x2x11x7x256xf32, #tpu.memory_space<vmem>>, vector<1x1x7x7x128xf32>
    %530 = vector.shape_cast %529 : vector<1x1x7x7x128xf32> to vector<7x7x128xf32>
    %531 = vector.extract_strided_slice %501 {offsets = [0, 3, 0], sizes = [1, 1, 128], strides = [1, 1, 1]} : vector<5x5x128xf32> to vector<1x1x128xf32>
    %532 = vector.shape_cast %531 : vector<1x1x128xf32> to vector<128xf32>
    %533 = vector.shape_cast %532 : vector<128xf32> to vector<1x1x128xf32>
    %534 = vector.broadcast %533 : vector<1x1x128xf32> to vector<7x7x128xf32>
    %535 = arith.mulf %530, %534 : vector<7x7x128xf32>
    %536 = arith.addf %528, %535 : vector<7x7x128xf32>
    %c4_414 = arith.constant 4 : index
    %c0_415 = arith.constant 0 : index
    %c0_416 = arith.constant 0 : index
    %c0_417 = arith.constant 0 : index
    %c128_418 = arith.constant 128 : index
    %537 = vector.load %arg7[%c4_414, %c0_415, %c0_416, %c0_417, %c128_418] : memref<5x2x11x7x256xf32, #tpu.memory_space<vmem>>, vector<1x1x7x7x128xf32>
    %538 = vector.shape_cast %537 : vector<1x1x7x7x128xf32> to vector<7x7x128xf32>
    %539 = vector.extract_strided_slice %501 {offsets = [0, 4, 0], sizes = [1, 1, 128], strides = [1, 1, 1]} : vector<5x5x128xf32> to vector<1x1x128xf32>
    %540 = vector.shape_cast %539 : vector<1x1x128xf32> to vector<128xf32>
    %541 = vector.shape_cast %540 : vector<128xf32> to vector<1x1x128xf32>
    %542 = vector.broadcast %541 : vector<1x1x128xf32> to vector<7x7x128xf32>
    %543 = arith.mulf %538, %542 : vector<7x7x128xf32>
    %544 = arith.addf %536, %543 : vector<7x7x128xf32>
    %c0_419 = arith.constant 0 : index
    %c0_420 = arith.constant 0 : index
    %c1_421 = arith.constant 1 : index
    %c0_422 = arith.constant 0 : index
    %c128_423 = arith.constant 128 : index
    %545 = vector.load %arg7[%c0_419, %c0_420, %c1_421, %c0_422, %c128_423] : memref<5x2x11x7x256xf32, #tpu.memory_space<vmem>>, vector<1x1x7x7x128xf32>
    %546 = vector.shape_cast %545 : vector<1x1x7x7x128xf32> to vector<7x7x128xf32>
    %547 = vector.extract_strided_slice %501 {offsets = [1, 0, 0], sizes = [1, 1, 128], strides = [1, 1, 1]} : vector<5x5x128xf32> to vector<1x1x128xf32>
    %548 = vector.shape_cast %547 : vector<1x1x128xf32> to vector<128xf32>
    %549 = vector.shape_cast %548 : vector<128xf32> to vector<1x1x128xf32>
    %550 = vector.broadcast %549 : vector<1x1x128xf32> to vector<7x7x128xf32>
    %551 = arith.mulf %546, %550 : vector<7x7x128xf32>
    %552 = arith.addf %544, %551 : vector<7x7x128xf32>
    %c1_424 = arith.constant 1 : index
    %c0_425 = arith.constant 0 : index
    %c1_426 = arith.constant 1 : index
    %c0_427 = arith.constant 0 : index
    %c128_428 = arith.constant 128 : index
    %553 = vector.load %arg7[%c1_424, %c0_425, %c1_426, %c0_427, %c128_428] : memref<5x2x11x7x256xf32, #tpu.memory_space<vmem>>, vector<1x1x7x7x128xf32>
    %554 = vector.shape_cast %553 : vector<1x1x7x7x128xf32> to vector<7x7x128xf32>
    %555 = vector.extract_strided_slice %501 {offsets = [1, 1, 0], sizes = [1, 1, 128], strides = [1, 1, 1]} : vector<5x5x128xf32> to vector<1x1x128xf32>
    %556 = vector.shape_cast %555 : vector<1x1x128xf32> to vector<128xf32>
    %557 = vector.shape_cast %556 : vector<128xf32> to vector<1x1x128xf32>
    %558 = vector.broadcast %557 : vector<1x1x128xf32> to vector<7x7x128xf32>
    %559 = arith.mulf %554, %558 : vector<7x7x128xf32>
    %560 = arith.addf %552, %559 : vector<7x7x128xf32>
    %c2_429 = arith.constant 2 : index
    %c0_430 = arith.constant 0 : index
    %c1_431 = arith.constant 1 : index
    %c0_432 = arith.constant 0 : index
    %c128_433 = arith.constant 128 : index
    %561 = vector.load %arg7[%c2_429, %c0_430, %c1_431, %c0_432, %c128_433] : memref<5x2x11x7x256xf32, #tpu.memory_space<vmem>>, vector<1x1x7x7x128xf32>
    %562 = vector.shape_cast %561 : vector<1x1x7x7x128xf32> to vector<7x7x128xf32>
    %563 = vector.extract_strided_slice %501 {offsets = [1, 2, 0], sizes = [1, 1, 128], strides = [1, 1, 1]} : vector<5x5x128xf32> to vector<1x1x128xf32>
    %564 = vector.shape_cast %563 : vector<1x1x128xf32> to vector<128xf32>
    %565 = vector.shape_cast %564 : vector<128xf32> to vector<1x1x128xf32>
    %566 = vector.broadcast %565 : vector<1x1x128xf32> to vector<7x7x128xf32>
    %567 = arith.mulf %562, %566 : vector<7x7x128xf32>
    %568 = arith.addf %560, %567 : vector<7x7x128xf32>
    %c3_434 = arith.constant 3 : index
    %c0_435 = arith.constant 0 : index
    %c1_436 = arith.constant 1 : index
    %c0_437 = arith.constant 0 : index
    %c128_438 = arith.constant 128 : index
    %569 = vector.load %arg7[%c3_434, %c0_435, %c1_436, %c0_437, %c128_438] : memref<5x2x11x7x256xf32, #tpu.memory_space<vmem>>, vector<1x1x7x7x128xf32>
    %570 = vector.shape_cast %569 : vector<1x1x7x7x128xf32> to vector<7x7x128xf32>
    %571 = vector.extract_strided_slice %501 {offsets = [1, 3, 0], sizes = [1, 1, 128], strides = [1, 1, 1]} : vector<5x5x128xf32> to vector<1x1x128xf32>
    %572 = vector.shape_cast %571 : vector<1x1x128xf32> to vector<128xf32>
    %573 = vector.shape_cast %572 : vector<128xf32> to vector<1x1x128xf32>
    %574 = vector.broadcast %573 : vector<1x1x128xf32> to vector<7x7x128xf32>
    %575 = arith.mulf %570, %574 : vector<7x7x128xf32>
    %576 = arith.addf %568, %575 : vector<7x7x128xf32>
    %c4_439 = arith.constant 4 : index
    %c0_440 = arith.constant 0 : index
    %c1_441 = arith.constant 1 : index
    %c0_442 = arith.constant 0 : index
    %c128_443 = arith.constant 128 : index
    %577 = vector.load %arg7[%c4_439, %c0_440, %c1_441, %c0_442, %c128_443] : memref<5x2x11x7x256xf32, #tpu.memory_space<vmem>>, vector<1x1x7x7x128xf32>
    %578 = vector.shape_cast %577 : vector<1x1x7x7x128xf32> to vector<7x7x128xf32>
    %579 = vector.extract_strided_slice %501 {offsets = [1, 4, 0], sizes = [1, 1, 128], strides = [1, 1, 1]} : vector<5x5x128xf32> to vector<1x1x128xf32>
    %580 = vector.shape_cast %579 : vector<1x1x128xf32> to vector<128xf32>
    %581 = vector.shape_cast %580 : vector<128xf32> to vector<1x1x128xf32>
    %582 = vector.broadcast %581 : vector<1x1x128xf32> to vector<7x7x128xf32>
    %583 = arith.mulf %578, %582 : vector<7x7x128xf32>
    %584 = arith.addf %576, %583 : vector<7x7x128xf32>
    %c0_444 = arith.constant 0 : index
    %c0_445 = arith.constant 0 : index
    %c2_446 = arith.constant 2 : index
    %c0_447 = arith.constant 0 : index
    %c128_448 = arith.constant 128 : index
    %585 = vector.load %arg7[%c0_444, %c0_445, %c2_446, %c0_447, %c128_448] : memref<5x2x11x7x256xf32, #tpu.memory_space<vmem>>, vector<1x1x7x7x128xf32>
    %586 = vector.shape_cast %585 : vector<1x1x7x7x128xf32> to vector<7x7x128xf32>
    %587 = vector.extract_strided_slice %501 {offsets = [2, 0, 0], sizes = [1, 1, 128], strides = [1, 1, 1]} : vector<5x5x128xf32> to vector<1x1x128xf32>
    %588 = vector.shape_cast %587 : vector<1x1x128xf32> to vector<128xf32>
    %589 = vector.shape_cast %588 : vector<128xf32> to vector<1x1x128xf32>
    %590 = vector.broadcast %589 : vector<1x1x128xf32> to vector<7x7x128xf32>
    %591 = arith.mulf %586, %590 : vector<7x7x128xf32>
    %592 = arith.addf %584, %591 : vector<7x7x128xf32>
    %c1_449 = arith.constant 1 : index
    %c0_450 = arith.constant 0 : index
    %c2_451 = arith.constant 2 : index
    %c0_452 = arith.constant 0 : index
    %c128_453 = arith.constant 128 : index
    %593 = vector.load %arg7[%c1_449, %c0_450, %c2_451, %c0_452, %c128_453] : memref<5x2x11x7x256xf32, #tpu.memory_space<vmem>>, vector<1x1x7x7x128xf32>
    %594 = vector.shape_cast %593 : vector<1x1x7x7x128xf32> to vector<7x7x128xf32>
    %595 = vector.extract_strided_slice %501 {offsets = [2, 1, 0], sizes = [1, 1, 128], strides = [1, 1, 1]} : vector<5x5x128xf32> to vector<1x1x128xf32>
    %596 = vector.shape_cast %595 : vector<1x1x128xf32> to vector<128xf32>
    %597 = vector.shape_cast %596 : vector<128xf32> to vector<1x1x128xf32>
    %598 = vector.broadcast %597 : vector<1x1x128xf32> to vector<7x7x128xf32>
    %599 = arith.mulf %594, %598 : vector<7x7x128xf32>
    %600 = arith.addf %592, %599 : vector<7x7x128xf32>
    %c2_454 = arith.constant 2 : index
    %c0_455 = arith.constant 0 : index
    %c2_456 = arith.constant 2 : index
    %c0_457 = arith.constant 0 : index
    %c128_458 = arith.constant 128 : index
    %601 = vector.load %arg7[%c2_454, %c0_455, %c2_456, %c0_457, %c128_458] : memref<5x2x11x7x256xf32, #tpu.memory_space<vmem>>, vector<1x1x7x7x128xf32>
    %602 = vector.shape_cast %601 : vector<1x1x7x7x128xf32> to vector<7x7x128xf32>
    %603 = vector.extract_strided_slice %501 {offsets = [2, 2, 0], sizes = [1, 1, 128], strides = [1, 1, 1]} : vector<5x5x128xf32> to vector<1x1x128xf32>
    %604 = vector.shape_cast %603 : vector<1x1x128xf32> to vector<128xf32>
    %605 = vector.shape_cast %604 : vector<128xf32> to vector<1x1x128xf32>
    %606 = vector.broadcast %605 : vector<1x1x128xf32> to vector<7x7x128xf32>
    %607 = arith.mulf %602, %606 : vector<7x7x128xf32>
    %608 = arith.addf %600, %607 : vector<7x7x128xf32>
    %c3_459 = arith.constant 3 : index
    %c0_460 = arith.constant 0 : index
    %c2_461 = arith.constant 2 : index
    %c0_462 = arith.constant 0 : index
    %c128_463 = arith.constant 128 : index
    %609 = vector.load %arg7[%c3_459, %c0_460, %c2_461, %c0_462, %c128_463] : memref<5x2x11x7x256xf32, #tpu.memory_space<vmem>>, vector<1x1x7x7x128xf32>
    %610 = vector.shape_cast %609 : vector<1x1x7x7x128xf32> to vector<7x7x128xf32>
    %611 = vector.extract_strided_slice %501 {offsets = [2, 3, 0], sizes = [1, 1, 128], strides = [1, 1, 1]} : vector<5x5x128xf32> to vector<1x1x128xf32>
    %612 = vector.shape_cast %611 : vector<1x1x128xf32> to vector<128xf32>
    %613 = vector.shape_cast %612 : vector<128xf32> to vector<1x1x128xf32>
    %614 = vector.broadcast %613 : vector<1x1x128xf32> to vector<7x7x128xf32>
    %615 = arith.mulf %610, %614 : vector<7x7x128xf32>
    %616 = arith.addf %608, %615 : vector<7x7x128xf32>
    %c4_464 = arith.constant 4 : index
    %c0_465 = arith.constant 0 : index
    %c2_466 = arith.constant 2 : index
    %c0_467 = arith.constant 0 : index
    %c128_468 = arith.constant 128 : index
    %617 = vector.load %arg7[%c4_464, %c0_465, %c2_466, %c0_467, %c128_468] : memref<5x2x11x7x256xf32, #tpu.memory_space<vmem>>, vector<1x1x7x7x128xf32>
    %618 = vector.shape_cast %617 : vector<1x1x7x7x128xf32> to vector<7x7x128xf32>
    %619 = vector.extract_strided_slice %501 {offsets = [2, 4, 0], sizes = [1, 1, 128], strides = [1, 1, 1]} : vector<5x5x128xf32> to vector<1x1x128xf32>
    %620 = vector.shape_cast %619 : vector<1x1x128xf32> to vector<128xf32>
    %621 = vector.shape_cast %620 : vector<128xf32> to vector<1x1x128xf32>
    %622 = vector.broadcast %621 : vector<1x1x128xf32> to vector<7x7x128xf32>
    %623 = arith.mulf %618, %622 : vector<7x7x128xf32>
    %624 = arith.addf %616, %623 : vector<7x7x128xf32>
    %c0_469 = arith.constant 0 : index
    %c0_470 = arith.constant 0 : index
    %c3_471 = arith.constant 3 : index
    %c0_472 = arith.constant 0 : index
    %c128_473 = arith.constant 128 : index
    %625 = vector.load %arg7[%c0_469, %c0_470, %c3_471, %c0_472, %c128_473] : memref<5x2x11x7x256xf32, #tpu.memory_space<vmem>>, vector<1x1x7x7x128xf32>
    %626 = vector.shape_cast %625 : vector<1x1x7x7x128xf32> to vector<7x7x128xf32>
    %627 = vector.extract_strided_slice %501 {offsets = [3, 0, 0], sizes = [1, 1, 128], strides = [1, 1, 1]} : vector<5x5x128xf32> to vector<1x1x128xf32>
    %628 = vector.shape_cast %627 : vector<1x1x128xf32> to vector<128xf32>
    %629 = vector.shape_cast %628 : vector<128xf32> to vector<1x1x128xf32>
    %630 = vector.broadcast %629 : vector<1x1x128xf32> to vector<7x7x128xf32>
    %631 = arith.mulf %626, %630 : vector<7x7x128xf32>
    %632 = arith.addf %624, %631 : vector<7x7x128xf32>
    %c1_474 = arith.constant 1 : index
    %c0_475 = arith.constant 0 : index
    %c3_476 = arith.constant 3 : index
    %c0_477 = arith.constant 0 : index
    %c128_478 = arith.constant 128 : index
    %633 = vector.load %arg7[%c1_474, %c0_475, %c3_476, %c0_477, %c128_478] : memref<5x2x11x7x256xf32, #tpu.memory_space<vmem>>, vector<1x1x7x7x128xf32>
    %634 = vector.shape_cast %633 : vector<1x1x7x7x128xf32> to vector<7x7x128xf32>
    %635 = vector.extract_strided_slice %501 {offsets = [3, 1, 0], sizes = [1, 1, 128], strides = [1, 1, 1]} : vector<5x5x128xf32> to vector<1x1x128xf32>
    %636 = vector.shape_cast %635 : vector<1x1x128xf32> to vector<128xf32>
    %637 = vector.shape_cast %636 : vector<128xf32> to vector<1x1x128xf32>
    %638 = vector.broadcast %637 : vector<1x1x128xf32> to vector<7x7x128xf32>
    %639 = arith.mulf %634, %638 : vector<7x7x128xf32>
    %640 = arith.addf %632, %639 : vector<7x7x128xf32>
    %c2_479 = arith.constant 2 : index
    %c0_480 = arith.constant 0 : index
    %c3_481 = arith.constant 3 : index
    %c0_482 = arith.constant 0 : index
    %c128_483 = arith.constant 128 : index
    %641 = vector.load %arg7[%c2_479, %c0_480, %c3_481, %c0_482, %c128_483] : memref<5x2x11x7x256xf32, #tpu.memory_space<vmem>>, vector<1x1x7x7x128xf32>
    %642 = vector.shape_cast %641 : vector<1x1x7x7x128xf32> to vector<7x7x128xf32>
    %643 = vector.extract_strided_slice %501 {offsets = [3, 2, 0], sizes = [1, 1, 128], strides = [1, 1, 1]} : vector<5x5x128xf32> to vector<1x1x128xf32>
    %644 = vector.shape_cast %643 : vector<1x1x128xf32> to vector<128xf32>
    %645 = vector.shape_cast %644 : vector<128xf32> to vector<1x1x128xf32>
    %646 = vector.broadcast %645 : vector<1x1x128xf32> to vector<7x7x128xf32>
    %647 = arith.mulf %642, %646 : vector<7x7x128xf32>
    %648 = arith.addf %640, %647 : vector<7x7x128xf32>
    %c3_484 = arith.constant 3 : index
    %c0_485 = arith.constant 0 : index
    %c3_486 = arith.constant 3 : index
    %c0_487 = arith.constant 0 : index
    %c128_488 = arith.constant 128 : index
    %649 = vector.load %arg7[%c3_484, %c0_485, %c3_486, %c0_487, %c128_488] : memref<5x2x11x7x256xf32, #tpu.memory_space<vmem>>, vector<1x1x7x7x128xf32>
    %650 = vector.shape_cast %649 : vector<1x1x7x7x128xf32> to vector<7x7x128xf32>
    %651 = vector.extract_strided_slice %501 {offsets = [3, 3, 0], sizes = [1, 1, 128], strides = [1, 1, 1]} : vector<5x5x128xf32> to vector<1x1x128xf32>
    %652 = vector.shape_cast %651 : vector<1x1x128xf32> to vector<128xf32>
    %653 = vector.shape_cast %652 : vector<128xf32> to vector<1x1x128xf32>
    %654 = vector.broadcast %653 : vector<1x1x128xf32> to vector<7x7x128xf32>
    %655 = arith.mulf %650, %654 : vector<7x7x128xf32>
    %656 = arith.addf %648, %655 : vector<7x7x128xf32>
    %c4_489 = arith.constant 4 : index
    %c0_490 = arith.constant 0 : index
    %c3_491 = arith.constant 3 : index
    %c0_492 = arith.constant 0 : index
    %c128_493 = arith.constant 128 : index
    %657 = vector.load %arg7[%c4_489, %c0_490, %c3_491, %c0_492, %c128_493] : memref<5x2x11x7x256xf32, #tpu.memory_space<vmem>>, vector<1x1x7x7x128xf32>
    %658 = vector.shape_cast %657 : vector<1x1x7x7x128xf32> to vector<7x7x128xf32>
    %659 = vector.extract_strided_slice %501 {offsets = [3, 4, 0], sizes = [1, 1, 128], strides = [1, 1, 1]} : vector<5x5x128xf32> to vector<1x1x128xf32>
    %660 = vector.shape_cast %659 : vector<1x1x128xf32> to vector<128xf32>
    %661 = vector.shape_cast %660 : vector<128xf32> to vector<1x1x128xf32>
    %662 = vector.broadcast %661 : vector<1x1x128xf32> to vector<7x7x128xf32>
    %663 = arith.mulf %658, %662 : vector<7x7x128xf32>
    %664 = arith.addf %656, %663 : vector<7x7x128xf32>
    %c0_494 = arith.constant 0 : index
    %c0_495 = arith.constant 0 : index
    %c4_496 = arith.constant 4 : index
    %c0_497 = arith.constant 0 : index
    %c128_498 = arith.constant 128 : index
    %665 = vector.load %arg7[%c0_494, %c0_495, %c4_496, %c0_497, %c128_498] : memref<5x2x11x7x256xf32, #tpu.memory_space<vmem>>, vector<1x1x7x7x128xf32>
    %666 = vector.shape_cast %665 : vector<1x1x7x7x128xf32> to vector<7x7x128xf32>
    %667 = vector.extract_strided_slice %501 {offsets = [4, 0, 0], sizes = [1, 1, 128], strides = [1, 1, 1]} : vector<5x5x128xf32> to vector<1x1x128xf32>
    %668 = vector.shape_cast %667 : vector<1x1x128xf32> to vector<128xf32>
    %669 = vector.shape_cast %668 : vector<128xf32> to vector<1x1x128xf32>
    %670 = vector.broadcast %669 : vector<1x1x128xf32> to vector<7x7x128xf32>
    %671 = arith.mulf %666, %670 : vector<7x7x128xf32>
    %672 = arith.addf %664, %671 : vector<7x7x128xf32>
    %c1_499 = arith.constant 1 : index
    %c0_500 = arith.constant 0 : index
    %c4_501 = arith.constant 4 : index
    %c0_502 = arith.constant 0 : index
    %c128_503 = arith.constant 128 : index
    %673 = vector.load %arg7[%c1_499, %c0_500, %c4_501, %c0_502, %c128_503] : memref<5x2x11x7x256xf32, #tpu.memory_space<vmem>>, vector<1x1x7x7x128xf32>
    %674 = vector.shape_cast %673 : vector<1x1x7x7x128xf32> to vector<7x7x128xf32>
    %675 = vector.extract_strided_slice %501 {offsets = [4, 1, 0], sizes = [1, 1, 128], strides = [1, 1, 1]} : vector<5x5x128xf32> to vector<1x1x128xf32>
    %676 = vector.shape_cast %675 : vector<1x1x128xf32> to vector<128xf32>
    %677 = vector.shape_cast %676 : vector<128xf32> to vector<1x1x128xf32>
    %678 = vector.broadcast %677 : vector<1x1x128xf32> to vector<7x7x128xf32>
    %679 = arith.mulf %674, %678 : vector<7x7x128xf32>
    %680 = arith.addf %672, %679 : vector<7x7x128xf32>
    %c2_504 = arith.constant 2 : index
    %c0_505 = arith.constant 0 : index
    %c4_506 = arith.constant 4 : index
    %c0_507 = arith.constant 0 : index
    %c128_508 = arith.constant 128 : index
    %681 = vector.load %arg7[%c2_504, %c0_505, %c4_506, %c0_507, %c128_508] : memref<5x2x11x7x256xf32, #tpu.memory_space<vmem>>, vector<1x1x7x7x128xf32>
    %682 = vector.shape_cast %681 : vector<1x1x7x7x128xf32> to vector<7x7x128xf32>
    %683 = vector.extract_strided_slice %501 {offsets = [4, 2, 0], sizes = [1, 1, 128], strides = [1, 1, 1]} : vector<5x5x128xf32> to vector<1x1x128xf32>
    %684 = vector.shape_cast %683 : vector<1x1x128xf32> to vector<128xf32>
    %685 = vector.shape_cast %684 : vector<128xf32> to vector<1x1x128xf32>
    %686 = vector.broadcast %685 : vector<1x1x128xf32> to vector<7x7x128xf32>
    %687 = arith.mulf %682, %686 : vector<7x7x128xf32>
    %688 = arith.addf %680, %687 : vector<7x7x128xf32>
    %c3_509 = arith.constant 3 : index
    %c0_510 = arith.constant 0 : index
    %c4_511 = arith.constant 4 : index
    %c0_512 = arith.constant 0 : index
    %c128_513 = arith.constant 128 : index
    %689 = vector.load %arg7[%c3_509, %c0_510, %c4_511, %c0_512, %c128_513] : memref<5x2x11x7x256xf32, #tpu.memory_space<vmem>>, vector<1x1x7x7x128xf32>
    %690 = vector.shape_cast %689 : vector<1x1x7x7x128xf32> to vector<7x7x128xf32>
    %691 = vector.extract_strided_slice %501 {offsets = [4, 3, 0], sizes = [1, 1, 128], strides = [1, 1, 1]} : vector<5x5x128xf32> to vector<1x1x128xf32>
    %692 = vector.shape_cast %691 : vector<1x1x128xf32> to vector<128xf32>
    %693 = vector.shape_cast %692 : vector<128xf32> to vector<1x1x128xf32>
    %694 = vector.broadcast %693 : vector<1x1x128xf32> to vector<7x7x128xf32>
    %695 = arith.mulf %690, %694 : vector<7x7x128xf32>
    %696 = arith.addf %688, %695 : vector<7x7x128xf32>
    %c4_514 = arith.constant 4 : index
    %c0_515 = arith.constant 0 : index
    %c4_516 = arith.constant 4 : index
    %c0_517 = arith.constant 0 : index
    %c128_518 = arith.constant 128 : index
    %697 = vector.load %arg7[%c4_514, %c0_515, %c4_516, %c0_517, %c128_518] : memref<5x2x11x7x256xf32, #tpu.memory_space<vmem>>, vector<1x1x7x7x128xf32>
    %698 = vector.shape_cast %697 : vector<1x1x7x7x128xf32> to vector<7x7x128xf32>
    %699 = vector.extract_strided_slice %501 {offsets = [4, 4, 0], sizes = [1, 1, 128], strides = [1, 1, 1]} : vector<5x5x128xf32> to vector<1x1x128xf32>
    %700 = vector.shape_cast %699 : vector<1x1x128xf32> to vector<128xf32>
    %701 = vector.shape_cast %700 : vector<128xf32> to vector<1x1x128xf32>
    %702 = vector.broadcast %701 : vector<1x1x128xf32> to vector<7x7x128xf32>
    %703 = arith.mulf %698, %702 : vector<7x7x128xf32>
    %704 = arith.addf %696, %703 : vector<7x7x128xf32>
    %cst_519 = arith.constant dense<0.000000e+00> : vector<7x128xf32>
    %705 = vector.multi_reduction <add>, %704, %cst_519 [0] : vector<7x7x128xf32> to vector<7x128xf32>
    %706 = arith.addf %502, %705 : vector<7x128xf32>
    %707 = arith.mulf %704, %704 : vector<7x7x128xf32>
    %cst_520 = arith.constant dense<0.000000e+00> : vector<7x128xf32>
    %708 = vector.multi_reduction <add>, %707, %cst_520 [0] : vector<7x7x128xf32> to vector<7x128xf32>
    %709 = arith.addf %503, %708 : vector<7x128xf32>
    %cst_521 = arith.constant 0.000000e+00 : f32
    %710 = vector.broadcast %cst_521 : f32 to vector<7x7x128xf32>
    %c0_522 = arith.constant 0 : index
    %c1_523 = arith.constant 1 : index
    %c0_524 = arith.constant 0 : index
    %c0_525 = arith.constant 0 : index
    %c128_526 = arith.constant 128 : index
    %711 = vector.load %arg7[%c0_522, %c1_523, %c0_524, %c0_525, %c128_526] : memref<5x2x11x7x256xf32, #tpu.memory_space<vmem>>, vector<1x1x7x7x128xf32>
    %712 = vector.shape_cast %711 : vector<1x1x7x7x128xf32> to vector<7x7x128xf32>
    %713 = vector.extract_strided_slice %501 {offsets = [0, 0, 0], sizes = [1, 1, 128], strides = [1, 1, 1]} : vector<5x5x128xf32> to vector<1x1x128xf32>
    %714 = vector.shape_cast %713 : vector<1x1x128xf32> to vector<128xf32>
    %715 = vector.shape_cast %714 : vector<128xf32> to vector<1x1x128xf32>
    %716 = vector.broadcast %715 : vector<1x1x128xf32> to vector<7x7x128xf32>
    %717 = arith.mulf %712, %716 : vector<7x7x128xf32>
    %718 = arith.addf %710, %717 : vector<7x7x128xf32>
    %c1_527 = arith.constant 1 : index
    %c1_528 = arith.constant 1 : index
    %c0_529 = arith.constant 0 : index
    %c0_530 = arith.constant 0 : index
    %c128_531 = arith.constant 128 : index
    %719 = vector.load %arg7[%c1_527, %c1_528, %c0_529, %c0_530, %c128_531] : memref<5x2x11x7x256xf32, #tpu.memory_space<vmem>>, vector<1x1x7x7x128xf32>
    %720 = vector.shape_cast %719 : vector<1x1x7x7x128xf32> to vector<7x7x128xf32>
    %721 = vector.extract_strided_slice %501 {offsets = [0, 1, 0], sizes = [1, 1, 128], strides = [1, 1, 1]} : vector<5x5x128xf32> to vector<1x1x128xf32>
    %722 = vector.shape_cast %721 : vector<1x1x128xf32> to vector<128xf32>
    %723 = vector.shape_cast %722 : vector<128xf32> to vector<1x1x128xf32>
    %724 = vector.broadcast %723 : vector<1x1x128xf32> to vector<7x7x128xf32>
    %725 = arith.mulf %720, %724 : vector<7x7x128xf32>
    %726 = arith.addf %718, %725 : vector<7x7x128xf32>
    %c2_532 = arith.constant 2 : index
    %c1_533 = arith.constant 1 : index
    %c0_534 = arith.constant 0 : index
    %c0_535 = arith.constant 0 : index
    %c128_536 = arith.constant 128 : index
    %727 = vector.load %arg7[%c2_532, %c1_533, %c0_534, %c0_535, %c128_536] : memref<5x2x11x7x256xf32, #tpu.memory_space<vmem>>, vector<1x1x7x7x128xf32>
    %728 = vector.shape_cast %727 : vector<1x1x7x7x128xf32> to vector<7x7x128xf32>
    %729 = vector.extract_strided_slice %501 {offsets = [0, 2, 0], sizes = [1, 1, 128], strides = [1, 1, 1]} : vector<5x5x128xf32> to vector<1x1x128xf32>
    %730 = vector.shape_cast %729 : vector<1x1x128xf32> to vector<128xf32>
    %731 = vector.shape_cast %730 : vector<128xf32> to vector<1x1x128xf32>
    %732 = vector.broadcast %731 : vector<1x1x128xf32> to vector<7x7x128xf32>
    %733 = arith.mulf %728, %732 : vector<7x7x128xf32>
    %734 = arith.addf %726, %733 : vector<7x7x128xf32>
    %c3_537 = arith.constant 3 : index
    %c1_538 = arith.constant 1 : index
    %c0_539 = arith.constant 0 : index
    %c0_540 = arith.constant 0 : index
    %c128_541 = arith.constant 128 : index
    %735 = vector.load %arg7[%c3_537, %c1_538, %c0_539, %c0_540, %c128_541] : memref<5x2x11x7x256xf32, #tpu.memory_space<vmem>>, vector<1x1x7x7x128xf32>
    %736 = vector.shape_cast %735 : vector<1x1x7x7x128xf32> to vector<7x7x128xf32>
    %737 = vector.extract_strided_slice %501 {offsets = [0, 3, 0], sizes = [1, 1, 128], strides = [1, 1, 1]} : vector<5x5x128xf32> to vector<1x1x128xf32>
    %738 = vector.shape_cast %737 : vector<1x1x128xf32> to vector<128xf32>
    %739 = vector.shape_cast %738 : vector<128xf32> to vector<1x1x128xf32>
    %740 = vector.broadcast %739 : vector<1x1x128xf32> to vector<7x7x128xf32>
    %741 = arith.mulf %736, %740 : vector<7x7x128xf32>
    %742 = arith.addf %734, %741 : vector<7x7x128xf32>
    %c4_542 = arith.constant 4 : index
    %c1_543 = arith.constant 1 : index
    %c0_544 = arith.constant 0 : index
    %c0_545 = arith.constant 0 : index
    %c128_546 = arith.constant 128 : index
    %743 = vector.load %arg7[%c4_542, %c1_543, %c0_544, %c0_545, %c128_546] : memref<5x2x11x7x256xf32, #tpu.memory_space<vmem>>, vector<1x1x7x7x128xf32>
    %744 = vector.shape_cast %743 : vector<1x1x7x7x128xf32> to vector<7x7x128xf32>
    %745 = vector.extract_strided_slice %501 {offsets = [0, 4, 0], sizes = [1, 1, 128], strides = [1, 1, 1]} : vector<5x5x128xf32> to vector<1x1x128xf32>
    %746 = vector.shape_cast %745 : vector<1x1x128xf32> to vector<128xf32>
    %747 = vector.shape_cast %746 : vector<128xf32> to vector<1x1x128xf32>
    %748 = vector.broadcast %747 : vector<1x1x128xf32> to vector<7x7x128xf32>
    %749 = arith.mulf %744, %748 : vector<7x7x128xf32>
    %750 = arith.addf %742, %749 : vector<7x7x128xf32>
    %c0_547 = arith.constant 0 : index
    %c1_548 = arith.constant 1 : index
    %c1_549 = arith.constant 1 : index
    %c0_550 = arith.constant 0 : index
    %c128_551 = arith.constant 128 : index
    %751 = vector.load %arg7[%c0_547, %c1_548, %c1_549, %c0_550, %c128_551] : memref<5x2x11x7x256xf32, #tpu.memory_space<vmem>>, vector<1x1x7x7x128xf32>
    %752 = vector.shape_cast %751 : vector<1x1x7x7x128xf32> to vector<7x7x128xf32>
    %753 = vector.extract_strided_slice %501 {offsets = [1, 0, 0], sizes = [1, 1, 128], strides = [1, 1, 1]} : vector<5x5x128xf32> to vector<1x1x128xf32>
    %754 = vector.shape_cast %753 : vector<1x1x128xf32> to vector<128xf32>
    %755 = vector.shape_cast %754 : vector<128xf32> to vector<1x1x128xf32>
    %756 = vector.broadcast %755 : vector<1x1x128xf32> to vector<7x7x128xf32>
    %757 = arith.mulf %752, %756 : vector<7x7x128xf32>
    %758 = arith.addf %750, %757 : vector<7x7x128xf32>
    %c1_552 = arith.constant 1 : index
    %c1_553 = arith.constant 1 : index
    %c1_554 = arith.constant 1 : index
    %c0_555 = arith.constant 0 : index
    %c128_556 = arith.constant 128 : index
    %759 = vector.load %arg7[%c1_552, %c1_553, %c1_554, %c0_555, %c128_556] : memref<5x2x11x7x256xf32, #tpu.memory_space<vmem>>, vector<1x1x7x7x128xf32>
    %760 = vector.shape_cast %759 : vector<1x1x7x7x128xf32> to vector<7x7x128xf32>
    %761 = vector.extract_strided_slice %501 {offsets = [1, 1, 0], sizes = [1, 1, 128], strides = [1, 1, 1]} : vector<5x5x128xf32> to vector<1x1x128xf32>
    %762 = vector.shape_cast %761 : vector<1x1x128xf32> to vector<128xf32>
    %763 = vector.shape_cast %762 : vector<128xf32> to vector<1x1x128xf32>
    %764 = vector.broadcast %763 : vector<1x1x128xf32> to vector<7x7x128xf32>
    %765 = arith.mulf %760, %764 : vector<7x7x128xf32>
    %766 = arith.addf %758, %765 : vector<7x7x128xf32>
    %c2_557 = arith.constant 2 : index
    %c1_558 = arith.constant 1 : index
    %c1_559 = arith.constant 1 : index
    %c0_560 = arith.constant 0 : index
    %c128_561 = arith.constant 128 : index
    %767 = vector.load %arg7[%c2_557, %c1_558, %c1_559, %c0_560, %c128_561] : memref<5x2x11x7x256xf32, #tpu.memory_space<vmem>>, vector<1x1x7x7x128xf32>
    %768 = vector.shape_cast %767 : vector<1x1x7x7x128xf32> to vector<7x7x128xf32>
    %769 = vector.extract_strided_slice %501 {offsets = [1, 2, 0], sizes = [1, 1, 128], strides = [1, 1, 1]} : vector<5x5x128xf32> to vector<1x1x128xf32>
    %770 = vector.shape_cast %769 : vector<1x1x128xf32> to vector<128xf32>
    %771 = vector.shape_cast %770 : vector<128xf32> to vector<1x1x128xf32>
    %772 = vector.broadcast %771 : vector<1x1x128xf32> to vector<7x7x128xf32>
    %773 = arith.mulf %768, %772 : vector<7x7x128xf32>
    %774 = arith.addf %766, %773 : vector<7x7x128xf32>
    %c3_562 = arith.constant 3 : index
    %c1_563 = arith.constant 1 : index
    %c1_564 = arith.constant 1 : index
    %c0_565 = arith.constant 0 : index
    %c128_566 = arith.constant 128 : index
    %775 = vector.load %arg7[%c3_562, %c1_563, %c1_564, %c0_565, %c128_566] : memref<5x2x11x7x256xf32, #tpu.memory_space<vmem>>, vector<1x1x7x7x128xf32>
    %776 = vector.shape_cast %775 : vector<1x1x7x7x128xf32> to vector<7x7x128xf32>
    %777 = vector.extract_strided_slice %501 {offsets = [1, 3, 0], sizes = [1, 1, 128], strides = [1, 1, 1]} : vector<5x5x128xf32> to vector<1x1x128xf32>
    %778 = vector.shape_cast %777 : vector<1x1x128xf32> to vector<128xf32>
    %779 = vector.shape_cast %778 : vector<128xf32> to vector<1x1x128xf32>
    %780 = vector.broadcast %779 : vector<1x1x128xf32> to vector<7x7x128xf32>
    %781 = arith.mulf %776, %780 : vector<7x7x128xf32>
    %782 = arith.addf %774, %781 : vector<7x7x128xf32>
    %c4_567 = arith.constant 4 : index
    %c1_568 = arith.constant 1 : index
    %c1_569 = arith.constant 1 : index
    %c0_570 = arith.constant 0 : index
    %c128_571 = arith.constant 128 : index
    %783 = vector.load %arg7[%c4_567, %c1_568, %c1_569, %c0_570, %c128_571] : memref<5x2x11x7x256xf32, #tpu.memory_space<vmem>>, vector<1x1x7x7x128xf32>
    %784 = vector.shape_cast %783 : vector<1x1x7x7x128xf32> to vector<7x7x128xf32>
    %785 = vector.extract_strided_slice %501 {offsets = [1, 4, 0], sizes = [1, 1, 128], strides = [1, 1, 1]} : vector<5x5x128xf32> to vector<1x1x128xf32>
    %786 = vector.shape_cast %785 : vector<1x1x128xf32> to vector<128xf32>
    %787 = vector.shape_cast %786 : vector<128xf32> to vector<1x1x128xf32>
    %788 = vector.broadcast %787 : vector<1x1x128xf32> to vector<7x7x128xf32>
    %789 = arith.mulf %784, %788 : vector<7x7x128xf32>
    %790 = arith.addf %782, %789 : vector<7x7x128xf32>
    %c0_572 = arith.constant 0 : index
    %c1_573 = arith.constant 1 : index
    %c2_574 = arith.constant 2 : index
    %c0_575 = arith.constant 0 : index
    %c128_576 = arith.constant 128 : index
    %791 = vector.load %arg7[%c0_572, %c1_573, %c2_574, %c0_575, %c128_576] : memref<5x2x11x7x256xf32, #tpu.memory_space<vmem>>, vector<1x1x7x7x128xf32>
    %792 = vector.shape_cast %791 : vector<1x1x7x7x128xf32> to vector<7x7x128xf32>
    %793 = vector.extract_strided_slice %501 {offsets = [2, 0, 0], sizes = [1, 1, 128], strides = [1, 1, 1]} : vector<5x5x128xf32> to vector<1x1x128xf32>
    %794 = vector.shape_cast %793 : vector<1x1x128xf32> to vector<128xf32>
    %795 = vector.shape_cast %794 : vector<128xf32> to vector<1x1x128xf32>
    %796 = vector.broadcast %795 : vector<1x1x128xf32> to vector<7x7x128xf32>
    %797 = arith.mulf %792, %796 : vector<7x7x128xf32>
    %798 = arith.addf %790, %797 : vector<7x7x128xf32>
    %c1_577 = arith.constant 1 : index
    %c1_578 = arith.constant 1 : index
    %c2_579 = arith.constant 2 : index
    %c0_580 = arith.constant 0 : index
    %c128_581 = arith.constant 128 : index
    %799 = vector.load %arg7[%c1_577, %c1_578, %c2_579, %c0_580, %c128_581] : memref<5x2x11x7x256xf32, #tpu.memory_space<vmem>>, vector<1x1x7x7x128xf32>
    %800 = vector.shape_cast %799 : vector<1x1x7x7x128xf32> to vector<7x7x128xf32>
    %801 = vector.extract_strided_slice %501 {offsets = [2, 1, 0], sizes = [1, 1, 128], strides = [1, 1, 1]} : vector<5x5x128xf32> to vector<1x1x128xf32>
    %802 = vector.shape_cast %801 : vector<1x1x128xf32> to vector<128xf32>
    %803 = vector.shape_cast %802 : vector<128xf32> to vector<1x1x128xf32>
    %804 = vector.broadcast %803 : vector<1x1x128xf32> to vector<7x7x128xf32>
    %805 = arith.mulf %800, %804 : vector<7x7x128xf32>
    %806 = arith.addf %798, %805 : vector<7x7x128xf32>
    %c2_582 = arith.constant 2 : index
    %c1_583 = arith.constant 1 : index
    %c2_584 = arith.constant 2 : index
    %c0_585 = arith.constant 0 : index
    %c128_586 = arith.constant 128 : index
    %807 = vector.load %arg7[%c2_582, %c1_583, %c2_584, %c0_585, %c128_586] : memref<5x2x11x7x256xf32, #tpu.memory_space<vmem>>, vector<1x1x7x7x128xf32>
    %808 = vector.shape_cast %807 : vector<1x1x7x7x128xf32> to vector<7x7x128xf32>
    %809 = vector.extract_strided_slice %501 {offsets = [2, 2, 0], sizes = [1, 1, 128], strides = [1, 1, 1]} : vector<5x5x128xf32> to vector<1x1x128xf32>
    %810 = vector.shape_cast %809 : vector<1x1x128xf32> to vector<128xf32>
    %811 = vector.shape_cast %810 : vector<128xf32> to vector<1x1x128xf32>
    %812 = vector.broadcast %811 : vector<1x1x128xf32> to vector<7x7x128xf32>
    %813 = arith.mulf %808, %812 : vector<7x7x128xf32>
    %814 = arith.addf %806, %813 : vector<7x7x128xf32>
    %c3_587 = arith.constant 3 : index
    %c1_588 = arith.constant 1 : index
    %c2_589 = arith.constant 2 : index
    %c0_590 = arith.constant 0 : index
    %c128_591 = arith.constant 128 : index
    %815 = vector.load %arg7[%c3_587, %c1_588, %c2_589, %c0_590, %c128_591] : memref<5x2x11x7x256xf32, #tpu.memory_space<vmem>>, vector<1x1x7x7x128xf32>
    %816 = vector.shape_cast %815 : vector<1x1x7x7x128xf32> to vector<7x7x128xf32>
    %817 = vector.extract_strided_slice %501 {offsets = [2, 3, 0], sizes = [1, 1, 128], strides = [1, 1, 1]} : vector<5x5x128xf32> to vector<1x1x128xf32>
    %818 = vector.shape_cast %817 : vector<1x1x128xf32> to vector<128xf32>
    %819 = vector.shape_cast %818 : vector<128xf32> to vector<1x1x128xf32>
    %820 = vector.broadcast %819 : vector<1x1x128xf32> to vector<7x7x128xf32>
    %821 = arith.mulf %816, %820 : vector<7x7x128xf32>
    %822 = arith.addf %814, %821 : vector<7x7x128xf32>
    %c4_592 = arith.constant 4 : index
    %c1_593 = arith.constant 1 : index
    %c2_594 = arith.constant 2 : index
    %c0_595 = arith.constant 0 : index
    %c128_596 = arith.constant 128 : index
    %823 = vector.load %arg7[%c4_592, %c1_593, %c2_594, %c0_595, %c128_596] : memref<5x2x11x7x256xf32, #tpu.memory_space<vmem>>, vector<1x1x7x7x128xf32>
    %824 = vector.shape_cast %823 : vector<1x1x7x7x128xf32> to vector<7x7x128xf32>
    %825 = vector.extract_strided_slice %501 {offsets = [2, 4, 0], sizes = [1, 1, 128], strides = [1, 1, 1]} : vector<5x5x128xf32> to vector<1x1x128xf32>
    %826 = vector.shape_cast %825 : vector<1x1x128xf32> to vector<128xf32>
    %827 = vector.shape_cast %826 : vector<128xf32> to vector<1x1x128xf32>
    %828 = vector.broadcast %827 : vector<1x1x128xf32> to vector<7x7x128xf32>
    %829 = arith.mulf %824, %828 : vector<7x7x128xf32>
    %830 = arith.addf %822, %829 : vector<7x7x128xf32>
    %c0_597 = arith.constant 0 : index
    %c1_598 = arith.constant 1 : index
    %c3_599 = arith.constant 3 : index
    %c0_600 = arith.constant 0 : index
    %c128_601 = arith.constant 128 : index
    %831 = vector.load %arg7[%c0_597, %c1_598, %c3_599, %c0_600, %c128_601] : memref<5x2x11x7x256xf32, #tpu.memory_space<vmem>>, vector<1x1x7x7x128xf32>
    %832 = vector.shape_cast %831 : vector<1x1x7x7x128xf32> to vector<7x7x128xf32>
    %833 = vector.extract_strided_slice %501 {offsets = [3, 0, 0], sizes = [1, 1, 128], strides = [1, 1, 1]} : vector<5x5x128xf32> to vector<1x1x128xf32>
    %834 = vector.shape_cast %833 : vector<1x1x128xf32> to vector<128xf32>
    %835 = vector.shape_cast %834 : vector<128xf32> to vector<1x1x128xf32>
    %836 = vector.broadcast %835 : vector<1x1x128xf32> to vector<7x7x128xf32>
    %837 = arith.mulf %832, %836 : vector<7x7x128xf32>
    %838 = arith.addf %830, %837 : vector<7x7x128xf32>
    %c1_602 = arith.constant 1 : index
    %c1_603 = arith.constant 1 : index
    %c3_604 = arith.constant 3 : index
    %c0_605 = arith.constant 0 : index
    %c128_606 = arith.constant 128 : index
    %839 = vector.load %arg7[%c1_602, %c1_603, %c3_604, %c0_605, %c128_606] : memref<5x2x11x7x256xf32, #tpu.memory_space<vmem>>, vector<1x1x7x7x128xf32>
    %840 = vector.shape_cast %839 : vector<1x1x7x7x128xf32> to vector<7x7x128xf32>
    %841 = vector.extract_strided_slice %501 {offsets = [3, 1, 0], sizes = [1, 1, 128], strides = [1, 1, 1]} : vector<5x5x128xf32> to vector<1x1x128xf32>
    %842 = vector.shape_cast %841 : vector<1x1x128xf32> to vector<128xf32>
    %843 = vector.shape_cast %842 : vector<128xf32> to vector<1x1x128xf32>
    %844 = vector.broadcast %843 : vector<1x1x128xf32> to vector<7x7x128xf32>
    %845 = arith.mulf %840, %844 : vector<7x7x128xf32>
    %846 = arith.addf %838, %845 : vector<7x7x128xf32>
    %c2_607 = arith.constant 2 : index
    %c1_608 = arith.constant 1 : index
    %c3_609 = arith.constant 3 : index
    %c0_610 = arith.constant 0 : index
    %c128_611 = arith.constant 128 : index
    %847 = vector.load %arg7[%c2_607, %c1_608, %c3_609, %c0_610, %c128_611] : memref<5x2x11x7x256xf32, #tpu.memory_space<vmem>>, vector<1x1x7x7x128xf32>
    %848 = vector.shape_cast %847 : vector<1x1x7x7x128xf32> to vector<7x7x128xf32>
    %849 = vector.extract_strided_slice %501 {offsets = [3, 2, 0], sizes = [1, 1, 128], strides = [1, 1, 1]} : vector<5x5x128xf32> to vector<1x1x128xf32>
    %850 = vector.shape_cast %849 : vector<1x1x128xf32> to vector<128xf32>
    %851 = vector.shape_cast %850 : vector<128xf32> to vector<1x1x128xf32>
    %852 = vector.broadcast %851 : vector<1x1x128xf32> to vector<7x7x128xf32>
    %853 = arith.mulf %848, %852 : vector<7x7x128xf32>
    %854 = arith.addf %846, %853 : vector<7x7x128xf32>
    %c3_612 = arith.constant 3 : index
    %c1_613 = arith.constant 1 : index
    %c3_614 = arith.constant 3 : index
    %c0_615 = arith.constant 0 : index
    %c128_616 = arith.constant 128 : index
    %855 = vector.load %arg7[%c3_612, %c1_613, %c3_614, %c0_615, %c128_616] : memref<5x2x11x7x256xf32, #tpu.memory_space<vmem>>, vector<1x1x7x7x128xf32>
    %856 = vector.shape_cast %855 : vector<1x1x7x7x128xf32> to vector<7x7x128xf32>
    %857 = vector.extract_strided_slice %501 {offsets = [3, 3, 0], sizes = [1, 1, 128], strides = [1, 1, 1]} : vector<5x5x128xf32> to vector<1x1x128xf32>
    %858 = vector.shape_cast %857 : vector<1x1x128xf32> to vector<128xf32>
    %859 = vector.shape_cast %858 : vector<128xf32> to vector<1x1x128xf32>
    %860 = vector.broadcast %859 : vector<1x1x128xf32> to vector<7x7x128xf32>
    %861 = arith.mulf %856, %860 : vector<7x7x128xf32>
    %862 = arith.addf %854, %861 : vector<7x7x128xf32>
    %c4_617 = arith.constant 4 : index
    %c1_618 = arith.constant 1 : index
    %c3_619 = arith.constant 3 : index
    %c0_620 = arith.constant 0 : index
    %c128_621 = arith.constant 128 : index
    %863 = vector.load %arg7[%c4_617, %c1_618, %c3_619, %c0_620, %c128_621] : memref<5x2x11x7x256xf32, #tpu.memory_space<vmem>>, vector<1x1x7x7x128xf32>
    %864 = vector.shape_cast %863 : vector<1x1x7x7x128xf32> to vector<7x7x128xf32>
    %865 = vector.extract_strided_slice %501 {offsets = [3, 4, 0], sizes = [1, 1, 128], strides = [1, 1, 1]} : vector<5x5x128xf32> to vector<1x1x128xf32>
    %866 = vector.shape_cast %865 : vector<1x1x128xf32> to vector<128xf32>
    %867 = vector.shape_cast %866 : vector<128xf32> to vector<1x1x128xf32>
    %868 = vector.broadcast %867 : vector<1x1x128xf32> to vector<7x7x128xf32>
    %869 = arith.mulf %864, %868 : vector<7x7x128xf32>
    %870 = arith.addf %862, %869 : vector<7x7x128xf32>
    %c0_622 = arith.constant 0 : index
    %c1_623 = arith.constant 1 : index
    %c4_624 = arith.constant 4 : index
    %c0_625 = arith.constant 0 : index
    %c128_626 = arith.constant 128 : index
    %871 = vector.load %arg7[%c0_622, %c1_623, %c4_624, %c0_625, %c128_626] : memref<5x2x11x7x256xf32, #tpu.memory_space<vmem>>, vector<1x1x7x7x128xf32>
    %872 = vector.shape_cast %871 : vector<1x1x7x7x128xf32> to vector<7x7x128xf32>
    %873 = vector.extract_strided_slice %501 {offsets = [4, 0, 0], sizes = [1, 1, 128], strides = [1, 1, 1]} : vector<5x5x128xf32> to vector<1x1x128xf32>
    %874 = vector.shape_cast %873 : vector<1x1x128xf32> to vector<128xf32>
    %875 = vector.shape_cast %874 : vector<128xf32> to vector<1x1x128xf32>
    %876 = vector.broadcast %875 : vector<1x1x128xf32> to vector<7x7x128xf32>
    %877 = arith.mulf %872, %876 : vector<7x7x128xf32>
    %878 = arith.addf %870, %877 : vector<7x7x128xf32>
    %c1_627 = arith.constant 1 : index
    %c1_628 = arith.constant 1 : index
    %c4_629 = arith.constant 4 : index
    %c0_630 = arith.constant 0 : index
    %c128_631 = arith.constant 128 : index
    %879 = vector.load %arg7[%c1_627, %c1_628, %c4_629, %c0_630, %c128_631] : memref<5x2x11x7x256xf32, #tpu.memory_space<vmem>>, vector<1x1x7x7x128xf32>
    %880 = vector.shape_cast %879 : vector<1x1x7x7x128xf32> to vector<7x7x128xf32>
    %881 = vector.extract_strided_slice %501 {offsets = [4, 1, 0], sizes = [1, 1, 128], strides = [1, 1, 1]} : vector<5x5x128xf32> to vector<1x1x128xf32>
    %882 = vector.shape_cast %881 : vector<1x1x128xf32> to vector<128xf32>
    %883 = vector.shape_cast %882 : vector<128xf32> to vector<1x1x128xf32>
    %884 = vector.broadcast %883 : vector<1x1x128xf32> to vector<7x7x128xf32>
    %885 = arith.mulf %880, %884 : vector<7x7x128xf32>
    %886 = arith.addf %878, %885 : vector<7x7x128xf32>
    %c2_632 = arith.constant 2 : index
    %c1_633 = arith.constant 1 : index
    %c4_634 = arith.constant 4 : index
    %c0_635 = arith.constant 0 : index
    %c128_636 = arith.constant 128 : index
    %887 = vector.load %arg7[%c2_632, %c1_633, %c4_634, %c0_635, %c128_636] : memref<5x2x11x7x256xf32, #tpu.memory_space<vmem>>, vector<1x1x7x7x128xf32>
    %888 = vector.shape_cast %887 : vector<1x1x7x7x128xf32> to vector<7x7x128xf32>
    %889 = vector.extract_strided_slice %501 {offsets = [4, 2, 0], sizes = [1, 1, 128], strides = [1, 1, 1]} : vector<5x5x128xf32> to vector<1x1x128xf32>
    %890 = vector.shape_cast %889 : vector<1x1x128xf32> to vector<128xf32>
    %891 = vector.shape_cast %890 : vector<128xf32> to vector<1x1x128xf32>
    %892 = vector.broadcast %891 : vector<1x1x128xf32> to vector<7x7x128xf32>
    %893 = arith.mulf %888, %892 : vector<7x7x128xf32>
    %894 = arith.addf %886, %893 : vector<7x7x128xf32>
    %c3_637 = arith.constant 3 : index
    %c1_638 = arith.constant 1 : index
    %c4_639 = arith.constant 4 : index
    %c0_640 = arith.constant 0 : index
    %c128_641 = arith.constant 128 : index
    %895 = vector.load %arg7[%c3_637, %c1_638, %c4_639, %c0_640, %c128_641] : memref<5x2x11x7x256xf32, #tpu.memory_space<vmem>>, vector<1x1x7x7x128xf32>
    %896 = vector.shape_cast %895 : vector<1x1x7x7x128xf32> to vector<7x7x128xf32>
    %897 = vector.extract_strided_slice %501 {offsets = [4, 3, 0], sizes = [1, 1, 128], strides = [1, 1, 1]} : vector<5x5x128xf32> to vector<1x1x128xf32>
    %898 = vector.shape_cast %897 : vector<1x1x128xf32> to vector<128xf32>
    %899 = vector.shape_cast %898 : vector<128xf32> to vector<1x1x128xf32>
    %900 = vector.broadcast %899 : vector<1x1x128xf32> to vector<7x7x128xf32>
    %901 = arith.mulf %896, %900 : vector<7x7x128xf32>
    %902 = arith.addf %894, %901 : vector<7x7x128xf32>
    %c4_642 = arith.constant 4 : index
    %c1_643 = arith.constant 1 : index
    %c4_644 = arith.constant 4 : index
    %c0_645 = arith.constant 0 : index
    %c128_646 = arith.constant 128 : index
    %903 = vector.load %arg7[%c4_642, %c1_643, %c4_644, %c0_645, %c128_646] : memref<5x2x11x7x256xf32, #tpu.memory_space<vmem>>, vector<1x1x7x7x128xf32>
    %904 = vector.shape_cast %903 : vector<1x1x7x7x128xf32> to vector<7x7x128xf32>
    %905 = vector.extract_strided_slice %501 {offsets = [4, 4, 0], sizes = [1, 1, 128], strides = [1, 1, 1]} : vector<5x5x128xf32> to vector<1x1x128xf32>
    %906 = vector.shape_cast %905 : vector<1x1x128xf32> to vector<128xf32>
    %907 = vector.shape_cast %906 : vector<128xf32> to vector<1x1x128xf32>
    %908 = vector.broadcast %907 : vector<1x1x128xf32> to vector<7x7x128xf32>
    %909 = arith.mulf %904, %908 : vector<7x7x128xf32>
    %910 = arith.addf %902, %909 : vector<7x7x128xf32>
    %cst_647 = arith.constant dense<0.000000e+00> : vector<7x128xf32>
    %911 = vector.multi_reduction <add>, %910, %cst_647 [0] : vector<7x7x128xf32> to vector<7x128xf32>
    %912 = arith.addf %706, %911 : vector<7x128xf32>
    %913 = arith.mulf %910, %910 : vector<7x7x128xf32>
    %cst_648 = arith.constant dense<0.000000e+00> : vector<7x128xf32>
    %914 = vector.multi_reduction <add>, %913, %cst_648 [0] : vector<7x7x128xf32> to vector<7x128xf32>
    %915 = arith.addf %709, %914 : vector<7x128xf32>
    %cst_649 = arith.constant dense<0.000000e+00> : vector<128xf32>
    %916 = vector.multi_reduction <add>, %912, %cst_649 [0] : vector<7x128xf32> to vector<128xf32>
    %cst_650 = arith.constant 0.0102040814 : f32
    %917 = vector.broadcast %cst_650 : f32 to vector<128xf32>
    %918 = arith.mulf %916, %917 : vector<128xf32>
    %cst_651 = arith.constant dense<0.000000e+00> : vector<128xf32>
    %919 = vector.multi_reduction <add>, %915, %cst_651 [0] : vector<7x128xf32> to vector<128xf32>
    %cst_652 = arith.constant 0.0102040814 : f32
    %920 = vector.broadcast %cst_652 : f32 to vector<128xf32>
    %921 = arith.mulf %919, %920 : vector<128xf32>
    %922 = arith.mulf %918, %918 : vector<128xf32>
    %923 = arith.subf %921, %922 : vector<128xf32>
    %cst_653 = arith.constant 1.000000e-03 : f32
    %924 = vector.broadcast %cst_653 : f32 to vector<128xf32>
    %925 = arith.addf %923, %924 : vector<128xf32>
    %926 = math.rsqrt %925 : vector<128xf32>
    %c0_654 = arith.constant 0 : index
    %c128_655 = arith.constant 128 : index
    %927 = vector.load %arg3[%c0_654, %c128_655] : memref<1x256xf32, #tpu.memory_space<vmem>>, vector<1x128xf32>
    %928 = vector.shape_cast %927 : vector<1x128xf32> to vector<128xf32>
    %929 = arith.mulf %928, %926 : vector<128xf32>
    %c0_656 = arith.constant 0 : index
    %c128_657 = arith.constant 128 : index
    %930 = vector.load %arg4[%c0_656, %c128_657] : memref<1x256xf32, #tpu.memory_space<vmem>>, vector<1x128xf32>
    %931 = vector.shape_cast %930 : vector<1x128xf32> to vector<128xf32>
    %932 = arith.mulf %918, %929 : vector<128xf32>
    %933 = arith.subf %931, %932 : vector<128xf32>
    %934 = vector.shape_cast %929 : vector<128xf32> to vector<1x1x128xf32>
    %935 = vector.broadcast %934 : vector<1x1x128xf32> to vector<7x7x128xf32>
    %936 = arith.mulf %704, %935 : vector<7x7x128xf32>
    %937 = vector.shape_cast %933 : vector<128xf32> to vector<1x1x128xf32>
    %938 = vector.broadcast %937 : vector<1x1x128xf32> to vector<7x7x128xf32>
    %939 = arith.addf %936, %938 : vector<7x7x128xf32>
    %c0_658 = arith.constant 0 : index
    %c0_659 = arith.constant 0 : index
    %c0_660 = arith.constant 0 : index
    %c128_661 = arith.constant 128 : index
    %940 = vector.load %arg5[%c0_658, %c0_659, %c0_660, %c128_661] : memref<2x7x7x256xf32, #tpu.memory_space<vmem>>, vector<1x7x7x128xf32>
    %941 = vector.shape_cast %940 : vector<1x7x7x128xf32> to vector<7x7x128xf32>
    %942 = vector.shape_cast %939 : vector<7x7x128xf32> to vector<1x7x7x128xf32>
    tpu.vector_store %arg5[%c0_658, %c0_659, %c0_660, %c128_661], %942 {strides = array<i32>} : memref<2x7x7x256xf32, #tpu.memory_space<vmem>>, vector<1x7x7x128xf32>,
    %943 = vector.shape_cast %929 : vector<128xf32> to vector<1x1x128xf32>
    %944 = vector.broadcast %943 : vector<1x1x128xf32> to vector<7x7x128xf32>
    %945 = arith.mulf %910, %944 : vector<7x7x128xf32>
    %946 = vector.shape_cast %933 : vector<128xf32> to vector<1x1x128xf32>
    %947 = vector.broadcast %946 : vector<1x1x128xf32> to vector<7x7x128xf32>
    %948 = arith.addf %945, %947 : vector<7x7x128xf32>
    %c1_662 = arith.constant 1 : index
    %c0_663 = arith.constant 0 : index
    %c0_664 = arith.constant 0 : index
    %c128_665 = arith.constant 128 : index
    %949 = vector.load %arg5[%c1_662, %c0_663, %c0_664, %c128_665] : memref<2x7x7x256xf32, #tpu.memory_space<vmem>>, vector<1x7x7x128xf32>
    %950 = vector.shape_cast %949 : vector<1x7x7x128xf32> to vector<7x7x128xf32>
    %951 = vector.shape_cast %948 : vector<7x7x128xf32> to vector<1x7x7x128xf32>
    tpu.vector_store %arg5[%c1_662, %c0_663, %c0_664, %c128_665], %951 {strides = array<i32>} : memref<2x7x7x256xf32, #tpu.memory_space<vmem>>, vector<1x7x7x128xf32>,
    return
  }
  func.func @transform_0(%arg0: i32) -> (i32, i32, i32, i32) {
    %c0_i32 = arith.constant 0 : i32
    %c0_i32_0 = arith.constant 0 : i32
    %c0_i32_1 = arith.constant 0 : i32
    %c0_i32_2 = arith.constant 0 : i32
    return %c0_i32, %c0_i32_0, %c0_i32_1, %arg0 : i32, i32, i32, i32
  }
  func.func @transform_1(%arg0: i32) -> (i32, i32, i32) {
    %c0_i32 = arith.constant 0 : i32
    %c0_i32_0 = arith.constant 0 : i32
    %c0_i32_1 = arith.constant 0 : i32
    return %c0_i32, %c0_i32_0, %arg0 : i32, i32, i32
  }
  func.func @transform_2(%arg0: i32) -> (i32, i32) {
    %c0_i32 = arith.constant 0 : i32
    %c0_i32_0 = arith.constant 0 : i32
    return %c0_i32, %arg0 : i32, i32
  }
  func.func @transform_3(%arg0: i32) -> (i32, i32) {
    %c0_i32 = arith.constant 0 : i32
    %c0_i32_0 = arith.constant 0 : i32
    return %c0_i32, %arg0 : i32, i32
  }
  func.func @transform_4(%arg0: i32) -> (i32, i32, i32, i32) {
    %c0_i32 = arith.constant 0 : i32
    %c0_i32_0 = arith.constant 0 : i32
    %c0_i32_1 = arith.constant 0 : i32
    %c0_i32_2 = arith.constant 0 : i32
    return %c0_i32, %c0_i32_0, %c0_i32_1, %arg0 : i32, i32, i32, i32
  }
}

</mosaic_0001>

<bundles_post_ra>
// kernel: tpu_custom_call.1
= control target key start
LH: loop header
LB: loop body
LE: loop exit
PB: predicated region body
PF: predicated region fallthrough
CT: control target
= control target key end

     0   :  { %v4457_v0 = vmov 0.0   ;;  %vm518_vm0 = vcmask 1045504   ;;  %vm718_vm1 = vcmask 1044480   ;;  %vm918_vm2 = vcmask 1043456   ;;  %s7562_s0 = inlined_call_operand.vmem [shape: f32[2,7,7,256], index: 0, kind: input, shape index: {}]   ;;  %s7563_s1 = inlined_call_operand.vmem [shape: f32[5,5,256], index: 1, kind: input, shape index: {}]   ;;  %s7564_s2 = inlined_call_operand.vmem [shape: f32[1,256], index: 2, kind: input, shape index: {}]   ;;  %s7565_s3 = inlined_call_operand.vmem [shape: f32[1,256], index: 3, kind: input, shape index: {}]   ;;  %s7566_s4 = inlined_call_operand.vmem [shape: f32[2,7,7,256], index: 4, kind: output, shape index: {}]  }
   0x1   :  { %17 = vst [vmem:[#allocation2] sm:$0xff] %v4457_v0  ;;  %18 = vst [vmem:[#allocation2 + $0x8] sm:$0xff] %v4457_v0  ;;  %v107_v1 = vld [vmem:[%s7562_s0] sm:$0x7f]  ;;  %v108_v2 = vld [vmem:[%s7562_s0 + $0x8] sm:$0x7f] }
   0x2   :  { %19 = vst [vmem:[#allocation2 + $0x10] sm:$0x7] %v4457_v0  ;;  %20 = vst [vmem:[#allocation2 + $0x18] sm:$0x7] %v4457_v0  ;;  %v109_v3 = vld [vmem:[%s7562_s0 + $0x10] sm:$0x7f] }
   0x3   :  { %21 = vst [vmem:[#allocation2 + $0x20] sm:$0xff] %v4457_v0  ;;  %22 = vst [vmem:[#allocation2 + $0x28] sm:$0xff] %v4457_v0  ;;  %v163_v4 = vrot.slane %v107_v1, 6  ;;  %v164_v5 = vrot.slane %v108_v2, 6  ;;  %v165_v6 = vrot.slane %v109_v3, 6  ;;  %v1042_v1 = vlaneseq }
   0x4   :  { %23 = vst [vmem:[#allocation2 + $0x30] sm:$0x7] %v4457_v0  ;;  %24 = vst [vmem:[#allocation2 + $0x38] sm:$0x7] %v4457_v0  ;;  %v110_v7 = vld [vmem:[%s7562_s0 + $0x18] sm:$0x7f] }
   0x5   :  { %25 = vst [vmem:[#allocation2 + $0x160] sm:$0xff] %v4457_v0  ;;  %26 = vst [vmem:[#allocation2 + $0x168] sm:$0xff] %v4457_v0  ;;  %v166_v8 = vrot.slane %v110_v7, 6  ;;  %v111_v9 = vld [vmem:[%s7562_s0 + $0x20] sm:$0x7f]  ;;  %vm1680_vm3 = vcmask 1046528  }
   0x6   :  { %27 = vst [vmem:[#allocation2 + $0x170] sm:$0x7] %v4457_v0  ;;  %28 = vst [vmem:[#allocation2 + $0x178] sm:$0x7] %v4457_v0  ;;  %v112_v10 = vld [vmem:[%s7562_s0 + $0x28] sm:$0x7f] }
   0x7   :  { %29 = vst [vmem:[#allocation2 + $0x180] sm:$0xff] %v4457_v0  ;;  %30 = vst [vmem:[#allocation2 + $0x188] sm:$0xff] %v4457_v0  ;;  %v167_v11 = vrot.slane %v111_v9, 6  ;;  %v168_v12 = vrot.slane %v112_v10, 6  ;;  %v113_v13 = vld [vmem:[%s7562_s0 + $0x30] sm:$0x7f] }
   0x8   :  { %31 = vst [vmem:[#allocation2 + $0x190] sm:$0x7] %v4457_v0  ;;  %32 = vst [vmem:[#allocation2 + $0x198] sm:$0x7] %v4457_v0  ;;  %v114_v14 = vld [vmem:[%s7562_s0 + $0x38] sm:$0x7f] }
   0x9   :  { %34 = vst [vmem:[#allocation2 + $0x120] sm:$0xff] %v4457_v0  ;;  %35 = vst [vmem:[#allocation2 + $0x128] sm:$0xff] %v4457_v0  ;;  %v169_v15 = vrot.slane %v113_v13, 6  ;;  %v170_v16 = vrot.slane %v114_v14, 6  ;;  %v121_v17 = vld [vmem:[%s7562_s0 + $0x70] sm:$0x7f] }
   0xa   :  { %36 = vst [vmem:[#allocation2 + $0x130] sm:$0x7] %v4457_v0  ;;  %37 = vst [vmem:[#allocation2 + $0x138] sm:$0x7] %v4457_v0  ;;  %v122_v18 = vld [vmem:[%s7562_s0 + $0x78] sm:$0x7f] }
   0xb   :  { %38 = vst [vmem:[#allocation2 + $0x140] sm:$0xff] %v4457_v0  ;;  %39 = vst [vmem:[#allocation2 + $0x148] sm:$0xff] %v4457_v0  ;;  %v177_v19 = vrot.slane %v121_v17, 6  ;;  %v178_v20 = vrot.slane %v122_v18, 6  ;;  %v123_v21 = vld [vmem:[%s7562_s0 + $0x80] sm:$0x7f] }
   0xc   :  { %40 = vst [vmem:[#allocation2 + $0x150] sm:$0x7] %v4457_v0  ;;  %41 = vst [vmem:[#allocation2 + $0x158] sm:$0x7] %v4457_v0  ;;  %v124_v22 = vld [vmem:[%s7562_s0 + $0x88] sm:$0x7f] }
   0xd   :  { %42 = vst [vmem:[#allocation2 + $0x280] sm:$0xff] %v4457_v0  ;;  %43 = vst [vmem:[#allocation2 + $0x288] sm:$0xff] %v4457_v0  ;;  %v179_v23 = vrot.slane %v123_v21, 6  ;;  %v180_v24 = vrot.slane %v124_v22, 6  ;;  %v125_v25 = vld [vmem:[%s7562_s0 + $0x90] sm:$0x7f] }
   0xe   :  { %44 = vst [vmem:[#allocation2 + $0x290] sm:$0x7] %v4457_v0  ;;  %45 = vst [vmem:[#allocation2 + $0x298] sm:$0x7] %v4457_v0  ;;  %v126_v26 = vld [vmem:[%s7562_s0 + $0x98] sm:$0x7f] }
   0xf   :  { %46 = vst [vmem:[#allocation2 + $0x2a0] sm:$0xff] %v4457_v0  ;;  %47 = vst [vmem:[#allocation2 + $0x2a8] sm:$0xff] %v4457_v0  ;;  %v181_v27 = vrot.slane %v125_v25, 6  ;;  %v182_v28 = vrot.slane %v126_v26, 6  ;;  %v127_v29 = vld [vmem:[%s7562_s0 + $0xa0] sm:$0x7f] }
  0x10   :  { %48 = vst [vmem:[#allocation2 + $0x2b0] sm:$0x7] %v4457_v0  ;;  %49 = vst [vmem:[#allocation2 + $0x2b8] sm:$0x7] %v4457_v0  ;;  %v128_v30 = vld [vmem:[%s7562_s0 + $0xa8] sm:$0x7f] }
  0x11   :  { %51 = vst [vmem:[#allocation2 + $0x40] sm:$0x3] %v4457_v0  ;;  %52 = vst [vmem:[#allocation2 + $0x48] sm:$0x3] %v4457_v0  ;;  %v183_v31 = vrot.slane %v127_v29, 6  ;;  %v184_v32 = vrot.slane %v128_v30, 6 }
  0x12   :  { %53 = vst [vmem:[#allocation2 + $0x60] sm:$0x3] %v4457_v0  ;;  %54 = vst [vmem:[#allocation2 + $0x68] sm:$0x3] %v4457_v0  ;;  %v115_v33 = vld [vmem:[%s7562_s0 + $0x40] sm:$0x7f] }
  0x13   :  { %55 = vst [vmem:[#allocation2 + $0x80] sm:$0x3] %v4457_v0  ;;  %56 = vst [vmem:[#allocation2 + $0x88] sm:$0x3] %v4457_v0  ;;  %v116_v34 = vld [vmem:[%s7562_s0 + $0x48] sm:$0x7f] }
  0x14   :  { %57 = vst [vmem:[#allocation2 + $0xa0] sm:$0x3] %v4457_v0  ;;  %58 = vst [vmem:[#allocation2 + $0xa8] sm:$0x3] %v4457_v0  ;;  %v171_v35 = vrot.slane %v115_v33, 6  ;;  %v172_v36 = vrot.slane %v116_v34, 6 }
  0x15   :  { %59 = vst [vmem:[#allocation2 + $0xc0] sm:$0x3] %v4457_v0  ;;  %60 = vst [vmem:[#allocation2 + $0xc8] sm:$0x3] %v4457_v0  ;;  %v129_v37 = vld [vmem:[%s7562_s0 + $0xb0] sm:$0x7f] }
  0x16   :  { %61 = vst [vmem:[#allocation2 + $0xe0] sm:$0x3] %v4457_v0  ;;  %62 = vst [vmem:[#allocation2 + $0xe8] sm:$0x3] %v4457_v0  ;;  %v130_v38 = vld [vmem:[%s7562_s0 + $0xb8] sm:$0x7f] }
  0x17   :  { %63 = vst [vmem:[#allocation2 + $0x100] sm:$0x3] %v4457_v0  ;;  %64 = vst [vmem:[#allocation2 + $0x108] sm:$0x3] %v4457_v0  ;;  %v185_v39 = vrot.slane %v129_v37, 6  ;;  %v186_v40 = vrot.slane %v130_v38, 6 }
  0x18   :  { %65 = vst [vmem:[#allocation2 + $0x1a0] sm:$0x3] %v4457_v0  ;;  %66 = vst [vmem:[#allocation2 + $0x1a8] sm:$0x3] %v4457_v0  ;;  %v275_v41 = vld [vmem:[#allocation2] sm:$0x7f] }
  0x19   :  { %67 = vst [vmem:[#allocation2 + $0x1c0] sm:$0x3] %v4457_v0  ;;  %68 = vst [vmem:[#allocation2 + $0x1c8] sm:$0x3] %v4457_v0  ;;  %v276_v42 = vld [vmem:[#allocation2 + $0x20] sm:$0x7f] }
  0x1a   :  { %69 = vst [vmem:[#allocation2 + $0x1e0] sm:$0x3] %v4457_v0  ;;  %70 = vst [vmem:[#allocation2 + $0x1e8] sm:$0x3] %v4457_v0  ;;  %v286_v43 = vld [vmem:[#allocation2 + $0x160] sm:$0x7f] }
  0x1b   :  { %71 = vst [vmem:[#allocation2 + $0x200] sm:$0x3] %v4457_v0  ;;  %72 = vst [vmem:[#allocation2 + $0x208] sm:$0x3] %v4457_v0  ;;  %v287_v44 = vld [vmem:[#allocation2 + $0x180] sm:$0x7f] }
  0x1c   :  { %73 = vst [vmem:[#allocation2 + $0x220] sm:$0x3] %v4457_v0  ;;  %74 = vst [vmem:[#allocation2 + $0x228] sm:$0x3] %v4457_v0  ;;  %v2381_v45 = vld [vmem:[#allocation2 + $0x8] sm:$0x7f] }
  0x1d   :  { %75 = vst [vmem:[#allocation2 + $0x240] sm:$0x3] %v4457_v0  ;;  %76 = vst [vmem:[#allocation2 + $0x248] sm:$0x3] %v4457_v0  ;;  %v2382_v46 = vld [vmem:[#allocation2 + $0x28] sm:$0x7f] }
  0x1e   :  { %77 = vst [vmem:[#allocation2 + $0x260] sm:$0x3] %v4457_v0  ;;  %78 = vst [vmem:[#allocation2 + $0x268] sm:$0x3] %v4457_v0  ;;  %v2392_v47 = vld [vmem:[#allocation2 + $0x168] sm:$0x7f] }
  0x1f   :  { %79 = vst [vmem:[#allocation2 + $0x50] sm:$0x6] %v4457_v0  ;;  %80 = vst [vmem:[#allocation2 + $0x58] sm:$0x6] %v4457_v0  ;;  %v2393_v48 = vld [vmem:[#allocation2 + $0x188] sm:$0x7f] }
  0x20   :  { %81 = vst [vmem:[#allocation2 + $0x70] sm:$0x6] %v4457_v0  ;;  %82 = vst [vmem:[#allocation2 + $0x78] sm:$0x6] %v4457_v0  ;;  %v319_v49 = vld [vmem:[#allocation2] sm:$0xfe] }
  0x21   :  { %83 = vst [vmem:[#allocation2 + $0x90] sm:$0x6] %v4457_v0  ;;  %84 = vst [vmem:[#allocation2 + $0x98] sm:$0x6] %v4457_v0  ;;  %v363_v50 = vrot.slane %v319_v49, 1 }
  0x22   :  { %85 = vst [vmem:[#allocation2 + $0xb0] sm:$0x6] %v4457_v0  ;;  %86 = vst [vmem:[#allocation2 + $0xb8] sm:$0x6] %v4457_v0  ;;  %v320_v51 = vld [vmem:[#allocation2 + $0x20] sm:$0xfe] }
  0x23   :  { %87 = vst [vmem:[#allocation2 + $0xd0] sm:$0x6] %v4457_v0  ;;  %88 = vst [vmem:[#allocation2 + $0xd8] sm:$0x6] %v4457_v0  ;;  %v330_v52 = vld [vmem:[#allocation2 + $0x160] sm:$0xfe] }
  0x24   :  { %89 = vst [vmem:[#allocation2 + $0xf0] sm:$0x6] %v4457_v0  ;;  %90 = vst [vmem:[#allocation2 + $0xf8] sm:$0x6] %v4457_v0  ;;  %v364_v53 = vrot.slane %v320_v51, 1  ;;  %v374_v54 = vrot.slane %v330_v52, 1 }
  0x25   :  { %91 = vst [vmem:[#allocation2 + $0x110] sm:$0x6] %v4457_v0  ;;  %92 = vst [vmem:[#allocation2 + $0x118] sm:$0x6] %v4457_v0  ;;  %v331_v55 = vld [vmem:[#allocation2 + $0x180] sm:$0xfe] }
  0x26   :  { %93 = vst [vmem:[#allocation2 + $0x1b0] sm:$0x6] %v4457_v0  ;;  %94 = vst [vmem:[#allocation2 + $0x1b8] sm:$0x6] %v4457_v0  ;;  %v2425_v56 = vld [vmem:[#allocation2 + $0x8] sm:$0xfe] }
  0x27   :  { %95 = vst [vmem:[#allocation2 + $0x1d0] sm:$0x6] %v4457_v0  ;;  %96 = vst [vmem:[#allocation2 + $0x1d8] sm:$0x6] %v4457_v0  ;;  %v375_v57 = vrot.slane %v331_v55, 1  ;;  %v2469_v58 = vrot.slane %v2425_v56, 1 }
  0x28   :  { %97 = vst [vmem:[#allocation2 + $0x1f0] sm:$0x6] %v4457_v0  ;;  %98 = vst [vmem:[#allocation2 + $0x1f8] sm:$0x6] %v4457_v0  ;;  %v2426_v59 = vld [vmem:[#allocation2 + $0x28] sm:$0xfe] }
  0x29   :  { %99 = vst [vmem:[#allocation2 + $0x210] sm:$0x6] %v4457_v0  ;;  %100 = vst [vmem:[#allocation2 + $0x218] sm:$0x6] %v4457_v0  ;;  %v2436_v60 = vld [vmem:[#allocation2 + $0x168] sm:$0xfe] }
  0x2a   :  { %101 = vst [vmem:[#allocation2 + $0x230] sm:$0x6] %v4457_v0  ;;  %102 = vst [vmem:[#allocation2 + $0x238] sm:$0x6] %v4457_v0  ;;  %v2470_v61 = vrot.slane %v2426_v59, 1  ;;  %v2480_v62 = vrot.slane %v2436_v60, 1 }
  0x2b   :  { %103 = vst [vmem:[#allocation2 + $0x250] sm:$0x6] %v4457_v0  ;;  %104 = vst [vmem:[#allocation2 + $0x258] sm:$0x6] %v4457_v0  ;;  %v2437_v63 = vld [vmem:[#allocation2 + $0x188] sm:$0xfe] }
  0x2c   :  { %105 = vst [vmem:[#allocation2 + $0x270] sm:$0x6] %v4457_v0  ;;  %106 = vst [vmem:[#allocation2 + $0x278] sm:$0x6] %v4457_v0  ;;  %v2481_v0 = vrot.slane %v2437_v63, 1 }
  0x2d   :  { %219 = vst [vmem:[#allocation2 + $0x40] sm:$0xfc] %v163_v4  ;;  %221 = vst [vmem:[#allocation2 + $0x50] sm:$0x1] %v163_v4  ;;  %v430_v9 = vld [vmem:[#allocation2] sm:$0xfc] }
  0x2e   :  { %220 = vst [vmem:[#allocation2 + $0x48] sm:$0xfc] %v164_v5  ;;  %222 = vst [vmem:[#allocation2 + $0x58] sm:$0x1] %v164_v5  ;;  %v4631_v5 = vshrl.u32 %v1042_v1, 7  ;;  %v519_v13 = vrot.slane %v430_v9, 2 }
  0x2f   :  { %223 = vst [vmem:[#allocation2 + $0x60] sm:$0xfc] %v165_v6  ;;  %225 = vst [vmem:[#allocation2 + $0x70] sm:$0x1] %v165_v6  ;;  %v431_v10 = vld [vmem:[#allocation2 + $0x10] sm:$0x1] }
  0x30   :  { %224 = vst [vmem:[#allocation2 + $0x68] sm:$0xfc] %v166_v8  ;;  %226 = vst [vmem:[#allocation2 + $0x78] sm:$0x1] %v166_v8  ;;  %v4634_v7 = vsub.s32 0, %v4631_v5  ;;  %v4637_v8 = vsub.s32 1, %v4631_v5 }
  0x31   :  { %227 = vst [vmem:[#allocation2 + $0x80] sm:$0xfc] %v167_v11  ;;  %229 = vst [vmem:[#allocation2 + $0x90] sm:$0x1] %v167_v11  ;;  %v4642_v11 = vld [vmem:[%s7563_s1] sm:$0x1f] }
  0x32   :  { %228 = vst [vmem:[#allocation2 + $0x88] sm:$0xfc] %v168_v12  ;;  %230 = vst [vmem:[#allocation2 + $0x98] sm:$0x1] %v168_v12  ;;  %v4647_v12 = vld [vmem:[%s7563_s1 + $0x10] sm:$0x1f]  ;;  %v4665_v22 = vrot.slane %v4642_v11, %v4634_v7 }
  0x33   :  { %231 = vst [vmem:[#allocation2 + $0xa0] sm:$0xfc] %v169_v15  ;;  %233 = vst [vmem:[#allocation2 + $0xb0] sm:$0x1] %v169_v15  ;;  %v520_v14 = vrot.slane %v431_v10, 2  ;;  %v4685_v29 = vrot.slane %v4647_v12, %v4637_v8 }
  0x34   :  { %232 = vst [vmem:[#allocation2 + $0xa8] sm:$0xfc] %v170_v16  ;;  %234 = vst [vmem:[#allocation2 + $0xb8] sm:$0x1] %v170_v16  ;;  %v277_v2 = vld [vmem:[#allocation2 + $0x40] sm:$0x7f] }
  0x35   :  { %247 = vst [vmem:[#allocation2 + $0x1a0] sm:$0xfc] %v177_v19  ;;  %249 = vst [vmem:[#allocation2 + $0x1b0] sm:$0x1] %v177_v19  ;;  %v2383_v4 = vld [vmem:[#allocation2 + $0x48] sm:$0x7f]  ;;  %v521_v18 = vsel %vm518_vm0, %v519_v13, %v520_v14 }
  0x36   :  { %248 = vst [vmem:[#allocation2 + $0x1a8] sm:$0xfc] %v178_v20  ;;  %250 = vst [vmem:[#allocation2 + $0x1b8] sm:$0x1] %v178_v20  ;;  %v4652_v15 = vld [vmem:[%s7563_s1 + $0x8] sm:$0x1f] }
  0x37   :  { %251 = vst [vmem:[#allocation2 + $0x1c0] sm:$0xfc] %v179_v23  ;;  %253 = vst [vmem:[#allocation2 + $0x1d0] sm:$0x1] %v179_v23  ;;  %v4657_v16 = vld [vmem:[%s7563_s1 + $0x18] sm:$0x1f]  ;;  %v4669_v23 = vrot.slane %v4647_v12, %v4634_v7  ;;  %v4689_v33 = vrot.slane %v4652_v15, %v4637_v8 }
  0x38   :  { %252 = vst [vmem:[#allocation2 + $0x1c8] sm:$0xfc] %v180_v24  ;;  %254 = vst [vmem:[#allocation2 + $0x1d8] sm:$0x1] %v180_v24  ;;  %v432_v17 = vld [vmem:[#allocation2 + $0x20] sm:$0xfc]  ;;  %v4673_v24 = vrot.slane %v4642_v11, %v4637_v8 }
  0x39   :  { %255 = vst [vmem:[#allocation2 + $0x1e0] sm:$0xfc] %v181_v27  ;;  %257 = vst [vmem:[#allocation2 + $0x1f0] sm:$0x1] %v181_v27  ;;  %v4661_v19 = vsub.s32 2, %v4631_v5  ;;  %v4677_v27 = vrot.slane %v4652_v15, %v4634_v7  ;;  %v522_v30 = vrot.slane %v432_v17, 2 }
  0x3a   :  { %256 = vst [vmem:[#allocation2 + $0x1e8] sm:$0xfc] %v182_v28  ;;  %258 = vst [vmem:[#allocation2 + $0x1f8] sm:$0x1] %v182_v28  ;;  %v433_v20 = vld [vmem:[#allocation2 + $0x30] sm:$0x1]  ;;  %v4681_v28 = vrot.slane %v4657_v16, %v4634_v7 }
  0x3b   :  { %259 = vst [vmem:[#allocation2 + $0x200] sm:$0xfc] %v183_v31  ;;  %261 = vst [vmem:[#allocation2 + $0x210] sm:$0x1] %v183_v31  ;;  %v452_v21 = vld [vmem:[#allocation2 + $0x160] sm:$0xfc]  ;;  %v4713_v51 = vrot.slane %v4657_v16, %v4661_v19 }
  0x3c   :  { %260 = vst [vmem:[#allocation2 + $0x208] sm:$0xfc] %v184_v32  ;;  %262 = vst [vmem:[#allocation2 + $0x218] sm:$0x1] %v184_v32  ;;  %v288_v3 = vld [vmem:[#allocation2 + $0x1a0] sm:$0x7f] }
  0x3d   :  { %235 = vst [vmem:[#allocation2 + $0xc0] sm:$0xfc] %v171_v35  ;;  %237 = vst [vmem:[#allocation2 + $0xd0] sm:$0x1] %v171_v35  ;;  %v2394_v6 = vld [vmem:[#allocation2 + $0x1a8] sm:$0x7f] }
  0x3e   :  { %236 = vst [vmem:[#allocation2 + $0xc8] sm:$0xfc] %v172_v36  ;;  %238 = vst [vmem:[#allocation2 + $0xd8] sm:$0x1] %v172_v36  ;;  %v453_v31 = vld [vmem:[#allocation2 + $0x170] sm:$0x1] }
  0x3f   :  { %297 = vst [vmem:[#allocation3] sm:$0x7f] %v275_v41  ;;  %263 = vst [vmem:[#allocation2 + $0x220] sm:$0xfc] %v185_v39  ;;  %v454_v32 = vld [vmem:[#allocation2 + $0x180] sm:$0xfc]  ;;  %v4697_v41 = vrot.slane %v4642_v11, %v4661_v19 }
  0x40   :  { %265 = vst [vmem:[#allocation2 + $0x230] sm:$0x1] %v185_v39  ;;  %264 = vst [vmem:[#allocation2 + $0x228] sm:$0xfc] %v186_v40  ;;  %v523_v34 = vrot.slane %v433_v20, 2  ;;  %v552_v35 = vrot.slane %v452_v21, 2 }
  0x41   :  { %266 = vst [vmem:[#allocation2 + $0x238] sm:$0x1] %v186_v40  ;;  %298 = vst [vmem:[#allocation3 + $0x10] sm:$0x7f] %v276_v42  ;;  %v553_v36 = vrot.slane %v453_v31, 2  ;;  %v4693_v40 = vrot.slane %v4657_v16, %v4637_v8  ;;  %v555_v42 = vrot.slane %v454_v32, 2 }
  0x42   :  { %308 = vst [vmem:[#allocation3 + $0xb0] sm:$0x7f] %v286_v43  ;;  %309 = vst [vmem:[#allocation3 + $0xc0] sm:$0x7f] %v287_v44  ;;  %v455_v37 = vld [vmem:[#allocation2 + $0x190] sm:$0x1] }
  0x43   :  { %2403 = vst [vmem:[#allocation3 + $0x8] sm:$0x7f] %v2381_v45  ;;  %2404 = vst [vmem:[#allocation3 + $0x18] sm:$0x7f] %v2382_v46  ;;  %v4700_v43 = vsub.s32 3, %v4631_v5  ;;  %v524_v45 = vsel %vm518_vm0, %v522_v30, %v523_v34  ;;  %v4705_v46 = vrot.slane %v4647_v12, %v4661_v19 }
  0x44   :  { %2414 = vst [vmem:[#allocation3 + $0xb8] sm:$0x7f] %v2392_v47  ;;  %2415 = vst [vmem:[#allocation3 + $0xc8] sm:$0x7f] %v2393_v48  ;;  %v630_v47 = vld [vmem:[#allocation2] sm:$0xf8] }
  0x45   :  { %408 = vst [vmem:[#allocation3 + $0x160] sm:$0x7f] %v363_v50  ;;  %409 = vst [vmem:[#allocation3 + $0x170] sm:$0x7f] %v364_v53  ;;  %v631_v48 = vld [vmem:[#allocation2 + $0x10] sm:$0x3]  ;;  %v4709_v50 = vrot.slane %v4652_v15, %v4661_v19  ;;  %v554_v53 = vsel %vm518_vm0, %v552_v35, %v553_v36 }
  0x46   :  { %419 = vst [vmem:[#allocation3 + $0x210] sm:$0x7f] %v374_v54  ;;  %420 = vst [vmem:[#allocation3 + $0x220] sm:$0x7f] %v375_v57  ;;  %v1035_v25 = vld [vmem:[#allocation3] sm:$0x7f] }
  0x47   :  { %2513 = vst [vmem:[#allocation3 + $0x168] sm:$0x7f] %v2469_v58  ;;  %2514 = vst [vmem:[#allocation3 + $0x178] sm:$0x7f] %v2470_v61  ;;  %v632_v49 = vld [vmem:[#allocation2 + $0x20] sm:$0xf8]  ;;  %v4717_v58 = vmul.f32 %v4665_v22, %v1035_v25 }
  0x48   :  { %2524 = vst [vmem:[#allocation3 + $0x218] sm:$0x7f] %v2480_v62  ;;  %2525 = vst [vmem:[#allocation3 + $0x228] sm:$0x7f] %v2481_v0  ;;  %v1036_v26 = vld [vmem:[#allocation3 + $0x10] sm:$0x7f] }
  0x49   :  { %299 = vst [vmem:[#allocation3 + $0x20] sm:$0x7f] %v277_v2  ;;  %310 = vst [vmem:[#allocation3 + $0xd0] sm:$0x7f] %v288_v3  ;;  %v1161_v38 = vld [vmem:[#allocation3 + $0x10] sm:$0x7f]  ;;  %v4720_v59 = vmul.f32 %v4665_v22, %v1036_v26 }
  0x4a   :  { %2405 = vst [vmem:[#allocation3 + $0x28] sm:$0x7f] %v2383_v4  ;;  %7743 = vst [vmem:[#allocation4_spill] sm:$0xff] %v4634_v7  ;;  %v1717_v39 = vld [vmem:[#allocation3 + $0xb0] sm:$0x7f]  ;;  %v556_v54 = vrot.slane %v455_v37, 2  ;;  %v4725_v13 = vmul.f32 %v4669_v23, %v1161_v38 }
  0x4b   :  { %7744 = vst [vmem:[#allocation5_spill] sm:$0xff] %v4637_v8  ;;  %2416 = vst [vmem:[#allocation3 + $0xd8] sm:$0x7f] %v2394_v6  ;;  %v1718_v44 = vld [vmem:[#allocation3 + $0xc0] sm:$0x7f]  ;;  %v719_v55 = vrot.slane %v630_v47, 3  ;;  %v4728_v14 = vmul.f32 %v1717_v39, %v4665_v22 }
  0x4c   :  { %7745 = vst [vmem:[#allocation6_spill] sm:$0xff] %v4661_v19  ;;  %7746 = vst [vmem:[#allocation7_spill] sm:$0xff] %v4665_v22  ;;  %v1827_v52 = vld [vmem:[#allocation3 + $0xc0] sm:$0x7f]  ;;  %v720_v56 = vrot.slane %v631_v48, 3  ;;  %v722_v61 = vrot.slane %v632_v49, 3  ;;  %v557_v3 = vsel %vm518_vm0, %v555_v42, %v556_v54  ;;  %v4732_v26 = vmul.f32 %v1718_v44, %v4665_v22 }
  0x4d   :  { %7747 = vst [vmem:[#allocation8_spill] sm:$0xff] %v4669_v23  ;;  %7748 = vst [vmem:[#allocation9_spill] sm:$0xff] %v4673_v24  ;;  %v633_v57 = vld [vmem:[#allocation2 + $0x30] sm:$0x3]  ;;  %v3134_v60 = vld [vmem:[#allocation3 + $0x8] sm:$0x7f]  ;;  %v4736_v38 = vmul.f32 %v1827_v52, %v4669_v23 }
  0x4e   :  { %608 = vst [vmem:[#allocation3 + $0x2c0] sm:$0x7f] %v521_v18  ;;  %7749 = vst [vmem:[#allocation10_spill] sm:$0xff] %v4677_v27  ;;  %v723_v62 = vrot.slane %v633_v57, 3  ;;  %v652_v63 = vld [vmem:[#allocation2 + $0x160] sm:$0xf8]  ;;  %v721_v4 = vsel %vm718_vm1, %v719_v55, %v720_v56 }
  0x4f   :  { %7750 = vst [vmem:[#allocation11_spill] sm:$0xff] %v4681_v28  ;;  %7751 = vst [vmem:[#allocation12_spill] sm:$0xff] %v4685_v29  ;;  %v653_v0 = vld [vmem:[#allocation2 + $0x170] sm:$0x3]  ;;  %v3135_v1 = vld [vmem:[#allocation3 + $0x18] sm:$0x7f] }
  0x50   :  { %7752 = vst [vmem:[#allocation13_spill] sm:$0xff] %v4689_v33  ;;  %7753 = vst [vmem:[#allocation14_spill] sm:$0xff] %v4693_v40  ;;  %v3259_v2 = vld [vmem:[#allocation3 + $0x18] sm:$0x7f]  ;;  %v752_v6 = vrot.slane %v652_v63, 3  ;;  %v753_v9 = vrot.slane %v653_v0, 3  ;;  %v724_v18 = vsel %vm718_vm1, %v722_v61, %v723_v62  ;;  %v4747_v61 = vmul.f32 %v4677_v27, %v3135_v1 }
  0x51   :  { %7754 = vst [vmem:[#allocation15_spill] sm:$0xff] %v4697_v41  ;;  %7755 = vst [vmem:[#allocation16_spill] sm:$0xff] %v4705_v46  ;;  %v654_v10 = vld [vmem:[#allocation2 + $0x180] sm:$0xf8]  ;;  %v655_v20 = vld [vmem:[#allocation2 + $0x190] sm:$0x3]  ;;  %v4750_v62 = vmul.f32 %v4681_v28, %v3259_v2  ;;  %v4766_v2 = vrot.slane %v4647_v12, %v4700_v43 }
  0x52   :  { %7756 = vst [vmem:[#allocation17_spill] sm:$0xff] %v4709_v50  ;;  %7757 = vst [vmem:[#allocation18_spill] sm:$0xff] %v4713_v51  ;;  %v1060_v17 = vld [vmem:[#allocation3 + $0x160] sm:$0x7f]  ;;  %v755_v21 = vrot.slane %v654_v10, 3  ;;  %v754_v32 = vsel %vm718_vm1, %v752_v6, %v753_v9  ;;  %v756_v34 = vrot.slane %v655_v20, 3 }
  0x53   :  { %609 = vst [vmem:[#allocation3 + $0x2d0] sm:$0x7f] %v524_v45  ;;  %619 = vst [vmem:[#allocation3 + $0x370] sm:$0x7f] %v554_v53  ;;  %v830_v25 = vld [vmem:[#allocation2] sm:$0xf0]  ;;  %v4740_v45 = vrot.slane %v4642_v11, %v4700_v43  ;;  %v4743_v53 = vmul.f32 %v4677_v27, %v3134_v60  ;;  %v1071_v1 = vmul.f32 %v4673_v24, %v1060_v17 }
  0x54   :  { %620 = vst [vmem:[#allocation3 + $0x380] sm:$0x7f] %v557_v3  ;;  %808 = vst [vmem:[#allocation3 + $0x420] sm:$0x7f] %v721_v4  ;;  %v3794_v30 = vld [vmem:[#allocation3 + $0xb8] sm:$0x7f]  ;;  %v757_v54 = vsel %vm718_vm1, %v755_v21, %v756_v34 }
  0x55   :  { %v1739_v31 = vld [vmem:[#allocation3 + $0x210] sm:$0x7f]  ;;  %809 = vst [vmem:[#allocation3 + $0x430] sm:$0x7f] %v724_v18  ;;  %v919_v36 = vrot.slane %v830_v25, 4  ;;  %7758 = vst [vmem:[#allocation19_spill] sm:$0xff] %v4740_v45  ;;  %v4770_v18 = vmul.f32 %v3794_v30, %v4677_v27  ;;  %v4782_v30 = vrot.slane %v4652_v15, %v4700_v43 }
  0x56   :  { %v831_v35 = vld [vmem:[#allocation2 + $0x10] sm:$0x7]  ;;  %v832_v37 = vld [vmem:[#allocation2 + $0x20] sm:$0xf0]  ;;  %v3795_v39 = vld [vmem:[#allocation3 + $0xc8] sm:$0x7f]  ;;  %v1746_v20 = vmul.f32 %v1739_v31, %v4673_v24 }
  0x57   :  { %v3899_v42 = vld [vmem:[#allocation3 + $0xc8] sm:$0x7f]  ;;  %819 = vst [vmem:[#allocation3 + $0x4d0] sm:$0x7f] %v754_v32  ;;  %v920_v44 = vrot.slane %v831_v35, 4  ;;  %v922_v48 = vrot.slane %v832_v37, 4  ;;  %v4775_v34 = vmul.f32 %v3795_v39, %v4677_v27  ;;  %v4790_v39 = vrot.slane %v4657_v16, %v4700_v43 }
  0x58   :  { %v833_v47 = vld [vmem:[#allocation2 + $0x30] sm:$0x7]  ;;  %v852_v49 = vld [vmem:[#allocation2 + $0x160] sm:$0xf0]  ;;  %7759 = vst [vmem:[#allocation20_spill] sm:$0xff] %v4750_v62  ;;  %7761 = vst [vmem:[#allocation22_spill] sm:$0xff] %v4766_v2  ;;  %v4778_v35 = vmul.f32 %v3899_v42, %v4681_v28 }
  0x59   :  { %v923_v55 = vrot.slane %v833_v47, 4  ;;  %v853_v56 = vld [vmem:[#allocation2 + $0x170] sm:$0x7]  ;;  %v952_v52 = vrot.slane %v852_v49, 4  ;;  %v854_v57 = vld [vmem:[#allocation2 + $0x180] sm:$0xf0]  ;;  %v921_v0 = vsel %vm918_vm2, %v919_v36, %v920_v44 }
  0x5a   :  { %v4755_v63 = vld [vmem:[%s7563_s1 + $0x20] sm:$0x1f]  ;;  %v4760_v60 = vld [vmem:[%s7563_s1 + $0x28] sm:$0x1f]  ;;  %820 = vst [vmem:[#allocation3 + $0x4e0] sm:$0x7f] %v757_v54  ;;  %v1078_v54 = vadd.f32 %v1071_v1, %v4717_v58 }
  0x5b   :  { %7760 = vst [vmem:[#allocation21_spill] sm:$0xff] %v4755_v63  ;;  %v953_v3 = vrot.slane %v853_v56, 4  ;;  %1008 = vst [vmem:[#allocation3 + $0x580] sm:$0x7f] %v921_v0  ;;  %v924_v4 = vsel %vm918_vm2, %v922_v48, %v923_v55  ;;  %v855_v6 = vld [vmem:[#allocation2 + $0x190] sm:$0x7]  ;;  %v4786_v47 = vrot.slane %v4755_v63, %v4634_v7  ;;  %v4794_v42 = vrot.slane %v4755_v63, %v4637_v8 }
  0x5c   :  { %v955_v9 = vrot.slane %v854_v57, 4  ;;  %v2535_v10 = vld [vmem:[#allocation2 + $0x8] sm:$0xfc]  ;;  %v1085_v21 = vld [vmem:[#allocation3 + $0x2c0] sm:$0x7f]  ;;  %v956_v17 = vrot.slane %v855_v6, 4  ;;  %v4798_v49 = vrot.slane %v4755_v63, %v4661_v19  ;;  %v4803_v56 = vrot.slane %v4760_v60, %v4634_v7 }
  0x5d   :  { %1009 = vst [vmem:[#allocation3 + $0x590] sm:$0x7f] %v924_v4  ;;  %v954_v25 = vsel %vm918_vm2, %v952_v52, %v953_v3  ;;  %v2536_v32 = vld [vmem:[#allocation2 + $0x18] sm:$0x1]  ;;  %7762 = vst [vmem:[#allocation23_spill] sm:$0xff] %v4778_v35  ;;  %v2623_v37 = vrot.slane %v2535_v10, 2  ;;  %v1753_v3 = vadd.f32 %v1746_v20, %v4728_v14  ;;  %v1096_v4 = vmul.f32 %v4697_v41, %v1085_v21 }
  0x5e   :  { %v1761_v36 = vld [vmem:[#allocation3 + $0x370] sm:$0x7f]  ;;  %1019 = vst [vmem:[#allocation3 + $0x630] sm:$0x7f] %v954_v25  ;;  %v2537_v44 = vld [vmem:[#allocation2 + $0x28] sm:$0xfc]  ;;  %v957_v52 = vsel %vm918_vm2, %v955_v9, %v956_v17 }
  0x5f   :  { %7763 = vst [vmem:[#allocation24_spill] sm:$0xff] %v4782_v30  ;;  %v1061_v31 = vld [vmem:[#allocation3 + $0x170] sm:$0x7f]  ;;  %7764 = vst [vmem:[#allocation25_spill] sm:$0xff] %v4786_v47  ;;  %v2538_v48 = vld [vmem:[#allocation2 + $0x38] sm:$0x1]  ;;  %v1768_v6 = vmul.f32 %v1761_v36, %v4697_v41  ;;  %v4816_v36 = vrot.slane %v4760_v60, %v4637_v8 }
  0x60   :  { %7765 = vst [vmem:[#allocation26_spill] sm:$0xff] %v4790_v39  ;;  %7766 = vst [vmem:[#allocation27_spill] sm:$0xff] %v4794_v42  ;;  %v1187_v55 = vld [vmem:[#allocation3 + $0x170] sm:$0x7f]  ;;  %v2624_v57 = vrot.slane %v2536_v32, 2  ;;  %v2626_v10 = vrot.slane %v2537_v44, 2  ;;  %v1072_v17 = vmul.f32 %v4673_v24, %v1061_v31  ;;  %v4820_v44 = vrot.slane %v4755_v63, %v4700_v43 }
  0x61   :  { %7767 = vst [vmem:[#allocation28_spill] sm:$0xff] %v4798_v49  ;;  %7768 = vst [vmem:[#allocation29_spill] sm:$0xff] %v4803_v56  ;;  %v2557_v0 = vld [vmem:[#allocation2 + $0x168] sm:$0xfc]  ;;  %v2558_v25 = vld [vmem:[#allocation2 + $0x178] sm:$0x1]  ;;  %v1103_v39 = vadd.f32 %v1096_v4, %v1078_v54 }
  0x62   :  { %1020 = vst [vmem:[#allocation3 + $0x640] sm:$0x7f] %v957_v52  ;;  %v2559_v49 = vld [vmem:[#allocation2 + $0x188] sm:$0xfc]  ;;  %v1740_v58 = vld [vmem:[#allocation3 + $0x220] sm:$0x7f]  ;;  %v2625_v42 = vsel %vm518_vm0, %v2623_v37, %v2624_v57  ;;  %v4839_v54 = vadd.f32 %v1072_v17, %v4720_v59 }
  0x63   :  { %v4810_v1 = vsub.s32 4, %v4631_v5  ;;  %v2627_v35 = vrot.slane %v2538_v48, 2  ;;  %v2656_v9 = vrot.slane %v2557_v0, 2  ;;  %v1849_v32 = vld [vmem:[#allocation3 + $0x220] sm:$0x7f]  ;;  %v2657_v20 = vrot.slane %v2558_v25, 2 }
  0x64   :  { %v3159_v14 = vld [vmem:[#allocation3 + $0x168] sm:$0x7f]  ;;  %2711 = vst [vmem:[#allocation3 + $0x2c8] sm:$0x7f] %v2625_v42  ;;  %v2560_v21 = vld [vmem:[#allocation2 + $0x198] sm:$0x1]  ;;  %v4823_v5 = vmul.f32 %v4685_v29, %v1187_v55  ;;  %v1747_v42 = vmul.f32 %v1740_v58, %v4673_v24  ;;  %v1775_v25 = vadd.f32 %v1768_v6, %v1753_v3  ;;  %v4830_v55 = vrot.slane %v4760_v60, %v4661_v19 }
  0x65   :  { %7769 = vst [vmem:[#allocation30_spill] sm:$0xff] %v4816_v36  ;;  %7770 = vst [vmem:[#allocation31_spill] sm:$0xff] %v4820_v44  ;;  %v3160_v37 = vld [vmem:[#allocation3 + $0x178] sm:$0x7f]  ;;  %v1783_v48 = vld [vmem:[#allocation3 + $0x4d0] sm:$0x7f]  ;;  %v2628_v31 = vsel %vm518_vm0, %v2626_v10, %v2627_v35  ;;  %v2658_v36 = vsel %vm518_vm0, %v2656_v9, %v2657_v20  ;;  %v4834_v35 = vrot.slane %v4642_v11, %v4810_v1 }
  0x66   :  { %v2659_v52 = vrot.slane %v2559_v49, 2  ;;  %v2660_v57 = vrot.slane %v2560_v21, 2  ;;  %v3815_v0 = vld [vmem:[#allocation3 + $0x218] sm:$0x7f]  ;;  %v1110_v62 = vld [vmem:[#allocation3 + $0x420] sm:$0x7f]  ;;  %v1790_v9 = vmul.f32 %v1783_v48, %v4740_v45  ;;  %v4842_v11 = vmul.f32 %v1849_v32, %v4685_v29 }
  0x67   :  { %2712 = vst [vmem:[#allocation3 + $0x2d8] sm:$0x7f] %v2628_v31  ;;  %v2733_v8 = vld [vmem:[#allocation2 + $0x8] sm:$0xf8]  ;;  %v2734_v7 = vld [vmem:[#allocation2 + $0x18] sm:$0x3]  ;;  %v3170_v4 = vmul.f32 %v4689_v33, %v3159_v14  ;;  %v3171_v48 = vmul.f32 %v4689_v33, %v3160_v37  ;;  %v3822_v32 = vmul.f32 %v3815_v0, %v4689_v33 }
  0x68   :  { %7771 = vst [vmem:[#allocation32_spill] sm:$0xff] %v4830_v55  ;;  %v3816_v44 = vld [vmem:[#allocation3 + $0x228] sm:$0x7f]  ;;  %7772 = vst [vmem:[#allocation33_spill] sm:$0xff] %v4834_v35  ;;  %v2661_v49 = vsel %vm518_vm0, %v2659_v52, %v2660_v57  ;;  %v2821_v3 = vrot.slane %v2733_v8, 3  ;;  %v2822_v20 = vrot.slane %v2734_v7, 3  ;;  %v1121_v8 = vmul.f32 %v4740_v45, %v1110_v62 }
  0x69   :  { %2722 = vst [vmem:[#allocation3 + $0x378] sm:$0x7f] %v2658_v36  ;;  %v2735_v6 = vld [vmem:[#allocation2 + $0x28] sm:$0xf8]  ;;  %v2736_v10 = vld [vmem:[#allocation2 + $0x38] sm:$0x3]  ;;  %v3823_v51 = vmul.f32 %v3816_v44, %v4689_v33  ;;  %v4861_v44 = vadd.f32 %v3170_v4, %v4743_v53  ;;  %v4871_v53 = vadd.f32 %v3822_v32, %v4770_v18 }
  0x6a   :  { %v3284_v58 = vld [vmem:[#allocation3 + $0x178] sm:$0x7f]  ;;  %2723 = vst [vmem:[#allocation3 + $0x388] sm:$0x7f] %v2661_v49  ;;  %v2824_v21 = vrot.slane %v2735_v6, 3  ;;  %v2825_v31 = vrot.slane %v2736_v10, 3  ;;  %v1797_v49 = vadd.f32 %v1790_v9, %v1775_v25  ;;  %v2823_v7 = vsel %vm718_vm1, %v2821_v3, %v2822_v20 }
  0x6b   :  { %v2755_v55 = vld [vmem:[#allocation2 + $0x168] sm:$0xf8]  ;;  %v1135_v36 = vld [vmem:[#allocation3 + $0x580] sm:$0x7f]  ;;  %v1805_v52 = vld [vmem:[#allocation3 + $0x630] sm:$0x7f]  ;;  %v1128_v14 = vadd.f32 %v1121_v8, %v1103_v39  ;;  %v4874_v4 = vadd.f32 %v3823_v51, %v4775_v34 }
  0x6c   :  { %v2756_v57 = vld [vmem:[#allocation2 + $0x178] sm:$0x3]  ;;  %v2826_v6 = vsel %vm718_vm1, %v2824_v21, %v2825_v31  ;;  %v2757_v10 = vld [vmem:[#allocation2 + $0x188] sm:$0xf8]  ;;  %v1037_v24 = vld [vmem:[#allocation3 + $0x20] sm:$0x7f]  ;;  %v1812_v3 = vmul.f32 %v1805_v52, %v4834_v35  ;;  %v4853_v31 = vmul.f32 %v4693_v40, %v3284_v58  ;;  %v1146_v39 = vmul.f32 %v4834_v35, %v1135_v36 }
  0x6d   :  { %v2758_v59 = vld [vmem:[#allocation2 + $0x198] sm:$0x3]  ;;  %v2931_v17 = vld [vmem:[#allocation2 + $0x8] sm:$0xf0]  ;;  %2909 = vst [vmem:[#allocation3 + $0x428] sm:$0x7f] %v2823_v7 }
  0x6e   :  { %v3920_v29 = vld [vmem:[#allocation3 + $0x228] sm:$0x7f]  ;;  %2910 = vst [vmem:[#allocation3 + $0x438] sm:$0x7f] %v2826_v6  ;;  %v2854_v62 = vrot.slane %v2755_v55, 3  ;;  %v2855_v19 = vrot.slane %v2756_v57, 3  ;;  %v4858_v57 = vadd.f32 %v1747_v42, %v4732_v26 }
  0x6f   :  { %v1162_v37 = vld [vmem:[#allocation3 + $0x20] sm:$0x7f]  ;;  %v2857_v9 = vrot.slane %v2757_v10, 3  ;;  %v2858_v20 = vrot.slane %v2758_v59, 3  ;;  %v2932_v21 = vld [vmem:[#allocation2 + $0x18] sm:$0x7]  ;;  %v1819_v10 = vadd.f32 %v1812_v3, %v1797_v49  ;;  %v4865_v59 = vadd.f32 %v3171_v48, %v4747_v61 }
  0x70   :  { %v1291_v25 = vld [vmem:[#allocation3 + $0x20] sm:$0x7f]  ;;  %v1719_v0 = vld [vmem:[#allocation3 + $0xd0] sm:$0x7f]  ;;  %v2856_v8 = vsel %vm718_vm1, %v2854_v62, %v2855_v19  ;;  %v3019_v55 = vrot.slane %v2931_v17, 4  ;;  %v4868_v36 = vmul.f32 %v3920_v29, %v4693_v40  ;;  %v1153_v17 = vadd.f32 %v1146_v39, %v1128_v14 }
  0x71   :  { %v1828_v63 = vld [vmem:[#allocation3 + $0xd0] sm:$0x7f]  ;;  %v3136_v7 = vld [vmem:[#allocation3 + $0x28] sm:$0x7f]  ;;  %2920 = vst [vmem:[#allocation3 + $0x4d8] sm:$0x7f] %v2856_v8  ;;  %v2859_v58 = vsel %vm718_vm1, %v2857_v9, %v2858_v20  ;;  %v4877_v49 = vmul.f32 %v4665_v22, %v1037_v24  ;;  %v4881_v14 = vrot.slane %v4760_v60, %v4700_v43  ;;  %v4884_v20 = vmul.f32 %v4669_v23, %v1162_v37 }
  0x72   :  { %v1937_v52 = vld [vmem:[#allocation3 + $0xd0] sm:$0x7f]  ;;  %v3260_v6 = vld [vmem:[#allocation3 + $0x28] sm:$0x7f]  ;;  %2921 = vst [vmem:[#allocation3 + $0x4e8] sm:$0x7f] %v2859_v58  ;;  %v4887_v18 = vmul.f32 %v4786_v47, %v1291_v25  ;;  %v4890_v51 = vmul.f32 %v1719_v0, %v4665_v22  ;;  %v4894_v39 = vmul.f32 %v1828_v63, %v4669_v23  ;;  %v1841_v37 = vadd.f32 %v4736_v38, %v1819_v10 }
  0x73   :  { %v1086_v19 = vld [vmem:[#allocation3 + $0x2d0] sm:$0x7f]  ;;  %v3020_v26 = vrot.slane %v2932_v21, 4  ;;  %v2933_v42 = vld [vmem:[#allocation2 + $0x28] sm:$0xf0]  ;;  %7773 = vst [vmem:[#allocation34_spill] sm:$0xff] %v4881_v14  ;;  %v4897_v8 = vmul.f32 %v1937_v52, %v4786_v47  ;;  %v4901_v0 = vmul.f32 %v4677_v27, %v3136_v7  ;;  %v1179_v52 = vadd.f32 %v4725_v13, %v1153_v17 }
  0x74   :  { %v3384_v62 = vld [vmem:[#allocation3 + $0x28] sm:$0x7f]  ;;  %v1762_v61 = vld [vmem:[#allocation3 + $0x380] sm:$0x7f]  ;;  %v2934_v3 = vld [vmem:[#allocation2 + $0x38] sm:$0x7]  ;;  %v1097_v63 = vmul.f32 %v4697_v41, %v1086_v19 }
  0x75   :  { %v3184_v48 = vld [vmem:[#allocation3 + $0x2c8] sm:$0x7f]  ;;  %v2954_v9 = vld [vmem:[#allocation2 + $0x178] sm:$0x7]  ;;  %7774 = vst [vmem:[#allocation35_spill] sm:$0xff] %v4887_v18  ;;  %7775 = vst [vmem:[#allocation36_spill] sm:$0xff] %v4890_v51  ;;  %v3021_v24 = vsel %vm918_vm2, %v3019_v55, %v3020_v26  ;;  %v4904_v55 = vmul.f32 %v4681_v28, %v3260_v6  ;;  %v4909_v7 = vmul.f32 %v4803_v56, %v3384_v62 }
  0x76   :  { %v2953_v29 = vld [vmem:[#allocation2 + $0x168] sm:$0xf0]  ;;  %v278_v32 = vld [vmem:[#allocation2 + $0x60] sm:$0x7f]  ;;  %v3796_v58 = vld [vmem:[#allocation3 + $0xd8] sm:$0x7f]  ;;  %v1769_v6 = vmul.f32 %v1762_v61, %v4697_v41  ;;  %v3195_v13 = vmul.f32 %v4709_v50, %v3184_v48  ;;  %v1205_v61 = vadd.f32 %v4823_v5, %v1179_v52 }
  0x77   :  { %v2955_v34 = vld [vmem:[#allocation2 + $0x188] sm:$0xf0]  ;;  %v279_v21 = vld [vmem:[#allocation2 + $0x80] sm:$0x7f]  ;;  %v3836_v14 = vld [vmem:[#allocation3 + $0x378] sm:$0x7f]  ;;  %v4918_v62 = vmul.f32 %v3796_v58, %v4677_v27 }
  0x78   :  { %3107 = vst [vmem:[#allocation3 + $0x588] sm:$0x7f] %v3021_v24  ;;  %v3022_v25 = vrot.slane %v2933_v42, 4  ;;  %v2956_v18 = vld [vmem:[#allocation2 + $0x198] sm:$0x7]  ;;  %7776 = vst [vmem:[#allocation37_spill] sm:$0xff] %v4901_v0 }
  0x79   :  { %300 = vst [vmem:[#allocation3 + $0x30] sm:$0x7f] %v278_v32  ;;  %301 = vst [vmem:[#allocation3 + $0x40] sm:$0x7f] %v279_v21  ;;  %v280_v26 = vld [vmem:[#allocation2 + $0xa0] sm:$0x7f] }
  0x7a   :  { %7777 = vst [vmem:[#allocation38_spill] sm:$0xff] %v4904_v55  ;;  %v289_v40 = vld [vmem:[#allocation2 + $0x1c0] sm:$0x7f]  ;;  %v3900_v38 = vld [vmem:[#allocation3 + $0xd8] sm:$0x7f]  ;;  %v3023_v24 = vrot.slane %v2934_v3, 4  ;;  %v1863_v3 = vadd.f32 %v4842_v11, %v1841_v37 }
  0x7b   :  { %v290_v33 = vld [vmem:[#allocation2 + $0x1e0] sm:$0x7f]  ;;  %v4004_v10 = vld [vmem:[#allocation3 + $0xd8] sm:$0x7f]  ;;  %v3052_v42 = vrot.slane %v2953_v29, 4  ;;  %v3053_v51 = vrot.slane %v2954_v9, 4  ;;  %v3843_v29 = vmul.f32 %v3836_v14, %v4709_v50  ;;  %v1104_v14 = vadd.f32 %v1097_v63, %v4839_v54 }
  0x7c   :  { %v3055_v32 = vrot.slane %v2955_v34, 4  ;;  %302 = vst [vmem:[#allocation3 + $0x50] sm:$0x7f] %v280_v26  ;;  %311 = vst [vmem:[#allocation3 + $0xe0] sm:$0x7f] %v289_v40  ;;  %v3056_v17 = vrot.slane %v2956_v18, 4  ;;  %v3024_v9 = vsel %vm918_vm2, %v3022_v25, %v3023_v24  ;;  %v4925_v58 = vmul.f32 %v3900_v38, %v4681_v28 }
  0x7d   :  { %312 = vst [vmem:[#allocation3 + $0xf0] sm:$0x7f] %v290_v33  ;;  %7778 = vst [vmem:[#allocation39_spill] sm:$0xff] %v4909_v7  ;;  %v1871_v19 = vld [vmem:[#allocation3 + $0x380] sm:$0x7f]  ;;  %v3054_v33 = vsel %vm918_vm2, %v3052_v42, %v3053_v51  ;;  %v4928_v5 = vmul.f32 %v4004_v10, %v4803_v56  ;;  %v1776_v54 = vadd.f32 %v1769_v6, %v4858_v57 }
  0x7e   :  { %v291_v21 = vld [vmem:[#allocation2 + $0x200] sm:$0x7f]  ;;  %v1213_v0 = vld [vmem:[#allocation3 + $0x2d0] sm:$0x7f]  ;;  %7779 = vst [vmem:[#allocation40_spill] sm:$0xff] %v4918_v62  ;;  %v3057_v48 = vsel %vm918_vm2, %v3055_v32, %v3056_v17  ;;  %v1878_v37 = vmul.f32 %v1871_v19, %v4705_v46  ;;  %v3202_v32 = vadd.f32 %v3195_v13, %v4861_v44  ;;  %v3850_v38 = vadd.f32 %v3843_v29, %v4871_v53 }
  0x7f   :  { %v1111_v55 = vld [vmem:[#allocation3 + $0x430] sm:$0x7f]  ;;  %313 = vst [vmem:[#allocation3 + $0x100] sm:$0x7f] %v291_v21  ;;  %v321_v40 = vld [vmem:[#allocation2 + $0x40] sm:$0xfe]  ;;  %v1224_v52 = vmul.f32 %v4705_v46, %v1213_v0  ;;  %v4937_v0 = vrot.slane %v4647_v12, %v4810_v1  ;;  %v4942_v57 = vrot.slane %v4652_v15, %v4810_v1  ;;  %v4951_v15 = vrot.slane %v4657_v16, %v4810_v1 }
  0x80   :  { %3108 = vst [vmem:[#allocation3 + $0x598] sm:$0x7f] %v3024_v9  ;;  %3118 = vst [vmem:[#allocation3 + $0x638] sm:$0x7f] %v3054_v33  ;;  %v365_v18 = vrot.slane %v321_v40, 1  ;;  %v1122_v63 = vmul.f32 %v4740_v45, %v1111_v55  ;;  %v1885_v21 = vadd.f32 %v1878_v37, %v1863_v3 }
  0x81   :  { %v322_v34 = vld [vmem:[#allocation2 + $0x60] sm:$0xfe]  ;;  %v3209_v25 = vld [vmem:[#allocation3 + $0x428] sm:$0x7f]  ;;  %3119 = vst [vmem:[#allocation3 + $0x648] sm:$0x7f] %v3057_v48  ;;  %v1231_v33 = vadd.f32 %v1224_v52, %v1205_v61 }
  0x82   :  { %v323_v11 = vld [vmem:[#allocation2 + $0x80] sm:$0xfe]  ;;  %v366_v51 = vrot.slane %v322_v34, 1  ;;  %v3857_v17 = vld [vmem:[#allocation3 + $0x4d8] sm:$0x7f]  ;;  %7780 = vst [vmem:[#allocation41_spill] sm:$0xff] %v4937_v0  ;;  %v3220_v44 = vmul.f32 %v4782_v30, %v3209_v25  ;;  %v1129_v55 = vadd.f32 %v1122_v63, %v1104_v14 }
  0x83   :  { %v367_v26 = vrot.slane %v323_v11, 1  ;;  %v1784_v24 = vld [vmem:[#allocation3 + $0x4e0] sm:$0x7f]  ;;  %410 = vst [vmem:[#allocation3 + $0x180] sm:$0x7f] %v365_v18  ;;  %7781 = vst [vmem:[#allocation42_spill] sm:$0xff] %v4942_v57  ;;  %v3864_v3 = vmul.f32 %v3857_v17, %v4782_v30 }
  0x84   :  { %v1893_v42 = vld [vmem:[#allocation3 + $0x4e0] sm:$0x7f]  ;;  %v1239_v19 = vld [vmem:[#allocation3 + $0x430] sm:$0x7f]  ;;  %v3185_v9 = vld [vmem:[#allocation3 + $0x2d8] sm:$0x7f]  ;;  %v1791_v6 = vmul.f32 %v1784_v24, %v4740_v45  ;;  %v3227_v18 = vadd.f32 %v3220_v44, %v3202_v32 }
  0x85   :  { %411 = vst [vmem:[#allocation3 + $0x190] sm:$0x7f] %v366_v51  ;;  %412 = vst [vmem:[#allocation3 + $0x1a0] sm:$0x7f] %v367_v26  ;;  %v1136_v10 = vld [vmem:[#allocation3 + $0x590] sm:$0x7f]  ;;  %v1900_v13 = vmul.f32 %v1893_v42, %v4766_v2  ;;  %v1250_v40 = vmul.f32 %v4766_v2, %v1239_v19  ;;  %v3196_v48 = vmul.f32 %v4709_v50, %v3185_v9 }
  0x86   :  { %v3837_v53 = vld [vmem:[#allocation3 + $0x388] sm:$0x7f]  ;;  %v1806_v61 = vld [vmem:[#allocation3 + $0x640] sm:$0x7f]  ;;  %v1798_v34 = vadd.f32 %v1791_v6, %v1776_v54  ;;  %v1147_v11 = vmul.f32 %v4834_v35, %v1136_v10  ;;  %v1265_v14 = vld [vmem:[#allocation3 + $0x590] sm:$0x7f]  ;;  %v3871_v25 = vadd.f32 %v3864_v3, %v3850_v38 }
  0x87   :  { %v3234_v29 = vld [vmem:[#allocation3 + $0x588] sm:$0x7f]  ;;  %v1915_v12 = vld [vmem:[#allocation3 + $0x640] sm:$0x7f]  ;;  %v1907_v37 = vadd.f32 %v1900_v13, %v1885_v21  ;;  %v3878_v51 = vld [vmem:[#allocation3 + $0x638] sm:$0x7f]  ;;  %v1257_v26 = vadd.f32 %v1250_v40, %v1231_v33  ;;  %v3844_v24 = vmul.f32 %v3837_v53, %v4709_v50  ;;  %v1813_v16 = vmul.f32 %v1806_v61, %v4834_v35 }
  0x88   :  { %v3309_v52 = vld [vmem:[#allocation3 + $0x2d8] sm:$0x7f]  ;;  %v3245_v42 = vmul.f32 %v4942_v57, %v3234_v29  ;;  %v7782_v17 = vld [vmem:[#allocation21_spill] sm:$0xff]  ;;  %v1154_v63 = vadd.f32 %v1147_v11, %v1129_v55  ;;  %v1922_v54 = vmul.f32 %v1915_v12, %v4937_v0  ;;  %v3885_v21 = vmul.f32 %v3878_v51, %v4942_v57  ;;  %v4968_v6 = vld [vmem:[%s7563_s1 + $0x30] sm:$0x1f] }
  0x89   :  { %v4958_v32 = vrot.slane %v7782_v17, %v4810_v1  ;;  %v3941_v19 = vld [vmem:[#allocation3 + $0x388] sm:$0x7f]  ;;  %v3210_v9 = vld [vmem:[#allocation3 + $0x438] sm:$0x7f]  ;;  %v1276_v38 = vmul.f32 %v4937_v0, %v1265_v14  ;;  %v3203_v10 = vadd.f32 %v3196_v48, %v4865_v59  ;;  %v4972_v55 = vrot.slane %v4760_v60, %v4810_v1  ;;  %v7785_v3 = vld [vmem:[#allocation18_spill] sm:$0xff] }
  0x8a   :  { %v3334_v33 = vld [vmem:[#allocation3 + $0x438] sm:$0x7f]  ;;  %v3252_v44 = vadd.f32 %v3245_v42, %v3227_v18  ;;  %v1820_v13 = vadd.f32 %v1813_v16, %v1798_v34  ;;  %v1929_v53 = vadd.f32 %v1922_v54, %v1907_v37  ;;  %v4975_v29 = vmul.f32 %v7785_v3, %v3309_v52  ;;  %v3858_v40 = vld [vmem:[#allocation3 + $0x4e8] sm:$0x7f]  ;;  %v4980_v59 = vld [vmem:[%s7563_s1 + $0x40] sm:$0x1f] }
  0x8b   :  { %7783 = vst [vmem:[#allocation21_spill] sm:$0xff] %v4958_v32  ;;  %7784 = vst [vmem:[#allocation43_spill] sm:$0xff] %v4972_v55  ;;  %v3892_v61 = vadd.f32 %v3885_v21, %v3871_v25  ;;  %v4982_v12 = vadd.f32 %v1276_v38, %v1257_v26  ;;  %v3851_v48 = vadd.f32 %v3844_v24, %v4874_v4  ;;  %v3962_v34 = vld [vmem:[#allocation3 + $0x4e8] sm:$0x7f]  ;;  %v7787_v11 = vld [vmem:[#allocation26_spill] sm:$0xff] }
  0x8c   :  { %v4986_v18 = vmul.f32 %v3941_v19, %v7785_v3  ;;  %v3221_v60 = vmul.f32 %v4782_v30, %v3210_v9  ;;  %v4990_v14 = vmul.f32 %v7787_v11, %v3334_v33  ;;  %v1038_v37 = vld [vmem:[#allocation3 + $0x30] sm:$0x7f]  ;;  %v7788_v25 = vld [vmem:[#allocation4_spill] sm:$0xff]  ;;  %v4997_v52 = vadd.f32 %v4884_v20, %v1154_v63  ;;  %v7790_v26 = vld [vmem:[#allocation5_spill] sm:$0xff] }
  0x8d   :  { %7786 = vst [vmem:[#allocation44_spill] sm:$0xff] %v4982_v12  ;;  %v4994_v51 = vrot.slane %v4968_v6, %v7788_v25  ;;  %v5001_v4 = vrot.slane %v4968_v6, %v7790_v26  ;;  %v324_v24 = vld [vmem:[#allocation2 + $0xa0] sm:$0xfe]  ;;  %v3865_v16 = vmul.f32 %v3858_v40, %v4782_v30  ;;  %v1163_v9 = vld [vmem:[#allocation3 + $0x30] sm:$0x7f]  ;;  %v5009_v33 = vrot.slane %v4980_v59, %v7788_v25  ;;  %v7794_v63 = vld [vmem:[#allocation23_spill] sm:$0xff] }
  0x8e   :  { %v332_v42 = vld [vmem:[#allocation2 + $0x1a0] sm:$0xfe]  ;;  %v5003_v17 = vadd.f32 %v3221_v60, %v3203_v10  ;;  %v1292_v21 = vld [vmem:[#allocation3 + $0x30] sm:$0x7f]  ;;  %v5012_v20 = vmul.f32 %v3962_v34, %v7787_v11  ;;  %v3913_v7 = vadd.f32 %v7794_v63, %v3892_v61  ;;  %v5016_v60 = vadd.f32 %v4894_v39, %v1820_v13  ;;  %v2384_v63 = vld [vmem:[#allocation2 + $0x68] sm:$0x7f] }
  0x8f   :  { %7789 = vst [vmem:[#allocation45_spill] sm:$0xff] %v4994_v51  ;;  %7791 = vst [vmem:[#allocation5_spill] sm:$0xff] %v5001_v4  ;;  %v7792_v54 = vld [vmem:[#allocation20_spill] sm:$0xff]  ;;  %v1040_v30 = vld [vmem:[#allocation3 + $0x50] sm:$0x7f]  ;;  %v5025_v34 = vrot.slane %v4980_v59, %v7790_v26  ;;  %v5039_v13 = vmul.f32 %v4669_v23, %v1163_v9  ;;  %v368_v2 = vrot.slane %v324_v24, 1 }
  0x90   :  { %v3277_v19 = vadd.f32 %v7792_v54, %v3252_v44  ;;  %v1039_v38 = vld [vmem:[#allocation3 + $0x40] sm:$0x7f]  ;;  %7793 = vst [vmem:[#allocation20_spill] sm:$0xff] %v5009_v33  ;;  %v5019_v44 = vadd.f32 %v4897_v8, %v1929_v53  ;;  %v5021_v54 = vadd.f32 %v3865_v16, %v3851_v48  ;;  %v1165_v3 = vld [vmem:[#allocation3 + $0x50] sm:$0x7f]  ;;  %v5036_v8 = vmul.f32 %v4665_v22, %v1038_v37 }
  0x91   :  { %v1164_v12 = vld [vmem:[#allocation3 + $0x40] sm:$0x7f]  ;;  %7795 = vst [vmem:[#allocation23_spill] sm:$0xff] %v5025_v34  ;;  %v7796_v11 = vld [vmem:[#allocation6_spill] sm:$0xff]  ;;  %7799 = vst [vmem:[#allocation47_spill] sm:$0xff] %v5039_v13  ;;  %v5042_v53 = vmul.f32 %v4786_v47, %v1292_v21  ;;  %v376_v9 = vrot.slane %v332_v42, 1 }
  0x92   :  { %v1293_v55 = vld [vmem:[#allocation3 + $0x40] sm:$0x7f]  ;;  %v5029_v32 = vrot.slane %v4968_v6, %v7796_v11  ;;  %v5033_v39 = vrot.slane %v4980_v59, %v7796_v11  ;;  %v1294_v48 = vld [vmem:[#allocation3 + $0x50] sm:$0x7f]  ;;  %2406 = vst [vmem:[#allocation3 + $0x38] sm:$0x7f] %v2384_v63  ;;  %v3302_v35 = vadd.f32 %v4853_v31, %v3277_v19  ;;  %v3934_v63 = vadd.f32 %v4868_v36, %v3913_v7 }
  0x93   :  { %v1422_v10 = vld [vmem:[#allocation3 + $0x40] sm:$0x7f]  ;;  %7800 = vst [vmem:[#allocation48_spill] sm:$0xff] %v5042_v53  ;;  %v2385_v16 = vld [vmem:[#allocation2 + $0x88] sm:$0x7f]  ;;  %v5054_v24 = vmul.f32 %v4669_v23, %v1164_v12  ;;  %v5070_v12 = vmul.f32 %v4669_v23, %v1165_v3 }
  0x94   :  { %v333_v40 = vld [vmem:[#allocation2 + $0x1c0] sm:$0xfe]  ;;  %7797 = vst [vmem:[#allocation6_spill] sm:$0xff] %v5029_v32  ;;  %7798 = vst [vmem:[#allocation46_spill] sm:$0xff] %v5033_v39  ;;  %v2386_v0 = vld [vmem:[#allocation2 + $0xa8] sm:$0x7f]  ;;  %v5046_v32 = vrot.slane %v4968_v6, %v4700_v43  ;;  %v5050_v39 = vmul.f32 %v4665_v22, %v1039_v38  ;;  %v5060_v42 = vmul.f32 %v4994_v51, %v1422_v10 }
  0x95   :  { %v334_v50 = vld [vmem:[#allocation2 + $0x1e0] sm:$0xfe]  ;;  %v1423_v37 = vld [vmem:[#allocation3 + $0x50] sm:$0x7f]  ;;  %2407 = vst [vmem:[#allocation3 + $0x48] sm:$0x7f] %v2385_v16  ;;  %v3955_v3 = vadd.f32 %v4986_v18, %v3934_v63 }
  0x96   :  { %v335_v61 = vld [vmem:[#allocation2 + $0x200] sm:$0xfe]  ;;  %7801 = vst [vmem:[#allocation49_spill] sm:$0xff] %v5046_v32  ;;  %2408 = vst [vmem:[#allocation3 + $0x58] sm:$0x7f] %v2386_v0  ;;  %v377_v62 = vrot.slane %v333_v40, 1  ;;  %v5057_v0 = vmul.f32 %v4786_v47, %v1293_v55 }
  0x97   :  { %v2395_v21 = vld [vmem:[#allocation2 + $0x1c8] sm:$0x7f]  ;;  %v3235_v13 = vld [vmem:[#allocation3 + $0x598] sm:$0x7f]  ;;  %v1720_v45 = vld [vmem:[#allocation3 + $0xe0] sm:$0x7f] }
  0x98   :  { %v2396_v53 = vld [vmem:[#allocation2 + $0x1e8] sm:$0x7f]  ;;  %v1829_v46 = vld [vmem:[#allocation3 + $0xe0] sm:$0x7f]  ;;  %v378_v32 = vrot.slane %v334_v50, 1  ;;  %v379_v34 = vrot.slane %v335_v61, 1  ;;  %v5064_v61 = vrot.slane %v4968_v6, %v4810_v1  ;;  %v5074_v6 = vmul.f32 %v4786_v47, %v1294_v48 }
  0x99   :  { %v1938_v41 = vld [vmem:[#allocation3 + $0xe0] sm:$0x7f]  ;;  %2417 = vst [vmem:[#allocation3 + $0xe8] sm:$0x7f] %v2395_v21  ;;  %2418 = vst [vmem:[#allocation3 + $0xf8] sm:$0x7f] %v2396_v53  ;;  %v5067_v53 = vmul.f32 %v4665_v22, %v1040_v30  ;;  %v3327_v21 = vadd.f32 %v4975_v29, %v3302_v35  ;;  %v3246_v35 = vmul.f32 %v4942_v57, %v3235_v13 }
  0x9a   :  { %v3359_v31 = vld [vmem:[#allocation3 + $0x598] sm:$0x7f]  ;;  %v3879_v19 = vld [vmem:[#allocation3 + $0x648] sm:$0x7f]  ;;  %7802 = vst [vmem:[#allocation50_spill] sm:$0xff] %v5054_v24  ;;  %7803 = vst [vmem:[#allocation51_spill] sm:$0xff] %v5057_v0  ;;  %v5082_v29 = vmul.f32 %v1720_v45, %v4665_v22  ;;  %v5085_v48 = vmul.f32 %v1829_v46, %v4669_v23 }
  0x9b   :  { %v3983_v38 = vld [vmem:[#allocation3 + $0x648] sm:$0x7f]  ;;  %7804 = vst [vmem:[#allocation52_spill] sm:$0xff] %v5060_v42  ;;  %v2047_v36 = vld [vmem:[#allocation3 + $0xe0] sm:$0x7f]  ;;  %7805 = vst [vmem:[#allocation53_spill] sm:$0xff] %v5064_v61 }
  0x9c   :  { %413 = vst [vmem:[#allocation3 + $0x1b0] sm:$0x7f] %v368_v2  ;;  %421 = vst [vmem:[#allocation3 + $0x230] sm:$0x7f] %v376_v9  ;;  %v2397_v7 = vld [vmem:[#allocation2 + $0x208] sm:$0x7f]  ;;  %v3990_v13 = vmul.f32 %v3983_v38, %v4951_v15  ;;  %v5094_v45 = vmul.f32 %v2047_v36, %v4994_v51 }
  0x9d   :  { %v2427_v50 = vld [vmem:[#allocation2 + $0x48] sm:$0xfe]  ;;  %7806 = vst [vmem:[#allocation54_spill] sm:$0xff] %v5070_v12  ;;  %v1721_v55 = vld [vmem:[#allocation3 + $0xf0] sm:$0x7f]  ;;  %7807 = vst [vmem:[#allocation55_spill] sm:$0xff] %v5074_v6 }
  0x9e   :  { %v2428_v40 = vld [vmem:[#allocation2 + $0x68] sm:$0xfe]  ;;  %422 = vst [vmem:[#allocation3 + $0x240] sm:$0x7f] %v377_v62  ;;  %423 = vst [vmem:[#allocation3 + $0x250] sm:$0x7f] %v378_v32  ;;  %v5078_v62 = vmul.f32 %v4994_v51, %v1423_v37 }
  0x9f   :  { %424 = vst [vmem:[#allocation3 + $0x260] sm:$0x7f] %v379_v34  ;;  %2419 = vst [vmem:[#allocation3 + $0x108] sm:$0x7f] %v2397_v7  ;;  %v2471_v2 = vrot.slane %v2427_v50, 1  ;;  %v2472_v10 = vrot.slane %v2428_v40, 1  ;;  %v5088_v40 = vmul.f32 %v1938_v41, %v4786_v47  ;;  %v3253_v41 = vadd.f32 %v3246_v35, %v5003_v17 }
  0xa0   :  { %v2429_v16 = vld [vmem:[#allocation2 + $0x88] sm:$0xfe]  ;;  %7808 = vst [vmem:[#allocation56_spill] sm:$0xff] %v5078_v62  ;;  %v1830_v32 = vld [vmem:[#allocation3 + $0xf0] sm:$0x7f] }
  0xa1   :  { %v2430_v9 = vld [vmem:[#allocation2 + $0xa8] sm:$0xfe]  ;;  %v2473_v42 = vrot.slane %v2429_v16, 1  ;;  %v1939_v34 = vld [vmem:[#allocation3 + $0xf0] sm:$0x7f]  ;;  %v3352_v16 = vadd.f32 %v4990_v14, %v3327_v21 }
  0xa2   :  { %v2474_v30 = vrot.slane %v2430_v9, 1  ;;  %v2438_v61 = vld [vmem:[#allocation2 + $0x1a8] sm:$0xfe]  ;;  %2515 = vst [vmem:[#allocation3 + $0x188] sm:$0x7f] %v2471_v2  ;;  %v3370_v2 = vmul.f32 %v4951_v15, %v3359_v31  ;;  %v5102_v31 = vmul.f32 %v1830_v32, %v4669_v23 }
  0xa3   :  { %v2439_v0 = vld [vmem:[#allocation2 + $0x1c8] sm:$0xfe]  ;;  %2516 = vst [vmem:[#allocation3 + $0x198] sm:$0x7f] %v2472_v10  ;;  %v2482_v7 = vrot.slane %v2438_v61, 1 }
  0xa4   :  { %v2483_v50 = vrot.slane %v2439_v0, 1  ;;  %v2048_v18 = vld [vmem:[#allocation3 + $0xf0] sm:$0x7f]  ;;  %v1062_v63 = vld [vmem:[#allocation3 + $0x180] sm:$0x7f]  ;;  %v3886_v0 = vmul.f32 %v3879_v19, %v4942_v57  ;;  %7809 = vst [vmem:[#allocation57_spill] sm:$0xff] %v5102_v31  ;;  %v5130_v12 = vadd.f32 %v3370_v2, %v3352_v16 }
  0xa5   :  { %v2157_v37 = vld [vmem:[#allocation3 + $0xf0] sm:$0x7f]  ;;  %2517 = vst [vmem:[#allocation3 + $0x1a8] sm:$0x7f] %v2473_v42  ;;  %2518 = vst [vmem:[#allocation3 + $0x1b8] sm:$0x7f] %v2474_v30  ;;  %v5099_v42 = vmul.f32 %v1721_v55, %v4665_v22  ;;  %v3976_v30 = vadd.f32 %v5012_v20, %v3955_v3  ;;  %v5111_v55 = vmul.f32 %v2048_v18, %v4994_v51 }
  0xa6   :  { %v1722_v61 = vld [vmem:[#allocation3 + $0x100] sm:$0x7f]  ;;  %v1063_v10 = vld [vmem:[#allocation3 + $0x190] sm:$0x7f]  ;;  %2526 = vst [vmem:[#allocation3 + $0x238] sm:$0x7f] %v2482_v7  ;;  %v3893_v36 = vadd.f32 %v3886_v0, %v5021_v54  ;;  %v5107_v7 = vmul.f32 %v1939_v34, %v4786_v47  ;;  %v5114_v32 = vmul.f32 %v2157_v37, %v5009_v33 }
  0xa7   :  { %v1831_v46 = vld [vmem:[#allocation3 + $0x100] sm:$0x7f]  ;;  %2527 = vst [vmem:[#allocation3 + $0x248] sm:$0x7f] %v2483_v50  ;;  %v7811_v17 = vld [vmem:[#allocation9_spill] sm:$0xff]  ;;  %7812 = vst [vmem:[#allocation59_spill] sm:$0xff] %v5111_v55  ;;  %v5117_v62 = vmul.f32 %v1722_v61, %v4665_v22  ;;  %v3997_v2 = vadd.f32 %v3990_v13, %v3976_v30 }
  0xa8   :  { %v1940_v19 = vld [vmem:[#allocation3 + $0x100] sm:$0x7f]  ;;  %7810 = vst [vmem:[#allocation58_spill] sm:$0xff] %v5107_v7  ;;  %v1073_v35 = vmul.f32 %v7811_v17, %v1062_v63  ;;  %7813 = vst [vmem:[#allocation60_spill] sm:$0xff] %v5114_v32  ;;  %v1074_v54 = vmul.f32 %v7811_v17, %v1063_v10  ;;  %v1189_v20 = vld [vmem:[#allocation3 + $0x190] sm:$0x7f]  ;;  %v5121_v34 = vmul.f32 %v1831_v46, %v4669_v23 }
  0xa9   :  { %v2049_v38 = vld [vmem:[#allocation3 + $0x100] sm:$0x7f]  ;;  %v1318_v3 = vld [vmem:[#allocation3 + $0x190] sm:$0x7f]  ;;  %v5124_v63 = vmul.f32 %v1940_v19, %v4786_v47  ;;  %7817 = vst [vmem:[#allocation64_spill] sm:$0xff] %v5130_v12  ;;  %v7820_v55 = vld [vmem:[#allocation27_spill] sm:$0xff]  ;;  %v5195_v31 = vadd.f32 %v4928_v5, %v3997_v2 }
  0xaa   :  { %v1064_v9 = vld [vmem:[#allocation3 + $0x1a0] sm:$0x7f]  ;;  %7814 = vst [vmem:[#allocation61_spill] sm:$0xff] %v5121_v34  ;;  %v5127_v0 = vmul.f32 %v2049_v38, %v4994_v51  ;;  %v3132_v19 = vld [vmem:[%s7563_s1 + $0x38] sm:$0x1f]  ;;  %v5148_v16 = vadd.f32 %v1073_v35, %v4877_v49 }
  0xab   :  { %v2158_v50 = vld [vmem:[#allocation3 + $0x100] sm:$0x7f]  ;;  %7815 = vst [vmem:[#allocation62_spill] sm:$0xff] %v5124_v63  ;;  %v1075_v18 = vmul.f32 %v7811_v17, %v1064_v9  ;;  %v5145_v38 = vld [vmem:[%s7563_s1 + $0x48] sm:$0x1f]  ;;  %v5217_v2 = vrot.slane %v3132_v19, %v4810_v1 }
  0xac   :  { %v1188_v14 = vld [vmem:[#allocation3 + $0x180] sm:$0x7f]  ;;  %7816 = vst [vmem:[#allocation63_spill] sm:$0xff] %v5127_v0  ;;  %v5133_v61 = vmul.f32 %v2158_v50, %v5009_v33  ;;  %v5154_v50 = vmul.f32 %v7820_v55, %v1318_v3  ;;  %v3137_v49 = vld [vmem:[#allocation3 + $0x38] sm:$0x7f]  ;;  %v7829_v0 = vld [vmem:[#allocation38_spill] sm:$0xff] }
  0xad   :  { %v1317_v21 = vld [vmem:[#allocation3 + $0x180] sm:$0x7f]  ;;  %v3261_v30 = vld [vmem:[#allocation3 + $0x38] sm:$0x7f]  ;;  %v5182_v63 = vadd.f32 %v7829_v0, %v3253_v41  ;;  %v5202_v41 = vrot.slane %v5145_v38, %v7796_v11  ;;  %v1449_v0 = vld [vmem:[#allocation3 + $0x1b0] sm:$0x7f] }
  0xae   :  { %v1190_v37 = vld [vmem:[#allocation3 + $0x1a0] sm:$0x7f]  ;;  %7818 = vst [vmem:[#allocation65_spill] sm:$0xff] %v5133_v61  ;;  %v5137_v46 = vmul.f32 %v7820_v55, %v1317_v21  ;;  %v5160_v21 = vadd.f32 %v1074_v54, %v5036_v8  ;;  %v3385_v35 = vld [vmem:[#allocation3 + $0x38] sm:$0x7f]  ;;  %v5175_v8 = vrot.slane %v3132_v19, %v7788_v25  ;;  %v5179_v54 = vrot.slane %v5145_v38, %v7788_v25 }
  0xaf   :  { %v1319_v6 = vld [vmem:[#allocation3 + $0x1a0] sm:$0x7f]  ;;  %v3510_v61 = vld [vmem:[#allocation3 + $0x48] sm:$0x7f]  ;;  %v3139_v7 = vld [vmem:[#allocation3 + $0x58] sm:$0x7f]  ;;  %v5211_v24 = vmul.f32 %v4681_v28, %v3261_v30  ;;  %v5214_v5 = vmul.f32 %v4803_v56, %v3385_v35 }
  0xb0   :  { %v7819_v10 = vld [vmem:[#allocation12_spill] sm:$0xff]  ;;  %7821 = vst [vmem:[#allocation66_spill] sm:$0xff] %v5137_v46  ;;  %7822 = vst [vmem:[#allocation67_spill] sm:$0xff] %v5160_v21  ;;  %v5166_v13 = vmul.f32 %v7820_v55, %v1319_v6  ;;  %v3386_v46 = vld [vmem:[#allocation3 + $0x48] sm:$0x7f] }
  0xb1   :  { %v1199_v32 = vmul.f32 %v7819_v10, %v1188_v14  ;;  %v1448_v34 = vld [vmem:[#allocation3 + $0x1a0] sm:$0x7f]  ;;  %v5151_v9 = vmul.f32 %v7819_v10, %v1189_v20  ;;  %v5163_v12 = vmul.f32 %v7819_v10, %v1190_v37  ;;  %v5169_v20 = vadd.f32 %v1075_v18, %v5050_v39  ;;  %7827 = vst [vmem:[#allocation72_spill] sm:$0xff] %v5175_v8  ;;  %v1065_v6 = vld [vmem:[#allocation3 + $0x1b0] sm:$0x7f] }
  0xb2   :  { %7824 = vst [vmem:[#allocation69_spill] sm:$0xff] %v5166_v13  ;;  %v5172_v3 = vmul.f32 %v5001_v4, %v1448_v34  ;;  %7828 = vst [vmem:[#allocation73_spill] sm:$0xff] %v5179_v54  ;;  %v1741_v37 = vld [vmem:[#allocation3 + $0x230] sm:$0x7f]  ;;  %v5185_v39 = vrot.slane %v3132_v19, %v7790_v26  ;;  %v5188_v34 = vadd.f32 %v4925_v58, %v3893_v36  ;;  %v3263_v25 = vld [vmem:[#allocation3 + $0x58] sm:$0x7f] }
  0xb3   :  { %v5157_v14 = vadd.f32 %v1199_v32, %v4997_v52  ;;  %7823 = vst [vmem:[#allocation68_spill] sm:$0xff] %v5163_v12  ;;  %7825 = vst [vmem:[#allocation70_spill] sm:$0xff] %v5169_v20  ;;  %v3138_v52 = vld [vmem:[#allocation3 + $0x48] sm:$0x7f]  ;;  %v5192_v18 = vrot.slane %v5145_v38, %v7790_v26  ;;  %v5198_v13 = vrot.slane %v3132_v19, %v7796_v11  ;;  %v1320_v36 = vld [vmem:[#allocation3 + $0x1b0] sm:$0x7f] }
  0xb4   :  { %7826 = vst [vmem:[#allocation71_spill] sm:$0xff] %v5172_v3  ;;  %v3262_v32 = vld [vmem:[#allocation3 + $0x48] sm:$0x7f]  ;;  %7830 = vst [vmem:[#allocation38_spill] sm:$0xff] %v5185_v39  ;;  %v1191_v3 = vld [vmem:[#allocation3 + $0x1b0] sm:$0x7f]  ;;  %v5205_v58 = vrot.slane %v3132_v19, %v4700_v43  ;;  %v5208_v12 = vmul.f32 %v4677_v27, %v3137_v49  ;;  %v1076_v11 = vmul.f32 %v7811_v17, %v1065_v6 }
  0xb5   :  { %7831 = vst [vmem:[#allocation74_spill] sm:$0xff] %v5192_v18  ;;  %7832 = vst [vmem:[#allocation75_spill] sm:$0xff] %v5198_v13  ;;  %v1742_v26 = vld [vmem:[#allocation3 + $0x240] sm:$0x7f]  ;;  %v1959_v33 = vld [vmem:[#allocation3 + $0x230] sm:$0x7f]  ;;  %v5222_v47 = vmul.f32 %v4677_v27, %v3138_v52  ;;  %v5226_v49 = vrot.slane %v4980_v59, %v4700_v43  ;;  %v5229_v19 = vmul.f32 %v4681_v28, %v3262_v32 }
  0xb6   :  { %7833 = vst [vmem:[#allocation76_spill] sm:$0xff] %v5202_v41  ;;  %7834 = vst [vmem:[#allocation77_spill] sm:$0xff] %v5205_v58  ;;  %v1748_v41 = vmul.f32 %v1741_v37, %v7811_v17  ;;  %v1850_v58 = vld [vmem:[#allocation3 + $0x230] sm:$0x7f]  ;;  %v1851_v30 = vld [vmem:[#allocation3 + $0x240] sm:$0x7f]  ;;  %v5232_v6 = vmul.f32 %v4803_v56, %v3386_v46  ;;  %v5235_v37 = vmul.f32 %v5175_v8, %v3510_v61 }
  0xb7   :  { %7835 = vst [vmem:[#allocation78_spill] sm:$0xff] %v5214_v5  ;;  %7836 = vst [vmem:[#allocation79_spill] sm:$0xff] %v5217_v2  ;;  %v1743_v51 = vld [vmem:[#allocation3 + $0x250] sm:$0x7f]  ;;  %v1960_v35 = vld [vmem:[#allocation3 + $0x240] sm:$0x7f]  ;;  %v5238_v2 = vmul.f32 %v4677_v27, %v3139_v7  ;;  %v5241_v52 = vmul.f32 %v7819_v10, %v1191_v3  ;;  %v5244_v59 = vmul.f32 %v7820_v55, %v1320_v36 }
  0xb8   :  { %7837 = vst [vmem:[#allocation80_spill] sm:$0xff] %v5226_v49  ;;  %v1744_v23 = vld [vmem:[#allocation3 + $0x260] sm:$0x7f]  ;;  %7838 = vst [vmem:[#allocation81_spill] sm:$0xff] %v5229_v19  ;;  %v1749_v49 = vmul.f32 %v1742_v26, %v7811_v17  ;;  %v1852_v32 = vld [vmem:[#allocation3 + $0x250] sm:$0x7f]  ;;  %v5248_v46 = vmul.f32 %v4681_v28, %v3263_v25  ;;  %v5251_v61 = vmul.f32 %v5001_v4, %v1449_v0 }
  0xb9   :  { %7839 = vst [vmem:[#allocation82_spill] sm:$0xff] %v5232_v6  ;;  %7840 = vst [vmem:[#allocation83_spill] sm:$0xff] %v5235_v37  ;;  %v2069_v22 = vld [vmem:[#allocation3 + $0x240] sm:$0x7f]  ;;  %v1961_v19 = vld [vmem:[#allocation3 + $0x250] sm:$0x7f]  ;;  %v1857_v7 = vmul.f32 %v1850_v58, %v7819_v10  ;;  %v1966_v37 = vmul.f32 %v1959_v33, %v7820_v55  ;;  %v1750_v3 = vmul.f32 %v1743_v51, %v7811_v17 }
  0xba   :  { %7841 = vst [vmem:[#allocation84_spill] sm:$0xff] %v5241_v52  ;;  %7842 = vst [vmem:[#allocation85_spill] sm:$0xff] %v5244_v59  ;;  %v2070_v52 = vld [vmem:[#allocation3 + $0x250] sm:$0x7f]  ;;  %v1853_v59 = vld [vmem:[#allocation3 + $0x260] sm:$0x7f]  ;;  %v5257_v26 = vadd.f32 %v1076_v11, %v5067_v53  ;;  %v5263_v25 = vmul.f32 %v1851_v30, %v7819_v10  ;;  %v1751_v0 = vmul.f32 %v1744_v23, %v7811_v17 }
  0xbb   :  { %7843 = vst [vmem:[#allocation86_spill] sm:$0xff] %v5248_v46  ;;  %7844 = vst [vmem:[#allocation87_spill] sm:$0xff] %v5251_v61  ;;  %v2179_v36 = vld [vmem:[#allocation3 + $0x250] sm:$0x7f]  ;;  %v7846_v6 = vld [vmem:[#allocation36_spill] sm:$0xff]  ;;  %v5267_v33 = vadd.f32 %v1857_v7, %v5016_v60  ;;  %v5270_v51 = vadd.f32 %v1966_v37, %v5019_v44  ;;  %v5273_v53 = vmul.f32 %v1960_v35, %v7820_v55 }
  0xbc   :  { %7845 = vst [vmem:[#allocation88_spill] sm:$0xff] %v5257_v26  ;;  %v5260_v13 = vadd.f32 %v1748_v41, %v7846_v6  ;;  %v1962_v61 = vld [vmem:[#allocation3 + $0x260] sm:$0x7f]  ;;  %v5276_v41 = vmul.f32 %v2069_v22, %v5001_v4  ;;  %v3387_v11 = vld [vmem:[#allocation3 + $0x58] sm:$0x7f]  ;;  %v5279_v23 = vadd.f32 %v1749_v49, %v5082_v29  ;;  %v5282_v17 = vmul.f32 %v1852_v32, %v7819_v10 }
  0xbd   :  { %v2071_v58 = vld [vmem:[#allocation3 + $0x260] sm:$0x7f]  ;;  %v3511_v30 = vld [vmem:[#allocation3 + $0x58] sm:$0x7f]  ;;  %v3797_v6 = vld [vmem:[#allocation3 + $0xe8] sm:$0x7f]  ;;  %v5285_v60 = vmul.f32 %v1961_v19, %v7820_v55  ;;  %v5288_v44 = vmul.f32 %v2070_v52, %v5001_v4  ;;  %v5291_v26 = vadd.f32 %v1750_v3, %v5099_v42  ;;  %v5297_v29 = vmul.f32 %v1853_v59, %v7819_v10 }
  0xbe   :  { %v2180_v46 = vld [vmem:[#allocation3 + $0x260] sm:$0x7f]  ;;  %7847 = vst [vmem:[#allocation36_spill] sm:$0xff] %v5279_v23  ;;  %7848 = vst [vmem:[#allocation89_spill] sm:$0xff] %v5282_v17  ;;  %v3901_v35 = vld [vmem:[#allocation3 + $0xe8] sm:$0x7f]  ;;  %v5300_v49 = vmul.f32 %v1962_v61, %v7820_v55  ;;  %v5312_v3 = vmul.f32 %v4803_v56, %v3387_v11  ;;  %v5315_v61 = vmul.f32 %v5175_v8, %v3511_v30 }
  0xbf   :  { %7849 = vst [vmem:[#allocation90_spill] sm:$0xff] %v5285_v60  ;;  %7850 = vst [vmem:[#allocation91_spill] sm:$0xff] %v5288_v44  ;;  %v4005_v37 = vld [vmem:[#allocation3 + $0xe8] sm:$0x7f]  ;;  %v7852_v20 = vld [vmem:[#allocation23_spill] sm:$0xff]  ;;  %v5303_v44 = vadd.f32 %v1751_v0, %v5117_v62  ;;  %v5306_v60 = vmul.f32 %v2071_v58, %v5001_v4  ;;  %v5321_v62 = vmul.f32 %v3901_v35, %v4681_v28 }
  0xc0   :  { %v4109_v7 = vld [vmem:[#allocation3 + $0xe8] sm:$0x7f]  ;;  %7851 = vst [vmem:[#allocation92_spill] sm:$0xff] %v5291_v26  ;;  %v5294_v21 = vmul.f32 %v2179_v36, %v7852_v20  ;;  %7854 = vst [vmem:[#allocation94_spill] sm:$0xff] %v5297_v29  ;;  %v3798_v19 = vld [vmem:[#allocation3 + $0xf8] sm:$0x7f]  ;;  %v5309_v42 = vmul.f32 %v2180_v46, %v7852_v20  ;;  %v5324_v0 = vmul.f32 %v4005_v37, %v4803_v56 }
  0xc1   :  { %v2440_v22 = vld [vmem:[#allocation2 + $0x1e8] sm:$0xfe]  ;;  %7855 = vst [vmem:[#allocation95_spill] sm:$0xff] %v5300_v49  ;;  %v3902_v32 = vld [vmem:[#allocation3 + $0xf8] sm:$0x7f]  ;;  %7856 = vst [vmem:[#allocation96_spill] sm:$0xff] %v5303_v44  ;;  %v5318_v49 = vmul.f32 %v3797_v6, %v4677_v27  ;;  %v5327_v11 = vmul.f32 %v4109_v7, %v5175_v8 }
  0xc2   :  { %7853 = vst [vmem:[#allocation93_spill] sm:$0xff] %v5294_v21  ;;  %v4006_v52 = vld [vmem:[#allocation3 + $0xf8] sm:$0x7f]  ;;  %7857 = vst [vmem:[#allocation97_spill] sm:$0xff] %v5306_v60  ;;  %v2441_v29 = vld [vmem:[#allocation2 + $0x208] sm:$0xfe]  ;;  %v5333_v30 = vmul.f32 %v3902_v32, %v4681_v28 }
  0xc3   :  { %7858 = vst [vmem:[#allocation98_spill] sm:$0xff] %v5309_v42  ;;  %7859 = vst [vmem:[#allocation99_spill] sm:$0xff] %v5312_v3  ;;  %v4110_v59 = vld [vmem:[#allocation3 + $0xf8] sm:$0x7f]  ;;  %v3799_v46 = vld [vmem:[#allocation3 + $0x108] sm:$0x7f]  ;;  %v5330_v3 = vmul.f32 %v3798_v19, %v4677_v27  ;;  %v5336_v6 = vmul.f32 %v4006_v52, %v4803_v56 }
  0xc4   :  { %v4214_v36 = vld [vmem:[#allocation3 + $0xf8] sm:$0x7f]  ;;  %7860 = vst [vmem:[#allocation100_spill] sm:$0xff] %v5315_v61  ;;  %7861 = vst [vmem:[#allocation101_spill] sm:$0xff] %v5321_v62  ;;  %v434_v58 = vld [vmem:[#allocation2 + $0x40] sm:$0xfc]  ;;  %v5339_v21 = vmul.f32 %v4110_v59, %v5175_v8 }
  0xc5   :  { %7862 = vst [vmem:[#allocation102_spill] sm:$0xff] %v5324_v0  ;;  %v435_v42 = vld [vmem:[#allocation2 + $0x50] sm:$0x1]  ;;  %7863 = vst [vmem:[#allocation103_spill] sm:$0xff] %v5327_v11  ;;  %v3903_v35 = vld [vmem:[#allocation3 + $0x108] sm:$0x7f]  ;;  %v5342_v52 = vmul.f32 %v4214_v36, %v5179_v54 }
  0xc6   :  { %7864 = vst [vmem:[#allocation104_spill] sm:$0xff] %v5333_v30  ;;  %7865 = vst [vmem:[#allocation105_spill] sm:$0xff] %v5336_v6  ;;  %v456_v61 = vld [vmem:[#allocation2 + $0x1a0] sm:$0xfc]  ;;  %v457_v60 = vld [vmem:[#allocation2 + $0x1b0] sm:$0x1]  ;;  %v5345_v6 = vmul.f32 %v3799_v46, %v4677_v27  ;;  %v5350_v46 = vmul.f32 %v3903_v35, %v4681_v28 }
  0xc7   :  { %v634_v37 = vld [vmem:[#allocation2 + $0x40] sm:$0xf8]  ;;  %7866 = vst [vmem:[#allocation106_spill] sm:$0xff] %v5339_v21  ;;  %v4007_v17 = vld [vmem:[#allocation3 + $0x108] sm:$0x7f]  ;;  %v2484_v20 = vrot.slane %v2440_v22, 1 }
  0xc8   :  { %v2485_v7 = vrot.slane %v2441_v29, 1  ;;  %v525_v4 = vrot.slane %v434_v58, 2  ;;  %v635_v55 = vld [vmem:[#allocation2 + $0x50] sm:$0x3]  ;;  %v3161_v19 = vld [vmem:[#allocation3 + $0x188] sm:$0x7f] }
  0xc9   :  { %v526_v10 = vrot.slane %v435_v42, 2  ;;  %v558_v44 = vrot.slane %v456_v61, 2  ;;  %v559_v32 = vrot.slane %v457_v60, 2  ;;  %v725_v30 = vrot.slane %v634_v37, 3  ;;  %v656_v26 = vld [vmem:[#allocation2 + $0x1a0] sm:$0xf8] }
  0xca   :  { %7867 = vst [vmem:[#allocation107_spill] sm:$0xff] %v5342_v52  ;;  %v3162_v23 = vld [vmem:[#allocation3 + $0x198] sm:$0x7f]  ;;  %2528 = vst [vmem:[#allocation3 + $0x258] sm:$0x7f] %v2484_v20  ;;  %v726_v59 = vrot.slane %v635_v55, 3 }
  0xcb   :  { %2529 = vst [vmem:[#allocation3 + $0x268] sm:$0x7f] %v2485_v7  ;;  %v657_v22 = vld [vmem:[#allocation2 + $0x1b0] sm:$0x3]  ;;  %v758_v29 = vrot.slane %v656_v26, 3  ;;  %v527_v42 = vsel %vm518_vm0, %v525_v4, %v526_v10  ;;  %v560_v60 = vsel %vm518_vm0, %v558_v44, %v559_v32  ;;  %7868 = vst [vmem:[#allocation108_spill] sm:$0xff] %v5350_v46  ;;  %v5354_v10 = vmul.f32 %v4007_v17, %v4803_v56 }
  0xcc   :  { %v834_v58 = vld [vmem:[#allocation2 + $0x40] sm:$0xf0]  ;;  %v4111_v21 = vld [vmem:[#allocation3 + $0x108] sm:$0x7f]  ;;  %v759_v61 = vrot.slane %v657_v22, 3  ;;  %v727_v55 = vsel %vm718_vm1, %v725_v30, %v726_v59 }
  0xcd   :  { %v3163_v11 = vld [vmem:[#allocation3 + $0x1a8] sm:$0x7f]  ;;  %v835_v37 = vld [vmem:[#allocation2 + $0x50] sm:$0x7]  ;;  %v925_v36 = vrot.slane %v834_v58, 4  ;;  %7869 = vst [vmem:[#allocation109_spill] sm:$0xff] %v5354_v10 }
  0xce   :  { %v856_v52 = vld [vmem:[#allocation2 + $0x1a0] sm:$0xf0]  ;;  %v4215_v27 = vld [vmem:[#allocation3 + $0x108] sm:$0x7f]  ;;  %610 = vst [vmem:[#allocation3 + $0x2e0] sm:$0x7f] %v527_v42  ;;  %v760_v32 = vsel %vm718_vm1, %v758_v29, %v759_v61 }
  0xcf   :  { %v3285_v20 = vld [vmem:[#allocation3 + $0x188] sm:$0x7f]  ;;  %621 = vst [vmem:[#allocation3 + $0x390] sm:$0x7f] %v560_v60  ;;  %v926_v26 = vrot.slane %v835_v37, 4  ;;  %v958_v62 = vrot.slane %v856_v52, 4 }
  0xd0   :  { %v3409_v7 = vld [vmem:[#allocation3 + $0x188] sm:$0x7f]  ;;  %v857_v0 = vld [vmem:[#allocation2 + $0x1b0] sm:$0x7]  ;;  %v3286_v44 = vld [vmem:[#allocation3 + $0x198] sm:$0x7f] }
  0xd1   :  { %v2539_v4 = vld [vmem:[#allocation2 + $0x48] sm:$0xfc]  ;;  %810 = vst [vmem:[#allocation3 + $0x440] sm:$0x7f] %v727_v55  ;;  %v959_v35 = vrot.slane %v857_v0, 4  ;;  %v927_v30 = vsel %vm918_vm2, %v925_v36, %v926_v26 }
  0xd2   :  { %v2540_v22 = vld [vmem:[#allocation2 + $0x58] sm:$0x1]  ;;  %v2629_v58 = vrot.slane %v2539_v4, 2  ;;  %v2561_v46 = vld [vmem:[#allocation2 + $0x1a8] sm:$0xfc]  ;;  %v5362_v4 = vmul.f32 %v4111_v21, %v5175_v8 }
  0xd3   :  { %v7870_v28 = vld [vmem:[#allocation13_spill] sm:$0xff]  ;;  %v3410_v60 = vld [vmem:[#allocation3 + $0x198] sm:$0x7f]  ;;  %821 = vst [vmem:[#allocation3 + $0x4f0] sm:$0x7f] %v760_v32  ;;  %v2630_v59 = vrot.slane %v2540_v22, 2  ;;  %v960_v29 = vsel %vm918_vm2, %v958_v62, %v959_v35 }
  0xd4   :  { %v3172_v42 = vmul.f32 %v7870_v28, %v3161_v19  ;;  %v2562_v52 = vld [vmem:[#allocation2 + $0x1b8] sm:$0x1]  ;;  %v2662_v37 = vrot.slane %v2561_v46, 2  ;;  %v2737_v5 = vld [vmem:[#allocation2 + $0x48] sm:$0xf8]  ;;  %v3173_v17 = vmul.f32 %v7870_v28, %v3162_v23  ;;  %7871 = vst [vmem:[#allocation110_spill] sm:$0xff] %v5362_v4  ;;  %v3174_v19 = vmul.f32 %v7870_v28, %v3163_v11 }
  0xd5   :  { %v3164_v10 = vld [vmem:[#allocation3 + $0x1b8] sm:$0x7f]  ;;  %1010 = vst [vmem:[#allocation3 + $0x5a0] sm:$0x7f] %v927_v30  ;;  %v2663_v0 = vrot.slane %v2562_v52, 2  ;;  %v2827_v55 = vrot.slane %v2737_v5, 3  ;;  %v2631_v46 = vsel %vm518_vm0, %v2629_v58, %v2630_v59  ;;  %v5367_v23 = vmul.f32 %v4215_v27, %v5179_v54 }
  0xd6   :  { %v2738_v61 = vld [vmem:[#allocation2 + $0x58] sm:$0x3]  ;;  %v3287_v32 = vld [vmem:[#allocation3 + $0x1a8] sm:$0x7f]  ;;  %1021 = vst [vmem:[#allocation3 + $0x650] sm:$0x7f] %v960_v29  ;;  %v3175_v27 = vmul.f32 %v7870_v28, %v3164_v10 }
  0xd7   :  { %v3817_v36 = vld [vmem:[#allocation3 + $0x238] sm:$0x7f]  ;;  %v2828_v26 = vrot.slane %v2738_v61, 3  ;;  %7872 = vst [vmem:[#allocation111_spill] sm:$0xff] %v5367_v23  ;;  %v7873_v22 = vld [vmem:[#allocation14_spill] sm:$0xff]  ;;  %v2664_v11 = vsel %vm518_vm0, %v2662_v37, %v2663_v0  ;;  %v7876_v4 = vld [vmem:[#allocation37_spill] sm:$0xff] }
  0xd8   :  { %v3296_v30 = vmul.f32 %v7873_v22, %v3285_v20  ;;  %v7874_v62 = vld [vmem:[#allocation30_spill] sm:$0xff]  ;;  %v3411_v5 = vld [vmem:[#allocation3 + $0x1a8] sm:$0x7f]  ;;  %v3288_v21 = vld [vmem:[#allocation3 + $0x1b8] sm:$0x7f]  ;;  %v5375_v8 = vadd.f32 %v3172_v42, %v7876_v4  ;;  %v5378_v58 = vmul.f32 %v7873_v22, %v3286_v44  ;;  %v3824_v44 = vmul.f32 %v3817_v36, %v7870_v28 }
  0xd9   :  { %v5371_v35 = vmul.f32 %v7874_v62, %v3409_v7  ;;  %v3535_v52 = vld [vmem:[#allocation3 + $0x1a8] sm:$0x7f]  ;;  %2713 = vst [vmem:[#allocation3 + $0x2e8] sm:$0x7f] %v2631_v46  ;;  %v3412_v59 = vld [vmem:[#allocation3 + $0x1b8] sm:$0x7f]  ;;  %v2829_v7 = vsel %vm718_vm1, %v2827_v55, %v2828_v26  ;;  %v5386_v46 = vadd.f32 %v3173_v17, %v5208_v12  ;;  %v5389_v42 = vmul.f32 %v7874_v62, %v3410_v60 }
  0xda   :  { %v3536_v29 = vld [vmem:[#allocation3 + $0x1b8] sm:$0x7f]  ;;  %v3818_v20 = vld [vmem:[#allocation3 + $0x248] sm:$0x7f]  ;;  %2724 = vst [vmem:[#allocation3 + $0x398] sm:$0x7f] %v2664_v11  ;;  %v5383_v61 = vadd.f32 %v3296_v30, %v5182_v63  ;;  %v5393_v4 = vadd.f32 %v3174_v19, %v5222_v47  ;;  %v5396_v55 = vmul.f32 %v7873_v22, %v3287_v32  ;;  %v5399_v63 = vmul.f32 %v7874_v62, %v3411_v5 }
  0xdb   :  { %7875 = vst [vmem:[#allocation112_spill] sm:$0xff] %v5371_v35  ;;  %7877 = vst [vmem:[#allocation37_spill] sm:$0xff] %v5386_v46  ;;  %v3921_v37 = vld [vmem:[#allocation3 + $0x238] sm:$0x7f]  ;;  %v3922_v10 = vld [vmem:[#allocation3 + $0x248] sm:$0x7f]  ;;  %v5402_v12 = vmul.f32 %v5185_v39, %v3535_v52  ;;  %v5405_v36 = vmul.f32 %v7873_v22, %v3288_v21  ;;  %v5408_v30 = vmul.f32 %v7874_v62, %v3412_v59 }
  0xdc   :  { %v4025_v0 = vld [vmem:[#allocation3 + $0x238] sm:$0x7f]  ;;  %2911 = vst [vmem:[#allocation3 + $0x448] sm:$0x7f] %v2829_v7  ;;  %7878 = vst [vmem:[#allocation113_spill] sm:$0xff] %v5393_v4  ;;  %v5411_v47 = vmul.f32 %v5185_v39, %v3536_v29  ;;  %v3825_v19 = vmul.f32 %v3818_v20, %v7870_v28  ;;  %v5415_v11 = vadd.f32 %v3175_v27, %v5238_v2  ;;  %v7887_v29 = vld [vmem:[#allocation40_spill] sm:$0xff] }
  0xdd   :  { %7879 = vst [vmem:[#allocation114_spill] sm:$0xff] %v5396_v55  ;;  %7880 = vst [vmem:[#allocation115_spill] sm:$0xff] %v5399_v63  ;;  %v4026_v60 = vld [vmem:[#allocation3 + $0x248] sm:$0x7f]  ;;  %v3819_v17 = vld [vmem:[#allocation3 + $0x258] sm:$0x7f]  ;;  %v3928_v52 = vmul.f32 %v3921_v37, %v7873_v22  ;;  %v4032_v7 = vmul.f32 %v4025_v0, %v7874_v62  ;;  %v5420_v21 = vmul.f32 %v3922_v10, %v7873_v22 }
  0xde   :  { %7881 = vst [vmem:[#allocation116_spill] sm:$0xff] %v5402_v12  ;;  %v1087_v26 = vld [vmem:[#allocation3 + $0x2e0] sm:$0x7f]  ;;  %7882 = vst [vmem:[#allocation117_spill] sm:$0xff] %v5405_v36  ;;  %v4130_v32 = vld [vmem:[#allocation3 + $0x248] sm:$0x7f]  ;;  %v5428_v20 = vmul.f32 %v4026_v60, %v7874_v62  ;;  %v3826_v2 = vmul.f32 %v3819_v17, %v7870_v28  ;;  %v5443_v17 = vadd.f32 %v3825_v19, %v5318_v49 }
  0xdf   :  { %7883 = vst [vmem:[#allocation118_spill] sm:$0xff] %v5408_v30  ;;  %7884 = vst [vmem:[#allocation119_spill] sm:$0xff] %v5411_v47  ;;  %v1763_v5 = vld [vmem:[#allocation3 + $0x390] sm:$0x7f]  ;;  %v3923_v12 = vld [vmem:[#allocation3 + $0x258] sm:$0x7f]  ;;  %v5425_v47 = vadd.f32 %v3824_v44, %v7887_v29  ;;  %v5433_v10 = vadd.f32 %v3928_v52, %v5188_v34  ;;  %v5436_v23 = vadd.f32 %v4032_v7, %v5195_v31 }
  0xe0   :  { %7885 = vst [vmem:[#allocation120_spill] sm:$0xff] %v5415_v11  ;;  %7886 = vst [vmem:[#allocation121_spill] sm:$0xff] %v5420_v21  ;;  %v4027_v59 = vld [vmem:[#allocation3 + $0x258] sm:$0x7f]  ;;  %v5422_v35 = vld [vmem:[#allocation2 + $0x1a8] sm:$0xf8]  ;;  %v5439_v63 = vmul.f32 %v4130_v32, %v5185_v39  ;;  %v5446_v55 = vmul.f32 %v3923_v12, %v7873_v22  ;;  %v5451_v31 = vrot.slane %v5145_v38, %v4700_v43 }
  0xe1   :  { %7888 = vst [vmem:[#allocation40_spill] sm:$0xff] %v5428_v20  ;;  %v4131_v27 = vld [vmem:[#allocation3 + $0x258] sm:$0x7f]  ;;  %v3820_v30 = vld [vmem:[#allocation3 + $0x268] sm:$0x7f]  ;;  %7891 = vst [vmem:[#allocation123_spill] sm:$0xff] %v5443_v17  ;;  %v5454_v32 = vmul.f32 %v4027_v59, %v7874_v62  ;;  %v5462_v17 = vadd.f32 %v3826_v2, %v5330_v3 }
  0xe2   :  { %v7889_v37 = vld [vmem:[#allocation15_spill] sm:$0xff]  ;;  %v1214_v0 = vld [vmem:[#allocation3 + $0x2e0] sm:$0x7f]  ;;  %7890 = vst [vmem:[#allocation122_spill] sm:$0xff] %v5439_v63  ;;  %v1872_v29 = vld [vmem:[#allocation3 + $0x390] sm:$0x7f]  ;;  %v3827_v49 = vmul.f32 %v3820_v30, %v7870_v28 }
  0xe3   :  { %v1098_v36 = vmul.f32 %v7889_v37, %v1087_v26  ;;  %v4235_v44 = vld [vmem:[#allocation3 + $0x258] sm:$0x7f]  ;;  %v1770_v60 = vmul.f32 %v1763_v5, %v7889_v37  ;;  %7892 = vst [vmem:[#allocation124_spill] sm:$0xff] %v5446_v55  ;;  %v3924_v26 = vld [vmem:[#allocation3 + $0x268] sm:$0x7f]  ;;  %7893 = vst [vmem:[#allocation125_spill] sm:$0xff] %v5451_v31  ;;  %v5457_v5 = vmul.f32 %v4131_v27, %v5185_v39 }
  0xe4   :  { %v1981_v54 = vld [vmem:[#allocation3 + $0x390] sm:$0x7f]  ;;  %7894 = vst [vmem:[#allocation126_spill] sm:$0xff] %v5454_v32  ;;  %v4028_v19 = vld [vmem:[#allocation3 + $0x268] sm:$0x7f]  ;;  %v7896_v12 = vld [vmem:[#allocation16_spill] sm:$0xff]  ;;  %v5465_v34 = vmul.f32 %v4235_v44, %v5192_v18 }
  0xe5   :  { %7895 = vst [vmem:[#allocation127_spill] sm:$0xff] %v5457_v5  ;;  %v4132_v52 = vld [vmem:[#allocation3 + $0x268] sm:$0x7f]  ;;  %v1225_v7 = vmul.f32 %v7896_v12, %v1214_v0  ;;  %v1112_v55 = vld [vmem:[#allocation3 + $0x440] sm:$0x7f]  ;;  %7897 = vst [vmem:[#allocation128_spill] sm:$0xff] %v5462_v17  ;;  %v1105_v43 = vadd.f32 %v1098_v36, %v5148_v16  ;;  %v1879_v59 = vmul.f32 %v1872_v29, %v7896_v12 }
  0xe6   :  { %7898 = vst [vmem:[#allocation129_spill] sm:$0xff] %v5465_v34  ;;  %v1240_v31 = vld [vmem:[#allocation3 + $0x440] sm:$0x7f]  ;;  %v1785_v27 = vld [vmem:[#allocation3 + $0x4f0] sm:$0x7f]  ;;  %v5470_v5 = vmul.f32 %v3924_v26, %v7873_v22  ;;  %v1777_v28 = vadd.f32 %v1770_v60, %v5260_v13  ;;  %v5476_v34 = vmul.f32 %v4028_v19, %v7874_v62  ;;  %v5479_v16 = vmul.f32 %v4132_v52, %v5185_v39  ;;  %v7903_v29 = vld [vmem:[#allocation19_spill] sm:$0xff] }
  0xe7   :  { %v4236_v30 = vld [vmem:[#allocation3 + $0x268] sm:$0x7f]  ;;  %v1232_v32 = vadd.f32 %v1225_v7, %v5157_v14  ;;  %v1343_v0 = vld [vmem:[#allocation3 + $0x2e0] sm:$0x7f]  ;;  %v1894_v17 = vld [vmem:[#allocation3 + $0x4f0] sm:$0x7f]  ;;  %v1886_v36 = vadd.f32 %v1879_v59, %v5267_v33  ;;  %v1123_v26 = vmul.f32 %v7903_v29, %v1112_v55  ;;  %v5484_v7 = vadd.f32 %v3827_v49, %v5345_v6 }
  0xe8   :  { %7899 = vst [vmem:[#allocation130_spill] sm:$0xff] %v5470_v5  ;;  %v7900_v3 = vld [vmem:[#allocation28_spill] sm:$0xff]  ;;  %v2760_v44 = vld [vmem:[#allocation2 + $0x1b8] sm:$0x3]  ;;  %7901 = vst [vmem:[#allocation131_spill] sm:$0xff] %v5476_v34  ;;  %v1792_v19 = vmul.f32 %v1785_v27, %v7903_v29 }
  0xe9   :  { %v1988_v2 = vmul.f32 %v1981_v54, %v7900_v3  ;;  %7902 = vst [vmem:[#allocation132_spill] sm:$0xff] %v5479_v16  ;;  %v2003_v5 = vld [vmem:[#allocation3 + $0x4f0] sm:$0x7f]  ;;  %v1137_v22 = vld [vmem:[#allocation3 + $0x5a0] sm:$0x7f]  ;;  %7904 = vst [vmem:[#allocation133_spill] sm:$0xff] %v5484_v7  ;;  %v5490_v16 = vmul.f32 %v4236_v30, %v5192_v18  ;;  %v5493_v33 = vmul.f32 %v7900_v3, %v1343_v0 }
  0xea   :  { %v2935_v14 = vld [vmem:[#allocation2 + $0x48] sm:$0xf0]  ;;  %v7905_v54 = vld [vmem:[#allocation22_spill] sm:$0xff]  ;;  %v1266_v34 = vld [vmem:[#allocation3 + $0x5a0] sm:$0x7f]  ;;  %v1130_v55 = vadd.f32 %v1123_v26, %v1105_v43  ;;  %v2861_v26 = vrot.slane %v2760_v44, 3 }
  0xeb   :  { %v1995_v13 = vadd.f32 %v1988_v2, %v5270_v51  ;;  %v1251_v60 = vmul.f32 %v7905_v54, %v1240_v31  ;;  %v1807_v62 = vld [vmem:[#allocation3 + $0x650] sm:$0x7f]  ;;  %7906 = vst [vmem:[#allocation134_spill] sm:$0xff] %v5490_v16  ;;  %7907 = vst [vmem:[#allocation135_spill] sm:$0xff] %v5493_v33  ;;  %v1901_v59 = vmul.f32 %v1894_v17, %v7905_v54  ;;  %v2936_v6 = vld [vmem:[#allocation2 + $0x58] sm:$0x7] }
  0xec   :  { %v1916_v52 = vld [vmem:[#allocation3 + $0x650] sm:$0x7f]  ;;  %v2957_v49 = vld [vmem:[#allocation2 + $0x1a8] sm:$0xf0]  ;;  %v2958_v39 = vld [vmem:[#allocation2 + $0x1b8] sm:$0x7]  ;;  %v5496_v2 = vadd.f32 %v1792_v19, %v1777_v28 }
  0xed   :  { %v1258_v51 = vadd.f32 %v1251_v60, %v1232_v32  ;;  %v7908_v31 = vld [vmem:[#allocation31_spill] sm:$0xff]  ;;  %v7909_v7 = vld [vmem:[#allocation33_spill] sm:$0xff]  ;;  %v2025_v11 = vld [vmem:[#allocation3 + $0x650] sm:$0x7f]  ;;  %v5500_v18 = vadd.f32 %v1901_v59, %v1886_v36  ;;  %v3025_v17 = vrot.slane %v2935_v14, 4  ;;  %v3026_v60 = vrot.slane %v2936_v6, 4 }
  0xee   :  { %v2010_v27 = vmul.f32 %v2003_v5, %v7908_v31  ;;  %v1148_v29 = vmul.f32 %v7909_v7, %v1137_v22  ;;  %v436_v56 = vld [vmem:[#allocation2 + $0x60] sm:$0xfc]  ;;  %v437_v30 = vld [vmem:[#allocation2 + $0x70] sm:$0x1]  ;;  %v7910_v0 = vld [vmem:[#allocation41_spill] sm:$0xff]  ;;  %v5506_v28 = vmul.f32 %v1807_v62, %v7909_v7  ;;  %v7911_v44 = vrot.slane %v5422_v35, 3 }
  0xef   :  { %v438_v16 = vld [vmem:[#allocation2 + $0x80] sm:$0xfc]  ;;  %v1277_v43 = vmul.f32 %v7910_v0, %v1266_v34  ;;  %v439_v33 = vld [vmem:[#allocation2 + $0x90] sm:$0x1]  ;;  %v5509_v32 = vmul.f32 %v1916_v52, %v7910_v0  ;;  %v3186_v22 = vld [vmem:[#allocation3 + $0x2e8] sm:$0x7f]  ;;  %v3027_v52 = vsel %vm918_vm2, %v3025_v17, %v3026_v60 }
  0xf0   :  { %v440_v54 = vld [vmem:[#allocation2 + $0xa0] sm:$0xfc]  ;;  %v5503_v63 = vadd.f32 %v2010_v27, %v1995_v13  ;;  %v3310_v5 = vld [vmem:[#allocation3 + $0x2e8] sm:$0x7f]  ;;  %v441_v19 = vld [vmem:[#allocation2 + $0xb0] sm:$0x1]  ;;  %v5511_v59 = vadd.f32 %v1148_v29, %v1130_v55  ;;  %v2862_v14 = vsel %vm718_vm1, %v7911_v44, %v2861_v26 }
  0xf1   :  { %v458_v36 = vld [vmem:[#allocation2 + $0x1c0] sm:$0xfc]  ;;  %v3838_v34 = vld [vmem:[#allocation3 + $0x398] sm:$0x7f]  ;;  %v3058_v13 = vrot.slane %v2957_v49, 4  ;;  %v3059_v27 = vrot.slane %v2958_v39, 4  ;;  %v5516_v7 = vadd.f32 %v1277_v43, %v1258_v51 }
  0xf2   :  { %v459_v31 = vld [vmem:[#allocation2 + $0x1d0] sm:$0x1]  ;;  %v460_v62 = vld [vmem:[#allocation2 + $0x1e0] sm:$0xfc]  ;;  %2922 = vst [vmem:[#allocation3 + $0x4f8] sm:$0x7f] %v2862_v14 }
  0xf3   :  { %v528_v0 = vrot.slane %v436_v56, 2  ;;  %v529_v6 = vrot.slane %v437_v30, 2  ;;  %v461_v20 = vld [vmem:[#allocation2 + $0x1f0] sm:$0x1]  ;;  %v462_v21 = vld [vmem:[#allocation2 + $0x200] sm:$0xfc]  ;;  %v3060_v35 = vsel %vm918_vm2, %v3058_v13, %v3059_v27 }
  0xf4   :  { %v7912_v29 = vld [vmem:[#allocation21_spill] sm:$0xff]  ;;  %3109 = vst [vmem:[#allocation3 + $0x5a8] sm:$0x7f] %v3027_v52  ;;  %v531_v4 = vrot.slane %v438_v16, 2  ;;  %v532_v26 = vrot.slane %v439_v33, 2  ;;  %v534_v43 = vrot.slane %v440_v54, 2 }
  0xf5   :  { %v2032_v55 = vmul.f32 %v2025_v11, %v7912_v29  ;;  %v463_v49 = vld [vmem:[#allocation2 + $0x210] sm:$0x1]  ;;  %v2541_v39 = vld [vmem:[#allocation2 + $0x68] sm:$0xfc]  ;;  %3120 = vst [vmem:[#allocation3 + $0x658] sm:$0x7f] %v3060_v35  ;;  %v530_v51 = vsel %vm518_vm0, %v528_v0, %v529_v6 }
  0xf6   :  { %v535_v44 = vrot.slane %v441_v19, 2  ;;  %v561_v14 = vrot.slane %v458_v36, 2  ;;  %v2542_v17 = vld [vmem:[#allocation2 + $0x78] sm:$0x1]  ;;  %v7913_v56 = vld [vmem:[#allocation17_spill] sm:$0xff]  ;;  %v7914_v60 = vld [vmem:[#allocation18_spill] sm:$0xff]  ;;  %v533_v11 = vsel %vm518_vm0, %v531_v4, %v532_v26 }
  0xf7   :  { %v3197_v30 = vmul.f32 %v7913_v56, %v3186_v22  ;;  %v3321_v46 = vmul.f32 %v7914_v60, %v3310_v5  ;;  %611 = vst [vmem:[#allocation3 + $0x2f0] sm:$0x7f] %v530_v51  ;;  %v562_v52 = vrot.slane %v459_v31, 2  ;;  %v2543_v13 = vld [vmem:[#allocation2 + $0x88] sm:$0xfc]  ;;  %v3845_v33 = vmul.f32 %v3838_v34, %v7913_v56 }
  0xf8   :  { %v2544_v16 = vld [vmem:[#allocation2 + $0x98] sm:$0x1]  ;;  %612 = vst [vmem:[#allocation3 + $0x300] sm:$0x7f] %v533_v11  ;;  %v536_v54 = vsel %vm518_vm0, %v534_v43, %v535_v44  ;;  %v564_v0 = vrot.slane %v460_v62, 2  ;;  %v565_v19 = vrot.slane %v461_v20, 2 }
  0xf9   :  { %v3942_v27 = vld [vmem:[#allocation3 + $0x398] sm:$0x7f]  ;;  %613 = vst [vmem:[#allocation3 + $0x310] sm:$0x7f] %v536_v54  ;;  %v563_v22 = vsel %vm518_vm0, %v561_v14, %v562_v52  ;;  %v567_v36 = vrot.slane %v462_v21, 2  ;;  %v568_v5 = vrot.slane %v463_v49, 2  ;;  %v3204_v29 = vadd.f32 %v3197_v30, %v5375_v8 }
  0xfa   :  { %v4046_v35 = vld [vmem:[#allocation3 + $0x398] sm:$0x7f]  ;;  %v2632_v6 = vrot.slane %v2541_v39, 2  ;;  %v3211_v51 = vld [vmem:[#allocation3 + $0x448] sm:$0x7f]  ;;  %v566_v4 = vsel %vm518_vm0, %v564_v0, %v565_v19  ;;  %v2633_v31 = vrot.slane %v2542_v17, 2  ;;  %v3949_v11 = vmul.f32 %v3942_v27, %v7914_v60 }
  0xfb   :  { %622 = vst [vmem:[#allocation3 + $0x3a0] sm:$0x7f] %v563_v22  ;;  %v2635_v26 = vrot.slane %v2543_v13, 2  ;;  %v2636_v34 = vrot.slane %v2544_v16, 2  ;;  %v7915_v43 = vld [vmem:[#allocation32_spill] sm:$0xff]  ;;  %v569_v21 = vsel %vm518_vm0, %v567_v36, %v568_v5  ;;  %v1821_v49 = vadd.f32 %v5506_v28, %v5496_v2 }
  0xfc   :  { %v4053_v62 = vmul.f32 %v4046_v35, %v7915_v43  ;;  %v3335_v20 = vld [vmem:[#allocation3 + $0x448] sm:$0x7f]  ;;  %v3859_v44 = vld [vmem:[#allocation3 + $0x4f8] sm:$0x7f]  ;;  %623 = vst [vmem:[#allocation3 + $0x3b0] sm:$0x7f] %v566_v4  ;;  %v3328_v39 = vadd.f32 %v3321_v46, %v5383_v61  ;;  %v3852_v14 = vadd.f32 %v3845_v33, %v5425_v47  ;;  %v2634_v8 = vsel %vm518_vm0, %v2632_v6, %v2633_v31 }
  0xfd   :  { %v3963_v17 = vld [vmem:[#allocation3 + $0x4f8] sm:$0x7f]  ;;  %624 = vst [vmem:[#allocation3 + $0x3c0] sm:$0x7f] %v569_v21  ;;  %v3956_v30 = vadd.f32 %v3949_v11, %v5433_v10  ;;  %v7916_v16 = vld [vmem:[#allocation24_spill] sm:$0xff]  ;;  %v2637_v35 = vsel %vm518_vm0, %v2635_v26, %v2636_v34  ;;  %v1930_v2 = vadd.f32 %v5509_v32, %v5500_v18  ;;  %v2039_v61 = vadd.f32 %v2032_v55, %v5503_v63  ;;  %v7917_v46 = vld [vmem:[#allocation26_spill] sm:$0xff] }
  0xfe   :  { %v4067_v52 = vld [vmem:[#allocation3 + $0x4f8] sm:$0x7f]  ;;  %v4060_v13 = vadd.f32 %v4053_v62, %v5436_v23  ;;  %v3222_v27 = vmul.f32 %v7916_v16, %v3211_v51  ;;  %2714 = vst [vmem:[#allocation3 + $0x2f8] sm:$0x7f] %v2634_v8  ;;  %v3346_v47 = vmul.f32 %v7917_v46, %v3335_v20  ;;  %v3866_v28 = vmul.f32 %v3859_v44, %v7916_v16  ;;  %v3236_v33 = vld [vmem:[#allocation3 + $0x5a8] sm:$0x7f] }
  0xff   :  { %2715 = vst [vmem:[#allocation3 + $0x308] sm:$0x7f] %v2637_v35  ;;  %v3970_v10 = vmul.f32 %v3963_v17, %v7917_v46  ;;  %v7918_v23 = vld [vmem:[#allocation34_spill] sm:$0xff]  ;;  %v3360_v19 = vld [vmem:[#allocation3 + $0x5a8] sm:$0x7f]  ;;  %v7920_v63 = vld [vmem:[#allocation47_spill] sm:$0xff]  ;;  %v1843_v26 = vadd.f32 %v5085_v48, %v1821_v49  ;;  %v3247_v62 = vmul.f32 %v4942_v57, %v3236_v33  ;;  %v1952_v44 = vadd.f32 %v5088_v40, %v1930_v2 }
 0x100   :  { %v3229_v54 = vadd.f32 %v3222_v27, %v3204_v29  ;;  %v4074_v0 = vmul.f32 %v4067_v52, %v7918_v23  ;;  %v3880_v22 = vld [vmem:[#allocation3 + $0x658] sm:$0x7f]  ;;  %v4456_v36 = vld [vmem:[%s7563_s1 + $0x40] sm:$0x1f]  ;;  %v1181_v32 = vadd.f32 %v7920_v63, %v5511_v59  ;;  %v3434_v29 = vld [vmem:[#allocation3 + $0x2e8] sm:$0x7f]  ;;  %v3353_v6 = vadd.f32 %v3346_v47, %v3328_v39 }
 0x101   :  { %v5553_v18 = vrot.slane %v4456_v36, %v4810_v1  ;;  %v7921_v55 = vld [vmem:[#allocation48_spill] sm:$0xff]  ;;  %v3873_v51 = vadd.f32 %v3866_v28, %v3852_v14  ;;  %v3984_v4 = vld [vmem:[#allocation3 + $0x658] sm:$0x7f]  ;;  %v3977_v34 = vadd.f32 %v3970_v10, %v3956_v30  ;;  %v1088_v20 = vld [vmem:[#allocation3 + $0x2f0] sm:$0x7f]  ;;  %v2061_v21 = vadd.f32 %v5094_v45, %v2039_v61 }
 0x102   :  { %v1310_v5 = vadd.f32 %v7921_v55, %v5516_v7  ;;  %v4088_v31 = vld [vmem:[#allocation3 + $0x658] sm:$0x7f]  ;;  %v4081_v11 = vadd.f32 %v4074_v0, %v4060_v13  ;;  %v3371_v59 = vmul.f32 %v4951_v15, %v3360_v19  ;;  %v3887_v7 = vmul.f32 %v3880_v22, %v4942_v57  ;;  %v1215_v52 = vld [vmem:[#allocation3 + $0x2f0] sm:$0x7f]  ;;  %v1089_v27 = vld [vmem:[#allocation3 + $0x300] sm:$0x7f] }
 0x103   :  { %7919 = vst [vmem:[#allocation136_spill] sm:$0xff] %v5553_v18  ;;  %v5566_v39 = vmul.f32 %v7915_v43, %v3434_v29  ;;  %v3254_v14 = vadd.f32 %v3247_v62, %v3229_v54  ;;  %v3991_v17 = vmul.f32 %v3984_v4, %v4951_v15  ;;  %v7923_v48 = vld [vmem:[#allocation43_spill] sm:$0xff]  ;;  %v1099_v13 = vmul.f32 %v7889_v37, %v1088_v20  ;;  %v1344_v45 = vld [vmem:[#allocation3 + $0x2f0] sm:$0x7f]  ;;  %v1764_v28 = vld [vmem:[#allocation3 + $0x3a0] sm:$0x7f] }
 0x104   :  { %v4095_v49 = vmul.f32 %v4088_v31, %v7923_v48  ;;  %v3378_v8 = vadd.f32 %v3371_v59, %v3353_v6  ;;  %v3894_v30 = vadd.f32 %v3887_v7, %v3873_v51  ;;  %v1207_v40 = vadd.f32 %v5151_v9, %v1181_v32  ;;  %v1090_v35 = vld [vmem:[#allocation3 + $0x310] sm:$0x7f]  ;;  %v1216_v10 = vld [vmem:[#allocation3 + $0x300] sm:$0x7f]  ;;  %v7929_v62 = vld [vmem:[#allocation103_spill] sm:$0xff] }
 0x105   :  { %7922 = vst [vmem:[#allocation47_spill] sm:$0xff] %v5566_v39  ;;  %v3998_v2 = vadd.f32 %v3991_v17, %v3977_v34  ;;  %v1336_v47 = vadd.f32 %v5154_v50, %v1310_v5  ;;  %v5574_v33 = vadd.f32 %v5263_v25, %v1843_v26  ;;  %v1226_v54 = vmul.f32 %v7896_v12, %v1215_v52  ;;  %v1345_v0 = vld [vmem:[#allocation3 + $0x300] sm:$0x7f]  ;;  %v1217_v55 = vld [vmem:[#allocation3 + $0x310] sm:$0x7f] }
 0x106   :  { %v4102_v61 = vadd.f32 %v4095_v49, %v4081_v11  ;;  %v1974_v19 = vadd.f32 %v5273_v53, %v1952_v44  ;;  %v5579_v22 = vadd.f32 %v5276_v41, %v2061_v21  ;;  %v5583_v9 = vrot.slane %v5145_v38, %v4810_v1  ;;  %v1474_v63 = vld [vmem:[#allocation3 + $0x300] sm:$0x7f]  ;;  %v1346_v5 = vld [vmem:[#allocation3 + $0x310] sm:$0x7f]  ;;  %v7926_v41 = vld [vmem:[#allocation101_spill] sm:$0xff] }
 0x107   :  { %v5586_v36 = vadd.f32 %v5211_v24, %v3254_v14  ;;  %v1355_v50 = vmul.f32 %v7900_v3, %v1344_v45  ;;  %v1100_v25 = vmul.f32 %v7889_v37, %v1089_v27  ;;  %v1101_v32 = vmul.f32 %v7889_v37, %v1090_v35  ;;  %v7925_v53 = vld [vmem:[#allocation78_spill] sm:$0xff]  ;;  %v7927_v1 = vld [vmem:[#allocation67_spill] sm:$0xff]  ;;  %v1873_v4 = vld [vmem:[#allocation3 + $0x3a0] sm:$0x7f] }
 0x108   :  { %7924 = vst [vmem:[#allocation48_spill] sm:$0xff] %v5583_v9  ;;  %v5592_v29 = vadd.f32 %v7925_v53, %v3378_v8  ;;  %v5595_v6 = vadd.f32 %v7926_v41, %v3894_v30  ;;  %v5598_v38 = vadd.f32 %v1099_v13, %v7927_v1  ;;  %v1475_v24 = vld [vmem:[#allocation3 + $0x310] sm:$0x7f]  ;;  %v1771_v51 = vmul.f32 %v1764_v28, %v7889_v37  ;;  %v1982_v31 = vld [vmem:[#allocation3 + $0x3a0] sm:$0x7f] }
 0x109   :  { %v5601_v26 = vld [vmem:[#allocation2 + $0xa8] sm:$0xfc]  ;;  %v7928_v34 = vld [vmem:[#allocation102_spill] sm:$0xff]  ;;  %v5607_v20 = vadd.f32 %v7929_v62, %v4102_v61  ;;  %v5609_v44 = vadd.f32 %v1226_v54, %v1207_v40  ;;  %v5611_v21 = vadd.f32 %v1355_v50, %v1336_v47  ;;  %v2091_v59 = vld [vmem:[#allocation3 + $0x3a0] sm:$0x7f]  ;;  %v5614_v52 = vmul.f32 %v7896_v12, %v1216_v10 }
 0x10a   :  { %v5604_v11 = vadd.f32 %v7928_v34, %v3998_v2  ;;  %v2546_v7 = vld [vmem:[#allocation2 + $0xb8] sm:$0x1]  ;;  %v2563_v14 = vld [vmem:[#allocation2 + $0x1c8] sm:$0xfc]  ;;  %v281_v17 = vld [vmem:[#allocation2 + $0xc0] sm:$0x7f]  ;;  %v5617_v8 = vmul.f32 %v7900_v3, %v1345_v0  ;;  %v5623_v45 = vmul.f32 %v7896_v12, %v1217_v55  ;;  %v5632_v10 = vmul.f32 %v7900_v3, %v1346_v5 }
 0x10b   :  { %v292_v49 = vld [vmem:[#allocation2 + $0x220] sm:$0x7f]  ;;  %v7930_v30 = vld [vmem:[#allocation6_spill] sm:$0xff]  ;;  %v2564_v2 = vld [vmem:[#allocation2 + $0x1d8] sm:$0x1]  ;;  %v1880_v1 = vmul.f32 %v1873_v4, %v7896_v12  ;;  %v2665_v9 = vrot.slane %v2563_v14, 2 }
 0x10c   :  { %v5620_v13 = vmul.f32 %v7930_v30, %v1474_v63  ;;  %7932 = vst [vmem:[#allocation78_spill] sm:$0xff] %v5623_v45  ;;  %v1765_v40 = vld [vmem:[#allocation3 + $0x3b0] sm:$0x7f]  ;;  %303 = vst [vmem:[#allocation3 + $0x60] sm:$0x7f] %v281_v17  ;;  %v7935_v28 = vld [vmem:[#allocation88_spill] sm:$0xff]  ;;  %v5635_v0 = vmul.f32 %v7930_v30, %v1475_v24  ;;  %v2098_v34 = vmul.f32 %v2091_v59, %v7930_v30 }
 0x10d   :  { %v1874_v27 = vld [vmem:[#allocation3 + $0x3b0] sm:$0x7f]  ;;  %314 = vst [vmem:[#allocation3 + $0x110] sm:$0x7f] %v292_v49  ;;  %v5629_v54 = vadd.f32 %v1101_v32, %v7935_v28  ;;  %7937 = vst [vmem:[#allocation102_spill] sm:$0xff] %v5632_v10  ;;  %v7939_v53 = vld [vmem:[#allocation36_spill] sm:$0xff] }
 0x10e   :  { %7931 = vst [vmem:[#allocation43_spill] sm:$0xff] %v5620_v13  ;;  %v1983_v35 = vld [vmem:[#allocation3 + $0x3b0] sm:$0x7f]  ;;  %7938 = vst [vmem:[#allocation103_spill] sm:$0xff] %v5635_v0  ;;  %v2565_v50 = vld [vmem:[#allocation2 + $0x1e8] sm:$0xfc]  ;;  %v5638_v41 = vadd.f32 %v1771_v51, %v7939_v53  ;;  %v1772_v51 = vmul.f32 %v1765_v40, %v7889_v37  ;;  %v5651_v49 = vmul.f32 %v1874_v27, %v7896_v12 }
 0x10f   :  { %v7933_v61 = vld [vmem:[#allocation70_spill] sm:$0xff]  ;;  %7936 = vst [vmem:[#allocation67_spill] sm:$0xff] %v5629_v54  ;;  %v2566_v63 = vld [vmem:[#allocation2 + $0x1f8] sm:$0x1]  ;;  %v2567_v55 = vld [vmem:[#allocation2 + $0x208] sm:$0xfc]  ;;  %v5654_v4 = vmul.f32 %v1983_v35, %v7900_v3  ;;  %v5661_v53 = vadd.f32 %v1880_v1, %v5574_v33 }
 0x110   :  { %v5626_v47 = vadd.f32 %v1100_v25, %v7933_v61  ;;  %v1989_v25 = vmul.f32 %v1982_v31, %v7900_v3  ;;  %v2092_v32 = vld [vmem:[#allocation3 + $0x3b0] sm:$0x7f]  ;;  %v1766_v62 = vld [vmem:[#allocation3 + $0x3c0] sm:$0x7f]  ;;  %v2568_v17 = vld [vmem:[#allocation2 + $0x218] sm:$0x1] }
 0x111   :  { %v117_v5 = vld [vmem:[%s7562_s0 + $0x50] sm:$0x7f]  ;;  %v118_v24 = vld [vmem:[%s7562_s0 + $0x58] sm:$0x7f]  ;;  %7940 = vst [vmem:[#allocation70_spill] sm:$0xff] %v5651_v49  ;;  %7941 = vst [vmem:[#allocation88_spill] sm:$0xff] %v5654_v4  ;;  %v5669_v35 = vmul.f32 %v2092_v32, %v7930_v30  ;;  %v1773_v18 = vmul.f32 %v1766_v62, %v7889_v37 }
 0x112   :  { %7934 = vst [vmem:[#allocation101_spill] sm:$0xff] %v5626_v47  ;;  %v2638_v31 = vrot.slane %v5601_v26, 2  ;;  %v131_v59 = vld [vmem:[%s7562_s0 + $0xc0] sm:$0x7f]  ;;  %v2387_v61 = vld [vmem:[#allocation2 + $0xc8] sm:$0x7f]  ;;  %v5663_v39 = vadd.f32 %v1989_v25, %v1974_v19  ;;  %v5666_v26 = vadd.f32 %v2098_v34, %v5579_v22 }
 0x113   :  { %v2398_v28 = vld [vmem:[#allocation2 + $0x228] sm:$0x7f]  ;;  %v2201_v40 = vld [vmem:[#allocation3 + $0x3b0] sm:$0x7f]  ;;  %v1875_v0 = vld [vmem:[#allocation3 + $0x3c0] sm:$0x7f] }
 0x114   :  { %v1984_v27 = vld [vmem:[#allocation3 + $0x3c0] sm:$0x7f]  ;;  %v2639_v13 = vrot.slane %v2546_v7, 2  ;;  %2409 = vst [vmem:[#allocation3 + $0x68] sm:$0x7f] %v2387_v61  ;;  %7942 = vst [vmem:[#allocation36_spill] sm:$0xff] %v5669_v35 }
 0x115   :  { %2420 = vst [vmem:[#allocation3 + $0x118] sm:$0x7f] %v2398_v28  ;;  %v2093_v10 = vld [vmem:[#allocation3 + $0x3c0] sm:$0x7f]  ;;  %v3187_v1 = vld [vmem:[#allocation3 + $0x2f8] sm:$0x7f] }
 0x116   :  { %v2202_v33 = vld [vmem:[#allocation3 + $0x3c0] sm:$0x7f]  ;;  %v2666_v19 = vrot.slane %v2564_v2, 2  ;;  %v132_v25 = vld [vmem:[%s7562_s0 + $0xc8] sm:$0x7f]  ;;  %v2640_v14 = vsel %vm518_vm0, %v2638_v31, %v2639_v13  ;;  %v2668_v61 = vrot.slane %v2565_v50, 2 }
 0x117   :  { %v3311_v7 = vld [vmem:[#allocation3 + $0x2f8] sm:$0x7f]  ;;  %v2669_v28 = vrot.slane %v2566_v63, 2  ;;  %v2671_v22 = vrot.slane %v2567_v55, 2  ;;  %v3188_v34 = vld [vmem:[#allocation3 + $0x308] sm:$0x7f]  ;;  %v5685_v55 = vmul.f32 %v1875_v0, %v7896_v12  ;;  %v5695_v0 = vmul.f32 %v2093_v10, %v7930_v30 }
 0x118   :  { %2716 = vst [vmem:[#allocation3 + $0x318] sm:$0x7f] %v2640_v14  ;;  %v2667_v32 = vsel %vm518_vm0, %v2665_v9, %v2666_v19  ;;  %v2672_v45 = vrot.slane %v2568_v17, 2  ;;  %v173_v62 = vrot.slane %v117_v5, 6  ;;  %v174_v37 = vrot.slane %v118_v24, 6  ;;  %v7943_v35 = vld [vmem:[#allocation92_spill] sm:$0xff] }
 0x119   :  { %v5678_v4 = vadd.f32 %v1772_v51, %v7943_v35  ;;  %2725 = vst [vmem:[#allocation3 + $0x3a8] sm:$0x7f] %v2667_v32  ;;  %v2670_v2 = vsel %vm518_vm0, %v2668_v61, %v2669_v28  ;;  %v187_v49 = vrot.slane %v131_v59, 6  ;;  %v188_v54 = vrot.slane %v132_v25, 6  ;;  %v325_v47 = vld [vmem:[#allocation2 + $0xc0] sm:$0xfe] }
 0x11a   :  { %v336_v13 = vld [vmem:[#allocation2 + $0x220] sm:$0xfe]  ;;  %v7945_v50 = vld [vmem:[#allocation46_spill] sm:$0xff]  ;;  %7947 = vst [vmem:[#allocation138_spill] sm:$0xff] %v5685_v55  ;;  %v5688_v9 = vmul.f32 %v1984_v27, %v7900_v3  ;;  %v3435_v17 = vld [vmem:[#allocation3 + $0x2f8] sm:$0x7f]  ;;  %v2673_v24 = vsel %vm518_vm0, %v2671_v22, %v2672_v45  ;;  %v3198_v19 = vmul.f32 %v7913_v56, %v3187_v1  ;;  %v3322_v14 = vmul.f32 %v7914_v60, %v3311_v7 }
 0x11b   :  { %7944 = vst [vmem:[#allocation92_spill] sm:$0xff] %v5678_v4  ;;  %v5682_v63 = vmul.f32 %v2201_v40, %v7945_v50  ;;  %v3312_v5 = vld [vmem:[#allocation3 + $0x308] sm:$0x7f]  ;;  %2726 = vst [vmem:[#allocation3 + $0x3b8] sm:$0x7f] %v2670_v2  ;;  %v7949_v40 = vld [vmem:[#allocation96_spill] sm:$0xff]  ;;  %v5698_v27 = vmul.f32 %v2202_v33, %v7945_v50  ;;  %v3428_v10 = vadd.f32 %v5389_v42, %v5592_v29 }
 0x11c   :  { %7948 = vst [vmem:[#allocation139_spill] sm:$0xff] %v5688_v9  ;;  %239 = vst [vmem:[#allocation2 + $0xe0] sm:$0xfc] %v173_v62  ;;  %v636_v51 = vld [vmem:[#allocation2 + $0x60] sm:$0xf8]  ;;  %v5692_v35 = vadd.f32 %v1773_v18, %v7949_v40  ;;  %v3304_v18 = vadd.f32 %v5378_v58, %v5586_v36  ;;  %v369_v28 = vrot.slane %v325_v47, 1  ;;  %v3199_v1 = vmul.f32 %v7913_v56, %v3188_v34 }
 0x11d   :  { %7946 = vst [vmem:[#allocation137_spill] sm:$0xff] %v5682_v63  ;;  %241 = vst [vmem:[#allocation2 + $0xf0] sm:$0x1] %v173_v62  ;;  %v637_v31 = vld [vmem:[#allocation2 + $0x70] sm:$0x3]  ;;  %v380_v32 = vrot.slane %v336_v13, 1  ;;  %v3446_v42 = vmul.f32 %v7915_v43, %v3435_v17  ;;  %v5712_v29 = vmul.f32 %v7914_v60, %v3312_v5 }
 0x11e   :  { %240 = vst [vmem:[#allocation2 + $0xe8] sm:$0xfc] %v174_v37  ;;  %242 = vst [vmem:[#allocation2 + $0xf8] sm:$0x1] %v174_v37  ;;  %v658_v59 = vld [vmem:[#allocation2 + $0x1c0] sm:$0xf8] }
 0x11f   :  { %7950 = vst [vmem:[#allocation96_spill] sm:$0xff] %v5692_v35  ;;  %7951 = vst [vmem:[#allocation140_spill] sm:$0xff] %v5695_v0  ;;  %v659_v37 = vld [vmem:[#allocation2 + $0x1d0] sm:$0x3]  ;;  %v836_v45 = vld [vmem:[#allocation2 + $0x60] sm:$0xf0] }
 0x120   :  { %7952 = vst [vmem:[#allocation141_spill] sm:$0xff] %v5698_v27  ;;  %2727 = vst [vmem:[#allocation3 + $0x3c8] sm:$0x7f] %v2673_v24  ;;  %v837_v25 = vld [vmem:[#allocation2 + $0x70] sm:$0x7]  ;;  %v729_v62 = vrot.slane %v637_v31, 3 }
 0x121   :  { %267 = vst [vmem:[#allocation2 + $0x240] sm:$0xfc] %v187_v49  ;;  %269 = vst [vmem:[#allocation2 + $0x250] sm:$0x1] %v187_v49  ;;  %v3436_v33 = vld [vmem:[#allocation3 + $0x308] sm:$0x7f] }
 0x122   :  { %268 = vst [vmem:[#allocation2 + $0x248] sm:$0xfc] %v188_v54  ;;  %270 = vst [vmem:[#allocation2 + $0x258] sm:$0x1] %v188_v54  ;;  %v3560_v61 = vld [vmem:[#allocation3 + $0x308] sm:$0x7f]  ;;  %v5718_v31 = vmul.f32 %v7915_v43, %v3436_v33 }
 0x123   :  { %v1041_v22 = vld [vmem:[#allocation3 + $0x60] sm:$0x7f]  ;;  %v728_v54 = vrot.slane %v636_v51, 3  ;;  %414 = vst [vmem:[#allocation3 + $0x1c0] sm:$0x7f] %v369_v28  ;;  %v761_v24 = vrot.slane %v658_v59, 3  ;;  %v5715_v51 = vadd.f32 %v3322_v14, %v3304_v18 }
 0x124   :  { %v1166_v49 = vld [vmem:[#allocation3 + $0x60] sm:$0x7f]  ;;  %v762_v40 = vrot.slane %v659_v37, 3  ;;  %v928_v58 = vrot.slane %v836_v45, 4  ;;  %v929_v36 = vrot.slane %v837_v25, 4  ;;  %v7953_v7 = vld [vmem:[#allocation37_spill] sm:$0xff]  ;;  %v5724_v25 = vadd.f32 %v3446_v42, %v3428_v10 }
 0x125   :  { %v1295_v2 = vld [vmem:[#allocation3 + $0x60] sm:$0x7f]  ;;  %v5708_v27 = vadd.f32 %v3198_v19, %v7953_v7  ;;  %7954 = vst [vmem:[#allocation37_spill] sm:$0xff] %v5712_v29  ;;  %v1723_v34 = vld [vmem:[#allocation3 + $0x110] sm:$0x7f]  ;;  %v730_v13 = vsel %vm718_vm1, %v728_v54, %v729_v62  ;;  %7955 = vst [vmem:[#allocation142_spill] sm:$0xff] %v5718_v31 }
 0x126   :  { %v1424_v47 = vld [vmem:[#allocation3 + $0x60] sm:$0x7f]  ;;  %v1832_v0 = vld [vmem:[#allocation3 + $0x110] sm:$0x7f]  ;;  %425 = vst [vmem:[#allocation3 + $0x270] sm:$0x7f] %v380_v32  ;;  %v763_v5 = vsel %vm718_vm1, %v761_v24, %v762_v40 }
 0x127   :  { %v7956_v59 = vld [vmem:[#allocation75_spill] sm:$0xff]  ;;  %v1941_v45 = vld [vmem:[#allocation3 + $0x110] sm:$0x7f]  ;;  %811 = vst [vmem:[#allocation3 + $0x450] sm:$0x7f] %v730_v13  ;;  %v7958_v28 = vld [vmem:[#allocation113_spill] sm:$0xff] }
 0x128   :  { %v5721_v37 = vmul.f32 %v7956_v59, %v3560_v61  ;;  %v3189_v19 = vld [vmem:[#allocation3 + $0x318] sm:$0x7f]  ;;  %v2050_v17 = vld [vmem:[#allocation3 + $0x110] sm:$0x7f]  ;;  %v5727_v32 = vadd.f32 %v3199_v1, %v7958_v28  ;;  %v3839_v54 = vld [vmem:[#allocation3 + $0x3a8] sm:$0x7f]  ;;  %v930_v61 = vsel %vm918_vm2, %v928_v58, %v929_v36 }
 0x129   :  { %v7960_v18 = vld [vmem:[#allocation121_spill] sm:$0xff]  ;;  %v2159_v33 = vld [vmem:[#allocation3 + $0x110] sm:$0x7f]  ;;  %822 = vst [vmem:[#allocation3 + $0x500] sm:$0x7f] %v763_v5  ;;  %v7963_v40 = vld [vmem:[#allocation7_spill] sm:$0xff]  ;;  %v3200_v5 = vmul.f32 %v7913_v56, %v3189_v19 }
 0x12a   :  { %7957 = vst [vmem:[#allocation143_spill] sm:$0xff] %v5721_v37  ;;  %7959 = vst [vmem:[#allocation113_spill] sm:$0xff] %v5727_v32  ;;  %v3936_v14 = vadd.f32 %v7960_v18, %v5595_v6  ;;  %v3140_v62 = vld [vmem:[#allocation3 + $0x68] sm:$0x7f]  ;;  %v3313_v7 = vld [vmem:[#allocation3 + $0x318] sm:$0x7f]  ;;  %v5737_v42 = vmul.f32 %v7963_v40, %v1041_v22 }
 0x12b   :  { %v7961_v37 = vld [vmem:[#allocation40_spill] sm:$0xff]  ;;  %v7962_v24 = vld [vmem:[#allocation122_spill] sm:$0xff]  ;;  %1011 = vst [vmem:[#allocation3 + $0x5b0] sm:$0x7f] %v930_v61  ;;  %v3264_v6 = vld [vmem:[#allocation3 + $0x68] sm:$0x7f] }
 0x12c   :  { %v4040_v13 = vadd.f32 %v7961_v37, %v5604_v11  ;;  %v4144_v10 = vadd.f32 %v7962_v24, %v5607_v20  ;;  %v7964_v1 = vld [vmem:[#allocation8_spill] sm:$0xff]  ;;  %v3388_v18 = vld [vmem:[#allocation3 + $0x68] sm:$0x7f]  ;;  %v3437_v58 = vld [vmem:[#allocation3 + $0x318] sm:$0x7f]  ;;  %v5750_v20 = vmul.f32 %v1723_v34, %v7963_v40 }
 0x12d   :  { %v5740_v28 = vmul.f32 %v7964_v1, %v1166_v49  ;;  %v3943_v36 = vld [vmem:[#allocation3 + $0x3a8] sm:$0x7f]  ;;  %v3840_v9 = vld [vmem:[#allocation3 + $0x3b8] sm:$0x7f]  ;;  %v3846_v49 = vmul.f32 %v3839_v54, %v7913_v56  ;;  %v7975_v34 = vld [vmem:[#allocation10_spill] sm:$0xff] }
 0x12e   :  { %v7966_v55 = vld [vmem:[#allocation25_spill] sm:$0xff]  ;;  %v3561_v22 = vld [vmem:[#allocation3 + $0x318] sm:$0x7f]  ;;  %v5766_v40 = vmul.f32 %v7975_v34, %v3140_v62 }
 0x12f   :  { %7965 = vst [vmem:[#allocation121_spill] sm:$0xff] %v5740_v28  ;;  %v5744_v50 = vmul.f32 %v7966_v55, %v1295_v2  ;;  %v7968_v11 = vld [vmem:[#allocation45_spill] sm:$0xff]  ;;  %v5754_v28 = vmul.f32 %v1832_v0, %v7964_v1  ;;  %v5757_v19 = vmul.f32 %v1941_v45, %v7966_v55  ;;  %v7977_v54 = vld [vmem:[#allocation11_spill] sm:$0xff]  ;;  %v5775_v45 = vmul.f32 %v7914_v60, %v3313_v7  ;;  %v7990_v1 = vld [vmem:[#allocation128_spill] sm:$0xff] }
 0x130   :  { %v5747_v37 = vmul.f32 %v7968_v11, %v1424_v47  ;;  %v4047_v61 = vld [vmem:[#allocation3 + $0x3a8] sm:$0x7f]  ;;  %v5760_v2 = vmul.f32 %v2050_v17, %v7968_v11  ;;  %7976 = vst [vmem:[#allocation10_spill] sm:$0xff] %v5766_v40  ;;  %v5769_v3 = vmul.f32 %v7977_v54, %v3264_v6  ;;  %v5778_v17 = vmul.f32 %v7915_v43, %v3437_v58  ;;  %v4256_v62 = vld [vmem:[#allocation3 + $0x3b8] sm:$0x7f] }
 0x131   :  { %7967 = vst [vmem:[#allocation40_spill] sm:$0xff] %v5744_v50  ;;  %v4151_v24 = vld [vmem:[#allocation3 + $0x3a8] sm:$0x7f]  ;;  %7970 = vst [vmem:[#allocation7_spill] sm:$0xff] %v5754_v28  ;;  %v3944_v50 = vld [vmem:[#allocation3 + $0x3b8] sm:$0x7f]  ;;  %v5786_v6 = vmul.f32 %v7956_v59, %v3561_v22 }
 0x132   :  { %7969 = vst [vmem:[#allocation122_spill] sm:$0xff] %v5747_v37  ;;  %7971 = vst [vmem:[#allocation144_spill] sm:$0xff] %v5757_v19  ;;  %v3841_v47 = vld [vmem:[#allocation3 + $0x3c8] sm:$0x7f]  ;;  %v7973_v37 = vld [vmem:[#allocation20_spill] sm:$0xff]  ;;  %v4158_v7 = vmul.f32 %v4151_v24, %v7956_v59 }
 0x133   :  { %7972 = vst [vmem:[#allocation145_spill] sm:$0xff] %v5760_v2  ;;  %v5763_v30 = vmul.f32 %v2159_v33, %v7973_v37  ;;  %7978 = vst [vmem:[#allocation147_spill] sm:$0xff] %v5769_v3  ;;  %v7979_v12 = vld [vmem:[#allocation29_spill] sm:$0xff]  ;;  %v3950_v2 = vmul.f32 %v3943_v36, %v7914_v60  ;;  %v3847_v33 = vmul.f32 %v3840_v9, %v7913_v56  ;;  %v4152_v19 = vld [vmem:[#allocation3 + $0x3b8] sm:$0x7f] }
 0x134   :  { %v5772_v0 = vmul.f32 %v7979_v12, %v3388_v18  ;;  %7981 = vst [vmem:[#allocation149_spill] sm:$0xff] %v5775_v45  ;;  %7982 = vst [vmem:[#allocation150_spill] sm:$0xff] %v5778_v17  ;;  %v7983_v28 = vld [vmem:[#allocation120_spill] sm:$0xff]  ;;  %v4054_v18 = vmul.f32 %v4047_v61, %v7915_v43  ;;  %v4049_v58 = vld [vmem:[#allocation3 + $0x3c8] sm:$0x7f]  ;;  %v5796_v45 = vmul.f32 %v3944_v50, %v7914_v60 }
 0x135   :  { %7974 = vst [vmem:[#allocation146_spill] sm:$0xff] %v5763_v30  ;;  %v4048_v30 = vld [vmem:[#allocation3 + $0x3b8] sm:$0x7f]  ;;  %v5783_v37 = vadd.f32 %v3200_v5, %v7983_v28  ;;  %7985 = vst [vmem:[#allocation151_spill] sm:$0xff] %v5786_v6  ;;  %v1066_v3 = vld [vmem:[#allocation3 + $0x1c0] sm:$0x7f]  ;;  %v5793_v9 = vadd.f32 %v3950_v2, %v3936_v14  ;;  %v3848_v28 = vmul.f32 %v3841_v47, %v7913_v56 }
 0x136   :  { %7980 = vst [vmem:[#allocation148_spill] sm:$0xff] %v5772_v0  ;;  %v3945_v0 = vld [vmem:[#allocation3 + $0x3c8] sm:$0x7f]  ;;  %v7986_v17 = vld [vmem:[#allocation123_spill] sm:$0xff]  ;;  %v1113_v22 = vld [vmem:[#allocation3 + $0x450] sm:$0x7f]  ;;  %v5799_v11 = vadd.f32 %v4054_v18, %v4040_v13  ;;  %v5801_v61 = vadd.f32 %v4158_v7, %v4144_v10  ;;  %v5804_v24 = vmul.f32 %v4048_v30, %v7915_v43  ;;  %v5808_v50 = vadd.f32 %v3847_v33, %v7990_v1 }
 0x137   :  { %7984 = vst [vmem:[#allocation120_spill] sm:$0xff] %v5783_v37  ;;  %v5791_v36 = vadd.f32 %v3846_v49, %v7986_v17  ;;  %7987 = vst [vmem:[#allocation123_spill] sm:$0xff] %v5796_v45  ;;  %v4153_v5 = vld [vmem:[#allocation3 + $0x3c8] sm:$0x7f]  ;;  %v1241_v6 = vld [vmem:[#allocation3 + $0x450] sm:$0x7f]  ;;  %v5811_v47 = vmul.f32 %v4152_v19, %v7956_v59  ;;  %v5818_v32 = vmul.f32 %v3945_v0, %v7914_v60 }
 0x138   :  { %7988 = vst [vmem:[#allocation152_spill] sm:$0xff] %v5804_v24  ;;  %v4257_v55 = vld [vmem:[#allocation3 + $0x3c8] sm:$0x7f]  ;;  %v1192_v49 = vld [vmem:[#allocation3 + $0x1c0] sm:$0x7f]  ;;  %v7989_v14 = vld [vmem:[#allocation19_spill] sm:$0xff]  ;;  %v5821_v35 = vmul.f32 %v4049_v58, %v7915_v43  ;;  %v5824_v1 = vmul.f32 %v4153_v5, %v7956_v59 }
 0x139   :  { %v1321_v17 = vld [vmem:[#allocation3 + $0x1c0] sm:$0x7f]  ;;  %v1124_v2 = vmul.f32 %v7989_v14, %v1113_v22  ;;  %7991 = vst [vmem:[#allocation128_spill] sm:$0xff] %v5808_v50  ;;  %7992 = vst [vmem:[#allocation153_spill] sm:$0xff] %v5811_v47  ;;  %v7995_v13 = vld [vmem:[#allocation9_spill] sm:$0xff] }
 0x13a   :  { %v7993_v56 = vld [vmem:[#allocation76_spill] sm:$0xff]  ;;  %v1077_v10 = vmul.f32 %v7995_v13, %v1066_v3  ;;  %v1745_v7 = vld [vmem:[#allocation3 + $0x270] sm:$0x7f]  ;;  %7996 = vst [vmem:[#allocation9_spill] sm:$0xff] %v5818_v32  ;;  %7997 = vst [vmem:[#allocation155_spill] sm:$0xff] %v5821_v35 }
 0x13b   :  { %v5814_v37 = vmul.f32 %v4256_v62, %v7993_v56  ;;  %v1450_v18 = vld [vmem:[#allocation3 + $0x1c0] sm:$0x7f]  ;;  %7998 = vst [vmem:[#allocation156_spill] sm:$0xff] %v5824_v1  ;;  %v1854_v33 = vld [vmem:[#allocation3 + $0x270] sm:$0x7f]  ;;  %v5831_v3 = vmul.f32 %v4257_v55, %v7993_v56  ;;  %v8005_v32 = vld [vmem:[#allocation27_spill] sm:$0xff]  ;;  %v1131_v55 = vadd.f32 %v1124_v2, %v5598_v38 }
 0x13c   :  { %v858_v30 = vld [vmem:[#allocation2 + $0x1c0] sm:$0xf0]  ;;  %v7999_v19 = vld [vmem:[#allocation22_spill] sm:$0xff]  ;;  %v5837_v58 = vmul.f32 %v8005_v32, %v1321_v17  ;;  %v2431_v59 = vld [vmem:[#allocation2 + $0xc8] sm:$0xfe]  ;;  %v5848_v17 = vadd.f32 %v1077_v10, %v5737_v42 }
 0x13d   :  { %7994 = vst [vmem:[#allocation154_spill] sm:$0xff] %v5814_v37  ;;  %v1252_v22 = vmul.f32 %v7999_v19, %v1241_v6  ;;  %v1370_v50 = vld [vmem:[#allocation3 + $0x450] sm:$0x7f]  ;;  %v8000_v37 = vld [vmem:[#allocation133_spill] sm:$0xff]  ;;  %8002 = vst [vmem:[#allocation157_spill] sm:$0xff] %v5831_v3 }
 0x13e   :  { %v859_v62 = vld [vmem:[#allocation2 + $0x1d0] sm:$0x7]  ;;  %v5828_v47 = vadd.f32 %v3848_v28, %v8000_v37  ;;  %v8003_v24 = vld [vmem:[#allocation12_spill] sm:$0xff]  ;;  %8006 = vst [vmem:[#allocation159_spill] sm:$0xff] %v5837_v58  ;;  %v2442_v43 = vld [vmem:[#allocation2 + $0x228] sm:$0xfe]  ;;  %v5843_v37 = vmul.f32 %v1745_v7, %v7995_v13 }
 0x13f   :  { %v5834_v0 = vmul.f32 %v8003_v24, %v1192_v49  ;;  %v1963_v35 = vld [vmem:[#allocation3 + $0x270] sm:$0x7f]  ;;  %v8007_v6 = vld [vmem:[#allocation5_spill] sm:$0xff]  ;;  %v1259_v49 = vadd.f32 %v1252_v22, %v5609_v44  ;;  %8009 = vst [vmem:[#allocation161_spill] sm:$0xff] %v5848_v17  ;;  %v8010_v58 = vld [vmem:[#allocation31_spill] sm:$0xff]  ;;  %v962_v45 = vrot.slane %v859_v62, 4 }
 0x140   :  { %8001 = vst [vmem:[#allocation133_spill] sm:$0xff] %v5828_v47  ;;  %v1138_v5 = vld [vmem:[#allocation3 + $0x5b0] sm:$0x7f]  ;;  %v5840_v60 = vmul.f32 %v8007_v6, %v1450_v18  ;;  %v2739_v3 = vld [vmem:[#allocation2 + $0x68] sm:$0xf8]  ;;  %v1381_v56 = vmul.f32 %v8010_v58, %v1370_v50  ;;  %v961_v47 = vrot.slane %v858_v30, 4  ;;  %v5855_v13 = vmul.f32 %v1963_v35, %v8005_v32 }
 0x141   :  { %8004 = vst [vmem:[#allocation158_spill] sm:$0xff] %v5834_v0  ;;  %v1267_v1 = vld [vmem:[#allocation3 + $0x5b0] sm:$0x7f]  ;;  %v1786_v0 = vld [vmem:[#allocation3 + $0x500] sm:$0x7f]  ;;  %v8013_v38 = vld [vmem:[#allocation33_spill] sm:$0xff] }
 0x142   :  { %8008 = vst [vmem:[#allocation160_spill] sm:$0xff] %v5840_v60  ;;  %v2072_v28 = vld [vmem:[#allocation3 + $0x270] sm:$0x7f]  ;;  %v2740_v31 = vld [vmem:[#allocation2 + $0x78] sm:$0x3]  ;;  %v5852_v60 = vmul.f32 %v1854_v33, %v8003_v24  ;;  %8012 = vst [vmem:[#allocation163_spill] sm:$0xff] %v5855_v13  ;;  %v1149_v2 = vmul.f32 %v8013_v38, %v1138_v5  ;;  %v5863_v50 = vadd.f32 %v1381_v56, %v5611_v21 }
 0x143   :  { %v2761_v18 = vld [vmem:[#allocation2 + $0x1c8] sm:$0xf8]  ;;  %v2762_v22 = vld [vmem:[#allocation2 + $0x1d8] sm:$0x3]  ;;  %v5860_v10 = vmul.f32 %v2072_v28, %v8007_v6  ;;  %v1793_v30 = vmul.f32 %v1786_v0, %v7989_v14  ;;  %v963_v33 = vsel %vm918_vm2, %v961_v47, %v962_v45  ;;  %v638_v32 = vld [vmem:[#allocation2 + $0x80] sm:$0xf8] }
 0x144   :  { %8011 = vst [vmem:[#allocation162_spill] sm:$0xff] %v5852_v60  ;;  %v8014_v44 = vld [vmem:[#allocation41_spill] sm:$0xff]  ;;  %v2938_v42 = vld [vmem:[#allocation2 + $0x78] sm:$0x7]  ;;  %v1156_v24 = vadd.f32 %v1149_v2, %v1131_v55  ;;  %1022 = vst [vmem:[#allocation3 + $0x660] sm:$0x7f] %v963_v33 }
 0x145   :  { %v1278_v7 = vmul.f32 %v8014_v44, %v1267_v1  ;;  %v2937_v29 = vld [vmem:[#allocation2 + $0x68] sm:$0xf0]  ;;  %8015 = vst [vmem:[#allocation33_spill] sm:$0xff] %v5860_v10  ;;  %v2960_v35 = vld [vmem:[#allocation2 + $0x1d8] sm:$0x7]  ;;  %v2475_v1 = vrot.slane %v2431_v59, 1 }
 0x146   :  { %v2959_v62 = vld [vmem:[#allocation2 + $0x1c8] sm:$0xf0]  ;;  %v2486_v13 = vrot.slane %v2442_v43, 1  ;;  %v639_v60 = vld [vmem:[#allocation2 + $0x90] sm:$0x3]  ;;  %v2830_v28 = vrot.slane %v2739_v3, 3 }
 0x147   :  { %v1285_v5 = vadd.f32 %v1278_v7, %v1259_v49  ;;  %v640_v17 = vld [vmem:[#allocation2 + $0xa0] sm:$0xf8]  ;;  %v2831_v6 = vrot.slane %v2740_v31, 3  ;;  %v2863_v10 = vrot.slane %v2761_v18, 3  ;;  %v2864_v56 = vrot.slane %v2762_v22, 3  ;;  %v8016_v18 = vld [vmem:[#allocation50_spill] sm:$0xff] }
 0x148   :  { %v1895_v4 = vld [vmem:[#allocation3 + $0x500] sm:$0x7f]  ;;  %v641_v21 = vld [vmem:[#allocation2 + $0xb0] sm:$0x3]  ;;  %2519 = vst [vmem:[#allocation3 + $0x1c8] sm:$0x7f] %v2475_v1  ;;  %v1182_v22 = vadd.f32 %v8016_v18, %v1156_v24 }
 0x149   :  { %2530 = vst [vmem:[#allocation3 + $0x278] sm:$0x7f] %v2486_v13  ;;  %v3028_v0 = vrot.slane %v2937_v29, 4  ;;  %v3029_v45 = vrot.slane %v2938_v42, 4  ;;  %v3061_v47 = vrot.slane %v2959_v62, 4  ;;  %v3062_v63 = vrot.slane %v2960_v35, 4 }
 0x14a   :  { %v660_v40 = vld [vmem:[#allocation2 + $0x1e0] sm:$0xf8]  ;;  %v2832_v49 = vsel %vm718_vm1, %v2830_v28, %v2831_v6  ;;  %v2865_v43 = vsel %vm718_vm1, %v2863_v10, %v2864_v56  ;;  %v731_v59 = vrot.slane %v638_v32, 3  ;;  %v732_v2 = vrot.slane %v639_v60, 3  ;;  %v661_v7 = vld [vmem:[#allocation2 + $0x1f0] sm:$0x3] }
 0x14b   :  { %v2004_v55 = vld [vmem:[#allocation3 + $0x500] sm:$0x7f]  ;;  %v2181_v3 = vld [vmem:[#allocation3 + $0x270] sm:$0x7f]  ;;  %v8017_v33 = vld [vmem:[#allocation51_spill] sm:$0xff]  ;;  %v3030_v29 = vsel %vm918_vm2, %v3028_v0, %v3029_v45  ;;  %v3063_v42 = vsel %vm918_vm2, %v3061_v47, %v3062_v63  ;;  %v734_v32 = vrot.slane %v640_v17, 3  ;;  %v5876_v62 = vadd.f32 %v5843_v37, %v5750_v20 }
 0x14c   :  { %v2113_v31 = vld [vmem:[#allocation3 + $0x500] sm:$0x7f]  ;;  %v1311_v1 = vadd.f32 %v8017_v33, %v1285_v5  ;;  %v1396_v13 = vld [vmem:[#allocation3 + $0x5b0] sm:$0x7f]  ;;  %2912 = vst [vmem:[#allocation3 + $0x458] sm:$0x7f] %v2832_v49  ;;  %v733_v6 = vsel %vm718_vm1, %v731_v59, %v732_v2  ;;  %v1902_v24 = vmul.f32 %v1895_v4, %v7999_v19  ;;  %v2011_v35 = vmul.f32 %v2004_v55, %v8010_v58 }
 0x14d   :  { %2923 = vst [vmem:[#allocation3 + $0x508] sm:$0x7f] %v2865_v43  ;;  %3110 = vst [vmem:[#allocation3 + $0x5b8] sm:$0x7f] %v3030_v29  ;;  %v735_v60 = vrot.slane %v641_v21, 3  ;;  %v764_v10 = vrot.slane %v660_v40, 3  ;;  %v1800_v4 = vadd.f32 %v1793_v30, %v5638_v41 }
 0x14e   :  { %3121 = vst [vmem:[#allocation3 + $0x668] sm:$0x7f] %v3063_v42  ;;  %v3512_v5 = vld [vmem:[#allocation3 + $0x68] sm:$0x7f]  ;;  %v3800_v28 = vld [vmem:[#allocation3 + $0x118] sm:$0x7f]  ;;  %v1909_v37 = vadd.f32 %v1902_v24, %v5661_v53  ;;  %v2018_v55 = vadd.f32 %v2011_v35, %v5663_v39 }
 0x14f   :  { %812 = vst [vmem:[#allocation3 + $0x460] sm:$0x7f] %v733_v6  ;;  %v765_v56 = vrot.slane %v661_v7, 3  ;;  %v8018_v63 = vld [vmem:[#allocation23_spill] sm:$0xff]  ;;  %v8020_v45 = vld [vmem:[#allocation49_spill] sm:$0xff]  ;;  %v736_v20 = vsel %vm718_vm1, %v734_v32, %v735_v60  ;;  %v8022_v42 = vld [vmem:[#allocation68_spill] sm:$0xff]  ;;  %v5901_v60 = vmul.f32 %v3800_v28, %v7975_v34 }
 0x150   :  { %v5881_v0 = vmul.f32 %v2181_v3, %v8018_v63  ;;  %v2120_v47 = vmul.f32 %v2113_v31, %v8020_v45  ;;  %v8021_v17 = vld [vmem:[#allocation21_spill] sm:$0xff]  ;;  %v1808_v40 = vld [vmem:[#allocation3 + $0x660] sm:$0x7f]  ;;  %v3904_v49 = vld [vmem:[#allocation3 + $0x118] sm:$0x7f]  ;;  %v1208_v41 = vadd.f32 %v8022_v42, %v1182_v22 }
 0x151   :  { %v1407_v21 = vmul.f32 %v8021_v17, %v1396_v13  ;;  %v4008_v43 = vld [vmem:[#allocation3 + $0x118] sm:$0x7f]  ;;  %v1917_v59 = vld [vmem:[#allocation3 + $0x660] sm:$0x7f]  ;;  %813 = vst [vmem:[#allocation3 + $0x470] sm:$0x7f] %v736_v20  ;;  %v766_v7 = vsel %vm718_vm1, %v764_v10, %v765_v56  ;;  %v1815_v39 = vmul.f32 %v1808_v40, %v8013_v38 }
 0x152   :  { %8019 = vst [vmem:[#allocation41_spill] sm:$0xff] %v5881_v0  ;;  %v4112_v2 = vld [vmem:[#allocation3 + $0x118] sm:$0x7f]  ;;  %v5890_v3 = vld [vmem:[#allocation2 + $0x200] sm:$0xf8]  ;;  %v2127_v31 = vadd.f32 %v2120_v47, %v5666_v26  ;;  %v8023_v30 = vld [vmem:[#allocation69_spill] sm:$0xff]  ;;  %v5904_v26 = vmul.f32 %v3904_v49, %v7977_v54  ;;  %v5908_v10 = vmul.f32 %v4008_v43, %v7979_v12  ;;  %v5923_v35 = vadd.f32 %v5614_v52, %v1208_v41 }
 0x153   :  { %v1414_v18 = vadd.f32 %v1407_v21, %v5863_v50  ;;  %v2026_v33 = vld [vmem:[#allocation3 + $0x660] sm:$0x7f]  ;;  %v4216_v29 = vld [vmem:[#allocation3 + $0x118] sm:$0x7f]  ;;  %v1337_v53 = vadd.f32 %v8023_v30, %v1311_v1  ;;  %823 = vst [vmem:[#allocation3 + $0x510] sm:$0x7f] %v766_v7  ;;  %v1924_v50 = vmul.f32 %v1917_v59, %v8014_v44 }
 0x154   :  { %v2135_v13 = vld [vmem:[#allocation3 + $0x660] sm:$0x7f]  ;;  %8026 = vst [vmem:[#allocation51_spill] sm:$0xff] %v5904_v26  ;;  %8027 = vst [vmem:[#allocation68_spill] sm:$0xff] %v5908_v10  ;;  %v3165_v1 = vld [vmem:[#allocation3 + $0x1c8] sm:$0x7f]  ;;  %v2033_v56 = vmul.f32 %v2026_v33, %v8021_v17 }
 0x155   :  { %v8024_v6 = vld [vmem:[#allocation72_spill] sm:$0xff]  ;;  %v3289_v24 = vld [vmem:[#allocation3 + $0x1c8] sm:$0x7f]  ;;  %v3212_v49 = vld [vmem:[#allocation3 + $0x458] sm:$0x7f] }
 0x156   :  { %v5898_v32 = vmul.f32 %v8024_v6, %v3512_v5  ;;  %v5911_v22 = vmul.f32 %v4112_v2, %v8024_v6  ;;  %v1822_v5 = vadd.f32 %v1815_v39, %v1800_v4  ;;  %v8029_v34 = vld [vmem:[#allocation53_spill] sm:$0xff]  ;;  %v3336_v20 = vld [vmem:[#allocation3 + $0x458] sm:$0x7f]  ;;  %v8032_v43 = vld [vmem:[#allocation52_spill] sm:$0xff]  ;;  %v1931_v2 = vadd.f32 %v1924_v50, %v1909_v37 }
 0x157   :  { %v2142_v28 = vmul.f32 %v2135_v13, %v8029_v34  ;;  %v8030_v47 = vld [vmem:[#allocation73_spill] sm:$0xff]  ;;  %v5920_v59 = vadd.f32 %v8032_v43, %v1414_v18  ;;  %v3460_v42 = vld [vmem:[#allocation3 + $0x458] sm:$0x7f]  ;;  %v5926_v4 = vadd.f32 %v5617_v8, %v1337_v53  ;;  %v2040_v33 = vadd.f32 %v2033_v56, %v2018_v55  ;;  %v8035_v43 = vld [vmem:[#allocation14_spill] sm:$0xff] }
 0x158   :  { %8025 = vst [vmem:[#allocation50_spill] sm:$0xff] %v5898_v32  ;;  %8028 = vst [vmem:[#allocation69_spill] sm:$0xff] %v5911_v22  ;;  %v5917_v21 = vmul.f32 %v4216_v29, %v8030_v47  ;;  %v3413_v40 = vld [vmem:[#allocation3 + $0x1c8] sm:$0x7f]  ;;  %v3223_v63 = vmul.f32 %v7916_v16, %v3212_v49  ;;  %v5931_v37 = vmul.f32 %v8035_v43, %v3289_v24  ;;  %v8037_v50 = vld [vmem:[#allocation30_spill] sm:$0xff] }
 0x159   :  { %8033 = vst [vmem:[#allocation52_spill] sm:$0xff] %v5920_v59  ;;  %v3537_v7 = vld [vmem:[#allocation3 + $0x1c8] sm:$0x7f]  ;;  %v2149_v13 = vadd.f32 %v2142_v28, %v2127_v31  ;;  %v5934_v59 = vmul.f32 %v8037_v50, %v3413_v40  ;;  %v3347_v52 = vmul.f32 %v7917_v46, %v3336_v20  ;;  %v3237_v41 = vld [vmem:[#allocation3 + $0x5b8] sm:$0x7f]  ;;  %v8040_v53 = vld [vmem:[#allocation38_spill] sm:$0xff]  ;;  %v3471_v28 = vmul.f32 %v7918_v23, %v3460_v42 }
 0x15a   :  { %8031 = vst [vmem:[#allocation53_spill] sm:$0xff] %v5917_v21  ;;  %v3860_v30 = vld [vmem:[#allocation3 + $0x508] sm:$0x7f]  ;;  %v3230_v56 = vadd.f32 %v3223_v63, %v5708_v27  ;;  %v3361_v24 = vld [vmem:[#allocation3 + $0x5b8] sm:$0x7f]  ;;  %v3248_v63 = vmul.f32 %v4942_v57, %v3237_v41  ;;  %v8073_v26 = vld [vmem:[#allocation88_spill] sm:$0xff] }
 0x15b   :  { %v8034_v29 = vld [vmem:[#allocation13_spill] sm:$0xff]  ;;  %8038 = vst [vmem:[#allocation164_spill] sm:$0xff] %v5934_v59  ;;  %v3867_v8 = vmul.f32 %v3860_v30, %v7916_v16  ;;  %v3821_v49 = vld [vmem:[#allocation3 + $0x278] sm:$0x7f]  ;;  %v3354_v40 = vadd.f32 %v3347_v52, %v5715_v51  ;;  %v3372_v52 = vmul.f32 %v4951_v15, %v3361_v24  ;;  %v1114_v0 = vld [vmem:[#allocation3 + $0x460] sm:$0x7f] }
 0x15c   :  { %v3176_v39 = vmul.f32 %v8034_v29, %v3165_v1  ;;  %v3964_v47 = vld [vmem:[#allocation3 + $0x508] sm:$0x7f]  ;;  %8036 = vst [vmem:[#allocation13_spill] sm:$0xff] %v5931_v37  ;;  %v5942_v1 = vmul.f32 %v8040_v53, %v3537_v7  ;;  %v3485_v59 = vld [vmem:[#allocation3 + $0x5b8] sm:$0x7f]  ;;  %v3478_v7 = vadd.f32 %v3471_v28, %v5724_v25 }
 0x15d   :  { %v4068_v6 = vld [vmem:[#allocation3 + $0x508] sm:$0x7f]  ;;  %v3971_v12 = vmul.f32 %v3964_v47, %v7917_v46  ;;  %v3874_v27 = vadd.f32 %v3867_v8, %v5791_v36  ;;  %v3496_v25 = vmul.f32 %v7923_v48, %v3485_v59  ;;  %v3925_v8 = vld [vmem:[#allocation3 + $0x278] sm:$0x7f]  ;;  %v3379_v21 = vadd.f32 %v3372_v52, %v3354_v40  ;;  %v8046_v59 = vld [vmem:[#allocation10_spill] sm:$0xff] }
 0x15e   :  { %v4172_v18 = vld [vmem:[#allocation3 + $0x508] sm:$0x7f]  ;;  %v4075_v20 = vmul.f32 %v4068_v6, %v7918_v23  ;;  %v4029_v41 = vld [vmem:[#allocation3 + $0x278] sm:$0x7f]  ;;  %v1242_v40 = vld [vmem:[#allocation3 + $0x460] sm:$0x7f] }
 0x15f   :  { %v8039_v55 = vld [vmem:[#allocation57_spill] sm:$0xff]  ;;  %v3978_v47 = vadd.f32 %v3971_v12, %v5793_v9  ;;  %v4133_v28 = vld [vmem:[#allocation3 + $0x278] sm:$0x7f]  ;;  %v3503_v22 = vadd.f32 %v3496_v25, %v3478_v7  ;;  %v8047_v52 = vld [vmem:[#allocation60_spill] sm:$0xff] }
 0x160   :  { %v5939_v31 = vadd.f32 %v8039_v55, %v1822_v5  ;;  %8041 = vst [vmem:[#allocation57_spill] sm:$0xff] %v5942_v1  ;;  %v8042_v30 = vld [vmem:[#allocation77_spill] sm:$0xff]  ;;  %v8043_v55 = vld [vmem:[#allocation58_spill] sm:$0xff]  ;;  %v4082_v6 = vadd.f32 %v4075_v20, %v5799_v11  ;;  %v8044_v9 = vld [vmem:[#allocation79_spill] sm:$0xff] }
 0x161   :  { %v4179_v54 = vmul.f32 %v4172_v18, %v8042_v30  ;;  %v3881_v5 = vld [vmem:[#allocation3 + $0x668] sm:$0x7f]  ;;  %v5951_v37 = vadd.f32 %v8043_v55, %v1931_v2  ;;  %v3828_v2 = vmul.f32 %v3821_v49, %v8034_v29  ;;  %v3255_v55 = vadd.f32 %v3248_v63, %v3230_v56  ;;  %v4237_v20 = vld [vmem:[#allocation3 + $0x278] sm:$0x7f]  ;;  %v1115_v7 = vld [vmem:[#allocation3 + $0x470] sm:$0x7f] }
 0x162   :  { %v3985_v42 = vld [vmem:[#allocation3 + $0x668] sm:$0x7f]  ;;  %v3888_v36 = vmul.f32 %v3881_v5, %v4942_v57  ;;  %v1125_v56 = vmul.f32 %v7989_v14, %v1114_v0  ;;  %v5969_v49 = vadd.f32 %v3176_v39, %v8046_v59  ;;  %v8052_v39 = vld [vmem:[#allocation74_spill] sm:$0xff]  ;;  %v1371_v25 = vld [vmem:[#allocation3 + $0x460] sm:$0x7f] }
 0x163   :  { %v4089_v1 = vld [vmem:[#allocation3 + $0x668] sm:$0x7f]  ;;  %v4186_v18 = vadd.f32 %v4179_v54, %v5801_v61  ;;  %v3992_v12 = vmul.f32 %v3985_v42, %v4951_v15  ;;  %v8045_v61 = vld [vmem:[#allocation59_spill] sm:$0xff]  ;;  %v2171_v42 = vadd.f32 %v8047_v52, %v2149_v13  ;;  %v5982_v0 = vadd.f32 %v3828_v2, %v5901_v60  ;;  %v8055_v13 = vld [vmem:[#allocation82_spill] sm:$0xff] }
 0x164   :  { %v4193_v51 = vld [vmem:[#allocation3 + $0x668] sm:$0x7f]  ;;  %v4096_v11 = vmul.f32 %v4089_v1, %v7923_v48  ;;  %v2062_v24 = vadd.f32 %v8045_v61, %v2040_v33  ;;  %v3895_v29 = vadd.f32 %v3888_v36, %v3874_v27  ;;  %v5973_v1 = vmul.f32 %v3925_v8, %v8035_v43  ;;  %v1500_v36 = vld [vmem:[#allocation3 + $0x460] sm:$0x7f]  ;;  %v1243_v8 = vld [vmem:[#allocation3 + $0x470] sm:$0x7f] }
 0x165   :  { %v4200_v54 = vmul.f32 %v4193_v51, %v8044_v9  ;;  %v3999_v5 = vadd.f32 %v3992_v12, %v3978_v47  ;;  %v5976_v51 = vmul.f32 %v4029_v41, %v8037_v50  ;;  %v5979_v33 = vmul.f32 %v4133_v28, %v8040_v53  ;;  %8051 = vst [vmem:[#allocation60_spill] sm:$0xff] %v5982_v0  ;;  %v8054_v47 = vld [vmem:[#allocation81_spill] sm:$0xff]  ;;  %v8056_v41 = vld [vmem:[#allocation83_spill] sm:$0xff]  ;;  %v8058_v28 = vld [vmem:[#allocation104_spill] sm:$0xff] }
 0x166   :  { %v4103_v63 = vadd.f32 %v4096_v11, %v4082_v6  ;;  %8048 = vst [vmem:[#allocation58_spill] sm:$0xff] %v5973_v1  ;;  %v5985_v27 = vmul.f32 %v4237_v20, %v8052_v39  ;;  %v5988_v6 = vadd.f32 %v8054_v47, %v3255_v55  ;;  %v5994_v12 = vadd.f32 %v8056_v41, %v3503_v22  ;;  %v8059_v60 = vld [vmem:[#allocation101_spill] sm:$0xff]  ;;  %v1372_v61 = vld [vmem:[#allocation3 + $0x470] sm:$0x7f]  ;;  %v8067_v39 = vld [vmem:[#allocation91_spill] sm:$0xff] }
 0x167   :  { %v4207_v10 = vadd.f32 %v4200_v54, %v4186_v18  ;;  %8049 = vst [vmem:[#allocation59_spill] sm:$0xff] %v5976_v51  ;;  %8050 = vst [vmem:[#allocation10_spill] sm:$0xff] %v5979_v33  ;;  %v5991_v18 = vadd.f32 %v8055_v13, %v3379_v21  ;;  %v5997_v11 = vadd.f32 %v8058_v28, %v3895_v29  ;;  %v1501_v55 = vld [vmem:[#allocation3 + $0x470] sm:$0x7f]  ;;  %v8060_v59 = vld [vmem:[#allocation105_spill] sm:$0xff] }
 0x168   :  { %8053 = vst [vmem:[#allocation165_spill] sm:$0xff] %v5985_v27  ;;  %8057 = vst [vmem:[#allocation81_spill] sm:$0xff] %v5994_v12  ;;  %v6000_v2 = vadd.f32 %v1125_v56, %v8059_v60  ;;  %v1253_v54 = vmul.f32 %v7999_v19, %v1242_v40  ;;  %v663_v20 = vld [vmem:[#allocation2 + $0x210] sm:$0x3]  ;;  %v6004_v21 = vadd.f32 %v8060_v59, %v3999_v5  ;;  %v8062_v13 = vld [vmem:[#allocation107_spill] sm:$0xff] }
 0x169   :  { %v8061_v52 = vld [vmem:[#allocation106_spill] sm:$0xff]  ;;  %v6010_v22 = vadd.f32 %v8062_v13, %v4207_v10  ;;  %v1126_v29 = vmul.f32 %v7989_v14, %v1115_v7  ;;  %v2741_v41 = vld [vmem:[#allocation2 + $0x88] sm:$0xf8]  ;;  %v2742_v28 = vld [vmem:[#allocation2 + $0x98] sm:$0x3]  ;;  %v1382_v40 = vmul.f32 %v8010_v58, %v1371_v25  ;;  %v6018_v60 = vmul.f32 %v8020_v45, %v1500_v36 }
 0x16a   :  { %v6007_v47 = vadd.f32 %v8061_v52, %v4103_v63  ;;  %v6014_v56 = vadd.f32 %v1253_v54, %v5923_v35  ;;  %v6021_v5 = vmul.f32 %v7999_v19, %v1243_v8  ;;  %v1787_v63 = vld [vmem:[#allocation3 + $0x510] sm:$0x7f]  ;;  %v2743_v59 = vld [vmem:[#allocation2 + $0xa8] sm:$0xf8]  ;;  %v2744_v52 = vld [vmem:[#allocation2 + $0xb8] sm:$0x3]  ;;  %v6024_v10 = vmul.f32 %v8010_v58, %v1372_v61 }
 0x16b   :  { %8063 = vst [vmem:[#allocation82_spill] sm:$0xff] %v6018_v60  ;;  %v6027_v7 = vmul.f32 %v8020_v45, %v1501_v55  ;;  %v8065_v35 = vld [vmem:[#allocation89_spill] sm:$0xff]  ;;  %v1896_v13 = vld [vmem:[#allocation3 + $0x510] sm:$0x7f]  ;;  %v768_v25 = vrot.slane %v663_v20, 3  ;;  %v2084_v53 = vadd.f32 %v8067_v39, %v2062_v24  ;;  %v2833_v50 = vrot.slane %v2741_v41, 3 }
 0x16c   :  { %v1866_v54 = vadd.f32 %v8065_v35, %v5939_v31  ;;  %v2763_v12 = vld [vmem:[#allocation2 + $0x1e8] sm:$0xf8]  ;;  %v8066_v36 = vld [vmem:[#allocation90_spill] sm:$0xff]  ;;  %v2834_v43 = vrot.slane %v2742_v28, 3  ;;  %v2764_v27 = vld [vmem:[#allocation2 + $0x1f8] sm:$0x3]  ;;  %v6035_v61 = vadd.f32 %v1382_v40, %v5926_v4  ;;  %v1794_v31 = vmul.f32 %v1787_v63, %v7989_v14 }
 0x16d   :  { %8064 = vst [vmem:[#allocation83_spill] sm:$0xff] %v6027_v7  ;;  %v1975_v60 = vadd.f32 %v8066_v36, %v5951_v37  ;;  %v2005_v8 = vld [vmem:[#allocation3 + $0x510] sm:$0x7f]  ;;  %v8068_v55 = vld [vmem:[#allocation67_spill] sm:$0xff]  ;;  %v8070_v20 = vrot.slane %v5890_v3, 3  ;;  %v1903_v24 = vmul.f32 %v1896_v13, %v7999_v19  ;;  %v8071_v39 = vld [vmem:[#allocation93_spill] sm:$0xff] }
 0x16e   :  { %v6038_v7 = vadd.f32 %v1126_v29, %v8068_v55  ;;  %v2114_v35 = vld [vmem:[#allocation3 + $0x510] sm:$0x7f]  ;;  %v2765_v37 = vld [vmem:[#allocation2 + $0x208] sm:$0xf8]  ;;  %v2766_v36 = vld [vmem:[#allocation2 + $0x218] sm:$0x3]  ;;  %v2193_v41 = vadd.f32 %v8071_v39, %v2171_v42  ;;  %v2835_v4 = vsel %vm718_vm1, %v2833_v50, %v2834_v43  ;;  %v2012_v55 = vmul.f32 %v2005_v8, %v8010_v58 }
 0x16f   :  { %v769_v33 = vsel %vm718_vm1, %v8070_v20, %v768_v25  ;;  %v2223_v28 = vld [vmem:[#allocation3 + $0x510] sm:$0x7f]  ;;  %v2836_v40 = vrot.slane %v2743_v59, 3  ;;  %v442_v29 = vld [vmem:[#allocation2 + $0xc0] sm:$0xfc]  ;;  %v2837_v63 = vrot.slane %v2744_v52, 3  ;;  %v1997_v32 = vadd.f32 %v8073_v26, %v1975_v60 }
 0x170   :  { %8069 = vst [vmem:[#allocation104_spill] sm:$0xff] %v6038_v7  ;;  %824 = vst [vmem:[#allocation3 + $0x520] sm:$0x7f] %v769_v33  ;;  %v2866_v51 = vrot.slane %v2763_v12, 3  ;;  %v2867_v3 = vrot.slane %v2764_v27, 3  ;;  %v8072_v25 = vld [vmem:[#allocation70_spill] sm:$0xff]  ;;  %v2121_v42 = vmul.f32 %v2114_v35, %v8020_v45 }
 0x171   :  { %2913 = vst [vmem:[#allocation3 + $0x468] sm:$0x7f] %v2835_v4  ;;  %v443_v1 = vld [vmem:[#allocation2 + $0xd0] sm:$0x1]  ;;  %v1888_v20 = vadd.f32 %v8072_v25, %v1866_v54  ;;  %v8074_v13 = vld [vmem:[#allocation36_spill] sm:$0xff]  ;;  %v2838_v8 = vsel %vm718_vm1, %v2836_v40, %v2837_v63  ;;  %v2869_v12 = vrot.slane %v2765_v37, 3 }
 0x172   :  { %v2106_v7 = vadd.f32 %v8074_v13, %v2084_v53  ;;  %v464_v33 = vld [vmem:[#allocation2 + $0x220] sm:$0xfc]  ;;  %v465_v39 = vld [vmem:[#allocation2 + $0x230] sm:$0x1]  ;;  %v2868_v52 = vsel %vm718_vm1, %v2866_v51, %v2867_v3  ;;  %v8076_v0 = vld [vmem:[#allocation137_spill] sm:$0xff]  ;;  %v2870_v25 = vrot.slane %v2766_v36, 3 }
 0x173   :  { %v838_v43 = vld [vmem:[#allocation2 + $0x80] sm:$0xf0]  ;;  %v839_v27 = vld [vmem:[#allocation2 + $0x90] sm:$0x7]  ;;  %v2215_v54 = vadd.f32 %v8076_v0, %v2193_v41  ;;  %v8078_v53 = vld [vmem:[#allocation115_spill] sm:$0xff]  ;;  %v537_v37 = vrot.slane %v442_v29, 2 }
 0x174   :  { %v8075_v50 = vld [vmem:[#allocation80_spill] sm:$0xff]  ;;  %v8077_v26 = vld [vmem:[#allocation114_spill] sm:$0xff]  ;;  %v3429_v35 = vadd.f32 %v8078_v53, %v5991_v18  ;;  %2914 = vst [vmem:[#allocation3 + $0x478] sm:$0x7f] %v2838_v8  ;;  %2924 = vst [vmem:[#allocation3 + $0x518] sm:$0x7f] %v2868_v52 }
 0x175   :  { %v2230_v59 = vmul.f32 %v2223_v28, %v8075_v50  ;;  %v282_v4 = vld [vmem:[#allocation2 + $0xe0] sm:$0x7f]  ;;  %v3305_v60 = vadd.f32 %v8077_v26, %v5988_v6  ;;  %v2388_v13 = vld [vmem:[#allocation2 + $0xe8] sm:$0x7f]  ;;  %v538_v63 = vrot.slane %v443_v1, 2  ;;  %v570_v3 = vrot.slane %v464_v33, 2 }
 0x176   :  { %304 = vst [vmem:[#allocation3 + $0x70] sm:$0x7f] %v282_v4  ;;  %v293_v28 = vld [vmem:[#allocation2 + $0x240] sm:$0x7f]  ;;  %2410 = vst [vmem:[#allocation3 + $0x78] sm:$0x7f] %v2388_v13  ;;  %v2871_v6 = vsel %vm718_vm1, %v2869_v12, %v2870_v25 }
 0x177   :  { %v8079_v40 = vld [vmem:[#allocation124_spill] sm:$0xff]  ;;  %315 = vst [vmem:[#allocation3 + $0x120] sm:$0x7f] %v293_v28  ;;  %v2399_v0 = vld [vmem:[#allocation2 + $0x248] sm:$0x7f]  ;;  %v571_v41 = vrot.slane %v465_v39, 2  ;;  %v539_v29 = vsel %vm518_vm0, %v537_v37, %v538_v63  ;;  %v6073_v39 = vadd.f32 %v1903_v24, %v1888_v20  ;;  %v6080_v13 = vadd.f32 %v2230_v59, %v2215_v54 }
 0x178   :  { %v3937_v51 = vadd.f32 %v8079_v40, %v5997_v11  ;;  %v931_v26 = vrot.slane %v838_v43, 4  ;;  %v932_v18 = vrot.slane %v839_v27, 4  ;;  %2421 = vst [vmem:[#allocation3 + $0x128] sm:$0x7f] %v2399_v0  ;;  %v1788_v8 = vld [vmem:[#allocation3 + $0x520] sm:$0x7f]  ;;  %v6075_v43 = vadd.f32 %v2012_v55, %v1997_v32 }
 0x179   :  { %v8080_v36 = vld [vmem:[#allocation126_spill] sm:$0xff]  ;;  %v8081_v4 = vld [vmem:[#allocation127_spill] sm:$0xff]  ;;  %v8082_v11 = vld [vmem:[#allocation129_spill] sm:$0xff]  ;;  %2925 = vst [vmem:[#allocation3 + $0x528] sm:$0x7f] %v2871_v6 }
 0x17a   :  { %v4041_v52 = vadd.f32 %v8080_v36, %v6004_v21  ;;  %v4145_v53 = vadd.f32 %v8081_v4, %v6007_v47  ;;  %v4249_v1 = vadd.f32 %v8082_v11, %v6010_v22  ;;  %v8083_v33 = vld [vmem:[#allocation92_spill] sm:$0xff]  ;;  %v3213_v25 = vld [vmem:[#allocation3 + $0x468] sm:$0x7f]  ;;  %614 = vst [vmem:[#allocation3 + $0x320] sm:$0x7f] %v539_v29  ;;  %v572_v21 = vsel %vm518_vm0, %v570_v3, %v571_v41  ;;  %v8085_v0 = vld [vmem:[#allocation142_spill] sm:$0xff] }
 0x17b   :  { %v6071_v28 = vadd.f32 %v1794_v31, %v8083_v33  ;;  %v1897_v12 = vld [vmem:[#allocation3 + $0x520] sm:$0x7f]  ;;  %v6078_v47 = vadd.f32 %v2121_v42, %v2106_v7  ;;  %v1795_v22 = vmul.f32 %v1788_v8, %v7989_v14  ;;  %v3337_v37 = vld [vmem:[#allocation3 + $0x468] sm:$0x7f]  ;;  %625 = vst [vmem:[#allocation3 + $0x3d0] sm:$0x7f] %v572_v21  ;;  %v933_v24 = vsel %vm918_vm2, %v931_v26, %v932_v18 }
 0x17c   :  { %v2006_v27 = vld [vmem:[#allocation3 + $0x520] sm:$0x7f]  ;;  %v3461_v31 = vld [vmem:[#allocation3 + $0x468] sm:$0x7f]  ;;  %v3224_v55 = vmul.f32 %v7916_v16, %v3213_v25  ;;  %v3454_v6 = vadd.f32 %v8085_v0, %v3429_v35  ;;  %v8086_v7 = vld [vmem:[#allocation123_spill] sm:$0xff]  ;;  %v6089_v59 = vmul.f32 %v1897_v12, %v7999_v19 }
 0x17d   :  { %v2115_v40 = vld [vmem:[#allocation3 + $0x520] sm:$0x7f]  ;;  %v8084_v20 = vld [vmem:[#allocation37_spill] sm:$0xff]  ;;  %v3958_v42 = vadd.f32 %v8086_v7, %v3937_v51  ;;  %1012 = vst [vmem:[#allocation3 + $0x5c0] sm:$0x7f] %v933_v24  ;;  %v8089_v11 = vld [vmem:[#allocation154_spill] sm:$0xff]  ;;  %v3348_v51 = vmul.f32 %v7917_v46, %v3337_v37  ;;  %v3472_v33 = vmul.f32 %v7918_v23, %v3461_v31 }
 0x17e   :  { %v2224_v32 = vld [vmem:[#allocation3 + $0x520] sm:$0x7f]  ;;  %v3330_v63 = vadd.f32 %v8084_v20, %v3305_v60  ;;  %v3585_v3 = vld [vmem:[#allocation3 + $0x468] sm:$0x7f]  ;;  %v3214_v54 = vld [vmem:[#allocation3 + $0x478] sm:$0x7f]  ;;  %v4270_v29 = vadd.f32 %v8089_v11, %v4249_v1  ;;  %v6095_v60 = vmul.f32 %v2006_v27, %v8010_v58  ;;  %v6098_v35 = vmul.f32 %v2115_v40, %v8020_v45 }
 0x17f   :  { %v3338_v41 = vld [vmem:[#allocation3 + $0x478] sm:$0x7f]  ;;  %v8087_v36 = vld [vmem:[#allocation152_spill] sm:$0xff]  ;;  %v8088_v26 = vld [vmem:[#allocation153_spill] sm:$0xff] }
 0x180   :  { %v3462_v8 = vld [vmem:[#allocation3 + $0x478] sm:$0x7f]  ;;  %v4062_v4 = vadd.f32 %v8087_v36, %v4041_v52  ;;  %v4166_v18 = vadd.f32 %v8088_v26, %v4145_v53  ;;  %8090 = vst [vmem:[#allocation101_spill] sm:$0xff] %v6098_v35  ;;  %v8091_v24 = vld [vmem:[#allocation96_spill] sm:$0xff]  ;;  %v6106_v52 = vmul.f32 %v2224_v32, %v8075_v50  ;;  %v3225_v53 = vmul.f32 %v7916_v16, %v3214_v54  ;;  %v8094_v7 = vld [vmem:[#allocation113_spill] sm:$0xff] }
 0x181   :  { %v3586_v12 = vld [vmem:[#allocation3 + $0x478] sm:$0x7f]  ;;  %v6103_v20 = vadd.f32 %v1795_v22, %v8091_v24  ;;  %v6111_v37 = vadd.f32 %v3224_v55, %v8094_v7  ;;  %v6113_v31 = vadd.f32 %v3348_v51, %v3330_v63  ;;  %v6115_v36 = vadd.f32 %v3472_v33, %v3454_v6  ;;  %v3862_v26 = vld [vmem:[#allocation3 + $0x528] sm:$0x7f]  ;;  %v860_v50 = vld [vmem:[#allocation2 + $0x1e0] sm:$0xf0] }
 0x182   :  { %v3861_v25 = vld [vmem:[#allocation3 + $0x518] sm:$0x7f]  ;;  %8093 = vst [vmem:[#allocation106_spill] sm:$0xff] %v6106_v52  ;;  %v6118_v22 = vmul.f32 %v8042_v30, %v3585_v3  ;;  %v3966_v32 = vld [vmem:[#allocation3 + $0x528] sm:$0x7f]  ;;  %v6121_v11 = vmul.f32 %v7917_v46, %v3338_v41  ;;  %v6124_v54 = vmul.f32 %v7918_v23, %v3462_v8  ;;  %v3869_v55 = vmul.f32 %v3862_v26, %v7916_v16  ;;  %v8100_v58 = vld [vmem:[#allocation120_spill] sm:$0xff] }
 0x183   :  { %v3965_v21 = vld [vmem:[#allocation3 + $0x518] sm:$0x7f]  ;;  %8092 = vst [vmem:[#allocation105_spill] sm:$0xff] %v6103_v20  ;;  %v3868_v1 = vmul.f32 %v3861_v25, %v7916_v16  ;;  %v4070_v24 = vld [vmem:[#allocation3 + $0x528] sm:$0x7f]  ;;  %v6129_v63 = vmul.f32 %v8042_v30, %v3586_v12  ;;  %v8102_v26 = vld [vmem:[#allocation128_spill] sm:$0xff] }
 0x184   :  { %v4069_v27 = vld [vmem:[#allocation3 + $0x518] sm:$0x7f]  ;;  %8095 = vst [vmem:[#allocation107_spill] sm:$0xff] %v6118_v22  ;;  %8096 = vst [vmem:[#allocation89_spill] sm:$0xff] %v6121_v11  ;;  %v3972_v25 = vmul.f32 %v3965_v21, %v7917_v46  ;;  %v8099_v51 = vld [vmem:[#allocation125_spill] sm:$0xff]  ;;  %v6135_v21 = vadd.f32 %v3225_v53, %v8100_v58  ;;  %v6152_v58 = vmul.f32 %v4070_v24, %v7918_v23 }
 0x185   :  { %v4173_v40 = vld [vmem:[#allocation3 + $0x518] sm:$0x7f]  ;;  %8097 = vst [vmem:[#allocation90_spill] sm:$0xff] %v6124_v54  ;;  %8098 = vst [vmem:[#allocation91_spill] sm:$0xff] %v6129_v63  ;;  %v4076_v6 = vmul.f32 %v4069_v27, %v7918_v23  ;;  %v4174_v7 = vld [vmem:[#allocation3 + $0x528] sm:$0x7f]  ;;  %v6138_v16 = vadd.f32 %v3868_v1, %v8102_v26  ;;  %v6143_v27 = vmul.f32 %v3966_v32, %v7917_v46 }
 0x186   :  { %v4277_v0 = vld [vmem:[#allocation3 + $0x518] sm:$0x7f]  ;;  %v4180_v3 = vmul.f32 %v4173_v40, %v8042_v30  ;;  %v4278_v41 = vld [vmem:[#allocation3 + $0x528] sm:$0x7f]  ;;  %v1091_v22 = vld [vmem:[#allocation3 + $0x320] sm:$0x7f]  ;;  %v6140_v12 = vadd.f32 %v3972_v25, %v3958_v42  ;;  %v6158_v32 = vmul.f32 %v4174_v7, %v8042_v30 }
 0x187   :  { %v4284_v33 = vmul.f32 %v4277_v0, %v8099_v51  ;;  %v861_v8 = vld [vmem:[#allocation2 + $0x1f0] sm:$0x7]  ;;  %v2547_v45 = vld [vmem:[#allocation2 + $0xc8] sm:$0xfc]  ;;  %8101 = vst [vmem:[#allocation67_spill] sm:$0xff] %v6135_v21  ;;  %8103 = vst [vmem:[#allocation93_spill] sm:$0xff] %v6143_v27  ;;  %v6145_v19 = vadd.f32 %v4076_v6, %v4062_v4  ;;  %v6161_v46 = vmul.f32 %v4278_v41, %v8099_v51 }
 0x188   :  { %v1218_v40 = vld [vmem:[#allocation3 + $0x320] sm:$0x7f]  ;;  %v2548_v0 = vld [vmem:[#allocation2 + $0xd8] sm:$0x1]  ;;  %v6147_v14 = vadd.f32 %v4180_v3, %v4166_v18  ;;  %8104 = vst [vmem:[#allocation70_spill] sm:$0xff] %v6152_v58  ;;  %v8105_v42 = vld [vmem:[#allocation133_spill] sm:$0xff] }
 0x189   :  { %v1347_v63 = vld [vmem:[#allocation3 + $0x320] sm:$0x7f]  ;;  %v6149_v54 = vadd.f32 %v4284_v33, %v4270_v29  ;;  %v2569_v26 = vld [vmem:[#allocation2 + $0x228] sm:$0xfc]  ;;  %v6155_v25 = vadd.f32 %v3869_v55, %v8105_v42  ;;  %8107 = vst [vmem:[#allocation36_spill] sm:$0xff] %v6158_v32  ;;  %8108 = vst [vmem:[#allocation137_spill] sm:$0xff] %v6161_v46 }
 0x18a   :  { %v1476_v53 = vld [vmem:[#allocation3 + $0x320] sm:$0x7f]  ;;  %v8109_v4 = vld [vmem:[#allocation15_spill] sm:$0xff]  ;;  %v2939_v3 = vld [vmem:[#allocation2 + $0x88] sm:$0xf0]  ;;  %v965_v46 = vrot.slane %v861_v8, 4 }
 0x18b   :  { %v1139_v1 = vld [vmem:[#allocation3 + $0x5c0] sm:$0x7f]  ;;  %8106 = vst [vmem:[#allocation88_spill] sm:$0xff] %v6155_v25  ;;  %v1102_v18 = vmul.f32 %v8109_v4, %v1091_v22  ;;  %v2570_v29 = vld [vmem:[#allocation2 + $0x238] sm:$0x1]  ;;  %v8114_v41 = vld [vmem:[#allocation6_spill] sm:$0xff] }
 0x18c   :  { %v1268_v6 = vld [vmem:[#allocation3 + $0x5c0] sm:$0x7f]  ;;  %v1767_v27 = vld [vmem:[#allocation3 + $0x3d0] sm:$0x7f]  ;;  %v1150_v55 = vmul.f32 %v8013_v38, %v1139_v1  ;;  %v2940_v42 = vld [vmem:[#allocation2 + $0x98] sm:$0x7]  ;;  %v6173_v51 = vmul.f32 %v8114_v41, %v1476_v53 }
 0x18d   :  { %v8110_v33 = vld [vmem:[#allocation16_spill] sm:$0xff]  ;;  %v1279_v7 = vmul.f32 %v8014_v44, %v1268_v6  ;;  %v2961_v30 = vld [vmem:[#allocation2 + $0x1e8] sm:$0xf0]  ;;  %v964_v22 = vrot.slane %v860_v50, 4  ;;  %v2641_v32 = vrot.slane %v2547_v45, 2  ;;  %v2674_v21 = vrot.slane %v2569_v26, 2 }
 0x18e   :  { %v6165_v24 = vmul.f32 %v8110_v33, %v1218_v40  ;;  %v8112_v23 = vld [vmem:[#allocation28_spill] sm:$0xff]  ;;  %8115 = vst [vmem:[#allocation124_spill] sm:$0xff] %v6173_v51  ;;  %v2962_v25 = vld [vmem:[#allocation2 + $0x1f8] sm:$0x7]  ;;  %v1157_v40 = vadd.f32 %v1150_v55, %v6000_v2  ;;  %v1774_v1 = vmul.f32 %v1767_v27, %v8109_v4  ;;  %v2675_v52 = vrot.slane %v2570_v29, 2  ;;  %v8116_v50 = vld [vmem:[#allocation54_spill] sm:$0xff] }
 0x18f   :  { %v6168_v58 = vmul.f32 %v8112_v23, %v1347_v63  ;;  %v1397_v63 = vld [vmem:[#allocation3 + $0x5c0] sm:$0x7f]  ;;  %v966_v6 = vsel %vm918_vm2, %v964_v22, %v965_v46  ;;  %v3031_v35 = vrot.slane %v2939_v3, 4  ;;  %v841_v53 = vld [vmem:[#allocation2 + $0xb0] sm:$0x7]  ;;  %v8117_v45 = vld [vmem:[#allocation55_spill] sm:$0xff] }
 0x190   :  { %8111 = vst [vmem:[#allocation114_spill] sm:$0xff] %v6165_v24  ;;  %v1286_v24 = vadd.f32 %v1279_v7, %v6014_v56  ;;  %v840_v11 = vld [vmem:[#allocation2 + $0xa0] sm:$0xf0]  ;;  %v1183_v8 = vadd.f32 %v8116_v50, %v1157_v40  ;;  %1023 = vst [vmem:[#allocation3 + $0x670] sm:$0x7f] %v966_v6  ;;  %v3032_v56 = vrot.slane %v2940_v42, 4  ;;  %v1408_v26 = vmul.f32 %v8021_v17, %v1397_v63 }
 0x191   :  { %8113 = vst [vmem:[#allocation115_spill] sm:$0xff] %v6168_v58  ;;  %v2642_v58 = vrot.slane %v2548_v0, 2  ;;  %v862_v51 = vld [vmem:[#allocation2 + $0x200] sm:$0xf0]  ;;  %v863_v55 = vld [vmem:[#allocation2 + $0x210] sm:$0x7]  ;;  %v2676_v27 = vsel %vm518_vm0, %v2674_v21, %v2675_v52 }
 0x192   :  { %v1312_v20 = vadd.f32 %v8117_v45, %v1286_v24  ;;  %v2941_v0 = vld [vmem:[#allocation2 + $0xa8] sm:$0xf0]  ;;  %v3064_v46 = vrot.slane %v2961_v30, 4  ;;  %v3065_v4 = vrot.slane %v2962_v25, 4  ;;  %v2942_v29 = vld [vmem:[#allocation2 + $0xb8] sm:$0x7] }
 0x193   :  { %v2643_v2 = vsel %vm518_vm0, %v2641_v32, %v2642_v58  ;;  %v2963_v3 = vld [vmem:[#allocation2 + $0x208] sm:$0xf0]  ;;  %v1876_v7 = vld [vmem:[#allocation3 + $0x3d0] sm:$0x7f]  ;;  %v8118_v22 = vld [vmem:[#allocation84_spill] sm:$0xff]  ;;  %v3033_v58 = vsel %vm918_vm2, %v3031_v35, %v3032_v56  ;;  %v934_v32 = vrot.slane %v840_v11, 4 }
 0x194   :  { %2717 = vst [vmem:[#allocation3 + $0x328] sm:$0x7f] %v2643_v2  ;;  %v1209_v40 = vadd.f32 %v8118_v22, %v1183_v8  ;;  %v8119_v50 = vld [vmem:[#allocation85_spill] sm:$0xff]  ;;  %2728 = vst [vmem:[#allocation3 + $0x3d8] sm:$0x7f] %v2676_v27  ;;  %v3066_v63 = vsel %vm918_vm2, %v3064_v46, %v3065_v4  ;;  %v935_v45 = vrot.slane %v841_v53, 4  ;;  %v1415_v8 = vadd.f32 %v1408_v26, %v6035_v61 }
 0x195   :  { %v1338_v24 = vadd.f32 %v8119_v50, %v1312_v20  ;;  %v2964_v42 = vld [vmem:[#allocation2 + $0x218] sm:$0x7]  ;;  %v1985_v6 = vld [vmem:[#allocation3 + $0x3d0] sm:$0x7f]  ;;  %3111 = vst [vmem:[#allocation3 + $0x5c8] sm:$0x7f] %v3033_v58  ;;  %v6195_v53 = vmul.f32 %v1876_v7, %v8110_v33  ;;  %v6205_v26 = vadd.f32 %v1774_v1, %v5876_v62 }
 0x196   :  { %v967_v52 = vrot.slane %v862_v51, 4  ;;  %v968_v30 = vrot.slane %v863_v55, 4  ;;  %v8120_v21 = vld [vmem:[#allocation161_spill] sm:$0xff]  ;;  %v2094_v2 = vld [vmem:[#allocation3 + $0x3d0] sm:$0x7f]  ;;  %v3034_v20 = vrot.slane %v2941_v0, 4  ;;  %v936_v35 = vsel %vm918_vm2, %v934_v32, %v935_v45 }
 0x197   :  { %v6189_v25 = vadd.f32 %v1102_v18, %v8120_v21  ;;  %3122 = vst [vmem:[#allocation3 + $0x678] sm:$0x7f] %v3066_v63  ;;  %v3035_v27 = vrot.slane %v2942_v29, 4  ;;  %v2203_v22 = vld [vmem:[#allocation3 + $0x3d0] sm:$0x7f]  ;;  %v3067_v56 = vrot.slane %v2963_v3, 4  ;;  %v6198_v51 = vmul.f32 %v1985_v6, %v8112_v23 }
 0x198   :  { %v969_v11 = vsel %vm918_vm2, %v967_v52, %v968_v30  ;;  %v3068_v50 = vrot.slane %v2964_v42, 4  ;;  %1013 = vst [vmem:[#allocation3 + $0x5d0] sm:$0x7f] %v936_v35  ;;  %v8121_v18 = vld [vmem:[#allocation78_spill] sm:$0xff]  ;;  %v6202_v0 = vld [vmem:[#allocation2 + $0xc0] sm:$0xf8]  ;;  %v6208_v46 = vmul.f32 %v2094_v2, %v8114_v41 }
 0x199   :  { %v1235_v55 = vadd.f32 %v8121_v18, %v1209_v40  ;;  %1024 = vst [vmem:[#allocation3 + $0x680] sm:$0x7f] %v969_v11  ;;  %v3036_v61 = vsel %vm918_vm2, %v3034_v20, %v3035_v27  ;;  %8122 = vst [vmem:[#allocation126_spill] sm:$0xff] %v6205_v26  ;;  %v1809_v4 = vld [vmem:[#allocation3 + $0x670] sm:$0x7f]  ;;  %v8125_v30 = vld [vmem:[#allocation56_spill] sm:$0xff] }
 0x19a   :  { %v1918_v29 = vld [vmem:[#allocation3 + $0x670] sm:$0x7f]  ;;  %3112 = vst [vmem:[#allocation3 + $0x5d8] sm:$0x7f] %v3036_v61  ;;  %v3069_v32 = vsel %vm918_vm2, %v3067_v56, %v3068_v50  ;;  %v1816_v6 = vmul.f32 %v1809_v4, %v8013_v38  ;;  %v6219_v21 = vadd.f32 %v8125_v30, %v1415_v8  ;;  %v8127_v2 = vld [vmem:[#allocation136_spill] sm:$0xff]  ;;  %v8128_v27 = vld [vmem:[#allocation17_spill] sm:$0xff] }
 0x19b   :  { %v2027_v3 = vld [vmem:[#allocation3 + $0x670] sm:$0x7f]  ;;  %v1925_v63 = vmul.f32 %v1918_v29, %v8014_v44  ;;  %v3190_v52 = vld [vmem:[#allocation3 + $0x328] sm:$0x7f]  ;;  %3123 = vst [vmem:[#allocation3 + $0x688] sm:$0x7f] %v3069_v32  ;;  %v6228_v29 = vadd.f32 %v6021_v5, %v1235_v55 }
 0x19c   :  { %v8123_v7 = vld [vmem:[#allocation102_spill] sm:$0xff]  ;;  %v2034_v62 = vmul.f32 %v2027_v3, %v8021_v17  ;;  %8126 = vst [vmem:[#allocation127_spill] sm:$0xff] %v6219_v21  ;;  %v1823_v50 = vadd.f32 %v1816_v6, %v6071_v28  ;;  %v3314_v4 = vld [vmem:[#allocation3 + $0x328] sm:$0x7f]  ;;  %v1833_v3 = vld [vmem:[#allocation3 + $0x120] sm:$0x7f] }
 0x19d   :  { %v1364_v58 = vadd.f32 %v8123_v7, %v1338_v24  ;;  %v8124_v40 = vld [vmem:[#allocation46_spill] sm:$0xff]  ;;  %v1932_v18 = vadd.f32 %v1925_v63, %v6073_v39  ;;  %v8130_v39 = vld [vmem:[#allocation61_spill] sm:$0xff]  ;;  %v3842_v6 = vld [vmem:[#allocation3 + $0x3d8] sm:$0x7f] }
 0x19e   :  { %v6213_v42 = vmul.f32 %v2203_v22, %v8124_v40  ;;  %v2136_v1 = vld [vmem:[#allocation3 + $0x670] sm:$0x7f]  ;;  %v3201_v22 = vmul.f32 %v8128_v27, %v3190_v52  ;;  %v2041_v61 = vadd.f32 %v2034_v62, %v6075_v43  ;;  %v1845_v43 = vadd.f32 %v8130_v39, %v1823_v50  ;;  %v3946_v63 = vld [vmem:[#allocation3 + $0x3d8] sm:$0x7f]  ;;  %v3238_v5 = vld [vmem:[#allocation3 + $0x5c8] sm:$0x7f] }
 0x19f   :  { %v2245_v45 = vld [vmem:[#allocation3 + $0x670] sm:$0x7f]  ;;  %v2143_v24 = vmul.f32 %v2136_v1, %v8029_v34  ;;  %v3438_v1 = vld [vmem:[#allocation3 + $0x328] sm:$0x7f]  ;;  %v6235_v52 = vadd.f32 %v6024_v10, %v1364_v58  ;;  %v8131_v55 = vld [vmem:[#allocation8_spill] sm:$0xff] }
 0x1a0   :  { %v2252_v20 = vmul.f32 %v2245_v45, %v8127_v2  ;;  %v1167_v35 = vld [vmem:[#allocation3 + $0x70] sm:$0x7f]  ;;  %v3562_v45 = vld [vmem:[#allocation3 + $0x328] sm:$0x7f]  ;;  %v3882_v39 = vld [vmem:[#allocation3 + $0x678] sm:$0x7f] }
 0x1a1   :  { %v1296_v11 = vld [vmem:[#allocation3 + $0x70] sm:$0x7f]  ;;  %v2150_v7 = vadd.f32 %v2143_v24, %v6078_v47  ;;  %v6240_v62 = vmul.f32 %v8131_v55, %v1167_v35  ;;  %v8133_v30 = vld [vmem:[#allocation25_spill] sm:$0xff]  ;;  %v8139_v21 = vld [vmem:[#allocation20_spill] sm:$0xff]  ;;  %v6258_v35 = vmul.f32 %v1833_v3, %v8131_v55  ;;  %v3849_v3 = vmul.f32 %v3842_v6, %v8128_v27 }
 0x1a2   :  { %v1425_v56 = vld [vmem:[#allocation3 + $0x70] sm:$0x7f]  ;;  %v6232_v32 = vadd.f32 %v2252_v20, %v6080_v13  ;;  %v6243_v47 = vmul.f32 %v8133_v30, %v1296_v11  ;;  %v8135_v13 = vld [vmem:[#allocation45_spill] sm:$0xff]  ;;  %v6249_v20 = vadd.f32 %v3201_v22, %v5969_v49  ;;  %v8143_v23 = vld [vmem:[#allocation63_spill] sm:$0xff] }
 0x1a3   :  { %v1554_v8 = vld [vmem:[#allocation3 + $0x70] sm:$0x7f]  ;;  %8132 = vst [vmem:[#allocation92_spill] sm:$0xff] %v6240_v62  ;;  %v6246_v24 = vmul.f32 %v8135_v13, %v1425_v56  ;;  %v3362_v28 = vld [vmem:[#allocation3 + $0x5c8] sm:$0x7f]  ;;  %8141 = vst [vmem:[#allocation153_spill] sm:$0xff] %v6258_v35  ;;  %v2063_v56 = vadd.f32 %v8143_v23, %v2041_v61 }
 0x1a4   :  { %8129 = vst [vmem:[#allocation129_spill] sm:$0xff] %v6232_v32  ;;  %8134 = vst [vmem:[#allocation37_spill] sm:$0xff] %v6243_v47  ;;  %v8138_v10 = vld [vmem:[#allocation18_spill] sm:$0xff]  ;;  %v3486_v50 = vld [vmem:[#allocation3 + $0x5c8] sm:$0x7f]  ;;  %v6255_v40 = vmul.f32 %v8139_v21, %v1554_v8  ;;  %v6271_v8 = vmul.f32 %v6232_v32, %v6232_v32  ;;  %v3373_v55 = vmul.f32 %v4951_v15, %v3362_v28 }
 0x1a5   :  { %8136 = vst [vmem:[#allocation142_spill] sm:$0xff] %v6246_v24  ;;  %8137 = vst [vmem:[#allocation123_spill] sm:$0xff] %v6249_v20  ;;  %v6252_v58 = vmul.f32 %v8138_v10, %v3314_v4  ;;  %v8142_v11 = vld [vmem:[#allocation62_spill] sm:$0xff]  ;;  %v8144_v33 = vld [vmem:[#allocation32_spill] sm:$0xff] }
 0x1a6   :  { %8140 = vst [vmem:[#allocation152_spill] sm:$0xff] %v6255_v40  ;;  %v1954_v41 = vadd.f32 %v8142_v11, %v1932_v18  ;;  %v6263_v24 = vmul.f32 %v8144_v33, %v3438_v1  ;;  %v8145_v49 = vld [vmem:[#allocation75_spill] sm:$0xff]  ;;  %v8146_v20 = vld [vmem:[#allocation65_spill] sm:$0xff]  ;;  %8147 = vst [vmem:[#allocation154_spill] sm:$0xff] %v6271_v8  ;;  %v6275_v18 = vmul.f32 %v3946_v63, %v8138_v10 }
 0x1a7   :  { %v6266_v22 = vmul.f32 %v8145_v49, %v3562_v45  ;;  %v3986_v4 = vld [vmem:[#allocation3 + $0x678] sm:$0x7f]  ;;  %v2172_v26 = vadd.f32 %v8146_v20, %v2150_v7  ;;  %v8148_v61 = vld [vmem:[#allocation94_spill] sm:$0xff]  ;;  %v3249_v45 = vmul.f32 %v4942_v57, %v3238_v5  ;;  %v3889_v11 = vmul.f32 %v3882_v39, %v4942_v57  ;;  %v8149_v5 = vld [vmem:[#allocation48_spill] sm:$0xff] }
 0x1a8   :  { %v4090_v47 = vld [vmem:[#allocation3 + $0x678] sm:$0x7f]  ;;  %v1867_v1 = vadd.f32 %v8148_v61, %v1845_v43  ;;  %v3497_v7 = vmul.f32 %v7923_v48, %v3486_v50  ;;  %v3993_v20 = vmul.f32 %v3986_v4, %v4951_v15  ;;  %v3380_v32 = vadd.f32 %v3373_v55, %v6113_v31  ;;  %v1140_v40 = vld [vmem:[#allocation3 + $0x5d0] sm:$0x7f]  ;;  %v8151_v35 = vld [vmem:[#allocation97_spill] sm:$0xff] }
 0x1a9   :  { %v4194_v62 = vld [vmem:[#allocation3 + $0x678] sm:$0x7f]  ;;  %v4097_v8 = vmul.f32 %v4090_v47, %v7923_v48  ;;  %v3256_v63 = vadd.f32 %v3249_v45, %v6111_v37  ;;  %v3896_v43 = vadd.f32 %v3889_v11, %v6138_v16  ;;  %v2085_v37 = vadd.f32 %v8151_v35, %v2063_v56  ;;  %v8152_v31 = vld [vmem:[#allocation86_spill] sm:$0xff]  ;;  %v8158_v56 = vld [vmem:[#allocation109_spill] sm:$0xff] }
 0x1aa   :  { %v4298_v23 = vld [vmem:[#allocation3 + $0x678] sm:$0x7f]  ;;  %v4201_v27 = vmul.f32 %v4194_v62, %v8044_v9  ;;  %v3504_v39 = vadd.f32 %v3497_v7, %v6115_v36  ;;  %v4000_v50 = vadd.f32 %v3993_v20, %v6140_v12  ;;  %v1269_v7 = vld [vmem:[#allocation3 + $0x5d0] sm:$0x7f]  ;;  %v1810_v20 = vld [vmem:[#allocation3 + $0x680] sm:$0x7f] }
 0x1ab   :  { %v4050_v6 = vld [vmem:[#allocation3 + $0x3d8] sm:$0x7f]  ;;  %v4305_v61 = vmul.f32 %v4298_v23, %v8149_v5  ;;  %v4104_v4 = vadd.f32 %v4097_v8, %v6145_v19  ;;  %v3281_v55 = vadd.f32 %v8152_v31, %v3256_v63  ;;  %v8154_v23 = vld [vmem:[#allocation98_spill] sm:$0xff]  ;;  %v8156_v8 = vld [vmem:[#allocation108_spill] sm:$0xff]  ;;  %v1151_v63 = vmul.f32 %v8013_v38, %v1140_v40 }
 0x1ac   :  { %v4154_v28 = vld [vmem:[#allocation3 + $0x3d8] sm:$0x7f]  ;;  %v4208_v47 = vadd.f32 %v4201_v27, %v6147_v14  ;;  %v2194_v11 = vadd.f32 %v8154_v23, %v2172_v26  ;;  %v6301_v36 = vmul.f32 %v4050_v6, %v8144_v33  ;;  %v3917_v14 = vadd.f32 %v8156_v8, %v3896_v43  ;;  %v8159_v26 = vld [vmem:[#allocation76_spill] sm:$0xff] }
 0x1ad   :  { %v8150_v62 = vld [vmem:[#allocation95_spill] sm:$0xff]  ;;  %v6297_v16 = vadd.f32 %v4305_v61, %v6149_v54  ;;  %v6309_v35 = vmul.f32 %v4154_v28, %v8145_v49  ;;  %v4021_v54 = vadd.f32 %v8158_v56, %v4000_v50  ;;  %v8160_v6 = vld [vmem:[#allocation100_spill] sm:$0xff]  ;;  %v1280_v50 = vmul.f32 %v8014_v44, %v1269_v7 }
 0x1ae   :  { %v1976_v10 = vadd.f32 %v8150_v62, %v1954_v41  ;;  %v4258_v45 = vld [vmem:[#allocation3 + $0x3d8] sm:$0x7f]  ;;  %v8157_v41 = vld [vmem:[#allocation60_spill] sm:$0xff]  ;;  %v6317_v62 = vadd.f32 %v8160_v6, %v3504_v39  ;;  %v1817_v40 = vmul.f32 %v1810_v20, %v8013_v38  ;;  %v8167_v39 = vld [vmem:[#allocation130_spill] sm:$0xff] }
 0x1af   :  { %8153 = vst [vmem:[#allocation96_spill] sm:$0xff] %v6297_v16  ;;  %v8155_v12 = vld [vmem:[#allocation99_spill] sm:$0xff]  ;;  %v6306_v27 = vadd.f32 %v3849_v3, %v8157_v41  ;;  %v6314_v61 = vmul.f32 %v4258_v45, %v8159_v26  ;;  %v8164_v3 = vld [vmem:[#allocation117_spill] sm:$0xff]  ;;  %v6324_v28 = vmul.f32 %v6297_v16, %v6297_v16  ;;  %v1919_v45 = vld [vmem:[#allocation3 + $0x680] sm:$0x7f]  ;;  %v3938_v6 = vadd.f32 %v8167_v39, %v3917_v14 }
 0x1b0   :  { %v3405_v19 = vadd.f32 %v8155_v12, %v3380_v32  ;;  %8161 = vst [vmem:[#allocation113_spill] sm:$0xff] %v6317_v62  ;;  %v8162_v32 = vld [vmem:[#allocation110_spill] sm:$0xff]  ;;  %v8163_v31 = vld [vmem:[#allocation111_spill] sm:$0xff]  ;;  %v3306_v8 = vadd.f32 %v8164_v3, %v3281_v55  ;;  %v8171_v3 = vld [vmem:[#allocation104_spill] sm:$0xff] }
 0x1b1   :  { %v4125_v43 = vadd.f32 %v8162_v32, %v4104_v4  ;;  %v4229_v23 = vadd.f32 %v8163_v31, %v4208_v47  ;;  %v1398_v12 = vld [vmem:[#allocation3 + $0x5d0] sm:$0x7f]  ;;  %8165 = vst [vmem:[#allocation120_spill] sm:$0xff] %v6324_v28  ;;  %v8169_v32 = vld [vmem:[#allocation139_spill] sm:$0xff]  ;;  %v2028_v31 = vld [vmem:[#allocation3 + $0x680] sm:$0x7f]  ;;  %v1158_v49 = vadd.f32 %v1151_v63, %v8171_v3  ;;  %v1287_v28 = vadd.f32 %v1280_v50, %v6228_v29 }
 0x1b2   :  { %v8166_v41 = vld [vmem:[#allocation118_spill] sm:$0xff]  ;;  %v1998_v47 = vadd.f32 %v8169_v32, %v1976_v10  ;;  %v8170_v26 = vld [vmem:[#allocation131_spill] sm:$0xff]  ;;  %v1409_v7 = vmul.f32 %v8021_v17, %v1398_v12  ;;  %v8173_v39 = vld [vmem:[#allocation105_spill] sm:$0xff]  ;;  %v2035_v63 = vmul.f32 %v2028_v31, %v8021_v17 }
 0x1b3   :  { %v3430_v56 = vadd.f32 %v8166_v41, %v3405_v19  ;;  %v8168_v62 = vld [vmem:[#allocation138_spill] sm:$0xff]  ;;  %v4042_v55 = vadd.f32 %v8170_v26, %v4021_v54  ;;  %v1926_v19 = vmul.f32 %v1919_v45, %v8014_v44  ;;  %v8172_v41 = vld [vmem:[#allocation140_spill] sm:$0xff]  ;;  %v1824_v54 = vadd.f32 %v1817_v40, %v8173_v39  ;;  %v8174_v26 = vld [vmem:[#allocation141_spill] sm:$0xff] }
 0x1b4   :  { %v1889_v4 = vadd.f32 %v8168_v62, %v1867_v1  ;;  %v1527_v16 = vld [vmem:[#allocation3 + $0x5d0] sm:$0x7f]  ;;  %v2020_v14 = vadd.f32 %v6095_v60, %v1998_v47  ;;  %v2107_v1 = vadd.f32 %v8172_v41, %v2085_v37  ;;  %v2137_v62 = vld [vmem:[#allocation3 + $0x680] sm:$0x7f]  ;;  %v1416_v10 = vadd.f32 %v1409_v7, %v6235_v52  ;;  %v3239_v50 = vld [vmem:[#allocation3 + $0x5d8] sm:$0x7f] }
 0x1b5   :  { %v2216_v29 = vadd.f32 %v8174_v26, %v2194_v11  ;;  %v284_v12 = vld [vmem:[#allocation2 + $0x120] sm:$0x7f]  ;;  %v8177_v60 = vld [vmem:[#allocation101_spill] sm:$0xff]  ;;  %v6348_v40 = vmul.f32 %v8029_v34, %v1527_v16  ;;  %v2144_v11 = vmul.f32 %v2137_v62, %v8029_v34  ;;  %v3363_v26 = vld [vmem:[#allocation3 + $0x5d8] sm:$0x7f] }
 0x1b6   :  { %v1911_v20 = vadd.f32 %v6089_v59, %v1889_v4  ;;  %v295_v32 = vld [vmem:[#allocation2 + $0x280] sm:$0x7f]  ;;  %v8176_v4 = vld [vmem:[#allocation134_spill] sm:$0xff]  ;;  %v2129_v47 = vadd.f32 %v8177_v60, %v2107_v1  ;;  %306 = vst [vmem:[#allocation3 + $0x90] sm:$0x7f] %v284_v12  ;;  %v2042_v31 = vadd.f32 %v2035_v63, %v2020_v14  ;;  %v8179_v41 = vld [vmem:[#allocation149_spill] sm:$0xff]  ;;  %v3250_v1 = vmul.f32 %v4942_v57, %v3239_v50 }
 0x1b7   :  { %v8175_v3 = vld [vmem:[#allocation132_spill] sm:$0xff]  ;;  %v4250_v45 = vadd.f32 %v8176_v4, %v4229_v23  ;;  %317 = vst [vmem:[#allocation3 + $0x140] sm:$0x7f] %v295_v32  ;;  %v2390_v37 = vld [vmem:[#allocation2 + $0x128] sm:$0x7f]  ;;  %8178 = vst [vmem:[#allocation128_spill] sm:$0xff] %v6348_v40  ;;  %v3331_v39 = vadd.f32 %v8179_v41, %v3306_v8  ;;  %v3374_v50 = vmul.f32 %v4951_v15, %v3363_v26 }
 0x1b8   :  { %v4146_v59 = vadd.f32 %v8175_v3, %v4125_v43  ;;  %v1933_v33 = vadd.f32 %v1926_v19, %v1911_v20  ;;  %v2401_v52 = vld [vmem:[#allocation2 + $0x288] sm:$0x7f]  ;;  %v2246_v7 = vld [vmem:[#allocation3 + $0x680] sm:$0x7f]  ;;  %2412 = vst [vmem:[#allocation3 + $0x98] sm:$0x7f] %v2390_v37  ;;  %v2151_v8 = vadd.f32 %v2144_v11, %v2129_v47 }
 0x1b9   :  { %2423 = vst [vmem:[#allocation3 + $0x148] sm:$0x7f] %v2401_v52  ;;  %v8180_v43 = vld [vmem:[#allocation121_spill] sm:$0xff]  ;;  %v8181_v20 = vld [vmem:[#allocation106_spill] sm:$0xff]  ;;  %v8183_v16 = vld [vmem:[#allocation40_spill] sm:$0xff] }
 0x1ba   :  { %v1184_v23 = vadd.f32 %v8180_v43, %v1158_v49  ;;  %v2238_v19 = vadd.f32 %v8181_v20, %v2216_v29  ;;  %v8182_v12 = vld [vmem:[#allocation150_spill] sm:$0xff]  ;;  %v3883_v3 = vld [vmem:[#allocation3 + $0x688] sm:$0x7f]  ;;  %v1313_v4 = vadd.f32 %v8183_v16, %v1287_v28  ;;  %v8185_v62 = vld [vmem:[#allocation7_spill] sm:$0xff]  ;;  %v2253_v49 = vmul.f32 %v2246_v7, %v8127_v2 }
 0x1bb   :  { %v3455_v32 = vadd.f32 %v8182_v12, %v3430_v56  ;;  %v8184_v14 = vld [vmem:[#allocation122_spill] sm:$0xff]  ;;  %v6359_v60 = vadd.f32 %v8185_v62, %v1824_v54  ;;  %v3487_v41 = vld [vmem:[#allocation3 + $0x5d8] sm:$0x7f]  ;;  %v8186_v37 = vld [vmem:[#allocation144_spill] sm:$0xff] }
 0x1bc   :  { %v1442_v63 = vadd.f32 %v8184_v14, %v1416_v10  ;;  %v6362_v52 = vadd.f32 %v8186_v37, %v1933_v33  ;;  %v8187_v29 = vld [vmem:[#allocation89_spill] sm:$0xff]  ;;  %v3611_v56 = vld [vmem:[#allocation3 + $0x5d8] sm:$0x7f]  ;;  %v8189_v28 = vld [vmem:[#allocation90_spill] sm:$0xff]  ;;  %v3890_v10 = vmul.f32 %v3883_v3, %v4942_v57  ;;  %v6371_v62 = vadd.f32 %v2253_v49, %v2238_v19 }
 0x1bd   :  { %v3356_v43 = vadd.f32 %v8187_v29, %v3331_v39  ;;  %v8188_v20 = vld [vmem:[#allocation145_spill] sm:$0xff]  ;;  %v3480_v16 = vadd.f32 %v8189_v28, %v3455_v32  ;;  %v8192_v33 = vld [vmem:[#allocation67_spill] sm:$0xff]  ;;  %v3498_v7 = vmul.f32 %v7923_v48, %v3487_v41  ;;  %v8194_v26 = vld [vmem:[#allocation146_spill] sm:$0xff] }
 0x1be   :  { %v2064_v12 = vadd.f32 %v8188_v20, %v2042_v31  ;;  %v8190_v54 = vld [vmem:[#allocation9_spill] sm:$0xff]  ;;  %8191 = vst [vmem:[#allocation133_spill] sm:$0xff] %v6371_v62  ;;  %v3257_v37 = vadd.f32 %v3250_v1, %v8192_v33  ;;  %v8193_v39 = vld [vmem:[#allocation155_spill] sm:$0xff]  ;;  %v2173_v40 = vadd.f32 %v8194_v26, %v2151_v8  ;;  %v6378_v31 = vmul.f32 %v8044_v9, %v3611_v56  ;;  %v8197_v3 = vld [vmem:[#allocation156_spill] sm:$0xff] }
 0x1bf   :  { %v3959_v14 = vadd.f32 %v8190_v54, %v3938_v6  ;;  %v3987_v47 = vld [vmem:[#allocation3 + $0x688] sm:$0x7f]  ;;  %v4063_v29 = vadd.f32 %v8193_v39, %v4042_v55  ;;  %v4167_v28 = vadd.f32 %v8197_v3, %v4146_v59  ;;  %v643_v54 = vld [vmem:[#allocation2 + $0xd0] sm:$0x3]  ;;  %v3381_v57 = vadd.f32 %v3374_v50, %v3356_v43  ;;  %v8199_v55 = vld [vmem:[#allocation88_spill] sm:$0xff] }
 0x1c0   :  { %v4091_v11 = vld [vmem:[#allocation3 + $0x688] sm:$0x7f]  ;;  %8195 = vst [vmem:[#allocation15_spill] sm:$0xff] %v6378_v31  ;;  %v3994_v19 = vmul.f32 %v3987_v47, %v4951_v15  ;;  %v8198_v49 = vld [vmem:[#allocation70_spill] sm:$0xff]  ;;  %v3505_v33 = vadd.f32 %v3498_v7, %v3480_v16  ;;  %v3897_v39 = vadd.f32 %v3890_v10, %v8199_v55  ;;  %v8200_v8 = vld [vmem:[#allocation36_spill] sm:$0xff]  ;;  %v738_v3 = vrot.slane %v643_v54, 3 }
 0x1c1   :  { %v8196_v32 = vld [vmem:[#allocation93_spill] sm:$0xff]  ;;  %v4084_v1 = vadd.f32 %v8198_v49, %v4063_v29  ;;  %v4098_v41 = vmul.f32 %v4091_v11, %v7923_v48  ;;  %v4188_v26 = vadd.f32 %v8200_v8, %v4167_v28  ;;  %v664_v43 = vld [vmem:[#allocation2 + $0x220] sm:$0xf8]  ;;  %v6391_v50 = vmul.f32 %v6371_v62, %v6371_v62  ;;  %v8203_v47 = vld [vmem:[#allocation147_spill] sm:$0xff] }
 0x1c2   :  { %v3980_v20 = vadd.f32 %v8196_v32, %v3959_v14  ;;  %v4195_v6 = vld [vmem:[#allocation3 + $0x688] sm:$0x7f]  ;;  %v3282_v11 = vadd.f32 %v8203_v47, %v3257_v37  ;;  %v8205_v10 = vld [vmem:[#allocation158_spill] sm:$0xff]  ;;  %v8206_v49 = vld [vmem:[#allocation148_spill] sm:$0xff] }
 0x1c3   :  { %v8201_v56 = vld [vmem:[#allocation157_spill] sm:$0xff]  ;;  %v4105_v14 = vadd.f32 %v4098_v41, %v4084_v1  ;;  %v4202_v59 = vmul.f32 %v4195_v6, %v8044_v9  ;;  %8202 = vst [vmem:[#allocation54_spill] sm:$0xff] %v6391_v50  ;;  %v1210_v29 = vadd.f32 %v8205_v10, %v1184_v23  ;;  %v665_v28 = vld [vmem:[#allocation2 + $0x230] sm:$0x3]  ;;  %v8208_v54 = vld [vmem:[#allocation159_spill] sm:$0xff]  ;;  %v770_v23 = vrot.slane %v664_v43, 3 }
 0x1c4   :  { %v4271_v31 = vadd.f32 %v8201_v56, %v4250_v45  ;;  %v4001_v2 = vadd.f32 %v3994_v19, %v3980_v20  ;;  %v4299_v32 = vld [vmem:[#allocation3 + $0x688] sm:$0x7f]  ;;  %v3406_v45 = vadd.f32 %v8206_v49, %v3381_v57  ;;  %v8207_v19 = vrot.slane %v6202_v0, 3  ;;  %v2746_v55 = vld [vmem:[#allocation2 + $0xd8] sm:$0x3]  ;;  %v8209_v8 = vld [vmem:[#allocation50_spill] sm:$0xff] }
 0x1c5   :  { %v8204_v16 = vld [vmem:[#allocation137_spill] sm:$0xff]  ;;  %v4209_v20 = vadd.f32 %v4202_v59, %v4188_v26  ;;  %v1339_v1 = vadd.f32 %v8208_v54, %v1313_v4  ;;  %v3530_v56 = vadd.f32 %v8209_v8, %v3505_v33  ;;  %v8210_v50 = vld [vmem:[#allocation51_spill] sm:$0xff]  ;;  %v8211_v47 = vld [vmem:[#allocation68_spill] sm:$0xff]  ;;  %v771_v10 = vrot.slane %v665_v28, 3 }
 0x1c6   :  { %v4292_v7 = vadd.f32 %v8204_v16, %v4271_v31  ;;  %v739_v6 = vsel %vm718_vm1, %v8207_v19, %v738_v3  ;;  %v2745_v41 = vld [vmem:[#allocation2 + $0xc8] sm:$0xf8]  ;;  %v3918_v37 = vadd.f32 %v8210_v50, %v3897_v39  ;;  %v4306_v31 = vmul.f32 %v4299_v32, %v8149_v5  ;;  %v8213_v59 = vld [vmem:[#allocation160_spill] sm:$0xff]  ;;  %v8215_v4 = vld [vmem:[#allocation114_spill] sm:$0xff] }
 0x1c7   :  { %814 = vst [vmem:[#allocation3 + $0x480] sm:$0x7f] %v739_v6  ;;  %v4022_v16 = vadd.f32 %v8211_v47, %v4001_v2  ;;  %v8212_v57 = vld [vmem:[#allocation69_spill] sm:$0xff]  ;;  %v1468_v0 = vadd.f32 %v8213_v59, %v1442_v63  ;;  %v6410_v49 = vadd.f32 %v8215_v4, %v1210_v29  ;;  %v2839_v19 = vrot.slane %v2745_v41, 3  ;;  %v2768_v39 = vld [vmem:[#allocation2 + $0x238] sm:$0x3] }
 0x1c8   :  { %v4126_v26 = vadd.f32 %v8212_v57, %v4105_v14  ;;  %v6407_v3 = vadd.f32 %v4306_v31, %v4292_v7  ;;  %v2840_v33 = vrot.slane %v2746_v55, 3  ;;  %v2767_v54 = vld [vmem:[#allocation2 + $0x228] sm:$0xf8]  ;;  %v8217_v6 = vld [vmem:[#allocation115_spill] sm:$0xff]  ;;  %v772_v2 = vsel %vm718_vm1, %v770_v23, %v771_v10  ;;  %v8218_v14 = vld [vmem:[#allocation162_spill] sm:$0xff] }
 0x1c9   :  { %v8216_v50 = vld [vmem:[#allocation53_spill] sm:$0xff]  ;;  %v1365_v43 = vadd.f32 %v8217_v6, %v1339_v1  ;;  %v1868_v8 = vadd.f32 %v8218_v14, %v6359_v60  ;;  %825 = vst [vmem:[#allocation3 + $0x530] sm:$0x7f] %v772_v2  ;;  %v8219_v63 = vld [vmem:[#allocation163_spill] sm:$0xff]  ;;  %v8223_v57 = vld [vmem:[#allocation164_spill] sm:$0xff]  ;;  %v2872_v59 = vrot.slane %v2767_v54, 3 }
 0x1ca   :  { %8214 = vst [vmem:[#allocation55_spill] sm:$0xff] %v6407_v3  ;;  %v4230_v32 = vadd.f32 %v8216_v50, %v4209_v20  ;;  %v1977_v7 = vadd.f32 %v8219_v63, %v6362_v52  ;;  %v8220_v28 = vld [vmem:[#allocation33_spill] sm:$0xff]  ;;  %v2841_v55 = vsel %vm718_vm1, %v2839_v19, %v2840_v33  ;;  %v3431_v1 = vadd.f32 %v8223_v57, %v3406_v45  ;;  %v8225_v10 = vld [vmem:[#allocation124_spill] sm:$0xff]  ;;  %v8228_v45 = vld [vmem:[#allocation59_spill] sm:$0xff] }
 0x1cb   :  { %v2086_v29 = vadd.f32 %v8220_v28, %v2064_v12  ;;  %v8221_v31 = vld [vmem:[#allocation41_spill] sm:$0xff]  ;;  %2915 = vst [vmem:[#allocation3 + $0x488] sm:$0x7f] %v2841_v55  ;;  %v2873_v23 = vrot.slane %v2768_v39, 3  ;;  %v6426_v60 = vmul.f32 %v6407_v3, %v6407_v3  ;;  %v1494_v4 = vadd.f32 %v8225_v10, %v1468_v0  ;;  %v8227_v12 = vld [vmem:[#allocation58_spill] sm:$0xff]  ;;  %v8230_v28 = vld [vmem:[#allocation19_spill] sm:$0xff] }
 0x1cc   :  { %v2195_v41 = vadd.f32 %v8221_v31, %v2173_v40  ;;  %v8222_v47 = vld [vmem:[#allocation13_spill] sm:$0xff]  ;;  %v3939_v6 = vadd.f32 %v8227_v12, %v3918_v37  ;;  %v842_v40 = vld [vmem:[#allocation2 + $0xc0] sm:$0xf0]  ;;  %v6432_v33 = vadd.f32 %v6195_v53, %v1868_v8  ;;  %v4043_v54 = vadd.f32 %v8228_v45, %v4022_v16  ;;  %v8229_v39 = vld [vmem:[#allocation10_spill] sm:$0xff] }
 0x1cd   :  { %v3307_v20 = vadd.f32 %v8222_v47, %v3282_v11  ;;  %8224 = vst [vmem:[#allocation84_spill] sm:$0xff] %v6426_v60  ;;  %v8226_v52 = vld [vmem:[#allocation57_spill] sm:$0xff]  ;;  %v2874_v11 = vsel %vm718_vm1, %v2872_v59, %v2873_v23  ;;  %v4147_v14 = vadd.f32 %v8229_v39, %v4126_v26  ;;  %v843_v63 = vld [vmem:[#allocation2 + $0xd0] sm:$0x7]  ;;  %v2108_v37 = vadd.f32 %v6208_v46, %v2086_v29  ;;  %v1942_v59 = vld [vmem:[#allocation3 + $0x120] sm:$0x7f] }
 0x1ce   :  { %v3555_v50 = vadd.f32 %v8226_v52, %v3530_v56  ;;  %v1116_v2 = vld [vmem:[#allocation3 + $0x480] sm:$0x7f]  ;;  %v1999_v56 = vadd.f32 %v6198_v51, %v1977_v7  ;;  %2926 = vst [vmem:[#allocation3 + $0x538] sm:$0x7f] %v2874_v11  ;;  %v8231_v47 = vld [vmem:[#allocation165_spill] sm:$0xff]  ;;  %v2217_v53 = vadd.f32 %v6213_v42, %v2195_v41  ;;  %v6446_v16 = vadd.f32 %v6263_v24, %v3431_v1  ;;  %v8232_v10 = vld [vmem:[#allocation22_spill] sm:$0xff] }
 0x1cf   :  { %v1244_v19 = vld [vmem:[#allocation3 + $0x480] sm:$0x7f]  ;;  %v1127_v31 = vmul.f32 %v8230_v28, %v1116_v2  ;;  %v4251_v57 = vadd.f32 %v8231_v47, %v4230_v32  ;;  %v6443_v8 = vadd.f32 %v6252_v58, %v3307_v20  ;;  %v937_v26 = vrot.slane %v842_v40, 4  ;;  %v3265_v42 = vld [vmem:[#allocation3 + $0x78] sm:$0x7f]  ;;  %v8234_v41 = vld [vmem:[#allocation49_spill] sm:$0xff] }
 0x1d0   :  { %v1373_v0 = vld [vmem:[#allocation3 + $0x480] sm:$0x7f]  ;;  %v1255_v52 = vmul.f32 %v8232_v10, %v1244_v19  ;;  %v6450_v51 = vadd.f32 %v6266_v22, %v3555_v50  ;;  %v6453_v46 = vadd.f32 %v6275_v18, %v3939_v6  ;;  %v938_v32 = vrot.slane %v843_v63, 4  ;;  %v8233_v29 = vld [vmem:[#allocation31_spill] sm:$0xff]  ;;  %v1789_v24 = vld [vmem:[#allocation3 + $0x530] sm:$0x7f] }
 0x1d1   :  { %v1502_v55 = vld [vmem:[#allocation3 + $0x480] sm:$0x7f]  ;;  %v1384_v58 = vmul.f32 %v8233_v29, %v1373_v0  ;;  %v1898_v1 = vld [vmem:[#allocation3 + $0x530] sm:$0x7f]  ;;  %v6458_v40 = vadd.f32 %v6301_v36, %v4043_v54  ;;  %v6461_v2 = vadd.f32 %v6309_v35, %v4147_v14  ;;  %v6464_v22 = vadd.f32 %v1127_v31, %v6189_v25  ;;  %v2402_v60 = vld [vmem:[#allocation2 + $0x2a8] sm:$0x7f] }
 0x1d2   :  { %v2051_v23 = vld [vmem:[#allocation3 + $0x120] sm:$0x7f]  ;;  %v1513_v20 = vmul.f32 %v8234_v41, %v1502_v55  ;;  %v2007_v12 = vld [vmem:[#allocation3 + $0x530] sm:$0x7f]  ;;  %v1796_v18 = vmul.f32 %v1789_v24, %v8230_v28  ;;  %v3215_v19 = vld [vmem:[#allocation3 + $0x488] sm:$0x7f]  ;;  %v6468_v11 = vadd.f32 %v6314_v61, %v4251_v57  ;;  %v939_v45 = vsel %vm918_vm2, %v937_v26, %v938_v32 }
 0x1d3   :  { %v2160_v7 = vld [vmem:[#allocation3 + $0x120] sm:$0x7f]  ;;  %v2116_v50 = vld [vmem:[#allocation3 + $0x530] sm:$0x7f]  ;;  %v6472_v39 = vadd.f32 %v1255_v52, %v6410_v49  ;;  %v6474_v36 = vadd.f32 %v1384_v58, %v1365_v43  ;;  %v3339_v54 = vld [vmem:[#allocation3 + $0x488] sm:$0x7f]  ;;  %v6479_v63 = vmul.f32 %v1942_v59, %v8133_v30  ;;  %v1905_v28 = vmul.f32 %v1898_v1, %v8232_v10 }
 0x1d4   :  { %v2225_v6 = vld [vmem:[#allocation3 + $0x530] sm:$0x7f]  ;;  %v6476_v35 = vadd.f32 %v1513_v20, %v1494_v4  ;;  %v3463_v25 = vld [vmem:[#allocation3 + $0x488] sm:$0x7f]  ;;  %1014 = vst [vmem:[#allocation3 + $0x5e0] sm:$0x7f] %v939_v45  ;;  %v6484_v0 = vmul.f32 %v2051_v23, %v8135_v13  ;;  %v6487_v49 = vmul.f32 %v2160_v7, %v8139_v21  ;;  %v2014_v47 = vmul.f32 %v2007_v12, %v8233_v29 }
 0x1d5   :  { %v864_v14 = vld [vmem:[#allocation2 + $0x220] sm:$0xf0]  ;;  %v2391_v55 = vld [vmem:[#allocation2 + $0x148] sm:$0x7f]  ;;  %v2123_v57 = vmul.f32 %v2116_v50, %v8234_v41  ;;  %v3863_v32 = vld [vmem:[#allocation3 + $0x538] sm:$0x7f]  ;;  %v6499_v1 = vadd.f32 %v1905_v28, %v6432_v33 }
 0x1d6   :  { %8235 = vst [vmem:[#allocation85_spill] sm:$0xff] %v6476_v35  ;;  %v8236_v61 = vld [vmem:[#allocation24_spill] sm:$0xff]  ;;  %8237 = vst [vmem:[#allocation161_spill] sm:$0xff] %v6484_v0  ;;  %v3587_v52 = vld [vmem:[#allocation3 + $0x488] sm:$0x7f]  ;;  %v6503_v3 = vadd.f32 %v2014_v47, %v1999_v56  ;;  %v970_v62 = vrot.slane %v864_v14, 4 }
 0x1d7   :  { %v3226_v31 = vmul.f32 %v8236_v61, %v3215_v19  ;;  %8238 = vst [vmem:[#allocation78_spill] sm:$0xff] %v6487_v49  ;;  %v285_v43 = vld [vmem:[#allocation2 + $0x140] sm:$0x7f]  ;;  %v865_v58 = vld [vmem:[#allocation2 + $0x230] sm:$0x7]  ;;  %v8240_v20 = vld [vmem:[#allocation11_spill] sm:$0xff]  ;;  %v3870_v50 = vmul.f32 %v3863_v32, %v8236_v61 }
 0x1d8   :  { %v296_v4 = vld [vmem:[#allocation2 + $0x2a0] sm:$0x7f]  ;;  %v6493_v24 = vmul.f32 %v8240_v20, %v3265_v42  ;;  %307 = vst [vmem:[#allocation3 + $0xa0] sm:$0x7f] %v285_v43  ;;  %2413 = vst [vmem:[#allocation3 + $0xa8] sm:$0x7f] %v2391_v55  ;;  %v6505_v42 = vadd.f32 %v2123_v57, %v2108_v37 }
 0x1d9   :  { %v8239_v26 = vld [vmem:[#allocation80_spill] sm:$0xff]  ;;  %318 = vst [vmem:[#allocation3 + $0x150] sm:$0x7f] %v296_v4  ;;  %v8242_v23 = vld [vmem:[#allocation126_spill] sm:$0xff]  ;;  %v4071_v45 = vld [vmem:[#allocation3 + $0x538] sm:$0x7f] }
 0x1da   :  { %v2232_v59 = vmul.f32 %v2225_v6, %v8239_v26  ;;  %8241 = vst [vmem:[#allocation102_spill] sm:$0xff] %v6493_v24  ;;  %v6496_v7 = vadd.f32 %v1796_v18, %v8242_v23  ;;  %v8243_v12 = vld [vmem:[#allocation26_spill] sm:$0xff]  ;;  %v3967_v6 = vld [vmem:[#allocation3 + $0x538] sm:$0x7f]  ;;  %2424 = vst [vmem:[#allocation3 + $0x158] sm:$0x7f] %v2402_v60 }
 0x1db   :  { %v3350_v19 = vmul.f32 %v8243_v12, %v3339_v54  ;;  %v8244_v4 = vld [vmem:[#allocation34_spill] sm:$0xff]  ;;  %v4175_v18 = vld [vmem:[#allocation3 + $0x538] sm:$0x7f]  ;;  %v8246_v61 = vld [vmem:[#allocation77_spill] sm:$0xff]  ;;  %v971_v57 = vrot.slane %v865_v58, 4 }
 0x1dc   :  { %v6507_v43 = vadd.f32 %v2232_v59, %v2217_v53  ;;  %v3474_v55 = vmul.f32 %v8244_v4, %v3463_v25  ;;  %v4279_v23 = vld [vmem:[#allocation3 + $0x538] sm:$0x7f]  ;;  %v3598_v32 = vmul.f32 %v8246_v61, %v3587_v52  ;;  %v2943_v56 = vld [vmem:[#allocation2 + $0xc8] sm:$0xf0]  ;;  %v3974_v53 = vmul.f32 %v3967_v6, %v8243_v12  ;;  %v466_v10 = vld [vmem:[#allocation2 + $0x240] sm:$0xfc] }
 0x1dd   :  { %v8245_v33 = vld [vmem:[#allocation123_spill] sm:$0xff]  ;;  %v6514_v54 = vadd.f32 %v3350_v19, %v6443_v8  ;;  %v4078_v25 = vmul.f32 %v4071_v45, %v8244_v4  ;;  %v2965_v60 = vld [vmem:[#allocation2 + $0x228] sm:$0xf0]  ;;  %v6526_v8 = vadd.f32 %v3870_v50, %v6306_v27  ;;  %v4182_v14 = vmul.f32 %v4175_v18, %v8246_v61  ;;  %v119_v18 = vld [vmem:[%s7562_s0 + $0x60] sm:$0x7f] }
 0x1de   :  { %v6511_v28 = vadd.f32 %v3226_v31, %v8245_v33  ;;  %v2944_v47 = vld [vmem:[#allocation2 + $0xd8] sm:$0x7]  ;;  %v6518_v37 = vadd.f32 %v3474_v55, %v6446_v16  ;;  %v6523_v31 = vadd.f32 %v3598_v32, %v6450_v51  ;;  %v8248_v52 = vld [vmem:[#allocation125_spill] sm:$0xff]  ;;  %v1141_v33 = vld [vmem:[#allocation3 + $0x5e0] sm:$0x7f]  ;;  %v6531_v6 = vadd.f32 %v3974_v53, %v6453_v46 }
 0x1df   :  { %v2966_v59 = vld [vmem:[#allocation2 + $0x238] sm:$0x7]  ;;  %v4286_v19 = vmul.f32 %v4279_v23, %v8248_v52  ;;  %v1270_v16 = vld [vmem:[#allocation3 + $0x5e0] sm:$0x7f]  ;;  %v6534_v58 = vadd.f32 %v4078_v25, %v6458_v40  ;;  %v1152_v45 = vmul.f32 %v8013_v38, %v1141_v33  ;;  %v972_v51 = vsel %vm918_vm2, %v970_v62, %v971_v57  ;;  %v120_v23 = vld [vmem:[%s7562_s0 + $0x68] sm:$0x7f] }
 0x1e0   :  { %8247 = vst [vmem:[#allocation56_spill] sm:$0xff] %v6523_v31  ;;  %v1399_v55 = vld [vmem:[#allocation3 + $0x5e0] sm:$0x7f]  ;;  %v3389_v32 = vld [vmem:[#allocation3 + $0x78] sm:$0x7f]  ;;  %v6548_v40 = vadd.f32 %v4182_v14, %v6461_v2  ;;  %v3037_v62 = vrot.slane %v2943_v56, 4  ;;  %v1281_v31 = vmul.f32 %v8014_v44, %v1270_v16 }
 0x1e1   :  { %v3513_v27 = vld [vmem:[#allocation3 + $0x78] sm:$0x7f]  ;;  %v133_v46 = vld [vmem:[%s7562_s0 + $0xd0] sm:$0x7f]  ;;  %1025 = vst [vmem:[#allocation3 + $0x690] sm:$0x7f] %v972_v51  ;;  %v6554_v33 = vadd.f32 %v4286_v19, %v6468_v11  ;;  %v1410_v35 = vmul.f32 %v8021_v17, %v1399_v55 }
 0x1e2   :  { %v3637_v50 = vld [vmem:[#allocation3 + $0x78] sm:$0x7f]  ;;  %v3038_v53 = vrot.slane %v2944_v47, 4  ;;  %v3070_v25 = vrot.slane %v2965_v60, 4  ;;  %v3071_v52 = vrot.slane %v2966_v59, 4  ;;  %v8249_v14 = vld [vmem:[#allocation29_spill] sm:$0xff]  ;;  %v1159_v59 = vadd.f32 %v1152_v45, %v6464_v22 }
 0x1e3   :  { %v134_v57 = vld [vmem:[%s7562_s0 + $0xd8] sm:$0x7f]  ;;  %v326_v61 = vld [vmem:[#allocation2 + $0xe0] sm:$0xfe]  ;;  %v6560_v56 = vmul.f32 %v8249_v14, %v3389_v32  ;;  %v8253_v51 = vld [vmem:[#allocation73_spill] sm:$0xff]  ;;  %v1288_v29 = vadd.f32 %v1281_v31, %v6472_v39  ;;  %v175_v30 = vrot.slane %v119_v18, 6 }
 0x1e4   :  { %v337_v4 = vld [vmem:[#allocation2 + $0x240] sm:$0xfe]  ;;  %v3039_v2 = vsel %vm918_vm2, %v3037_v62, %v3038_v53  ;;  %v6566_v26 = vmul.f32 %v8253_v51, %v3637_v50  ;;  %v3905_v11 = vld [vmem:[#allocation3 + $0x128] sm:$0x7f]  ;;  %v1417_v62 = vadd.f32 %v1410_v35, %v6474_v36  ;;  %v3072_v32 = vsel %vm918_vm2, %v3070_v25, %v3071_v52  ;;  %v445_v53 = vld [vmem:[#allocation2 + $0xf0] sm:$0x1] }
 0x1e5   :  { %8250 = vst [vmem:[#allocation17_spill] sm:$0xff] %v6560_v56  ;;  %v8251_v47 = vld [vmem:[#allocation72_spill] sm:$0xff]  ;;  %v4009_v19 = vld [vmem:[#allocation3 + $0x128] sm:$0x7f]  ;;  %3113 = vst [vmem:[#allocation3 + $0x5e8] sm:$0x7f] %v3039_v2 }
 0x1e6   :  { %v6563_v60 = vmul.f32 %v8251_v47, %v3513_v27  ;;  %8254 = vst [vmem:[#allocation8_spill] sm:$0xff] %v6566_v26  ;;  %v4113_v12 = vld [vmem:[#allocation3 + $0x128] sm:$0x7f]  ;;  %v444_v55 = vld [vmem:[#allocation2 + $0xe0] sm:$0xfc]  ;;  %v189_v56 = vrot.slane %v133_v46, 6 }
 0x1e7   :  { %v2432_v16 = vld [vmem:[#allocation2 + $0xe8] sm:$0xfe]  ;;  %v467_v50 = vld [vmem:[#allocation2 + $0x250] sm:$0x1]  ;;  %v1528_v26 = vld [vmem:[#allocation3 + $0x5e0] sm:$0x7f]  ;;  %v6582_v25 = vmul.f32 %v4113_v12, %v8251_v47 }
 0x1e8   :  { %8252 = vst [vmem:[#allocation61_spill] sm:$0xff] %v6563_v60  ;;  %v2443_v41 = vld [vmem:[#allocation2 + $0x248] sm:$0xfe]  ;;  %3124 = vst [vmem:[#allocation3 + $0x698] sm:$0x7f] %v3072_v32  ;;  %v176_v60 = vrot.slane %v120_v23, 6  ;;  %v6573_v46 = vmul.f32 %v8029_v34, %v1528_v26 }
 0x1e9   :  { %v4217_v27 = vld [vmem:[#allocation3 + $0x128] sm:$0x7f]  ;;  %v190_v24 = vrot.slane %v134_v57, 6  ;;  %v1427_v49 = vld [vmem:[#allocation3 + $0x90] sm:$0x7f]  ;;  %v370_v0 = vrot.slane %v326_v61, 1 }
 0x1ea   :  { %v381_v22 = vrot.slane %v337_v4, 1  ;;  %v2476_v45 = vrot.slane %v2432_v16, 1  ;;  %v2487_v39 = vrot.slane %v2443_v41, 1  ;;  %v1556_v31 = vld [vmem:[#allocation3 + $0x90] sm:$0x7f]  ;;  %v540_v36 = vrot.slane %v444_v55, 2 }
 0x1eb   :  { %243 = vst [vmem:[#allocation2 + $0x100] sm:$0xfc] %v175_v30  ;;  %245 = vst [vmem:[#allocation2 + $0x110] sm:$0x1] %v175_v30  ;;  %v541_v35 = vrot.slane %v445_v53, 2  ;;  %v573_v52 = vrot.slane %v466_v10, 2  ;;  %v6576_v41 = vmul.f32 %v3905_v11, %v8240_v20  ;;  %v6579_v30 = vmul.f32 %v4009_v19, %v8249_v14 }
 0x1ec   :  { %244 = vst [vmem:[#allocation2 + $0x108] sm:$0xfc] %v176_v60  ;;  %246 = vst [vmem:[#allocation2 + $0x118] sm:$0x1] %v176_v60  ;;  %v574_v18 = vrot.slane %v467_v50, 2  ;;  %v8256_v2 = vld [vmem:[#allocation92_spill] sm:$0xff]  ;;  %v6589_v20 = vmul.f32 %v4217_v27, %v8253_v51 }
 0x1ed   :  { %271 = vst [vmem:[#allocation2 + $0x260] sm:$0xfc] %v189_v56  ;;  %273 = vst [vmem:[#allocation2 + $0x270] sm:$0x1] %v189_v56  ;;  %v2053_v23 = vld [vmem:[#allocation3 + $0x140] sm:$0x7f]  ;;  %v6586_v56 = vadd.f32 %v8256_v2, %v1159_v59  ;;  %v542_v60 = vsel %vm518_vm0, %v540_v36, %v541_v35  ;;  %v6602_v59 = vmul.f32 %v8135_v13, %v1427_v49 }
 0x1ee   :  { %272 = vst [vmem:[#allocation2 + $0x268] sm:$0xfc] %v190_v24  ;;  %274 = vst [vmem:[#allocation2 + $0x278] sm:$0x1] %v190_v24  ;;  %v1811_v4 = vld [vmem:[#allocation3 + $0x690] sm:$0x7f] }
 0x1ef   :  { %8255 = vst [vmem:[#allocation20_spill] sm:$0xff] %v6573_v46  ;;  %v1920_v61 = vld [vmem:[#allocation3 + $0x690] sm:$0x7f]  ;;  %415 = vst [vmem:[#allocation3 + $0x1d0] sm:$0x7f] %v370_v0  ;;  %v1818_v24 = vmul.f32 %v1811_v4, %v8013_v38  ;;  %v8257_v0 = vld [vmem:[#allocation37_spill] sm:$0xff]  ;;  %v575_v38 = vsel %vm518_vm0, %v573_v52, %v574_v18 }
 0x1f0   :  { %426 = vst [vmem:[#allocation3 + $0x280] sm:$0x7f] %v381_v22  ;;  %2520 = vst [vmem:[#allocation3 + $0x1d8] sm:$0x7f] %v2476_v45  ;;  %v2162_v10 = vld [vmem:[#allocation3 + $0x140] sm:$0x7f]  ;;  %v6595_v19 = vadd.f32 %v8257_v0, %v1288_v29  ;;  %v1927_v32 = vmul.f32 %v1920_v61, %v8014_v44  ;;  %v6606_v22 = vmul.f32 %v8139_v21, %v1556_v31 }
 0x1f1   :  { %2531 = vst [vmem:[#allocation3 + $0x288] sm:$0x7f] %v2487_v39  ;;  %v2029_v26 = vld [vmem:[#allocation3 + $0x690] sm:$0x7f]  ;;  %v6592_v11 = vld [vmem:[#allocation2 + $0xe8] sm:$0xfc]  ;;  %v6609_v29 = vmul.f32 %v2053_v23, %v8135_v13  ;;  %v1825_v31 = vadd.f32 %v1818_v24, %v6496_v7 }
 0x1f2   :  { %v2247_v57 = vld [vmem:[#allocation3 + $0x690] sm:$0x7f]  ;;  %615 = vst [vmem:[#allocation3 + $0x330] sm:$0x7f] %v542_v60  ;;  %8259 = vst [vmem:[#allocation62_spill] sm:$0xff] %v6602_v59  ;;  %v2036_v45 = vmul.f32 %v2029_v26, %v8021_v17  ;;  %v8263_v39 = vld [vmem:[#allocation136_spill] sm:$0xff]  ;;  %v1934_v2 = vadd.f32 %v1927_v32, %v6499_v1 }
 0x1f3   :  { %v2138_v12 = vld [vmem:[#allocation3 + $0x690] sm:$0x7f]  ;;  %v3240_v27 = vld [vmem:[#allocation3 + $0x5e8] sm:$0x7f]  ;;  %626 = vst [vmem:[#allocation3 + $0x3e0] sm:$0x7f] %v575_v38  ;;  %v2254_v49 = vmul.f32 %v2247_v57, %v8263_v39 }
 0x1f4   :  { %v8258_v16 = vld [vmem:[#allocation142_spill] sm:$0xff]  ;;  %v3364_v53 = vld [vmem:[#allocation3 + $0x5e8] sm:$0x7f]  ;;  %8260 = vst [vmem:[#allocation63_spill] sm:$0xff] %v6606_v22  ;;  %8261 = vst [vmem:[#allocation65_spill] sm:$0xff] %v6609_v29  ;;  %v2145_v23 = vmul.f32 %v2138_v12, %v8029_v34  ;;  %v2043_v57 = vadd.f32 %v2036_v45, %v6503_v3 }
 0x1f5   :  { %v6598_v55 = vadd.f32 %v8258_v16, %v1417_v62  ;;  %v3488_v50 = vld [vmem:[#allocation3 + $0x5e8] sm:$0x7f]  ;;  %v6612_v62 = vmul.f32 %v2162_v10, %v8139_v21  ;;  %v8264_v36 = vld [vmem:[#allocation42_spill] sm:$0xff]  ;;  %v3884_v52 = vld [vmem:[#allocation3 + $0x698] sm:$0x7f]  ;;  %v6624_v16 = vadd.f32 %v2254_v49, %v6507_v43  ;;  %v3375_v38 = vmul.f32 %v4951_v15, %v3364_v53 }
 0x1f6   :  { %v3251_v35 = vmul.f32 %v8264_v36, %v3240_v27  ;;  %v3988_v18 = vld [vmem:[#allocation3 + $0x698] sm:$0x7f]  ;;  %v3891_v10 = vmul.f32 %v3884_v52, %v8264_v36  ;;  %v3499_v27 = vmul.f32 %v7923_v48, %v3488_v50  ;;  %v283_v4 = vld [vmem:[#allocation2 + $0x100] sm:$0x7f]  ;;  %v2389_v24 = vld [vmem:[#allocation2 + $0x108] sm:$0x7f]  ;;  %v2152_v1 = vadd.f32 %v2145_v23, %v6505_v42 }
 0x1f7   :  { %8262 = vst [vmem:[#allocation94_spill] sm:$0xff] %v6612_v62  ;;  %v3515_v61 = vld [vmem:[#allocation3 + $0x98] sm:$0x7f]  ;;  %8265 = vst [vmem:[#allocation95_spill] sm:$0xff] %v6624_v16  ;;  %v294_v7 = vld [vmem:[#allocation2 + $0x260] sm:$0x7f]  ;;  %v3995_v36 = vmul.f32 %v3988_v18, %v4951_v15  ;;  %v3382_v3 = vadd.f32 %v3375_v38, %v6514_v54  ;;  %v6644_v18 = vmul.f32 %v6624_v16, %v6624_v16 }
 0x1f8   :  { %v4092_v60 = vld [vmem:[#allocation3 + $0x698] sm:$0x7f]  ;;  %v3258_v12 = vadd.f32 %v3251_v35, %v6511_v28  ;;  %v3612_v32 = vld [vmem:[#allocation3 + $0x5e8] sm:$0x7f]  ;;  %305 = vst [vmem:[#allocation3 + $0x80] sm:$0x7f] %v283_v4  ;;  %v3506_v43 = vadd.f32 %v3499_v27, %v6518_v37  ;;  %v3898_v42 = vadd.f32 %v3891_v10, %v6526_v8  ;;  %v6640_v35 = vmul.f32 %v8251_v47, %v3515_v61 }
 0x1f9   :  { %v4196_v0 = vld [vmem:[#allocation3 + $0x698] sm:$0x7f]  ;;  %v4099_v52 = vmul.f32 %v4092_v60, %v7923_v48  ;;  %316 = vst [vmem:[#allocation3 + $0x130] sm:$0x7f] %v294_v7  ;;  %2411 = vst [vmem:[#allocation3 + $0x88] sm:$0x7f] %v2389_v24  ;;  %v4002_v28 = vadd.f32 %v3995_v36, %v6531_v6  ;;  %v6647_v54 = vmul.f32 %v8044_v9, %v3612_v32 }
 0x1fa   :  { %v4300_v26 = vld [vmem:[#allocation3 + $0x698] sm:$0x7f]  ;;  %v4203_v53 = vmul.f32 %v4196_v0, %v8044_v9  ;;  %v1193_v45 = vld [vmem:[#allocation3 + $0x1d0] sm:$0x7f]  ;;  %8266 = vst [vmem:[#allocation97_spill] sm:$0xff] %v6640_v35  ;;  %8267 = vst [vmem:[#allocation86_spill] sm:$0xff] %v6644_v18 }
 0x1fb   :  { %v4307_v50 = vmul.f32 %v4300_v26, %v8149_v5  ;;  %v4106_v49 = vadd.f32 %v4099_v52, %v6534_v58  ;;  %8268 = vst [vmem:[#allocation98_spill] sm:$0xff] %v6647_v54  ;;  %v1855_v8 = vld [vmem:[#allocation3 + $0x280] sm:$0x7f]  ;;  %v8270_v23 = vld [vmem:[#allocation153_spill] sm:$0xff]  ;;  %v1956_v58 = vadd.f32 %v6479_v63, %v1934_v2  ;;  %v1322_v26 = vld [vmem:[#allocation3 + $0x1d0] sm:$0x7f]  ;;  %v4023_v63 = vadd.f32 %v6579_v30, %v4002_v28 }
 0x1fc   :  { %v4210_v37 = vadd.f32 %v4203_v53, %v6548_v40  ;;  %v1847_v6 = vadd.f32 %v8270_v23, %v1825_v31  ;;  %v8271_v10 = vld [vmem:[#allocation161_spill] sm:$0xff]  ;;  %v8272_v60 = vld [vmem:[#allocation12_spill] sm:$0xff]  ;;  %v1451_v38 = vld [vmem:[#allocation3 + $0x1d0] sm:$0x7f]  ;;  %v3919_v31 = vadd.f32 %v6576_v41, %v3898_v42 }
 0x1fd   :  { %v6651_v4 = vadd.f32 %v4307_v50, %v6554_v33  ;;  %v2065_v61 = vadd.f32 %v8271_v10, %v2043_v57  ;;  %v1204_v0 = vmul.f32 %v8272_v60, %v1193_v45  ;;  %v8273_v27 = vld [vmem:[#allocation78_spill] sm:$0xff]  ;;  %v8275_v36 = vld [vmem:[#allocation17_spill] sm:$0xff]  ;;  %v1964_v53 = vld [vmem:[#allocation3 + $0x280] sm:$0x7f]  ;;  %v4127_v2 = vadd.f32 %v6582_v25, %v4106_v49 }
 0x1fe   :  { %v2174_v7 = vadd.f32 %v8273_v27, %v2152_v1  ;;  %v8274_v24 = vld [vmem:[#allocation102_spill] sm:$0xff]  ;;  %v3407_v40 = vadd.f32 %v8275_v36, %v3382_v3  ;;  %v8276_v52 = vld [vmem:[#allocation61_spill] sm:$0xff]  ;;  %v2073_v50 = vld [vmem:[#allocation3 + $0x280] sm:$0x7f]  ;;  %v1862_v57 = vmul.f32 %v1855_v8, %v8272_v60 }
 0x1ff   :  { %8269 = vst [vmem:[#allocation99_spill] sm:$0xff] %v6651_v4  ;;  %v3283_v32 = vadd.f32 %v8274_v24, %v3258_v12  ;;  %v3531_v33 = vadd.f32 %v8276_v52, %v3506_v43  ;;  %v3290_v54 = vld [vmem:[#allocation3 + $0x1d8] sm:$0x7f]  ;;  %v2182_v45 = vld [vmem:[#allocation3 + $0x280] sm:$0x7f]  ;;  %v6667_v1 = vmul.f32 %v6651_v4, %v6651_v4  ;;  %v4231_v12 = vadd.f32 %v6589_v20, %v4210_v37  ;;  %v8279_v10 = vld [vmem:[#allocation5_spill] sm:$0xff] }
 0x200   :  { %v3926_v23 = vld [vmem:[#allocation3 + $0x288] sm:$0x7f]  ;;  %v8278_v3 = vld [vmem:[#allocation27_spill] sm:$0xff]  ;;  %v1462_v27 = vmul.f32 %v8279_v10, %v1451_v38  ;;  %v1211_v41 = vadd.f32 %v1204_v0, %v6586_v56  ;;  %v2080_v25 = vmul.f32 %v2073_v50, %v8279_v10  ;;  %v8280_v42 = vld [vmem:[#allocation14_spill] sm:$0xff] }
 0x201   :  { %8277 = vst [vmem:[#allocation108_spill] sm:$0xff] %v6667_v1  ;;  %v1333_v43 = vmul.f32 %v8278_v3, %v1322_v26  ;;  %v3414_v24 = vld [vmem:[#allocation3 + $0x1d8] sm:$0x7f]  ;;  %v1971_v30 = vmul.f32 %v1964_v53, %v8278_v3  ;;  %v3301_v28 = vmul.f32 %v8280_v42, %v3290_v54  ;;  %v4030_v8 = vld [vmem:[#allocation3 + $0x288] sm:$0x7f]  ;;  %v3933_v38 = vmul.f32 %v3926_v23, %v8280_v42  ;;  %v8282_v1 = vld [vmem:[#allocation30_spill] sm:$0xff] }
 0x202   :  { %v3538_v49 = vld [vmem:[#allocation3 + $0x1d8] sm:$0x7f]  ;;  %v1219_v60 = vld [vmem:[#allocation3 + $0x330] sm:$0x7f]  ;;  %v6678_v20 = vadd.f32 %v1462_v27, %v6598_v55  ;;  %v4134_v52 = vld [vmem:[#allocation3 + $0x288] sm:$0x7f]  ;;  %v6682_v53 = vadd.f32 %v1862_v57, %v1847_v6  ;;  %v6686_v54 = vadd.f32 %v2080_v25, %v2065_v61  ;;  %v3425_v4 = vmul.f32 %v8282_v1, %v3414_v24 }
 0x203   :  { %v1340_v36 = vadd.f32 %v1333_v43, %v6595_v19  ;;  %v8281_v37 = vld [vmem:[#allocation23_spill] sm:$0xff]  ;;  %v4238_v56 = vld [vmem:[#allocation3 + $0x288] sm:$0x7f]  ;;  %v6684_v50 = vadd.f32 %v1971_v30, %v1956_v58  ;;  %v1348_v18 = vld [vmem:[#allocation3 + $0x330] sm:$0x7f]  ;;  %v4037_v23 = vmul.f32 %v4030_v8, %v8282_v1  ;;  %v6694_v58 = vadd.f32 %v3301_v28, %v3283_v32 }
 0x204   :  { %v2189_v26 = vmul.f32 %v2182_v45, %v8281_v37  ;;  %v2550_v0 = vld [vmem:[#allocation2 + $0xf8] sm:$0x1]  ;;  %v2571_v19 = vld [vmem:[#allocation2 + $0x248] sm:$0xfc]  ;;  %v8283_v27 = vld [vmem:[#allocation38_spill] sm:$0xff]  ;;  %v6696_v61 = vadd.f32 %v3425_v4, %v3407_v40  ;;  %v6702_v8 = vadd.f32 %v3933_v38, %v3919_v31 }
 0x205   :  { %v2400_v43 = vld [vmem:[#allocation2 + $0x268] sm:$0x7f]  ;;  %v3549_v45 = vmul.f32 %v8283_v27, %v3538_v49  ;;  %v8284_v42 = vld [vmem:[#allocation16_spill] sm:$0xff]  ;;  %v2572_v46 = vld [vmem:[#allocation2 + $0x258] sm:$0x1]  ;;  %v4141_v24 = vmul.f32 %v4134_v52, %v8283_v27  ;;  %v2677_v59 = vrot.slane %v2571_v19, 2 }
 0x206   :  { %v6689_v55 = vadd.f32 %v2189_v26, %v2174_v7  ;;  %v1230_v16 = vmul.f32 %v8284_v42, %v1219_v60  ;;  %v644_v6 = vld [vmem:[#allocation2 + $0xe0] sm:$0xf8]  ;;  %v645_v57 = vld [vmem:[#allocation2 + $0xf0] sm:$0x3]  ;;  %2422 = vst [vmem:[#allocation3 + $0x138] sm:$0x7f] %v2400_v43  ;;  %v6704_v60 = vadd.f32 %v4037_v23, %v4023_v63 }
 0x207   :  { %v8285_v30 = vld [vmem:[#allocation74_spill] sm:$0xff]  ;;  %v666_v26 = vld [vmem:[#allocation2 + $0x240] sm:$0xf8]  ;;  %v2747_v49 = vld [vmem:[#allocation2 + $0xe8] sm:$0xf8]  ;;  %v6700_v62 = vadd.f32 %v3549_v45, %v3531_v33  ;;  %v6707_v29 = vadd.f32 %v4141_v24, %v4127_v2  ;;  %v8288_v2 = vrot.slane %v6592_v11, 2 }
 0x208   :  { %v4245_v25 = vmul.f32 %v4238_v56, %v8285_v30  ;;  %v1477_v7 = vld [vmem:[#allocation3 + $0x330] sm:$0x7f]  ;;  %v8286_v22 = vld [vmem:[#allocation28_spill] sm:$0xff]  ;;  %v2748_v28 = vld [vmem:[#allocation2 + $0xf8] sm:$0x3]  ;;  %v2645_v56 = vrot.slane %v2550_v0, 2  ;;  %v6711_v45 = vadd.f32 %v1230_v16, %v1211_v41 }
 0x209   :  { %v667_v35 = vld [vmem:[#allocation2 + $0x250] sm:$0x3]  ;;  %v1359_v43 = vmul.f32 %v8286_v22, %v1348_v18  ;;  %v1877_v32 = vld [vmem:[#allocation3 + $0x3e0] sm:$0x7f]  ;;  %v2769_v4 = vld [vmem:[#allocation2 + $0x248] sm:$0xf8] }
 0x20a   :  { %v2770_v40 = vld [vmem:[#allocation2 + $0x258] sm:$0x3]  ;;  %v6709_v52 = vadd.f32 %v4245_v25, %v4231_v12  ;;  %v844_v30 = vld [vmem:[#allocation2 + $0xe0] sm:$0xf0]  ;;  %v845_v27 = vld [vmem:[#allocation2 + $0xf0] sm:$0x7]  ;;  %v1884_v37 = vmul.f32 %v1877_v32, %v8284_v42  ;;  %v2646_v12 = vsel %vm518_vm0, %v8288_v2, %v2645_v56 }
 0x20b   :  { %v866_v33 = vld [vmem:[#allocation2 + $0x240] sm:$0xf0]  ;;  %v6713_v31 = vadd.f32 %v1359_v43, %v1340_v36  ;;  %v8287_v63 = vld [vmem:[#allocation6_spill] sm:$0xff]  ;;  %v2678_v18 = vrot.slane %v2572_v46, 2  ;;  %v2945_v1 = vld [vmem:[#allocation2 + $0xe8] sm:$0xf0] }
 0x20c   :  { %v1488_v38 = vmul.f32 %v8287_v63, %v1477_v7  ;;  %v867_v23 = vld [vmem:[#allocation2 + $0x250] sm:$0x7]  ;;  %v740_v0 = vrot.slane %v644_v6, 3  ;;  %v741_v19 = vrot.slane %v645_v57, 3  ;;  %v2946_v24 = vld [vmem:[#allocation2 + $0xf8] sm:$0x7] }
 0x20d   :  { %v2967_v25 = vld [vmem:[#allocation2 + $0x248] sm:$0xf0]  ;;  %v2968_v10 = vld [vmem:[#allocation2 + $0x258] sm:$0x7]  ;;  %v1986_v16 = vld [vmem:[#allocation3 + $0x3e0] sm:$0x7f]  ;;  %v2679_v36 = vsel %vm518_vm0, %v2677_v59, %v2678_v18 }
 0x20e   :  { %v2095_v41 = vld [vmem:[#allocation3 + $0x3e0] sm:$0x7f]  ;;  %2718 = vst [vmem:[#allocation3 + $0x338] sm:$0x7f] %v2646_v12  ;;  %v773_v7 = vrot.slane %v666_v26, 3  ;;  %v774_v46 = vrot.slane %v667_v35, 3  ;;  %v742_v42 = vsel %vm718_vm1, %v740_v0, %v741_v19 }
 0x20f   :  { %v2842_v43 = vrot.slane %v2747_v49, 3  ;;  %v2204_v3 = vld [vmem:[#allocation3 + $0x3e0] sm:$0x7f]  ;;  %2729 = vst [vmem:[#allocation3 + $0x3e8] sm:$0x7f] %v2679_v36  ;;  %v2843_v11 = vrot.slane %v2748_v28, 3 }
 0x210   :  { %v2875_v32 = vrot.slane %v2769_v4, 3  ;;  %v2876_v56 = vrot.slane %v2770_v40, 3  ;;  %815 = vst [vmem:[#allocation3 + $0x490] sm:$0x7f] %v742_v42  ;;  %v775_v6 = vsel %vm718_vm1, %v773_v7, %v774_v46  ;;  %v940_v57 = vrot.slane %v844_v30, 4  ;;  %v8289_v19 = vld [vmem:[#allocation46_spill] sm:$0xff] }
 0x211   :  { %v941_v2 = vrot.slane %v845_v27, 4  ;;  %v973_v5 = vrot.slane %v866_v33, 4  ;;  %v1297_v9 = vld [vmem:[#allocation3 + $0x80] sm:$0x7f]  ;;  %826 = vst [vmem:[#allocation3 + $0x540] sm:$0x7f] %v775_v6  ;;  %v2844_v59 = vsel %vm718_vm1, %v2842_v43, %v2843_v11  ;;  %v1993_v27 = vmul.f32 %v1986_v16, %v8286_v22 }
 0x212   :  { %v2877_v35 = vsel %vm718_vm1, %v2875_v32, %v2876_v56  ;;  %v974_v26 = vrot.slane %v867_v23, 4  ;;  %v3040_v49 = vrot.slane %v2945_v1, 4  ;;  %v1426_v18 = vld [vmem:[#allocation3 + $0x80] sm:$0x7f]  ;;  %2916 = vst [vmem:[#allocation3 + $0x498] sm:$0x7f] %v2844_v59  ;;  %v2102_v33 = vmul.f32 %v2095_v41, %v8287_v63 }
 0x213   :  { %v1555_v12 = vld [vmem:[#allocation3 + $0x80] sm:$0x7f]  ;;  %2927 = vst [vmem:[#allocation3 + $0x548] sm:$0x7f] %v2877_v35  ;;  %v942_v28 = vsel %vm918_vm2, %v940_v57, %v941_v2  ;;  %v3041_v4 = vrot.slane %v2946_v24, 4  ;;  %v3073_v40 = vrot.slane %v2967_v25, 4  ;;  %v2211_v36 = vmul.f32 %v2204_v3, %v8289_v19 }
 0x214   :  { %v3074_v0 = vrot.slane %v2968_v10, 4  ;;  %v1943_v30 = vld [vmem:[#allocation3 + $0x130] sm:$0x7f]  ;;  %1015 = vst [vmem:[#allocation3 + $0x5f0] sm:$0x7f] %v942_v28  ;;  %v975_v23 = vsel %vm918_vm2, %v973_v5, %v974_v26  ;;  %v6731_v43 = vadd.f32 %v1488_v38, %v6678_v20  ;;  %v6734_v24 = vadd.f32 %v1884_v37, %v6682_v53  ;;  %v8290_v11 = vld [vmem:[#allocation25_spill] sm:$0xff] }
 0x215   :  { %v2052_v1 = vld [vmem:[#allocation3 + $0x130] sm:$0x7f]  ;;  %v3390_v46 = vld [vmem:[#allocation3 + $0x88] sm:$0x7f]  ;;  %1026 = vst [vmem:[#allocation3 + $0x6a0] sm:$0x7f] %v975_v23  ;;  %v3042_v10 = vsel %vm918_vm2, %v3040_v49, %v3041_v4  ;;  %v6739_v42 = vadd.f32 %v1993_v27, %v6684_v50  ;;  %v6742_v5 = vadd.f32 %v2102_v33, %v6686_v54  ;;  %v6745_v20 = vadd.f32 %v2211_v36, %v6689_v55 }
 0x216   :  { %v2161_v7 = vld [vmem:[#allocation3 + $0x130] sm:$0x7f]  ;;  %v3075_v25 = vsel %vm918_vm2, %v3073_v40, %v3074_v0  ;;  %v3514_v16 = vld [vmem:[#allocation3 + $0x88] sm:$0x7f]  ;;  %v4010_v3 = vld [vmem:[#allocation3 + $0x138] sm:$0x7f]  ;;  %v6748_v32 = vmul.f32 %v8290_v11, %v1297_v9  ;;  %v6752_v59 = vmul.f32 %v8135_v13, %v1426_v18  ;;  %v6755_v54 = vmul.f32 %v8139_v21, %v1555_v12 }
 0x217   :  { %v3638_v41 = vld [vmem:[#allocation3 + $0x88] sm:$0x7f]  ;;  %v3315_v38 = vld [vmem:[#allocation3 + $0x338] sm:$0x7f]  ;;  %3114 = vst [vmem:[#allocation3 + $0x5f8] sm:$0x7f] %v3042_v10  ;;  %v6758_v55 = vmul.f32 %v1943_v30, %v8290_v11  ;;  %v6762_v9 = vmul.f32 %v2052_v1, %v8135_v13  ;;  %v6765_v49 = vmul.f32 %v2161_v7, %v8139_v21  ;;  %v6768_v28 = vmul.f32 %v8249_v14, %v3390_v46 }
 0x218   :  { %v3439_v37 = vld [vmem:[#allocation3 + $0x338] sm:$0x7f]  ;;  %3125 = vst [vmem:[#allocation3 + $0x6a8] sm:$0x7f] %v3075_v25  ;;  %v8291_v56 = vld [vmem:[#allocation18_spill] sm:$0xff]  ;;  %8292 = vst [vmem:[#allocation60_spill] sm:$0xff] %v6755_v54  ;;  %v6773_v33 = vmul.f32 %v8251_v47, %v3514_v16  ;;  %v6776_v36 = vmul.f32 %v8253_v51, %v3638_v41 }
 0x219   :  { %v3563_v53 = vld [vmem:[#allocation3 + $0x338] sm:$0x7f]  ;;  %v3326_v6 = vmul.f32 %v8291_v56, %v3315_v38  ;;  %v3947_v57 = vld [vmem:[#allocation3 + $0x3e8] sm:$0x7f]  ;;  %v1245_v26 = vld [vmem:[#allocation3 + $0x490] sm:$0x7f] }
 0x21a   :  { %v4051_v2 = vld [vmem:[#allocation3 + $0x3e8] sm:$0x7f]  ;;  %v3954_v35 = vmul.f32 %v3947_v57, %v8291_v56  ;;  %v4114_v18 = vld [vmem:[#allocation3 + $0x138] sm:$0x7f]  ;;  %v8293_v4 = vld [vmem:[#allocation32_spill] sm:$0xff]  ;;  %8295 = vst [vmem:[#allocation109_spill] sm:$0xff] %v6776_v36 }
 0x21b   :  { %v4155_v50 = vld [vmem:[#allocation3 + $0x3e8] sm:$0x7f]  ;;  %v3450_v40 = vmul.f32 %v8293_v4, %v3439_v37  ;;  %v8294_v12 = vld [vmem:[#allocation75_spill] sm:$0xff]  ;;  %v1899_v30 = vld [vmem:[#allocation3 + $0x540] sm:$0x7f]  ;;  %v4058_v23 = vmul.f32 %v4051_v2, %v8293_v4  ;;  %v6782_v37 = vmul.f32 %v4010_v3, %v8249_v14  ;;  %v6788_v57 = vmul.f32 %v4114_v18, %v8251_v47 }
 0x21c   :  { %v3574_v0 = vmul.f32 %v8294_v12, %v3563_v53  ;;  %v4259_v27 = vld [vmem:[#allocation3 + $0x3e8] sm:$0x7f]  ;;  %v4162_v1 = vmul.f32 %v4155_v50, %v8294_v12  ;;  %v8296_v7 = vld [vmem:[#allocation22_spill] sm:$0xff]  ;;  %v3340_v38 = vld [vmem:[#allocation3 + $0x498] sm:$0x7f]  ;;  %v3333_v53 = vadd.f32 %v3326_v6, %v6694_v58  ;;  %v3961_v2 = vadd.f32 %v3954_v35, %v6702_v8 }
 0x21d   :  { %v1256_v46 = vmul.f32 %v8296_v7, %v1245_v26  ;;  %v1374_v10 = vld [vmem:[#allocation3 + $0x490] sm:$0x7f]  ;;  %v3457_v16 = vadd.f32 %v3450_v40, %v6696_v61  ;;  %v2008_v41 = vld [vmem:[#allocation3 + $0x540] sm:$0x7f]  ;;  %v4065_v50 = vadd.f32 %v4058_v23, %v6704_v60  ;;  %v1906_v14 = vmul.f32 %v1899_v30, %v8296_v7  ;;  %v3968_v54 = vld [vmem:[#allocation3 + $0x548] sm:$0x7f] }
 0x21e   :  { %v1503_v25 = vld [vmem:[#allocation3 + $0x490] sm:$0x7f]  ;;  %v3581_v11 = vadd.f32 %v3574_v0, %v6700_v62  ;;  %v2117_v56 = vld [vmem:[#allocation3 + $0x540] sm:$0x7f]  ;;  %v4169_v58 = vadd.f32 %v4162_v1, %v6707_v29  ;;  %v8298_v61 = vld [vmem:[#allocation31_spill] sm:$0xff] }
 0x21f   :  { %v8297_v26 = vld [vmem:[#allocation76_spill] sm:$0xff]  ;;  %v1385_v6 = vmul.f32 %v8298_v61, %v1374_v10  ;;  %v8299_v62 = vld [vmem:[#allocation49_spill] sm:$0xff]  ;;  %v8300_v0 = vld [vmem:[#allocation26_spill] sm:$0xff]  ;;  %v1263_v60 = vadd.f32 %v1256_v46, %v6711_v45  ;;  %v2015_v35 = vmul.f32 %v2008_v41, %v8298_v61 }
 0x220   :  { %v4266_v36 = vmul.f32 %v4259_v27, %v8297_v26  ;;  %v2226_v3 = vld [vmem:[#allocation3 + $0x540] sm:$0x7f]  ;;  %v1514_v40 = vmul.f32 %v8299_v62, %v1503_v25  ;;  %v3351_v13 = vmul.f32 %v8300_v0, %v3340_v38  ;;  %v3464_v18 = vld [vmem:[#allocation3 + $0x498] sm:$0x7f]  ;;  %v1271_v12 = vld [vmem:[#allocation3 + $0x5f0] sm:$0x7f]  ;;  %v2124_v27 = vmul.f32 %v2117_v56, %v8299_v62 }
 0x221   :  { %v3588_v30 = vld [vmem:[#allocation3 + $0x498] sm:$0x7f]  ;;  %v1392_v23 = vadd.f32 %v1385_v6, %v6713_v31  ;;  %v8301_v1 = vld [vmem:[#allocation80_spill] sm:$0xff]  ;;  %v3975_v10 = vmul.f32 %v3968_v54, %v8300_v0  ;;  %v4072_v25 = vld [vmem:[#allocation3 + $0x548] sm:$0x7f]  ;;  %v2022_v45 = vadd.f32 %v2015_v35, %v6739_v42  ;;  %v1282_v41 = vmul.f32 %v8014_v44, %v1271_v12 }
 0x222   :  { %v4273_v8 = vadd.f32 %v4266_v36, %v6709_v52  ;;  %v1521_v29 = vadd.f32 %v1514_v40, %v6731_v43  ;;  %v2233_v7 = vmul.f32 %v2226_v3, %v8301_v1  ;;  %v4176_v38 = vld [vmem:[#allocation3 + $0x548] sm:$0x7f]  ;;  %v1913_v52 = vadd.f32 %v1906_v14, %v6734_v24  ;;  %v8302_v36 = vld [vmem:[#allocation34_spill] sm:$0xff]  ;;  %v1921_v62 = vld [vmem:[#allocation3 + $0x6a0] sm:$0x7f] }
 0x223   :  { %v4280_v26 = vld [vmem:[#allocation3 + $0x548] sm:$0x7f]  ;;  %v3475_v46 = vmul.f32 %v8302_v36, %v3464_v18  ;;  %v1400_v56 = vld [vmem:[#allocation3 + $0x5f0] sm:$0x7f]  ;;  %v2131_v31 = vadd.f32 %v2124_v27, %v6742_v5  ;;  %v3358_v3 = vadd.f32 %v3351_v13, %v3333_v53  ;;  %v3365_v40 = vld [vmem:[#allocation3 + $0x5f8] sm:$0x7f]  ;;  %v4079_v1 = vmul.f32 %v4072_v25, %v8302_v36 }
 0x224   :  { %v2240_v43 = vadd.f32 %v2233_v7, %v6745_v20  ;;  %v8303_v6 = vld [vmem:[#allocation77_spill] sm:$0xff]  ;;  %v1529_v18 = vld [vmem:[#allocation3 + $0x5f0] sm:$0x7f]  ;;  %v2030_v35 = vld [vmem:[#allocation3 + $0x6a0] sm:$0x7f]  ;;  %v3982_v19 = vadd.f32 %v3975_v10, %v3961_v2  ;;  %v1411_v5 = vmul.f32 %v8021_v17, %v1400_v56  ;;  %v1928_v20 = vmul.f32 %v1921_v62, %v8014_v44 }
 0x225   :  { %v3599_v54 = vmul.f32 %v8303_v6, %v3588_v30  ;;  %v3482_v0 = vadd.f32 %v3475_v46, %v3457_v16  ;;  %v4183_v24 = vmul.f32 %v4176_v38, %v8303_v6  ;;  %v8304_v42 = vld [vmem:[#allocation125_spill] sm:$0xff]  ;;  %v2139_v12 = vld [vmem:[#allocation3 + $0x6a0] sm:$0x7f]  ;;  %v3489_v53 = vld [vmem:[#allocation3 + $0x5f8] sm:$0x7f]  ;;  %v4086_v30 = vadd.f32 %v4079_v1, %v4065_v50 }
 0x226   :  { %v4287_v14 = vmul.f32 %v4280_v26, %v8304_v42  ;;  %v2248_v13 = vld [vmem:[#allocation3 + $0x6a0] sm:$0x7f]  ;;  %v3989_v27 = vld [vmem:[#allocation3 + $0x6a8] sm:$0x7f]  ;;  %v1289_v7 = vadd.f32 %v1282_v41, %v1263_v60  ;;  %v3376_v25 = vmul.f32 %v4951_v15, %v3365_v40  ;;  %v3613_v38 = vld [vmem:[#allocation3 + $0x5f8] sm:$0x7f]  ;;  %v1418_v46 = vadd.f32 %v1411_v5, %v1392_v23 }
 0x227   :  { %v3606_v61 = vadd.f32 %v3599_v54, %v3581_v11  ;;  %v4190_v16 = vadd.f32 %v4183_v24, %v4169_v58  ;;  %v1540_v26 = vmul.f32 %v8029_v34, %v1529_v18  ;;  %v2037_v42 = vmul.f32 %v2030_v35, %v8021_v17  ;;  %v4093_v50 = vld [vmem:[#allocation3 + $0x6a8] sm:$0x7f]  ;;  %v327_v1 = vld [vmem:[#allocation2 + $0x100] sm:$0xfe]  ;;  %v8306_v40 = vld [vmem:[#allocation79_spill] sm:$0xff] }
 0x228   :  { %v2146_v11 = vmul.f32 %v2139_v12, %v8029_v34  ;;  %v1935_v2 = vadd.f32 %v1928_v20, %v1913_v52  ;;  %v2255_v10 = vmul.f32 %v2248_v13, %v8263_v39  ;;  %v3500_v44 = vmul.f32 %v7923_v48, %v3489_v53  ;;  %v4197_v58 = vld [vmem:[#allocation3 + $0x6a8] sm:$0x7f]  ;;  %v338_v41 = vld [vmem:[#allocation2 + $0x260] sm:$0xfe]  ;;  %v447_v12 = vld [vmem:[#allocation2 + $0x110] sm:$0x1] }
 0x229   :  { %v3996_v62 = vmul.f32 %v3989_v27, %v4951_v15  ;;  %v4301_v60 = vld [vmem:[#allocation3 + $0x6a8] sm:$0x7f]  ;;  %v4294_v56 = vadd.f32 %v4287_v14, %v4273_v8  ;;  %v6825_v23 = vadd.f32 %v1540_v26, %v1521_v29  ;;  %v6827_v54 = vadd.f32 %v2037_v42, %v2022_v45  ;;  %v446_v35 = vld [vmem:[#allocation2 + $0x100] sm:$0xfc]  ;;  %v469_v8 = vld [vmem:[#allocation2 + $0x270] sm:$0x1] }
 0x22a   :  { %v3624_v24 = vmul.f32 %v8306_v40, %v3613_v38  ;;  %v2433_v18 = vld [vmem:[#allocation2 + $0x108] sm:$0xfe]  ;;  %v6830_v5 = vadd.f32 %v2146_v11, %v2131_v31  ;;  %v6832_v20 = vadd.f32 %v2255_v10, %v2240_v43  ;;  %v6834_v15 = vadd.f32 %v3376_v25, %v3358_v3  ;;  %v468_v53 = vld [vmem:[#allocation2 + $0x260] sm:$0xfc]  ;;  %v2552_v26 = vld [vmem:[#allocation2 + $0x118] sm:$0x1] }
 0x22b   :  { %8305 = vst [vmem:[#allocation100_spill] sm:$0xff] %v6825_v23  ;;  %v2444_v52 = vld [vmem:[#allocation2 + $0x268] sm:$0xfe]  ;;  %v6836_v13 = vadd.f32 %v3500_v44, %v3482_v0  ;;  %v4100_v45 = vmul.f32 %v4093_v50, %v7923_v48  ;;  %v4204_v42 = vmul.f32 %v4197_v58, %v8306_v40  ;;  %v8309_v27 = vld [vmem:[#allocation48_spill] sm:$0xff]  ;;  %v2574_v11 = vld [vmem:[#allocation2 + $0x278] sm:$0x1]  ;;  %v6843_v43 = vadd.f32 %v3996_v62, %v3982_v19 }
 0x22c   :  { %8307 = vst [vmem:[#allocation110_spill] sm:$0xff] %v6832_v20  ;;  %v2551_v29 = vld [vmem:[#allocation2 + $0x108] sm:$0xfc]  ;;  %v6838_v14 = vadd.f32 %v3624_v24, %v3606_v61  ;;  %v4308_v38 = vmul.f32 %v4301_v60, %v8309_v27  ;;  %v6846_v3 = vadd.f32 %v6748_v32, %v1289_v7  ;;  %v6849_v0 = vadd.f32 %v6752_v59, %v1418_v46  ;;  %v646_v25 = vld [vmem:[#allocation2 + $0x100] sm:$0xf8] }
 0x22d   :  { %v2573_v31 = vld [vmem:[#allocation2 + $0x268] sm:$0xfc]  ;;  %v6852_v61 = vadd.f32 %v6758_v55, %v1935_v2  ;;  %v647_v10 = vld [vmem:[#allocation2 + $0x110] sm:$0x3]  ;;  %v668_v44 = vld [vmem:[#allocation2 + $0x260] sm:$0xf8]  ;;  %v6854_v50 = vadd.f32 %v4100_v45, %v4086_v30  ;;  %v6856_v58 = vadd.f32 %v4204_v42, %v4190_v16 }
 0x22e   :  { %8308 = vst [vmem:[#allocation111_spill] sm:$0xff] %v6838_v14  ;;  %v371_v60 = vrot.slane %v327_v1, 1  ;;  %v382_v24 = vrot.slane %v338_v41, 1  ;;  %v669_v19 = vld [vmem:[#allocation2 + $0x270] sm:$0x3]  ;;  %v2477_v14 = vrot.slane %v2433_v18, 1  ;;  %v6858_v55 = vadd.f32 %v4308_v38, %v4294_v56 }
 0x22f   :  { %v2749_v62 = vld [vmem:[#allocation2 + $0x108] sm:$0xf8]  ;;  %v2488_v32 = vrot.slane %v2444_v52, 1  ;;  %v543_v7 = vrot.slane %v446_v35, 2  ;;  %v544_v20 = vrot.slane %v447_v12, 2  ;;  %v576_v2 = vrot.slane %v468_v53, 2 }
 0x230   :  { %v2750_v59 = vld [vmem:[#allocation2 + $0x118] sm:$0x3]  ;;  %v2771_v46 = vld [vmem:[#allocation2 + $0x268] sm:$0xf8]  ;;  %8310 = vst [vmem:[#allocation117_spill] sm:$0xff] %v6858_v55  ;;  %v577_v30 = vrot.slane %v469_v8, 2 }
 0x231   :  { %v2772_v23 = vld [vmem:[#allocation2 + $0x278] sm:$0x3]  ;;  %416 = vst [vmem:[#allocation3 + $0x1e0] sm:$0x7f] %v371_v60  ;;  %427 = vst [vmem:[#allocation3 + $0x290] sm:$0x7f] %v382_v24  ;;  %v545_v1 = vsel %vm518_vm0, %v543_v7, %v544_v20 }
 0x232   :  { %v2647_v45 = vrot.slane %v2551_v29, 2  ;;  %v846_v16 = vld [vmem:[#allocation2 + $0x100] sm:$0xf0]  ;;  %2521 = vst [vmem:[#allocation3 + $0x1e8] sm:$0x7f] %v2477_v14  ;;  %v2648_v41 = vrot.slane %v2552_v26, 2  ;;  %v578_v12 = vsel %vm518_vm0, %v576_v2, %v577_v30 }
 0x233   :  { %2532 = vst [vmem:[#allocation3 + $0x298] sm:$0x7f] %v2488_v32  ;;  %v2680_v18 = vrot.slane %v2573_v31, 2  ;;  %v2681_v52 = vrot.slane %v2574_v11, 2  ;;  %v847_v35 = vld [vmem:[#allocation2 + $0x110] sm:$0x7] }
 0x234   :  { %616 = vst [vmem:[#allocation3 + $0x340] sm:$0x7f] %v545_v1  ;;  %v743_v42 = vrot.slane %v646_v25, 3  ;;  %v744_v56 = vrot.slane %v647_v10, 3  ;;  %v776_v38 = vrot.slane %v668_v44, 3  ;;  %v2649_v53 = vsel %vm518_vm0, %v2647_v45, %v2648_v41 }
 0x235   :  { %v868_v60 = vld [vmem:[#allocation2 + $0x260] sm:$0xf0]  ;;  %627 = vst [vmem:[#allocation3 + $0x3f0] sm:$0x7f] %v578_v12  ;;  %v2682_v8 = vsel %vm518_vm0, %v2680_v18, %v2681_v52  ;;  %v777_v29 = vrot.slane %v669_v19, 3  ;;  %v2845_v14 = vrot.slane %v2749_v62, 3  ;;  %v2066_v19 = vadd.f32 %v6762_v9, %v6827_v54 }
 0x236   :  { %v869_v24 = vld [vmem:[#allocation2 + $0x270] sm:$0x7]  ;;  %v4218_v20 = vld [vmem:[#allocation3 + $0x138] sm:$0x7f]  ;;  %2719 = vst [vmem:[#allocation3 + $0x348] sm:$0x7f] %v2649_v53  ;;  %v745_v26 = vsel %vm718_vm1, %v743_v42, %v744_v56  ;;  %v4024_v12 = vadd.f32 %v6782_v37, %v6843_v43 }
 0x237   :  { %2730 = vst [vmem:[#allocation3 + $0x3f8] sm:$0x7f] %v2682_v8  ;;  %v2846_v31 = vrot.slane %v2750_v59, 3  ;;  %v2878_v11 = vrot.slane %v2771_v46, 3  ;;  %v2879_v32 = vrot.slane %v2772_v23, 3  ;;  %v778_v25 = vsel %vm718_vm1, %v776_v38, %v777_v29  ;;  %v8311_v42 = vld [vmem:[#allocation27_spill] sm:$0xff] }
 0x238   :  { %816 = vst [vmem:[#allocation3 + $0x4a0] sm:$0x7f] %v745_v26  ;;  %v943_v10 = vrot.slane %v846_v16, 4  ;;  %v944_v44 = vrot.slane %v847_v35, 4  ;;  %v976_v7 = vrot.slane %v868_v60, 4  ;;  %v977_v1 = vrot.slane %v869_v24, 4 }
 0x239   :  { %v3639_v2 = vld [vmem:[#allocation3 + $0x98] sm:$0x7f]  ;;  %v4115_v30 = vld [vmem:[#allocation3 + $0x148] sm:$0x7f]  ;;  %827 = vst [vmem:[#allocation3 + $0x550] sm:$0x7f] %v778_v25  ;;  %v2847_v62 = vsel %vm718_vm1, %v2845_v14, %v2846_v31  ;;  %v2880_v45 = vsel %vm718_vm1, %v2878_v11, %v2879_v32  ;;  %v2175_v46 = vadd.f32 %v6765_v49, %v6830_v5  ;;  %v3408_v16 = vadd.f32 %v6768_v28, %v6834_v15 }
 0x23a   :  { %v6870_v59 = vld [vmem:[#allocation2 + $0x108] sm:$0xf0]  ;;  %v4225_v41 = vmul.f32 %v4218_v20, %v8253_v51  ;;  %v1323_v18 = vld [vmem:[#allocation3 + $0x1e0] sm:$0x7f]  ;;  %2917 = vst [vmem:[#allocation3 + $0x4a8] sm:$0x7f] %v2847_v62  ;;  %v945_v54 = vsel %vm918_vm2, %v943_v10, %v944_v44  ;;  %v3532_v35 = vadd.f32 %v6773_v33, %v6836_v13  ;;  %v978_v15 = vsel %vm918_vm2, %v976_v7, %v977_v1 }
 0x23b   :  { %v4219_v23 = vld [vmem:[#allocation3 + $0x148] sm:$0x7f]  ;;  %v1452_v52 = vld [vmem:[#allocation3 + $0x1e0] sm:$0x7f]  ;;  %2928 = vst [vmem:[#allocation3 + $0x558] sm:$0x7f] %v2880_v45  ;;  %v1334_v49 = vmul.f32 %v8311_v42, %v1323_v18  ;;  %v4128_v38 = vadd.f32 %v6788_v57, %v6854_v50  ;;  %v6891_v24 = vmul.f32 %v8253_v51, %v3639_v2  ;;  %v6894_v20 = vmul.f32 %v4115_v30, %v8251_v47 }
 0x23c   :  { %v1581_v9 = vld [vmem:[#allocation3 + $0x1e0] sm:$0x7f]  ;;  %v1965_v5 = vld [vmem:[#allocation3 + $0x290] sm:$0x7f]  ;;  %1016 = vst [vmem:[#allocation3 + $0x600] sm:$0x7f] %v945_v54  ;;  %v4232_v60 = vadd.f32 %v4225_v41, %v6856_v58  ;;  %v6897_v57 = vmul.f32 %v4219_v23, %v8253_v51 }
 0x23d   :  { %v2074_v56 = vld [vmem:[#allocation3 + $0x290] sm:$0x7f]  ;;  %v1972_v53 = vmul.f32 %v1965_v5, %v8311_v42  ;;  %v3415_v8 = vld [vmem:[#allocation3 + $0x1e8] sm:$0x7f]  ;;  %1027 = vst [vmem:[#allocation3 + $0x6b0] sm:$0x7f] %v978_v15  ;;  %v1341_v7 = vadd.f32 %v1334_v49, %v6846_v3 }
 0x23e   :  { %v2183_v28 = vld [vmem:[#allocation3 + $0x290] sm:$0x7f]  ;;  %v1557_v37 = vld [vmem:[#allocation3 + $0xa0] sm:$0x7f]  ;;  %v8312_v13 = vld [vmem:[#allocation5_spill] sm:$0xff] }
 0x23f   :  { %v1463_v43 = vmul.f32 %v8312_v13, %v1452_v52  ;;  %v3539_v29 = vld [vmem:[#allocation3 + $0x1e8] sm:$0x7f]  ;;  %v4031_v14 = vld [vmem:[#allocation3 + $0x298] sm:$0x7f]  ;;  %v2081_v26 = vmul.f32 %v2074_v56, %v8312_v13  ;;  %v8315_v11 = vld [vmem:[#allocation30_spill] sm:$0xff]  ;;  %v6909_v23 = vmul.f32 %v8139_v21, %v1557_v37  ;;  %v1979_v41 = vadd.f32 %v1972_v53, %v6852_v61 }
 0x240   :  { %v8313_v50 = vld [vmem:[#allocation23_spill] sm:$0xff]  ;;  %v3426_v32 = vmul.f32 %v8315_v11, %v3415_v8  ;;  %v3663_v25 = vld [vmem:[#allocation3 + $0x1e8] sm:$0x7f]  ;;  %v1349_v44 = vld [vmem:[#allocation3 + $0x340] sm:$0x7f]  ;;  %v4038_v30 = vmul.f32 %v4031_v14, %v8315_v11 }
 0x241   :  { %v6900_v58 = vmul.f32 %v8313_v50, %v1581_v9  ;;  %v2190_v31 = vmul.f32 %v2183_v28, %v8313_v50  ;;  %v4135_v10 = vld [vmem:[#allocation3 + $0x298] sm:$0x7f]  ;;  %v1470_v2 = vadd.f32 %v1463_v43, %v6849_v0  ;;  %v1478_v45 = vld [vmem:[#allocation3 + $0x340] sm:$0x7f]  ;;  %v1987_v1 = vld [vmem:[#allocation3 + $0x3f0] sm:$0x7f]  ;;  %v2088_v18 = vadd.f32 %v2081_v26, %v2066_v19 }
 0x242   :  { %v4239_v62 = vld [vmem:[#allocation3 + $0x298] sm:$0x7f]  ;;  %8316 = vst [vmem:[#allocation130_spill] sm:$0xff] %v6909_v23  ;;  %v8317_v52 = vld [vmem:[#allocation38_spill] sm:$0xff]  ;;  %v1360_v54 = vmul.f32 %v8286_v22, %v1349_v44  ;;  %v3440_v5 = vld [vmem:[#allocation3 + $0x348] sm:$0x7f]  ;;  %v1994_v28 = vmul.f32 %v1987_v1, %v8286_v22  ;;  %v3433_v37 = vadd.f32 %v3426_v32, %v3408_v16  ;;  %v1489_v19 = vmul.f32 %v8287_v63, %v1478_v45 }
 0x243   :  { %8314 = vst [vmem:[#allocation118_spill] sm:$0xff] %v6900_v58  ;;  %v3550_v9 = vmul.f32 %v8317_v52, %v3539_v29  ;;  %v2096_v42 = vld [vmem:[#allocation3 + $0x3f0] sm:$0x7f]  ;;  %v2197_v3 = vadd.f32 %v2190_v31, %v2175_v46  ;;  %v4142_v56 = vmul.f32 %v4135_v10, %v8317_v52  ;;  %v4052_v8 = vld [vmem:[#allocation3 + $0x3f8] sm:$0x7f]  ;;  %v4045_v14 = vadd.f32 %v4038_v30, %v4024_v12 }
 0x244   :  { %v8318_v49 = vld [vmem:[#allocation74_spill] sm:$0xff]  ;;  %v3564_v53 = vld [vmem:[#allocation3 + $0x348] sm:$0x7f]  ;;  %v1375_v29 = vld [vmem:[#allocation3 + $0x4a0] sm:$0x7f]  ;;  %v2103_v46 = vmul.f32 %v2096_v42, %v8287_v63  ;;  %v3451_v31 = vmul.f32 %v8293_v4, %v3440_v5  ;;  %v1367_v10 = vadd.f32 %v1360_v54, %v1341_v7  ;;  %v4059_v16 = vmul.f32 %v4052_v8, %v8293_v4 }
 0x245   :  { %v6915_v0 = vmul.f32 %v8318_v49, %v3663_v25  ;;  %v2205_v15 = vld [vmem:[#allocation3 + $0x3f0] sm:$0x7f]  ;;  %v3557_v43 = vadd.f32 %v3550_v9, %v3532_v35  ;;  %v4246_v61 = vmul.f32 %v4239_v62, %v8318_v49  ;;  %v4149_v26 = vadd.f32 %v4142_v56, %v4128_v38  ;;  %v4156_v11 = vld [vmem:[#allocation3 + $0x3f8] sm:$0x7f]  ;;  %v1504_v1 = vld [vmem:[#allocation3 + $0x4a0] sm:$0x7f] }
 0x246   :  { %v2009_v25 = vld [vmem:[#allocation3 + $0x550] sm:$0x7f]  ;;  %v4260_v35 = vld [vmem:[#allocation3 + $0x3f8] sm:$0x7f]  ;;  %v1496_v9 = vadd.f32 %v1489_v19, %v1470_v2  ;;  %v2001_v33 = vadd.f32 %v1994_v28, %v1979_v41  ;;  %v3465_v42 = vld [vmem:[#allocation3 + $0x4a8] sm:$0x7f]  ;;  %v2110_v56 = vadd.f32 %v2103_v46, %v2088_v18  ;;  %v3458_v8 = vadd.f32 %v3451_v31, %v3433_v37 }
 0x247   :  { %8319 = vst [vmem:[#allocation138_spill] sm:$0xff] %v6915_v0  ;;  %v8320_v22 = vld [vmem:[#allocation46_spill] sm:$0xff]  ;;  %v8321_v32 = vld [vmem:[#allocation31_spill] sm:$0xff]  ;;  %v4253_v45 = vadd.f32 %v4246_v61, %v4232_v60  ;;  %v1401_v4 = vld [vmem:[#allocation3 + $0x600] sm:$0x7f]  ;;  %v4066_v28 = vadd.f32 %v4059_v16, %v4045_v14  ;;  %v3476_v18 = vmul.f32 %v8302_v36, %v3465_v42 }
 0x248   :  { %v2212_v44 = vmul.f32 %v2205_v15, %v8320_v22  ;;  %v1386_v62 = vmul.f32 %v8321_v32, %v1375_v29  ;;  %v8322_v12 = vld [vmem:[#allocation75_spill] sm:$0xff]  ;;  %v2118_v30 = vld [vmem:[#allocation3 + $0x550] sm:$0x7f]  ;;  %v2016_v7 = vmul.f32 %v2009_v25, %v8321_v32  ;;  %v8323_v29 = vld [vmem:[#allocation76_spill] sm:$0xff]  ;;  %v1412_v37 = vmul.f32 %v8021_v17, %v1401_v4 }
 0x249   :  { %v3575_v38 = vmul.f32 %v8322_v12, %v3564_v53  ;;  %v4163_v55 = vmul.f32 %v4156_v11, %v8322_v12  ;;  %v2227_v54 = vld [vmem:[#allocation3 + $0x550] sm:$0x7f]  ;;  %v4073_v15 = vld [vmem:[#allocation3 + $0x558] sm:$0x7f]  ;;  %v4267_v47 = vmul.f32 %v4260_v35, %v8323_v29  ;;  %v8324_v60 = vld [vmem:[#allocation49_spill] sm:$0xff] }
 0x24a   :  { %v2219_v5 = vadd.f32 %v2212_v44, %v2197_v3  ;;  %v1515_v2 = vmul.f32 %v8324_v60, %v1504_v1  ;;  %v3589_v41 = vld [vmem:[#allocation3 + $0x4a8] sm:$0x7f]  ;;  %v1393_v19 = vadd.f32 %v1386_v62, %v1367_v10  ;;  %v4177_v3 = vld [vmem:[#allocation3 + $0x558] sm:$0x7f]  ;;  %v2125_v46 = vmul.f32 %v2118_v30, %v8324_v60  ;;  %v8325_v11 = vld [vmem:[#allocation80_spill] sm:$0xff] }
 0x24b   :  { %v3582_v0 = vadd.f32 %v3575_v38, %v3557_v43  ;;  %v4170_v61 = vadd.f32 %v4163_v55, %v4149_v26  ;;  %v4281_v53 = vld [vmem:[#allocation3 + $0x558] sm:$0x7f]  ;;  %v2234_v25 = vmul.f32 %v2227_v54, %v8325_v11  ;;  %v4080_v44 = vmul.f32 %v4073_v15, %v8302_v36  ;;  %v2969_v31 = vld [vmem:[#allocation2 + $0x268] sm:$0xf0]  ;;  %v328_v10 = vld [vmem:[#allocation2 + $0x120] sm:$0xfe] }
 0x24c   :  { %v2948_v43 = vld [vmem:[#allocation2 + $0x118] sm:$0x7]  ;;  %v6936_v35 = vadd.f32 %v4267_v47, %v4253_v45  ;;  %v1522_v1 = vadd.f32 %v1515_v2, %v1496_v9  ;;  %v6938_v14 = vadd.f32 %v2016_v7, %v2001_v33  ;;  %v3600_v55 = vmul.f32 %v8303_v6, %v3589_v41  ;;  %v339_v16 = vld [vmem:[#allocation2 + $0x280] sm:$0xfe]  ;;  %v8326_v42 = vld [vmem:[#allocation125_spill] sm:$0xff] }
 0x24d   :  { %v2970_v26 = vld [vmem:[#allocation2 + $0x278] sm:$0x7]  ;;  %v6941_v62 = vadd.f32 %v2125_v46, %v2110_v56  ;;  %v6943_v38 = vadd.f32 %v2234_v25, %v2219_v5  ;;  %v4184_v30 = vmul.f32 %v4177_v3, %v8303_v6  ;;  %v6947_v54 = vmul.f32 %v4281_v53, %v8326_v42  ;;  %v1530_v15 = vld [vmem:[#allocation3 + $0x600] sm:$0x7f]  ;;  %v2031_v47 = vld [vmem:[#allocation3 + $0x6b0] sm:$0x7f] }
 0x24e   :  { %v2434_v45 = vld [vmem:[#allocation2 + $0x128] sm:$0xfe]  ;;  %v448_v33 = vld [vmem:[#allocation2 + $0x120] sm:$0xfc]  ;;  %v6949_v7 = vadd.f32 %v3476_v18, %v3458_v8  ;;  %v6951_v4 = vadd.f32 %v3600_v55, %v3582_v0  ;;  %v2140_v2 = vld [vmem:[#allocation3 + $0x6b0] sm:$0x7f]  ;;  %v6953_v58 = vadd.f32 %v4080_v44, %v4066_v28  ;;  %v6957_v32 = vadd.f32 %v1412_v37, %v1393_v19 }
 0x24f   :  { %v2445_v9 = vld [vmem:[#allocation2 + $0x288] sm:$0xfe]  ;;  %v2249_v41 = vld [vmem:[#allocation3 + $0x6b0] sm:$0x7f]  ;;  %v3044_v56 = vrot.slane %v2948_v43, 4  ;;  %v3076_v46 = vrot.slane %v2969_v31, 4  ;;  %v6955_v53 = vadd.f32 %v4184_v30, %v4170_v61  ;;  %v1541_v55 = vmul.f32 %v8029_v34, %v1530_v15 }
 0x250   :  { %v449_v5 = vld [vmem:[#allocation2 + $0x130] sm:$0x1]  ;;  %v470_v25 = vld [vmem:[#allocation2 + $0x280] sm:$0xfc]  ;;  %v2553_v3 = vld [vmem:[#allocation2 + $0x128] sm:$0xfc]  ;;  %v2038_v43 = vmul.f32 %v2031_v47, %v8021_v17  ;;  %v2147_v61 = vmul.f32 %v2140_v2, %v8029_v34  ;;  %v6966_v19 = vmul.f32 %v2249_v41, %v8263_v39 }
 0x251   :  { %v471_v36 = vld [vmem:[#allocation2 + $0x290] sm:$0x1]  ;;  %v3077_v42 = vrot.slane %v2970_v26, 4  ;;  %v2554_v23 = vld [vmem:[#allocation2 + $0x138] sm:$0x1]  ;;  %v8327_v31 = vrot.slane %v6870_v59, 4  ;;  %v6969_v6 = vadd.f32 %v1541_v55, %v1522_v1 }
 0x252   :  { %v2575_v8 = vld [vmem:[#allocation2 + $0x288] sm:$0xfc]  ;;  %v2576_v18 = vld [vmem:[#allocation2 + $0x298] sm:$0x1]  ;;  %v648_v0 = vld [vmem:[#allocation2 + $0x120] sm:$0xf8] }
 0x253   :  { %v3045_v51 = vsel %vm918_vm2, %v8327_v31, %v3044_v56  ;;  %v372_v11 = vrot.slane %v328_v10, 1  ;;  %v649_v28 = vld [vmem:[#allocation2 + $0x130] sm:$0x3]  ;;  %v670_v44 = vld [vmem:[#allocation2 + $0x280] sm:$0xf8]  ;;  %v3078_v37 = vsel %vm918_vm2, %v3076_v46, %v3077_v42  ;;  %v383_v26 = vrot.slane %v339_v16, 1 }
 0x254   :  { %3115 = vst [vmem:[#allocation3 + $0x608] sm:$0x7f] %v3045_v51  ;;  %v671_v30 = vld [vmem:[#allocation2 + $0x290] sm:$0x3]  ;;  %v2751_v15 = vld [vmem:[#allocation2 + $0x128] sm:$0xf8] }
 0x255   :  { %3126 = vst [vmem:[#allocation3 + $0x6b8] sm:$0x7f] %v3078_v37  ;;  %417 = vst [vmem:[#allocation3 + $0x1f0] sm:$0x7f] %v372_v11  ;;  %v2478_v59 = vrot.slane %v2434_v45, 1  ;;  %v2489_v47 = vrot.slane %v2445_v9, 1 }
 0x256   :  { %v546_v10 = vrot.slane %v448_v33, 2  ;;  %v2752_v56 = vld [vmem:[#allocation2 + $0x138] sm:$0x3]  ;;  %428 = vst [vmem:[#allocation3 + $0x2a0] sm:$0x7f] %v383_v26  ;;  %v547_v31 = vrot.slane %v449_v5, 2 }
 0x257   :  { %v579_v2 = vrot.slane %v470_v25, 2  ;;  %v580_v17 = vrot.slane %v471_v36, 2  ;;  %v2650_v41 = vrot.slane %v2553_v3, 2  ;;  %v2773_v39 = vld [vmem:[#allocation2 + $0x288] sm:$0xf8]  ;;  %v2651_v51 = vrot.slane %v2554_v23, 2 }
 0x258   :  { %2522 = vst [vmem:[#allocation3 + $0x1f8] sm:$0x7f] %v2478_v59  ;;  %2533 = vst [vmem:[#allocation3 + $0x2a8] sm:$0x7f] %v2489_v47  ;;  %v2683_v16 = vrot.slane %v2575_v8, 2  ;;  %v2684_v42 = vrot.slane %v2576_v18, 2  ;;  %v548_v55 = vsel %vm518_vm0, %v546_v10, %v547_v31  ;;  %v2154_v47 = vadd.f32 %v2147_v61, %v6941_v62 }
 0x259   :  { %v746_v46 = vrot.slane %v648_v0, 3  ;;  %v2774_v1 = vld [vmem:[#allocation2 + $0x298] sm:$0x3]  ;;  %v581_v11 = vsel %vm518_vm0, %v579_v2, %v580_v17  ;;  %v747_v45 = vrot.slane %v649_v28, 3  ;;  %v779_v9 = vrot.slane %v670_v44, 3 }
 0x25a   :  { %v848_v33 = vld [vmem:[#allocation2 + $0x120] sm:$0xf0]  ;;  %v849_v37 = vld [vmem:[#allocation2 + $0x130] sm:$0x7]  ;;  %617 = vst [vmem:[#allocation3 + $0x350] sm:$0x7f] %v548_v55  ;;  %v2652_v36 = vsel %vm518_vm0, %v2650_v41, %v2651_v51  ;;  %v2685_v5 = vsel %vm518_vm0, %v2683_v16, %v2684_v42  ;;  %v2045_v17 = vadd.f32 %v2038_v43, %v6938_v14  ;;  %v4295_v14 = vadd.f32 %v6947_v54, %v6936_v35 }
 0x25b   :  { %628 = vst [vmem:[#allocation3 + $0x400] sm:$0x7f] %v581_v11  ;;  %v780_v25 = vrot.slane %v671_v30, 3  ;;  %v2848_v23 = vrot.slane %v2751_v15, 3  ;;  %2720 = vst [vmem:[#allocation3 + $0x358] sm:$0x7f] %v2652_v36  ;;  %v748_v3 = vsel %vm718_vm1, %v746_v46, %v747_v45  ;;  %v6989_v61 = vadd.f32 %v6966_v19, %v6943_v38 }
 0x25c   :  { %2731 = vst [vmem:[#allocation3 + $0x408] sm:$0x7f] %v2685_v5  ;;  %v2849_v8 = vrot.slane %v2752_v56, 3  ;;  %v2881_v18 = vrot.slane %v2773_v39, 3  ;;  %v2882_v0 = vrot.slane %v2774_v1, 3  ;;  %v946_v26 = vrot.slane %v848_v33, 4 }
 0x25d   :  { %v3490_v28 = vld [vmem:[#allocation3 + $0x608] sm:$0x7f]  ;;  %817 = vst [vmem:[#allocation3 + $0x4b0] sm:$0x7f] %v748_v3  ;;  %v781_v44 = vsel %vm718_vm1, %v779_v9, %v780_v25  ;;  %v947_v59 = vrot.slane %v849_v37, 4  ;;  %v8328_v35 = vld [vmem:[#allocation62_spill] sm:$0xff] }
 0x25e   :  { %v3501_v30 = vmul.f32 %v7923_v48, %v3490_v28  ;;  %v4094_v15 = vld [vmem:[#allocation3 + $0x6b8] sm:$0x7f]  ;;  %828 = vst [vmem:[#allocation3 + $0x560] sm:$0x7f] %v781_v44  ;;  %v2850_v31 = vsel %vm718_vm1, %v2848_v23, %v2849_v8  ;;  %v2883_v39 = vsel %vm718_vm1, %v2881_v18, %v2882_v0  ;;  %v3614_v43 = vld [vmem:[#allocation3 + $0x608] sm:$0x7f]  ;;  %v1445_v54 = vadd.f32 %v8328_v35, %v6957_v32 }
 0x25f   :  { %v4198_v10 = vld [vmem:[#allocation3 + $0x6b8] sm:$0x7f]  ;;  %v4101_v56 = vmul.f32 %v4094_v15, %v7923_v48  ;;  %v1453_v41 = vld [vmem:[#allocation3 + $0x1f0] sm:$0x7f]  ;;  %v2075_v51 = vld [vmem:[#allocation3 + $0x2a0] sm:$0x7f]  ;;  %v948_v62 = vsel %vm918_vm2, %v946_v26, %v947_v59 }
 0x260   :  { %v4205_v2 = vmul.f32 %v4198_v10, %v8306_v40  ;;  %2918 = vst [vmem:[#allocation3 + $0x4b8] sm:$0x7f] %v2850_v31  ;;  %2929 = vst [vmem:[#allocation3 + $0x568] sm:$0x7f] %v2883_v39  ;;  %v3508_v16 = vadd.f32 %v3501_v30, %v6949_v7  ;;  %v4302_v42 = vld [vmem:[#allocation3 + $0x6b8] sm:$0x7f]  ;;  %v1464_v46 = vmul.f32 %v8312_v13, %v1453_v41 }
 0x261   :  { %v3540_v1 = vld [vmem:[#allocation3 + $0x1f8] sm:$0x7f]  ;;  %1017 = vst [vmem:[#allocation3 + $0x610] sm:$0x7f] %v948_v62  ;;  %v2163_v55 = vld [vmem:[#allocation3 + $0x150] sm:$0x7f]  ;;  %v4108_v11 = vadd.f32 %v4101_v56, %v6953_v58  ;;  %v2082_v38 = vmul.f32 %v2075_v51, %v8312_v13  ;;  %v3625_v7 = vmul.f32 %v8306_v40, %v3614_v43 }
 0x262   :  { %v4212_v45 = vadd.f32 %v4205_v2, %v6955_v53  ;;  %v8329_v9 = vld [vmem:[#allocation65_spill] sm:$0xff]  ;;  %v8330_v37 = vld [vmem:[#allocation63_spill] sm:$0xff]  ;;  %v8331_v32 = vld [vmem:[#allocation94_spill] sm:$0xff]  ;;  %v4309_v53 = vmul.f32 %v4302_v42, %v8309_v27  ;;  %v7010_v26 = vmul.f32 %v2163_v55, %v8139_v21 }
 0x263   :  { %v2067_v33 = vadd.f32 %v8329_v9, %v2045_v17  ;;  %v4136_v19 = vld [vmem:[#allocation3 + $0x2a8] sm:$0x7f]  ;;  %v7002_v36 = vadd.f32 %v8330_v37, %v6969_v6  ;;  %v2176_v5 = vadd.f32 %v8331_v32, %v2154_v47  ;;  %v2184_v3 = vld [vmem:[#allocation3 + $0x2a0] sm:$0x7f]  ;;  %v1479_v8 = vld [vmem:[#allocation3 + $0x350] sm:$0x7f]  ;;  %v4129_v18 = vadd.f32 %v6894_v20, %v4108_v11 }
 0x264   :  { %v8332_v25 = vld [vmem:[#allocation97_spill] sm:$0xff]  ;;  %v2097_v58 = vld [vmem:[#allocation3 + $0x400] sm:$0x7f]  ;;  %v1582_v0 = vld [vmem:[#allocation3 + $0x1f0] sm:$0x7f]  ;;  %v3551_v17 = vmul.f32 %v8317_v52, %v3540_v1  ;;  %v3632_v6 = vadd.f32 %v3625_v7, %v6951_v4  ;;  %v4233_v59 = vadd.f32 %v6897_v57, %v4212_v45  ;;  %v1471_v47 = vadd.f32 %v1464_v46, %v1445_v54 }
 0x265   :  { %v3533_v23 = vadd.f32 %v8332_v25, %v3508_v16  ;;  %v4240_v28 = vld [vmem:[#allocation3 + $0x2a8] sm:$0x7f]  ;;  %v3565_v44 = vld [vmem:[#allocation3 + $0x358] sm:$0x7f]  ;;  %v4143_v30 = vmul.f32 %v4136_v19, %v8317_v52  ;;  %v2089_v10 = vadd.f32 %v2082_v38, %v2067_v33  ;;  %v2191_v31 = vmul.f32 %v2184_v3, %v8313_v50  ;;  %v1505_v43 = vld [vmem:[#allocation3 + $0x4b0] sm:$0x7f] }
 0x266   :  { %v4157_v15 = vld [vmem:[#allocation3 + $0x408] sm:$0x7f]  ;;  %v1490_v20 = vmul.f32 %v8287_v63, %v1479_v8  ;;  %v2104_v39 = vmul.f32 %v2097_v58, %v8287_v63  ;;  %v7019_v56 = vmul.f32 %v8313_v50, %v1582_v0  ;;  %v3664_v41 = vld [vmem:[#allocation3 + $0x1f8] sm:$0x7f]  ;;  %v4247_v4 = vmul.f32 %v4240_v28, %v8318_v49  ;;  %v1608_v57 = vld [vmem:[#allocation3 + $0x350] sm:$0x7f] }
 0x267   :  { %v3558_v2 = vadd.f32 %v3551_v17, %v3533_v23  ;;  %v2206_v51 = vld [vmem:[#allocation3 + $0x400] sm:$0x7f]  ;;  %v3576_v62 = vmul.f32 %v8322_v12, %v3565_v44  ;;  %v7023_v16 = vadd.f32 %v4309_v53, %v4295_v14  ;;  %v2198_v42 = vadd.f32 %v2191_v31, %v2176_v5  ;;  %v4261_v46 = vld [vmem:[#allocation3 + $0x408] sm:$0x7f]  ;;  %v3590_v55 = vld [vmem:[#allocation3 + $0x4b8] sm:$0x7f] }
 0x268   :  { %v4150_v35 = vadd.f32 %v4143_v30, %v4129_v18  ;;  %v4164_v54 = vmul.f32 %v4157_v15, %v8322_v12  ;;  %v2119_v1 = vld [vmem:[#allocation3 + $0x560] sm:$0x7f]  ;;  %v871_v45 = vld [vmem:[#allocation2 + $0x290] sm:$0x7]  ;;  %v7027_v9 = vadd.f32 %v6891_v24, %v3632_v6  ;;  %v4254_v33 = vadd.f32 %v4247_v4, %v4233_v59  ;;  %v3689_v19 = vld [vmem:[#allocation3 + $0x358] sm:$0x7f] }
 0x269   :  { %8333 = vst [vmem:[#allocation139_spill] sm:$0xff] %v7023_v16  ;;  %v870_v11 = vld [vmem:[#allocation2 + $0x280] sm:$0xf0]  ;;  %v1497_v38 = vadd.f32 %v1490_v20, %v1471_v47  ;;  %v1516_v7 = vmul.f32 %v8324_v60, %v1505_v43  ;;  %v2949_v14 = vld [vmem:[#allocation2 + $0x128] sm:$0xf0]  ;;  %v7031_v32 = vmul.f32 %v8318_v49, %v3664_v41  ;;  %v7034_v5 = vmul.f32 %v8320_v22, %v1608_v57 }
 0x26a   :  { %v2228_v37 = vld [vmem:[#allocation3 + $0x560] sm:$0x7f]  ;;  %v2111_v25 = vadd.f32 %v2104_v39, %v2089_v10  ;;  %v2213_v23 = vmul.f32 %v2206_v51, %v8320_v22  ;;  %v2950_v3 = vld [vmem:[#allocation2 + $0x138] sm:$0x7]  ;;  %v2971_v8 = vld [vmem:[#allocation2 + $0x288] sm:$0xf0]  ;;  %v3583_v58 = vadd.f32 %v3576_v62, %v3558_v2  ;;  %v4268_v53 = vmul.f32 %v4261_v46, %v8323_v29 }
 0x26b   :  { %v2972_v24 = vld [vmem:[#allocation2 + $0x298] sm:$0x7]  ;;  %v2126_v18 = vmul.f32 %v2119_v1, %v8324_v60  ;;  %v8334_v0 = vld [vmem:[#allocation77_spill] sm:$0xff]  ;;  %v329_v44 = vld [vmem:[#allocation2 + $0x140] sm:$0xfe]  ;;  %v7043_v47 = vmul.f32 %v8323_v29, %v3689_v19  ;;  %v7045_v30 = vadd.f32 %v4164_v54, %v4150_v35  ;;  %v7052_v2 = vadd.f32 %v1516_v7, %v1497_v38 }
 0x26c   :  { %v3601_v17 = vmul.f32 %v8334_v0, %v3590_v55  ;;  %v4178_v28 = vld [vmem:[#allocation3 + $0x568] sm:$0x7f]  ;;  %v340_v6 = vld [vmem:[#allocation2 + $0x2a0] sm:$0xfe]  ;;  %v7040_v59 = vadd.f32 %v2213_v23, %v2198_v42  ;;  %v7050_v43 = vadd.f32 %v4268_v53, %v4254_v33  ;;  %v1531_v41 = vld [vmem:[#allocation3 + $0x610] sm:$0x7f] }
 0x26d   :  { %8335 = vst [vmem:[#allocation131_spill] sm:$0xff] %v7043_v47  ;;  %v8336_v15 = vld [vmem:[#allocation80_spill] sm:$0xff]  ;;  %v2435_v31 = vld [vmem:[#allocation2 + $0x148] sm:$0xfe]  ;;  %v979_v4 = vrot.slane %v870_v11, 4  ;;  %v980_v57 = vrot.slane %v871_v45, 4  ;;  %v7055_v35 = vmul.f32 %v4178_v28, %v8334_v0  ;;  %v7057_v53 = vadd.f32 %v2126_v18, %v2111_v25 }
 0x26e   :  { %v7048_v10 = vmul.f32 %v2228_v37, %v8336_v15  ;;  %v2446_v20 = vld [vmem:[#allocation2 + $0x2a8] sm:$0xfe]  ;;  %v450_v39 = vld [vmem:[#allocation2 + $0x140] sm:$0xfc]  ;;  %8337 = vst [vmem:[#allocation104_spill] sm:$0xff] %v7050_v43  ;;  %v3046_v54 = vrot.slane %v2949_v14, 4  ;;  %v7059_v38 = vadd.f32 %v3601_v17, %v3583_v58  ;;  %v1542_v43 = vmul.f32 %v8029_v34, %v1531_v41 }
 0x26f   :  { %v451_v51 = vld [vmem:[#allocation2 + $0x150] sm:$0x1]  ;;  %v472_v62 = vld [vmem:[#allocation2 + $0x2a0] sm:$0xfc]  ;;  %v2555_v46 = vld [vmem:[#allocation2 + $0x148] sm:$0xfc]  ;;  %v981_v11 = vsel %vm918_vm2, %v979_v4, %v980_v57 }
 0x270   :  { %v473_v42 = vld [vmem:[#allocation2 + $0x2b0] sm:$0x1]  ;;  %v3047_v1 = vrot.slane %v2950_v3, 4  ;;  %v3079_v55 = vrot.slane %v2971_v8, 4  ;;  %v2556_v19 = vld [vmem:[#allocation2 + $0x158] sm:$0x1] }
 0x271   :  { %v2577_v37 = vld [vmem:[#allocation2 + $0x2a8] sm:$0xfc]  ;;  %v2578_v23 = vld [vmem:[#allocation2 + $0x2b8] sm:$0x1]  ;;  %v650_v33 = vld [vmem:[#allocation2 + $0x140] sm:$0xf8] }
 0x272   :  { %v3080_v45 = vrot.slane %v2972_v24, 4  ;;  %v651_v7 = vld [vmem:[#allocation2 + $0x150] sm:$0x3]  ;;  %v672_v16 = vld [vmem:[#allocation2 + $0x2a0] sm:$0xf8]  ;;  %v3048_v14 = vsel %vm918_vm2, %v3046_v54, %v3047_v1  ;;  %v373_v3 = vrot.slane %v329_v44, 1 }
 0x273   :  { %1028 = vst [vmem:[#allocation3 + $0x6c0] sm:$0x7f] %v981_v11  ;;  %v384_v8 = vrot.slane %v340_v6, 1  ;;  %v673_v28 = vld [vmem:[#allocation2 + $0x2b0] sm:$0x3]  ;;  %v2479_v18 = vrot.slane %v2435_v31, 1 }
 0x274   :  { %v2753_v27 = vld [vmem:[#allocation2 + $0x148] sm:$0xf8]  ;;  %3116 = vst [vmem:[#allocation3 + $0x618] sm:$0x7f] %v3048_v14  ;;  %v3081_v25 = vsel %vm918_vm2, %v3079_v55, %v3080_v45  ;;  %v2490_v58 = vrot.slane %v2446_v20, 1  ;;  %v549_v17 = vrot.slane %v450_v39, 2 }
 0x275   :  { %v2754_v47 = vld [vmem:[#allocation2 + $0x158] sm:$0x3]  ;;  %3127 = vst [vmem:[#allocation3 + $0x6c8] sm:$0x7f] %v3081_v25  ;;  %418 = vst [vmem:[#allocation3 + $0x200] sm:$0x7f] %v373_v3 }
 0x276   :  { %429 = vst [vmem:[#allocation3 + $0x2b0] sm:$0x7f] %v384_v8  ;;  %v550_v24 = vrot.slane %v451_v51, 2  ;;  %v582_v4 = vrot.slane %v472_v62, 2  ;;  %v583_v41 = vrot.slane %v473_v42, 2  ;;  %v2653_v57 = vrot.slane %v2555_v46, 2 }
 0x277   :  { %v2775_v11 = vld [vmem:[#allocation2 + $0x2a8] sm:$0xf8]  ;;  %2523 = vst [vmem:[#allocation3 + $0x208] sm:$0x7f] %v2479_v18  ;;  %2534 = vst [vmem:[#allocation3 + $0x2b8] sm:$0x7f] %v2490_v58 }
 0x278   :  { %v2654_v44 = vrot.slane %v2556_v19, 2  ;;  %v2686_v6 = vrot.slane %v2577_v37, 2  ;;  %v2687_v54 = vrot.slane %v2578_v23, 2  ;;  %v749_v1 = vrot.slane %v650_v33, 3  ;;  %v2776_v14 = vld [vmem:[#allocation2 + $0x2b8] sm:$0x3] }
 0x279   :  { %v551_v31 = vsel %vm518_vm0, %v549_v17, %v550_v24  ;;  %v584_v20 = vsel %vm518_vm0, %v582_v4, %v583_v41  ;;  %v750_v39 = vrot.slane %v651_v7, 3  ;;  %v782_v55 = vrot.slane %v672_v16, 3  ;;  %v850_v45 = vld [vmem:[#allocation2 + $0x140] sm:$0xf0]  ;;  %v851_v3 = vld [vmem:[#allocation2 + $0x150] sm:$0x7] }
 0x27a   :  { %618 = vst [vmem:[#allocation3 + $0x360] sm:$0x7f] %v551_v31  ;;  %629 = vst [vmem:[#allocation3 + $0x410] sm:$0x7f] %v584_v20  ;;  %v2655_v51 = vsel %vm518_vm0, %v2653_v57, %v2654_v44  ;;  %v2688_v62 = vsel %vm518_vm0, %v2686_v6, %v2687_v54  ;;  %v783_v42 = vrot.slane %v673_v28, 3  ;;  %v2851_v46 = vrot.slane %v2753_v27, 3 }
 0x27b   :  { %v3640_v19 = vld [vmem:[#allocation3 + $0xa8] sm:$0x7f]  ;;  %2721 = vst [vmem:[#allocation3 + $0x368] sm:$0x7f] %v2655_v51  ;;  %2732 = vst [vmem:[#allocation3 + $0x418] sm:$0x7f] %v2688_v62  ;;  %v751_v37 = vsel %vm718_vm1, %v749_v1, %v750_v39  ;;  %v1549_v16 = vadd.f32 %v1542_v43, %v7052_v2  ;;  %v4192_v27 = vadd.f32 %v7055_v35, %v7045_v30 }
 0x27c   :  { %v2852_v23 = vrot.slane %v2754_v47, 3  ;;  %v2884_v33 = vrot.slane %v2775_v11, 3  ;;  %v2885_v8 = vrot.slane %v2776_v14, 3  ;;  %v2141_v7 = vld [vmem:[#allocation3 + $0x6c0] sm:$0x7f]  ;;  %v784_v18 = vsel %vm718_vm1, %v782_v55, %v783_v42  ;;  %v8338_v11 = vld [vmem:[#allocation73_spill] sm:$0xff] }
 0x27d   :  { %v4220_v25 = vld [vmem:[#allocation3 + $0x158] sm:$0x7f]  ;;  %818 = vst [vmem:[#allocation3 + $0x4c0] sm:$0x7f] %v751_v37  ;;  %v949_v58 = vrot.slane %v850_v45, 4  ;;  %v950_v17 = vrot.slane %v851_v3, 4  ;;  %v2148_v24 = vmul.f32 %v2141_v7, %v8029_v34  ;;  %v3651_v44 = vmul.f32 %v8338_v11, %v3640_v19 }
 0x27e   :  { %v4282_v28 = vld [vmem:[#allocation3 + $0x568] sm:$0x7f]  ;;  %v3615_v4 = vld [vmem:[#allocation3 + $0x618] sm:$0x7f]  ;;  %829 = vst [vmem:[#allocation3 + $0x570] sm:$0x7f] %v784_v18  ;;  %v2853_v47 = vsel %vm718_vm1, %v2851_v46, %v2852_v23  ;;  %v2886_v41 = vsel %vm718_vm1, %v2884_v33, %v2885_v8  ;;  %v2242_v14 = vadd.f32 %v7048_v10, %v7040_v59  ;;  %v4227_v39 = vmul.f32 %v4220_v25, %v8338_v11 }
 0x27f   :  { %v2250_v43 = vld [vmem:[#allocation3 + $0x6c0] sm:$0x7f]  ;;  %v3626_v2 = vmul.f32 %v8306_v40, %v3615_v4  ;;  %v4199_v57 = vld [vmem:[#allocation3 + $0x6c8] sm:$0x7f]  ;;  %2919 = vst [vmem:[#allocation3 + $0x4c8] sm:$0x7f] %v2853_v47  ;;  %v951_v30 = vsel %vm918_vm2, %v949_v58, %v950_v17  ;;  %v2155_v31 = vadd.f32 %v2148_v24, %v7057_v53 }
 0x280   :  { %v1583_v6 = vld [vmem:[#allocation3 + $0x200] sm:$0x7f]  ;;  %2930 = vst [vmem:[#allocation3 + $0x578] sm:$0x7f] %v2886_v41  ;;  %v8340_v54 = vld [vmem:[#allocation35_spill] sm:$0xff]  ;;  %v4206_v20 = vmul.f32 %v4199_v57, %v8306_v40  ;;  %v8341_v42 = vld [vmem:[#allocation130_spill] sm:$0xff] }
 0x281   :  { %v8339_v35 = vld [vmem:[#allocation44_spill] sm:$0xff]  ;;  %v2185_v55 = vld [vmem:[#allocation3 + $0x2b0] sm:$0x7f]  ;;  %v3665_v45 = vld [vmem:[#allocation3 + $0x208] sm:$0x7f]  ;;  %v3633_v62 = vadd.f32 %v3626_v2, %v7059_v38  ;;  %v1575_v46 = vadd.f32 %v8341_v42, %v1549_v16  ;;  %v1594_v19 = vmul.f32 %v8313_v50, %v1583_v6  ;;  %v2177_v23 = vadd.f32 %v7010_v26, %v2155_v31 }
 0x282   :  { %v1309_v1 = vadd.f32 %v8340_v54, %v8339_v35  ;;  %v4241_v3 = vld [vmem:[#allocation3 + $0x2b8] sm:$0x7f]  ;;  %1018 = vst [vmem:[#allocation3 + $0x620] sm:$0x7f] %v951_v30  ;;  %v1369_v51 = vld [vmem:[#allocation3 + $0x440] sm:$0x7f]  ;;  %v2192_v37 = vmul.f32 %v2185_v55, %v8313_v50  ;;  %v4213_v53 = vadd.f32 %v4206_v20, %v4192_v27  ;;  %v3676_v16 = vmul.f32 %v8318_v49, %v3665_v45 }
 0x283   :  { %v8342_v59 = vld [vmem:[#allocation125_spill] sm:$0xff]  ;;  %v4248_v33 = vmul.f32 %v4241_v3, %v8318_v49  ;;  %v2207_v8 = vld [vmem:[#allocation3 + $0x410] sm:$0x7f]  ;;  %v872_v7 = vld [vmem:[#allocation2 + $0x2a0] sm:$0xf0]  ;;  %v3658_v38 = vadd.f32 %v3651_v44, %v3633_v62 }
 0x284   :  { %v7092_v10 = vmul.f32 %v4282_v28, %v8342_v59  ;;  %v873_v25 = vld [vmem:[#allocation2 + $0x2b0] sm:$0x7]  ;;  %v8343_v18 = vld [vmem:[#allocation136_spill] sm:$0xff]  ;;  %v4262_v24 = vld [vmem:[#allocation3 + $0x418] sm:$0x7f]  ;;  %v4234_v28 = vadd.f32 %v4227_v39, %v4213_v53  ;;  %v2199_v2 = vadd.f32 %v2192_v37, %v2177_v23  ;;  %v2214_v27 = vmul.f32 %v2207_v8, %v8320_v22 }
 0x285   :  { %v2257_v58 = vmul.f32 %v2250_v43, %v8343_v18  ;;  %v1609_v17 = vld [vmem:[#allocation3 + $0x360] sm:$0x7f]  ;;  %v2951_v4 = vld [vmem:[#allocation2 + $0x148] sm:$0xf0]  ;;  %v8344_v47 = vld [vmem:[#allocation66_spill] sm:$0xff]  ;;  %v7103_v43 = vadd.f32 %v1594_v19, %v1575_v46  ;;  %v982_v31 = vrot.slane %v872_v7, 4  ;;  %v4269_v39 = vmul.f32 %v4262_v24, %v8323_v29 }
 0x286   :  { %v1335_v41 = vadd.f32 %v8344_v47, %v1309_v1  ;;  %v3690_v26 = vld [vmem:[#allocation3 + $0x368] sm:$0x7f]  ;;  %v2952_v57 = vld [vmem:[#allocation2 + $0x158] sm:$0x7]  ;;  %v1635_v44 = vld [vmem:[#allocation3 + $0x4c0] sm:$0x7f]  ;;  %v4255_v45 = vadd.f32 %v4248_v33, %v4234_v28  ;;  %v7106_v1 = vmul.f32 %v8320_v22, %v1609_v17  ;;  %v7109_v37 = vadd.f32 %v3676_v16, %v3658_v38 }
 0x287   :  { %v2973_v6 = vld [vmem:[#allocation2 + $0x2a8] sm:$0xf0]  ;;  %v8345_v30 = vld [vmem:[#allocation31_spill] sm:$0xff]  ;;  %v7101_v54 = vadd.f32 %v2257_v58, %v2242_v14  ;;  %v983_v20 = vrot.slane %v873_v25, 4  ;;  %v2229_v3 = vld [vmem:[#allocation3 + $0x570] sm:$0x7f]  ;;  %v7112_v14 = vmul.f32 %v8323_v29, %v3690_v26  ;;  %v7115_v53 = vadd.f32 %v2214_v27, %v2199_v2 }
 0x288   :  { %v1380_v35 = vmul.f32 %v8345_v30, %v1369_v51  ;;  %v2974_v55 = vld [vmem:[#allocation2 + $0x2b8] sm:$0x7]  ;;  %v3715_v62 = vld [vmem:[#allocation3 + $0x4c8] sm:$0x7f]  ;;  %v3049_v42 = vrot.slane %v2951_v4, 4  ;;  %v3050_v19 = vrot.slane %v2952_v57, 4  ;;  %v7118_v23 = vmul.f32 %v8336_v15, %v1635_v44 }
 0x289   :  { %v4283_v51 = vld [vmem:[#allocation3 + $0x578] sm:$0x7f]  ;;  %v984_v46 = vsel %vm918_vm2, %v982_v31, %v983_v20  ;;  %v3082_v33 = vrot.slane %v2973_v6, 4  ;;  %v3083_v8 = vrot.slane %v2974_v55, 4  ;;  %v1395_v7 = vld [vmem:[#allocation3 + $0x5a0] sm:$0x7f]  ;;  %v7121_v58 = vmul.f32 %v2229_v3, %v8336_v15 }
 0x28a   :  { %1029 = vst [vmem:[#allocation3 + $0x6d0] sm:$0x7f] %v984_v46  ;;  %v1421_v25 = vld [vmem:[#allocation3 + $0x30] sm:$0x7f]  ;;  %v7124_v38 = vmul.f32 %v8342_v59, %v3715_v62  ;;  %v3051_v16 = vsel %vm918_vm2, %v3049_v42, %v3050_v19  ;;  %v8346_v17 = vld [vmem:[#allocation135_spill] sm:$0xff]  ;;  %v7128_v28 = vadd.f32 %v4269_v39, %v4255_v45  ;;  %v7131_v2 = vmul.f32 %v4283_v51, %v8342_v59  ;;  %v8349_v26 = vld [vmem:[#allocation52_spill] sm:$0xff] }
 0x28b   :  { %v1361_v24 = vadd.f32 %v8346_v17, %v1335_v41  ;;  %v1447_v4 = vld [vmem:[#allocation3 + $0x190] sm:$0x7f]  ;;  %3117 = vst [vmem:[#allocation3 + $0x628] sm:$0x7f] %v3051_v16  ;;  %v3084_v27 = vsel %vm918_vm2, %v3082_v33, %v3083_v8  ;;  %v8350_v57 = vld [vmem:[#allocation71_spill] sm:$0xff]  ;;  %v8351_v55 = vld [vmem:[#allocation21_spill] sm:$0xff] }
 0x28c   :  { %v1473_v47 = vld [vmem:[#allocation3 + $0x2f0] sm:$0x7f]  ;;  %8347 = vst [vmem:[#allocation140_spill] sm:$0xff] %v7128_v28  ;;  %8348 = vst [vmem:[#allocation105_spill] sm:$0xff] %v7131_v2  ;;  %v1466_v6 = vadd.f32 %v8350_v57, %v8349_v26  ;;  %v1526_v31 = vld [vmem:[#allocation3 + $0x5c0] sm:$0x7f]  ;;  %v1406_v41 = vmul.f32 %v8351_v55, %v1395_v7  ;;  %v1458_v51 = vmul.f32 %v8312_v13, %v1447_v4 }
 0x28d   :  { %v1499_v30 = vld [vmem:[#allocation3 + $0x450] sm:$0x7f]  ;;  %3128 = vst [vmem:[#allocation3 + $0x6d8] sm:$0x7f] %v3084_v27  ;;  %v1387_v20 = vadd.f32 %v1380_v35, %v1361_v24  ;;  %v8352_v3 = vld [vmem:[#allocation45_spill] sm:$0xff]  ;;  %v8353_v45 = vld [vmem:[#allocation127_spill] sm:$0xff]  ;;  %v1484_v46 = vmul.f32 %v8287_v63, %v1473_v47  ;;  %v1537_v63 = vmul.f32 %v8029_v34, %v1526_v31 }
 0x28e   :  { %v1525_v44 = vld [vmem:[#allocation3 + $0x5b0] sm:$0x7f]  ;;  %v1432_v62 = vmul.f32 %v8352_v3, %v1421_v25  ;;  %v8354_v39 = vld [vmem:[#allocation87_spill] sm:$0xff]  ;;  %v8356_v8 = vld [vmem:[#allocation85_spill] sm:$0xff]  ;;  %v1510_v25 = vmul.f32 %v8324_v60, %v1499_v30 }
 0x28f   :  { %v1467_v42 = vadd.f32 %v8354_v39, %v8353_v45  ;;  %v8355_v19 = vld [vmem:[#allocation43_spill] sm:$0xff]  ;;  %v8357_v16 = vld [vmem:[#allocation20_spill] sm:$0xff]  ;;  %v1552_v57 = vld [vmem:[#allocation3 + $0x50] sm:$0x7f]  ;;  %v1413_v24 = vadd.f32 %v1406_v41, %v1387_v20  ;;  %v1536_v3 = vmul.f32 %v8029_v34, %v1525_v44 }
 0x290   :  { %v1492_v33 = vadd.f32 %v8355_v19, %v1466_v6  ;;  %v1546_v17 = vadd.f32 %v8357_v16, %v8356_v8  ;;  %v1551_v26 = vld [vmem:[#allocation3 + $0x40] sm:$0x7f]  ;;  %v1580_v35 = vld [vmem:[#allocation3 + $0x1d0] sm:$0x7f]  ;;  %v8358_v7 = vld [vmem:[#allocation103_spill] sm:$0xff]  ;;  %v1563_v60 = vmul.f32 %v8139_v21, %v1552_v57 }
 0x291   :  { %v1553_v27 = vld [vmem:[#allocation3 + $0x60] sm:$0x7f]  ;;  %v1493_v55 = vadd.f32 %v8358_v7, %v1467_v42  ;;  %v8359_v13 = vld [vmem:[#allocation82_spill] sm:$0xff]  ;;  %v1439_v2 = vadd.f32 %v1432_v62, %v1413_v24  ;;  %v8363_v28 = vld [vmem:[#allocation83_spill] sm:$0xff]  ;;  %v1562_v41 = vmul.f32 %v8139_v21, %v1551_v26  ;;  %v1591_v34 = vmul.f32 %v8313_v50, %v1580_v35 }
 0x292   :  { %v1577_v45 = vld [vmem:[#allocation3 + $0x1a0] sm:$0x7f]  ;;  %v1518_v4 = vadd.f32 %v8359_v13, %v1492_v33  ;;  %v1578_v16 = vld [vmem:[#allocation3 + $0x1b0] sm:$0x7f]  ;;  %v1564_v42 = vmul.f32 %v8139_v21, %v1553_v27  ;;  %v1600_v26 = vadd.f32 %v7019_v56, %v7002_v36 }
 0x293   :  { %v8360_v47 = vld [vmem:[#allocation152_spill] sm:$0xff]  ;;  %v1519_v20 = vadd.f32 %v8363_v28, %v1493_v55  ;;  %v1588_v33 = vmul.f32 %v8313_v50, %v1577_v45  ;;  %v1465_v13 = vadd.f32 %v1458_v51, %v1439_v2  ;;  %v1589_v28 = vmul.f32 %v8313_v50, %v1578_v16  ;;  %v1606_v24 = vld [vmem:[#allocation3 + $0x330] sm:$0x7f] }
 0x294   :  { %v1572_v6 = vadd.f32 %v8360_v47, %v1546_v17  ;;  %v8361_v39 = vld [vmem:[#allocation100_spill] sm:$0xff]  ;;  %v1544_v44 = vadd.f32 %v1537_v63, %v1518_v4  ;;  %v1604_v17 = vld [vmem:[#allocation3 + $0x310] sm:$0x7f]  ;;  %v1617_v36 = vmul.f32 %v8320_v22, %v1606_v24 }
 0x295   :  { %v8362_v19 = vld [vmem:[#allocation60_spill] sm:$0xff]  ;;  %v8365_v45 = vld [vmem:[#allocation118_spill] sm:$0xff]  ;;  %v1491_v35 = vadd.f32 %v1484_v46, %v1465_v13  ;;  %v1615_v2 = vmul.f32 %v8320_v22, %v1604_v17  ;;  %v1626_v46 = vadd.f32 %v7034_v5, %v1600_v26 }
 0x296   :  { %v1573_v8 = vadd.f32 %v8362_v19, %v8361_v39  ;;  %v1579_v30 = vld [vmem:[#allocation3 + $0x1c0] sm:$0x7f]  ;;  %v1570_v55 = vadd.f32 %v1563_v60, %v1544_v44  ;;  %v1598_v27 = vadd.f32 %v1591_v34, %v1572_v6  ;;  %v1630_v51 = vld [vmem:[#allocation3 + $0x470] sm:$0x7f] }
 0x297   :  { %v1603_v31 = vld [vmem:[#allocation3 + $0x300] sm:$0x7f]  ;;  %v1590_v21 = vmul.f32 %v8313_v50, %v1579_v30  ;;  %v1632_v60 = vld [vmem:[#allocation3 + $0x490] sm:$0x7f]  ;;  %v1517_v6 = vadd.f32 %v1510_v25, %v1491_v35  ;;  %v1641_v13 = vmul.f32 %v8336_v15, %v1630_v51 }
 0x298   :  { %v1607_v7 = vld [vmem:[#allocation3 + $0x340] sm:$0x7f]  ;;  %v1599_v4 = vadd.f32 %v8365_v45, %v1573_v8  ;;  %v1614_v39 = vmul.f32 %v8320_v22, %v1603_v31  ;;  %v1596_v19 = vadd.f32 %v1589_v28, %v1570_v55  ;;  %v1634_v50 = vld [vmem:[#allocation3 + $0x4b0] sm:$0x7f]  ;;  %v1627_v8 = vadd.f32 %v7106_v1, %v7103_v43 }
 0x299   :  { %v8364_v47 = vld [vmem:[#allocation128_spill] sm:$0xff]  ;;  %v1618_v56 = vmul.f32 %v8320_v22, %v1607_v7  ;;  %v1624_v31 = vadd.f32 %v1617_v36, %v1598_v27  ;;  %v1643_v7 = vmul.f32 %v8336_v15, %v1632_v60  ;;  %v1656_v25 = vld [vmem:[#allocation3 + $0x5d0] sm:$0x7f]  ;;  %v1645_v43 = vmul.f32 %v8336_v15, %v1634_v50 }
 0x29a   :  { %v1545_v62 = vadd.f32 %v8364_v47, %v1519_v20  ;;  %v1605_v57 = vld [vmem:[#allocation3 + $0x320] sm:$0x7f]  ;;  %v1622_v34 = vadd.f32 %v1615_v2, %v1596_v19  ;;  %v1543_v47 = vadd.f32 %v1536_v3, %v1517_v6  ;;  %v1660_v55 = vld [vmem:[#allocation3 + $0x610] sm:$0x7f]  ;;  %v1667_v2 = vmul.f32 %v8343_v18, %v1656_v25 }
 0x29b   :  { %v1616_v16 = vmul.f32 %v8320_v22, %v1605_v57  ;;  %v1631_v20 = vld [vmem:[#allocation3 + $0x480] sm:$0x7f]  ;;  %v1625_v17 = vadd.f32 %v1618_v56, %v1599_v4  ;;  %v1658_v57 = vld [vmem:[#allocation3 + $0x5f0] sm:$0x7f]  ;;  %v1650_v45 = vadd.f32 %v1643_v7, %v1624_v31  ;;  %v1653_v4 = vadd.f32 %v7118_v23, %v1627_v8 }
 0x29c   :  { %v1571_v63 = vadd.f32 %v1564_v42, %v1545_v62  ;;  %v1629_v44 = vld [vmem:[#allocation3 + $0x460] sm:$0x7f]  ;;  %v1642_v22 = vmul.f32 %v8336_v15, %v1631_v20  ;;  %v1648_v1 = vadd.f32 %v1641_v13, %v1622_v34  ;;  %v1569_v27 = vadd.f32 %v1562_v41, %v1543_v47  ;;  %v2251_v19 = vld [vmem:[#allocation3 + $0x6d0] sm:$0x7f] }
 0x29d   :  { %v1633_v42 = vld [vmem:[#allocation3 + $0x4a0] sm:$0x7f]  ;;  %v1640_v5 = vmul.f32 %v8336_v15, %v1629_v44  ;;  %v1671_v56 = vmul.f32 %v8343_v18, %v1660_v55  ;;  %v2258_v8 = vmul.f32 %v2251_v19, %v8343_v18 }
 0x29e   :  { %v1597_v30 = vadd.f32 %v1590_v21, %v1571_v63  ;;  %v1657_v28 = vld [vmem:[#allocation3 + $0x5e0] sm:$0x7f]  ;;  %v1644_v26 = vmul.f32 %v8336_v15, %v1633_v42  ;;  %v1652_v63 = vadd.f32 %v1645_v43, %v1626_v46  ;;  %v1669_v15 = vmul.f32 %v8343_v18, %v1658_v57 }
 0x29f   :  { %v1659_v24 = vld [vmem:[#allocation3 + $0x600] sm:$0x7f]  ;;  %v1668_v51 = vmul.f32 %v8343_v18, %v1657_v28  ;;  %v7186_v60 = vadd.f32 %v1667_v2, %v1648_v1  ;;  %v2243_v46 = vadd.f32 %v7121_v58, %v7115_v53 }
 0x2a0   :  { %v1623_v62 = vadd.f32 %v1616_v16, %v1597_v30  ;;  %v1661_v21 = vld [vmem:[#allocation3 + $0x620] sm:$0x7f]  ;;  %v1651_v35 = vadd.f32 %v1644_v26, %v1625_v17  ;;  %v1595_v16 = vadd.f32 %v1588_v33, %v1569_v27  ;;  %v1670_v36 = vmul.f32 %v8343_v18, %v1659_v24 }
 0x2a1   :  { %v1655_v20 = vld [vmem:[#allocation3 + $0x5c0] sm:$0x7f]  ;;  %v1672_v41 = vmul.f32 %v8343_v18, %v1661_v21  ;;  %v7190_v6 = vadd.f32 %v1669_v15, %v1650_v45  ;;  %v7194_v33 = vadd.f32 %v1671_v56, %v1652_v63  ;;  %v1696_v42 = vmul.f32 %v7186_v60, %v7186_v60  ;;  %v8366_v21 = vld [vmem:[#allocation129_spill] sm:$0xff]  ;;  %v8370_v56 = vld [vmem:[#allocation110_spill] sm:$0xff] }
 0x2a2   :  { %v1649_v3 = vadd.f32 %v1642_v22, %v1623_v62  ;;  %v1621_v50 = vadd.f32 %v1614_v39, %v1595_v16  ;;  %v7192_v30 = vadd.f32 %v1670_v36, %v1651_v35  ;;  %v1666_v31 = vmul.f32 %v8343_v18, %v1655_v20 }
 0x2a3   :  { %v7199_v44 = vadd.f32 %v1672_v41, %v1653_v4  ;;  %v1682_v39 = vsel %vm1680_vm3, %v7186_v60, 0.0  ;;  %v1686_v13 = vsel %vm1680_vm3, %v7190_v6, 0.0  ;;  %v1698_v58 = vmul.f32 %v7190_v6, %v7190_v6  ;;  %v8368_v4 = vld [vmem:[#allocation95_spill] sm:$0xff] }
 0x2a4   :  { %v7188_v23 = vadd.f32 %v1668_v51, %v1649_v3  ;;  %v1647_v34 = vadd.f32 %v1640_v5, %v1621_v50  ;;  %v1699_v47 = vmul.f32 %v7192_v30, %v7192_v30  ;;  %v1688_v18 = vsel %vm1680_vm3, %v7192_v30, 0.0  ;;  %v8367_v3 = vld [vmem:[#allocation133_spill] sm:$0xff] }
 0x2a5   :  { %v1690_v22 = vsel %vm1680_vm3, %v7194_v33, 0.0  ;;  %v1700_v7 = vmul.f32 %v7194_v33, %v7194_v33  ;;  %v1692_v25 = vsel %vm1680_vm3, %v7199_v44, 0.0  ;;  %v1701_v28 = vmul.f32 %v7199_v44, %v7199_v44 }
 0x2a6   :  { %v1684_v17 = vsel %vm1680_vm3, %v7188_v23, 0.0  ;;  %v1697_v53 = vmul.f32 %v7188_v23, %v7188_v23  ;;  %v7216_v62 = vadd.f32 %v1666_v31, %v1647_v34  ;;  %v1703_v5 = vsel %vm1680_vm3, %v1696_v42, 0.0 }
 0x2a7   :  { %v1707_v57 = vsel %vm1680_vm3, %v1698_v58, 0.0  ;;  %v1709_v24 = vsel %vm1680_vm3, %v1699_v47, 0.0  ;;  %v2266_v27 = vsel %vm1680_vm3, %v8366_v21, 0.0  ;;  %v2267_v45 = vsel %vm1680_vm3, %v8367_v3, 0.0  ;;  %v8372_v47 = vld [vmem:[#allocation54_spill] sm:$0xff] }
 0x2a8   :  { %v1705_v26 = vsel %vm1680_vm3, %v1697_v53, 0.0  ;;  %v1681_v43 = vsel %vm1680_vm3, %v7216_v62, 0.0  ;;  %v1695_v1 = vmul.f32 %v7216_v62, %v7216_v62  ;;  %v2269_v35 = vsel %vm1680_vm3, %v8368_v4, 0.0 }
 0x2a9   :  { %v1683_v55 = vadd.f32 %v1682_v39, %v1681_v43  ;;  %v1711_v2 = vsel %vm1680_vm3, %v1700_v7, 0.0  ;;  %v7244_v51 = vadd.f32 %v2258_v8, %v2243_v46  ;;  %v2268_v19 = vadd.f32 %v2267_v45, %v2266_v27  ;;  %v8371_v39 = vld [vmem:[#allocation154_spill] sm:$0xff] }
 0x2aa   :  { %v1702_v63 = vsel %vm1680_vm3, %v1695_v1, 0.0  ;;  %v1713_v36 = vsel %vm1680_vm3, %v1701_v28, 0.0  ;;  %v2271_v20 = vsel %vm1680_vm3, %v8370_v56, 0.0  ;;  %v2273_v50 = vsel %vm1680_vm3, %v6989_v61, 0.0  ;;  %v8373_v28 = vld [vmem:[#allocation86_spill] sm:$0xff] }
 0x2ab   :  { %8369 = vst [vmem:[#allocation141_spill] sm:$0xff] %v7244_v51  ;;  %v1685_v16 = vadd.f32 %v1684_v17, %v1683_v55  ;;  %v1704_v15 = vadd.f32 %v1703_v5, %v1702_v63  ;;  %v2270_v41 = vadd.f32 %v2269_v35, %v2268_v19  ;;  %v2283_v42 = vmul.f32 %v8370_v56, %v8370_v56  ;;  %v3459_v55 = vld [vmem:[#allocation3 + $0x448] sm:$0x7f]  ;;  %v8374_v63 = vld [vmem:[#allocation64_spill] sm:$0xff]  ;;  %v8375_v19 = vld [vmem:[#allocation39_spill] sm:$0xff] }
 0x2ac   :  { %v2284_v34 = vmul.f32 %v6989_v61, %v6989_v61  ;;  %v2285_v31 = vmul.f32 %v7101_v54, %v7101_v54  ;;  %v2287_v17 = vsel %vm1680_vm3, %v8371_v39, 0.0  ;;  %v2286_v58 = vmul.f32 %v7244_v51, %v7244_v51 }
 0x2ad   :  { %v1687_v46 = vadd.f32 %v1686_v13, %v1685_v16  ;;  %v1706_v8 = vadd.f32 %v1705_v26, %v1704_v15  ;;  %v2272_v53 = vadd.f32 %v2271_v20, %v2270_v41  ;;  %v2288_v7 = vsel %vm1680_vm3, %v8372_v47, 0.0  ;;  %v3534_v47 = vld [vmem:[#allocation3 + $0x198] sm:$0x7f] }
 0x2ae   :  { %v2290_v5 = vsel %vm1680_vm3, %v8373_v28, 0.0  ;;  %v2275_v13 = vsel %vm1680_vm3, %v7101_v54, 0.0  ;;  %v2289_v26 = vadd.f32 %v2288_v7, %v2287_v17  ;;  %v2277_v45 = vsel %vm1680_vm3, %v7244_v51, 0.0  ;;  %v8377_v51 = vld [vmem:[#allocation34_spill] sm:$0xff] }
 0x2af   :  { %v1689_v43 = vadd.f32 %v1688_v18, %v1687_v46  ;;  %v1708_v1 = vadd.f32 %v1707_v57, %v1706_v8  ;;  %v2274_v27 = vadd.f32 %v2273_v50, %v2272_v53  ;;  %v2292_v35 = vsel %vm1680_vm3, %v2283_v42, 0.0  ;;  %v3484_v57 = vld [vmem:[#allocation3 + $0x5a8] sm:$0x7f]  ;;  %v8376_v50 = vld [vmem:[#allocation112_spill] sm:$0xff]  ;;  %v3509_v53 = vld [vmem:[#allocation3 + $0x38] sm:$0x7f] }
 0x2b0   :  { %v3402_v16 = vadd.f32 %v8375_v19, %v8374_v63  ;;  %v2291_v41 = vadd.f32 %v2290_v5, %v2289_v26  ;;  %v2294_v18 = vsel %vm1680_vm3, %v2284_v34, 0.0  ;;  %v2296_v8 = vsel %vm1680_vm3, %v2285_v31, 0.0  ;;  %v8378_v5 = vld [vmem:[#allocation47_spill] sm:$0xff]  ;;  %v8379_v34 = vld [vmem:[#allocation81_spill] sm:$0xff] }
 0x2b1   :  { %v1691_v15 = vadd.f32 %v1690_v22, %v1689_v43  ;;  %v1710_v20 = vadd.f32 %v1709_v24, %v1708_v1  ;;  %v2276_v46 = vadd.f32 %v2275_v13, %v2274_v27  ;;  %v2298_v39 = vsel %vm1680_vm3, %v2286_v58, 0.0  ;;  %v3610_v22 = vld [vmem:[#allocation3 + $0x5c8] sm:$0x7f]  ;;  %v8380_v1 = vld [vmem:[#allocation116_spill] sm:$0xff]  ;;  %v8382_v31 = vld [vmem:[#allocation119_spill] sm:$0xff] }
 0x2b2   :  { %v3427_v17 = vadd.f32 %v8376_v50, %v3402_v16  ;;  %v2293_v28 = vadd.f32 %v2292_v35, %v2291_v41  ;;  %v3470_v63 = vmul.f32 %v8377_v51, %v3459_v55  ;;  %v3553_v13 = vadd.f32 %v8380_v1, %v8379_v34  ;;  %v8381_v26 = vld [vmem:[#allocation113_spill] sm:$0xff]  ;;  %v8383_v16 = vld [vmem:[#allocation72_spill] sm:$0xff]  ;;  %v3559_v51 = vld [vmem:[#allocation3 + $0x2f8] sm:$0x7f] }
 0x2b3   :  { %v1693_v7 = vadd.f32 %v1692_v25, %v1691_v15  ;;  %v1712_v42 = vadd.f32 %v1711_v2, %v1710_v20  ;;  %v2278_v24 = vadd.f32 %v2277_v45, %v2276_v46  ;;  %v3554_v27 = vadd.f32 %v8382_v31, %v8381_v26  ;;  %v8384_v55 = vld [vmem:[#allocation143_spill] sm:$0xff]  ;;  %v3636_v46 = vld [vmem:[#allocation3 + $0x68] sm:$0x7f] }
 0x2b4   :  { %v3452_v43 = vadd.f32 %v8378_v5, %v3427_v17  ;;  %v2295_v58 = vadd.f32 %v2294_v18, %v2293_v28  ;;  %v3495_v19 = vmul.f32 %v7923_v48, %v3484_v57  ;;  %v3520_v50 = vmul.f32 %v8383_v16, %v3509_v53  ;;  %v8385_v15 = vld [vmem:[#allocation151_spill] sm:$0xff]  ;;  %v8386_v18 = vld [vmem:[#allocation56_spill] sm:$0xff]  ;;  %v8387_v28 = vld [vmem:[#allocation98_spill] sm:$0xff] }
 0x2b5   :  { %v3545_v25 = vmul.f32 %v8317_v52, %v3534_v47  ;;  %v2279_v2 = vadd.f32 %v2278_v24, %v1693_v7  ;;  %v3578_v45 = vadd.f32 %v8384_v55, %v3553_v13  ;;  %v3579_v20 = vadd.f32 %v8385_v15, %v3554_v27  ;;  %v3635_v41 = vld [vmem:[#allocation3 + $0x58] sm:$0x7f]  ;;  %v3634_v55 = vld [vmem:[#allocation3 + $0x48] sm:$0x7f] }
 0x2b6   :  { %v3477_v35 = vadd.f32 %v3470_v63, %v3452_v43  ;;  %v1714_v17 = vadd.f32 %v1713_v36, %v1712_v42  ;;  %v2297_v5 = vadd.f32 %v2296_v8, %v2295_v58  ;;  %v3621_v34 = vmul.f32 %v8306_v40, %v3610_v22  ;;  %v3584_v52 = vld [vmem:[#allocation3 + $0x458] sm:$0x7f] }
 0x2b7   :  { %v3630_v48 = vadd.f32 %v8387_v28, %v8386_v18  ;;  %v2301_v57 = vsel %vm1680_vm3, %v2279_v2, 0.0  ;;  %v8388_v47 = vld [vmem:[#allocation107_spill] sm:$0xff]  ;;  %v3570_v26 = vmul.f32 %v8322_v12, %v3559_v51  ;;  %v3646_v36 = vmul.f32 %v8338_v11, %v3635_v41  ;;  %v3659_v41 = vld [vmem:[#allocation3 + $0x1a8] sm:$0x7f] }
 0x2b8   :  { %v3502_v53 = vadd.f32 %v3495_v19, %v3477_v35  ;;  %v3603_v7 = vadd.f32 %v8388_v47, %v3578_v45  ;;  %v8389_v63 = vld [vmem:[#allocation91_spill] sm:$0xff]  ;;  %v2299_v1 = vadd.f32 %v2298_v39, %v2297_v5  ;;  %v2302_v13 = vrot.slane %v2301_v57, 4  ;;  %v3661_v39 = vld [vmem:[#allocation3 + $0x1c8] sm:$0x7f] }
 0x2b9   :  { %v3604_v24 = vadd.f32 %v8389_v63, %v3579_v20  ;;  %v3609_v43 = vld [vmem:[#allocation3 + $0x5b8] sm:$0x7f]  ;;  %v3647_v27 = vmul.f32 %v8338_v11, %v3636_v46  ;;  %v3595_v2 = vmul.f32 %v8334_v0, %v3584_v52  ;;  %v8391_v20 = vld [vmem:[#allocation8_spill] sm:$0xff]  ;;  %v8393_v18 = vld [vmem:[#allocation109_spill] sm:$0xff]  ;;  %v3670_v47 = vmul.f32 %v8318_v49, %v3659_v41 }
 0x2ba   :  { %v3527_v8 = vadd.f32 %v3520_v50, %v3502_v53  ;;  %v3628_v42 = vadd.f32 %v3621_v34, %v3603_v7  ;;  %v8390_v22 = vld [vmem:[#allocation15_spill] sm:$0xff]  ;;  %v2300_v19 = vadd.f32 %v2299_v1, %v1714_v17  ;;  %v2303_v16 = vadd.f32 %v2302_v13, %v2301_v57  ;;  %v3684_v63 = vld [vmem:[#allocation3 + $0x308] sm:$0x7f] }
 0x2bb   :  { %v3629_v31 = vadd.f32 %v8390_v22, %v3604_v24  ;;  %v3660_v58 = vld [vmem:[#allocation3 + $0x1b8] sm:$0x7f]  ;;  %v3620_v35 = vmul.f32 %v8306_v40, %v3609_v43  ;;  %v3655_v50 = vadd.f32 %v8391_v20, %v3630_v48  ;;  %v3645_v40 = vmul.f32 %v8338_v11, %v3634_v55  ;;  %v3686_v24 = vld [vmem:[#allocation3 + $0x328] sm:$0x7f]  ;;  %v8394_v22 = vld [vmem:[#allocation138_spill] sm:$0xff] }
 0x2bc   :  { %v3662_v45 = vld [vmem:[#allocation3 + $0x1d8] sm:$0x7f]  ;;  %v3552_v15 = vadd.f32 %v3545_v25, %v3527_v8  ;;  %v3653_v12 = vadd.f32 %v3646_v36, %v3628_v42  ;;  %v2304_v5 = vrot.slane %v2303_v16, 2  ;;  %v2309_v34 = vsel %vm1680_vm3, %v2300_v19, 0.0  ;;  %v3688_v43 = vld [vmem:[#allocation3 + $0x348] sm:$0x7f] }
 0x2bd   :  { %v3654_v51 = vadd.f32 %v3647_v27, %v3629_v31  ;;  %v8392_v46 = vld [vmem:[#allocation111_spill] sm:$0xff]  ;;  %v3671_v28 = vmul.f32 %v8318_v49, %v3660_v58  ;;  %v2310_v0 = vrot.slane %v2309_v34, 4  ;;  %v3672_v53 = vmul.f32 %v8318_v49, %v3661_v39  ;;  %v3709_v41 = vld [vmem:[#allocation3 + $0x468] sm:$0x7f] }
 0x2be   :  { %v3656_v17 = vadd.f32 %v8393_v18, %v8392_v46  ;;  %v3577_v57 = vadd.f32 %v3570_v26, %v3552_v15  ;;  %v3685_v25 = vld [vmem:[#allocation3 + $0x318] sm:$0x7f]  ;;  %v2305_v52 = vadd.f32 %v2304_v5, %v2303_v16  ;;  %v3673_v48 = vmul.f32 %v8318_v49, %v3662_v45 }
 0x2bf   :  { %v3678_v7 = vadd.f32 %v3671_v28, %v3653_v12  ;;  %v2311_v1 = vadd.f32 %v2310_v0, %v2309_v34  ;;  %v3679_v36 = vadd.f32 %v3672_v53, %v3654_v51  ;;  %v3682_v26 = vadd.f32 %v7031_v32, %v7027_v9  ;;  %v3687_v8 = vld [vmem:[#allocation3 + $0x338] sm:$0x7f]  ;;  %v3711_v32 = vld [vmem:[#allocation3 + $0x488] sm:$0x7f] }
 0x2c0   :  { %v3602_v13 = vadd.f32 %v3595_v2, %v3577_v57  ;;  %v2306_v11 = vrot.slane %v2305_v52, 1  ;;  %v3680_v42 = vadd.f32 %v3673_v48, %v3655_v50  ;;  %v3681_v31 = vadd.f32 %v8394_v22, %v3656_v17  ;;  %v3710_v55 = vld [vmem:[#allocation3 + $0x478] sm:$0x7f]  ;;  %v3740_v22 = vld [vmem:[#allocation3 + $0x628] sm:$0x7f] }
 0x2c1   :  { %v3696_v27 = vmul.f32 %v8323_v29, %v3685_v25  ;;  %v2312_v58 = vrot.slane %v2311_v1, 2  ;;  %v3695_v49 = vmul.f32 %v8323_v29, %v3684_v63  ;;  %v3697_v16 = vmul.f32 %v8323_v29, %v3686_v24  ;;  %v8395_v20 = vld [vmem:[#allocation131_spill] sm:$0xff]  ;;  %v3734_v63 = vld [vmem:[#allocation3 + $0x5c8] sm:$0x7f] }
 0x2c2   :  { %v3627_v19 = vadd.f32 %v3620_v35, %v3602_v13  ;;  %v2307_v39 = vadd.f32 %v2306_v11, %v2305_v52  ;;  %v3698_v2 = vmul.f32 %v8323_v29, %v3687_v8  ;;  %v3699_v45 = vmul.f32 %v8323_v29, %v3688_v43  ;;  %v3712_v5 = vld [vmem:[#allocation3 + $0x498] sm:$0x7f]  ;;  %v3713_v35 = vld [vmem:[#allocation3 + $0x4a8] sm:$0x7f]  ;;  %v8396_v11 = vld [vmem:[#allocation48_spill] sm:$0xff] }
 0x2c3   :  { %v3703_v9 = vadd.f32 %v3696_v27, %v3678_v7  ;;  %v2313_v15 = vadd.f32 %v2312_v58, %v2311_v1  ;;  %v3704_v51 = vadd.f32 %v3697_v16, %v3679_v36  ;;  %v3707_v50 = vadd.f32 %v8395_v20, %v3682_v26  ;;  %v3714_v28 = vld [vmem:[#allocation3 + $0x4b8] sm:$0x7f]  ;;  %v3736_v24 = vld [vmem:[#allocation3 + $0x5e8] sm:$0x7f] }
 0x2c4   :  { %v3652_v12 = vadd.f32 %v3645_v40, %v3627_v19  ;;  %v7317_v34 = vmul.f32 0.010204081, %v2307_v39  ;;  %v3705_v46 = vadd.f32 %v3698_v2, %v3680_v42  ;;  %v3706_v18 = vadd.f32 %v3699_v45, %v3681_v31  ;;  %v3735_v53 = vld [vmem:[#allocation3 + $0x5d8] sm:$0x7f]  ;;  %v3738_v8 = vld [vmem:[#allocation3 + $0x608] sm:$0x7f] }
 0x2c5   :  { %v3721_v17 = vmul.f32 %v8342_v59, %v3710_v55  ;;  %v2314_v0 = vrot.slane %v2313_v15, 1  ;;  %v3708_v29 = vadd.f32 %v7112_v14, %v7109_v37  ;;  %v3722_v40 = vmul.f32 %v8342_v59, %v3711_v32  ;;  %v3737_v36 = vld [vmem:[#allocation3 + $0x5f8] sm:$0x7f] }
 0x2c6   :  { %v3677_v57 = vadd.f32 %v3670_v47, %v3652_v12  ;;  %v3720_v25 = vmul.f32 %v8342_v59, %v3709_v41  ;;  %v3723_v52 = vmul.f32 %v8342_v59, %v3712_v5  ;;  %v3724_v48 = vmul.f32 %v8342_v59, %v3713_v35  ;;  %v3739_v58 = vld [vmem:[#allocation3 + $0x618] sm:$0x7f] }
 0x2c7   :  { %v3728_v7 = vadd.f32 %v3721_v17, %v3703_v9  ;;  %v2315_v43 = vadd.f32 %v2314_v0, %v2313_v15  ;;  %v2317_v1 = vmul.f32 %v7317_v34, %v7317_v34  ;;  %v3729_v13 = vadd.f32 %v3722_v40, %v3704_v51 }
 0x2c8   :  { %v3702_v47 = vadd.f32 %v3695_v49, %v3677_v57  ;;  %v3725_v37 = vmul.f32 %v8342_v59, %v3714_v28  ;;  %v3730_v14 = vadd.f32 %v3723_v52, %v3705_v46  ;;  %v3731_v26 = vadd.f32 %v3724_v48, %v3706_v18  ;;  %v4303_v59 = vld [vmem:[#allocation3 + $0x6c8] sm:$0x7f]  ;;  %v4304_v57 = vld [vmem:[#allocation3 + $0x6d8] sm:$0x7f] }
 0x2c9   :  { %v3746_v42 = vmul.f32 %v8396_v11, %v3735_v53  ;;  %v2316_v31 = vmul.f32 0.010204081, %v2315_v43  ;;  %v3745_v19 = vmul.f32 %v8396_v11, %v3734_v63  ;;  %v3747_v16 = vmul.f32 %v8396_v11, %v3736_v24  ;;  %v8398_v53 = vld [vmem:[#allocation140_spill] sm:$0xff] }
 0x2ca   :  { %v3727_v27 = vadd.f32 %v3720_v25, %v3702_v47  ;;  %v3732_v55 = vadd.f32 %v3725_v37, %v3707_v50  ;;  %v3733_v49 = vadd.f32 %v7124_v38, %v3708_v29  ;;  %v3748_v39 = vmul.f32 %v8396_v11, %v3737_v36  ;;  %v8397_v50 = vld [vmem:[#allocation104_spill] sm:$0xff]  ;;  %v8399_v25 = vld [vmem:[#allocation105_spill] sm:$0xff] }
 0x2cb   :  { %v7334_v2 = vadd.f32 %v3746_v42, %v3728_v7  ;;  %v2318_v45 = vsub.f32 %v2316_v31, %v2317_v1  ;;  %v3749_v9 = vmul.f32 %v8396_v11, %v3738_v8  ;;  %v7339_v15 = vadd.f32 %v3747_v16, %v3729_v13  ;;  %v8402_v16 = vld [vmem:[#allocation99_spill] sm:$0xff] }
 0x2cc   :  { %v7337_v32 = vadd.f32 %v3745_v19, %v3727_v27  ;;  %v3750_v12 = vmul.f32 %v8396_v11, %v3739_v58  ;;  %v3751_v51 = vmul.f32 %v8396_v11, %v3740_v22  ;;  %v7343_v20 = vadd.f32 %v3748_v39, %v3730_v14  ;;  %v8400_v22 = vld [vmem:[#allocation96_spill] sm:$0xff]  ;;  %v8401_v19 = vld [vmem:[#allocation55_spill] sm:$0xff] }
 0x2cd   :  { %v3760_v38 = vsel %vm1680_vm3, %v7334_v2, 0.0  ;;  %v4296_v41 = vadd.f32 %v7092_v10, %v8397_v50  ;;  %v2319_v5 = vadd.f32 0.001, %v2318_v45  ;;  %v3762_v46 = vsel %vm1680_vm3, %v7339_v15, 0.0  ;;  %v2321_v50 = vld [vmem:[%s7564_s2] sm:$0x1] }
 0x2ce   :  { %v3759_v35 = vsel %vm1680_vm3, %v7337_v32, 0.0  ;;  %v4310_v18 = vmul.f32 %v4303_v59, %v8396_v11  ;;  %v7354_v17 = vadd.f32 %v3749_v9, %v3731_v26  ;;  %v7356_v28 = vadd.f32 %v3750_v12, %v3732_v55 }
 0x2cf   :  { %v3761_v0 = vadd.f32 %v3760_v38, %v3759_v35  ;;  %4452 = vrsqrt.f32 %v2319_v5  ;;  %v3773_v29 = vmul.f32 %v7337_v32, %v7337_v32  ;;  %v3774_v10 = vmul.f32 %v7334_v2, %v7334_v2 }
 0x2d0   :  { %v3775_v40 = vmul.f32 %v7339_v15, %v7339_v15  ;;  %v4297_v52 = vadd.f32 %v8399_v25, %v8398_v53  ;;  %v7366_v48 = vadd.f32 %v3751_v51, %v3733_v49  ;;  %v3764_v63 = vsel %vm1680_vm3, %v7343_v20, 0.0  ;;  %v8406_v53 = vld [vmem:[#allocation84_spill] sm:$0xff] }
 0x2d1   :  { %v3763_v7 = vadd.f32 %v3762_v46, %v3761_v0  ;;  %v3776_v24 = vmul.f32 %v7343_v20, %v7343_v20  ;;  %v3780_v43 = vsel %vm1680_vm3, %v3773_v29, 0.0  ;;  %v3781_v1 = vsel %vm1680_vm3, %v3774_v10, 0.0  ;;  %v8403_v46 = vld [vmem:[#allocation117_spill] sm:$0xff]  ;;  %v8405_v10 = vld [vmem:[#allocation120_spill] sm:$0xff] }
 0x2d2   :  { %v3783_v47 = vsel %vm1680_vm3, %v3775_v40, 0.0  ;;  %v4311_v13 = vmul.f32 %v4304_v57, %v8396_v11  ;;  %v3777_v37 = vmul.f32 %v7354_v17, %v7354_v17  ;;  %v3782_v14 = vadd.f32 %v3781_v1, %v3780_v43  ;;  %v8404_v57 = vld [vmem:[#allocation139_spill] sm:$0xff]  ;;  %v8407_v43 = vld [vmem:[#allocation108_spill] sm:$0xff] }
 0x2d3   :  { %v3765_v36 = vadd.f32 %v3764_v63, %v3763_v7  ;;  %v7378_v26 = vadd.f32 %v4310_v18, %v4296_v41  ;;  %v3766_v8 = vsel %vm1680_vm3, %v7354_v17, 0.0  ;;  %v3778_v42 = vmul.f32 %v7356_v28, %v7356_v28 }
 0x2d4   :  { %v4319_v31 = vsel %vm1680_vm3, %v8400_v22, 0.0  ;;  %v3784_v58 = vadd.f32 %v3783_v47, %v3782_v14  ;;  %v4320_v11 = vsel %vm1680_vm3, %v8401_v19, 0.0  ;;  %v4322_v55 = vsel %vm1680_vm3, %v8402_v16, 0.0  ;;  %v2323_v14 = vld [vmem:[%s7565_s3] sm:$0x1] }
 0x2d5   :  { %v3767_v27 = vadd.f32 %v3766_v8, %v3765_v36  ;;  %v3768_v49 = vsel %vm1680_vm3, %v7356_v28, 0.0  ;;  %v3770_v39 = vsel %vm1680_vm3, %v7366_v48, 0.0  ;;  %v3785_v59 = vsel %vm1680_vm3, %v3776_v24, 0.0 }
 0x2d6   :  { %v4321_v45 = vadd.f32 %v4320_v11, %v4319_v31  ;;  %v7397_v9 = vmul.f32 %v7366_v48, %v7366_v48  ;;  %v3786_v12 = vadd.f32 %v3785_v59, %v3784_v58  ;;  %v3787_v51 = vsel %vm1680_vm3, %v3777_v37, 0.0  ;;  %v8408_v11 = vld [vmem:[#allocation4_spill] sm:$0xff] }
 0x2d7   :  { %v7400_v38 = vadd.f32 %v4311_v13, %v4297_v52  ;;  %v3769_v41 = vadd.f32 %v3768_v49, %v3767_v27  ;;  %v3789_v5 = vsel %vm1680_vm3, %v3778_v42, 0.0  ;;  %v4324_v18 = vsel %vm1680_vm3, %v8403_v46, 0.0 }
 0x2d8   :  { %v4323_v35 = vadd.f32 %v4322_v55, %v4321_v45  ;;  %v4336_v0 = vmul.f32 %v8403_v46, %v8403_v46  ;;  %v4337_v29 = vmul.f32 %v8404_v57, %v8404_v57  ;;  %v4340_v40 = vsel %vm1680_vm3, %v8405_v10, 0.0 }
 0x2d9   :  { %v4341_v25 = vsel %vm1680_vm3, %v8406_v53, 0.0  ;;  %v4453_v52 = vpop.eup %4452  ;;  %v3788_v7 = vadd.f32 %v3787_v51, %v3786_v12  ;;  %v4343_v1 = vsel %vm1680_vm3, %v8407_v43, 0.0  ;;  %v4326_v13 = vsel %vm1680_vm3, %v8404_v57, 0.0 }
 0x2da   :  { %v4325_v63 = vadd.f32 %v4324_v18, %v4323_v35  ;;  %v4342_v24 = vadd.f32 %v4341_v25, %v4340_v40  ;;  %v2322_v47 = vmul.f32 %v4453_v52, %v2321_v50  ;;  %v4328_v36 = vsel %vm1680_vm3, %v7378_v26, 0.0  ;;  %v8409_v25 = vld [vmem:[#allocation141_spill] sm:$0xff] }
 0x2db   :  { %v4330_v37 = vsel %vm1680_vm3, %v7400_v38, 0.0  ;;  %v4338_v42 = vmul.f32 %v7378_v26, %v7378_v26  ;;  %v4339_v31 = vmul.f32 %v7400_v38, %v7400_v38  ;;  %v3771_v49 = vadd.f32 %v3770_v39, %v3769_v41 }
 0x2dc   :  { %v4327_v8 = vadd.f32 %v4326_v13, %v4325_v63  ;;  %v4344_v27 = vadd.f32 %v4343_v1, %v4342_v24  ;;  %v2324_v58 = vmul.f32 %v2322_v47, %v7317_v34  ;;  %v2330_v55 = vrot.slane %v2322_v47, %v8408_v11 }
 0x2dd   :  { %v4345_v59 = vsel %vm1680_vm3, %v4336_v0, 0.0  ;;  %v3790_v45 = vadd.f32 %v3789_v5, %v3788_v7  ;;  %v4347_v50 = vsel %vm1680_vm3, %v4337_v29, 0.0 }
 0x2de   :  { %v4329_v12 = vadd.f32 %v4328_v36, %v4327_v8  ;;  %v4346_v51 = vadd.f32 %v4345_v59, %v4344_v27  ;;  %v2325_v35 = vsub.f32 %v2323_v14, %v2324_v58  ;;  %v2332_v18 = vmul.f32 %v2330_v55, %v7216_v62 }
 0x2df   :  { %v2333_v10 = vmul.f32 %v2330_v55, %v7186_v60  ;;  %v2334_v40 = vmul.f32 %v2330_v55, %v7188_v23  ;;  %v2335_v53 = vmul.f32 %v2330_v55, %v7190_v6  ;;  %v2336_v34 = vmul.f32 %v2330_v55, %v7192_v30 }
 0x2e0   :  { %v2337_v39 = vmul.f32 %v2330_v55, %v7194_v33  ;;  %v2338_v41 = vmul.f32 %v2330_v55, %v7199_v44  ;;  %v2343_v5 = vrot.slane %v2325_v35, %v8408_v11  ;;  %v2359_v0 = vmul.f32 %v2330_v55, %v8366_v21 }
 0x2e1   :  { %v2360_v29 = vmul.f32 %v2330_v55, %v8367_v3  ;;  %v2361_v62 = vmul.f32 %v2330_v55, %v8368_v4  ;;  %v2362_v60 = vmul.f32 %v2330_v55, %v8370_v56  ;;  %v2363_v23 = vmul.f32 %v2330_v55, %v6989_v61 }
 0x2e2   :  { %v2364_v6 = vmul.f32 %v2330_v55, %v7101_v54  ;;  %v2365_v30 = vmul.f32 %v2330_v55, %v8409_v25  ;;  %v2345_v52 = vadd.f32 %v2343_v5, %v2332_v18  ;;  %v2346_v33 = vadd.f32 %v2343_v5, %v2333_v10 }
 0x2e3   :  { %v2347_v7 = vadd.f32 %v2343_v5, %v2334_v40  ;;  %v2348_v44 = vadd.f32 %v2343_v5, %v2335_v53  ;;  %v2349_v63 = vadd.f32 %v2343_v5, %v2336_v34  ;;  %v2350_v24 = vadd.f32 %v2343_v5, %v2337_v39 }
 0x2e4   :  { %v2351_v43 = vadd.f32 %v2343_v5, %v2338_v41  ;;  %v2366_v21 = vadd.f32 %v2359_v0, %v2343_v5  ;;  %2352 = vst [vmem:[%s7566_s4] sm:$0x7f] %v2345_v52  ;;  %2353 = vst [vmem:[%s7566_s4 + $0x10] sm:$0x7f] %v2346_v33  ;;  %v2367_v61 = vadd.f32 %v2360_v29, %v2343_v5  ;;  %v3791_v36 = vsel %vm1680_vm3, %v7397_v9, 0.0 }
 0x2e5   :  { %2354 = vst [vmem:[%s7566_s4 + $0x20] sm:$0x7f] %v2347_v7  ;;  %2355 = vst [vmem:[%s7566_s4 + $0x30] sm:$0x7f] %v2348_v44  ;;  %v2368_v54 = vadd.f32 %v2361_v62, %v2343_v5  ;;  %v2369_v3 = vadd.f32 %v2362_v60, %v2343_v5  ;;  %v2370_v4 = vadd.f32 %v2363_v23, %v2343_v5  ;;  %v4351_v58 = vsel %vm1680_vm3, %v4339_v31, 0.0 }
 0x2e6   :  { %2356 = vst [vmem:[%s7566_s4 + $0x40] sm:$0x7f] %v2349_v63  ;;  %2357 = vst [vmem:[%s7566_s4 + $0x50] sm:$0x7f] %v2350_v24  ;;  %v2371_v56 = vadd.f32 %v2364_v6, %v2343_v5  ;;  %v2372_v1 = vadd.f32 %v2365_v30, %v2343_v5  ;;  %v4331_v47 = vadd.f32 %v4330_v37, %v4329_v12  ;;  %v4349_v37 = vsel %vm1680_vm3, %v4338_v42, 0.0 }
 0x2e7   :  { %2358 = vst [vmem:[%s7566_s4 + $0x60] sm:$0x7f] %v2351_v43  ;;  %4437 = vst [vmem:[%s7566_s4 + $0x70] sm:$0x7f] %v2366_v21  ;;  %v4348_v13 = vadd.f32 %v4347_v50, %v4346_v51  ;;  %v3792_v14 = vadd.f32 %v3791_v36, %v3790_v45  ;;  %v4374_v62 = vld [vmem:[%s7564_s2 + $0x1] sm:$0x1] }
 0x2e8   :  { %4438 = vst [vmem:[%s7566_s4 + $0x80] sm:$0x7f] %v2367_v61  ;;  %4439 = vst [vmem:[%s7566_s4 + $0x90] sm:$0x7f] %v2368_v54  ;;  %v4332_v8 = vadd.f32 %v4331_v47, %v3771_v49  ;;  %v4376_v6 = vld [vmem:[%s7565_s3 + $0x1] sm:$0x1] }
 0x2e9   :  { %4440 = vst [vmem:[%s7566_s4 + $0xa0] sm:$0x7f] %v2369_v3  ;;  %4441 = vst [vmem:[%s7566_s4 + $0xb0] sm:$0x7f] %v2370_v4  ;;  %v4350_v27 = vadd.f32 %v4349_v37, %v4348_v13 }
 0x2ea   :  { %4442 = vst [vmem:[%s7566_s4 + $0xc0] sm:$0x7f] %v2371_v56  ;;  %4443 = vst [vmem:[%s7566_s4 + $0xd0] sm:$0x7f] %v2372_v1  ;;  %v4354_v59 = vsel %vm1680_vm3, %v4332_v8, 0.0 }
 0x2eb   :  { %v4352_v55 = vadd.f32 %v4351_v58, %v4350_v27  ;;  %v4355_v12 = vrot.slane %v4354_v59, 4 }
 0x2ed   :  { %v4353_v9 = vadd.f32 %v4352_v55, %v3792_v14  ;;  %v4356_v51 = vadd.f32 %v4355_v12, %v4354_v59 }
 0x2ef   :  { %v4362_v42 = vsel %vm1680_vm3, %v4353_v9, 0.0  ;;  %v4357_v50 = vrot.slane %v4356_v51, 2 }
 0x2f0   :  { %v4363_v35 = vrot.slane %v4362_v42, 4 }
 0x2f1   :  { %v4358_v18 = vadd.f32 %v4357_v50, %v4356_v51 }
 0x2f2   :  { %v4364_v10 = vadd.f32 %v4363_v35, %v4362_v42 }
 0x2f3   :  { %v4359_v40 = vrot.slane %v4358_v18, 1 }
 0x2f4   :  { %v4365_v53 = vrot.slane %v4364_v10, 2 }
 0x2f5   :  { %v4360_v34 = vadd.f32 %v4359_v40, %v4358_v18 }
 0x2f6   :  { %v4366_v45 = vadd.f32 %v4365_v53, %v4364_v10 }
 0x2f7   :  { %v4361_v49 = vmul.f32 0.010204081, %v4360_v34 }
 0x2f8   :  { %v4367_v39 = vrot.slane %v4366_v45, 1 }
 0x2f9   :  { %v4370_v31 = vmul.f32 %v4361_v49, %v4361_v49 }
 0x2fa   :  { %v4368_v41 = vadd.f32 %v4367_v39, %v4366_v45 }
 0x2fc   :  { %v4369_v5 = vmul.f32 0.010204081, %v4368_v41 }
 0x2fe   :  { %v4371_v0 = vsub.f32 %v4369_v5, %v4370_v31 }
 0x300   :  { %v4372_v29 = vadd.f32 0.001, %v4371_v0 }
 0x302   :  { %4454 = vrsqrt.f32 %v4372_v29 }
 0x30c   :  { %v4455_v60 = vpop.eup %4454 }
 0x30d   :  { %v4375_v23 = vmul.f32 %v4455_v60, %v4374_v62 }
 0x30f   :  { %v4377_v25 = vmul.f32 %v4375_v23, %v4361_v49  ;;  %v4383_v30 = vrot.slane %v4375_v23, %v8408_v11 }
 0x311   :  { %v4378_v52 = vsub.f32 %v4376_v6, %v4377_v25  ;;  %v4385_v33 = vmul.f32 %v4383_v30, %v7337_v32  ;;  %v4386_v7 = vmul.f32 %v4383_v30, %v7334_v2  ;;  %v4387_v44 = vmul.f32 %v4383_v30, %v7339_v15 }
 0x312   :  { %v4388_v63 = vmul.f32 %v4383_v30, %v7343_v20  ;;  %v4389_v24 = vmul.f32 %v4383_v30, %v7354_v17  ;;  %v4390_v43 = vmul.f32 %v4383_v30, %v7356_v28  ;;  %v4391_v21 = vmul.f32 %v4383_v30, %v7366_v48 }
 0x313   :  { %v4396_v61 = vrot.slane %v4378_v52, %v8408_v11  ;;  %v4412_v54 = vmul.f32 %v4383_v30, %v8400_v22  ;;  %v4413_v3 = vmul.f32 %v4383_v30, %v8401_v19  ;;  %v4414_v32 = vmul.f32 %v4383_v30, %v8402_v16 }
 0x314   :  { %v4415_v2 = vmul.f32 %v4383_v30, %v8403_v46  ;;  %v4416_v15 = vmul.f32 %v4383_v30, %v8404_v57  ;;  %v4417_v20 = vmul.f32 %v4383_v30, %v7378_v26  ;;  %v4418_v17 = vmul.f32 %v4383_v30, %v7400_v38 }
 0x315   :  { %v4398_v4 = vadd.f32 %v4396_v61, %v4385_v33  ;;  %v4399_v28 = vadd.f32 %v4396_v61, %v4386_v7  ;;  %v4400_v56 = vadd.f32 %v4396_v61, %v4387_v44  ;;  %v4401_v48 = vadd.f32 %v4396_v61, %v4388_v63 }
 0x316   :  { %v4402_v1 = vadd.f32 %v4396_v61, %v4389_v24  ;;  %v4403_v11 = vadd.f32 %v4396_v61, %v4390_v43  ;;  %v4404_v47 = vadd.f32 %v4396_v61, %v4391_v21  ;;  %v4419_v22 = vadd.f32 %v4412_v54, %v4396_v61 }
 0x317   :  { %4405 = vst [vmem:[%s7566_s4 + $0x8] sm:$0x7f] %v4398_v4  ;;  %4406 = vst [vmem:[%s7566_s4 + $0x18] sm:$0x7f] %v4399_v28  ;;  %v4420_v26 = vadd.f32 %v4413_v3, %v4396_v61  ;;  %v4421_v19 = vadd.f32 %v4414_v32, %v4396_v61  ;;  %v4422_v16 = vadd.f32 %v4415_v2, %v4396_v61 }
 0x318   :  { %4407 = vst [vmem:[%s7566_s4 + $0x28] sm:$0x7f] %v4400_v56  ;;  %4408 = vst [vmem:[%s7566_s4 + $0x38] sm:$0x7f] %v4401_v48  ;;  %v4423_v38 = vadd.f32 %v4416_v15, %v4396_v61  ;;  %v4424_v46 = vadd.f32 %v4417_v20, %v4396_v61  ;;  %v4425_v57 = vadd.f32 %v4418_v17, %v4396_v61 }
 0x319   :  { %4409 = vst [vmem:[%s7566_s4 + $0x48] sm:$0x7f] %v4402_v1  ;;  %4410 = vst [vmem:[%s7566_s4 + $0x58] sm:$0x7f] %v4403_v11 }
 0x31a   :  { %4411 = vst [vmem:[%s7566_s4 + $0x68] sm:$0x7f] %v4404_v47  ;;  %4444 = vst [vmem:[%s7566_s4 + $0x78] sm:$0x7f] %v4419_v22 }
 0x31b   :  { %4445 = vst [vmem:[%s7566_s4 + $0x88] sm:$0x7f] %v4420_v26  ;;  %4446 = vst [vmem:[%s7566_s4 + $0x98] sm:$0x7f] %v4421_v19 }
 0x31c   :  { %4447 = vst [vmem:[%s7566_s4 + $0xa8] sm:$0x7f] %v4422_v16  ;;  %4448 = vst [vmem:[%s7566_s4 + $0xb8] sm:$0x7f] %v4423_v38 }
 0x31d   :  { %4449 = vst [vmem:[%s7566_s4 + $0xc8] sm:$0x7f] %v4424_v46  ;;  %4450 = vst [vmem:[%s7566_s4 + $0xd8] sm:$0x7f] %v4425_v57 }

</bundles_post_ra>
